<compile_context>
chip_gen: v5e
topology: v5e:2x2
jax: 0.10.0
libtpu: 0.0.40
codegen_flags: <defaults>
</compile_context>

<pallas_src>
import functools

import jax
import jax.numpy as jnp
from jax.experimental import pallas as pl
from jax.experimental.pallas import tpu as pltpu


def _round_up(x, m):
    return ((x + m - 1) // m) * m


def _device_kind():
    try:
        dev = jax.devices()[0]
        if dev.platform == "tpu":
            return dev.device_kind.lower()
    except Exception:
        pass
    return None


def _vmem_capacity_bytes(device_kind):
    try:
        return int(pltpu.get_tpu_info().vmem_capacity_bytes)
    except Exception:
        pass
    if device_kind is not None and "7" in device_kind:
        return 64 * 1024 * 1024   # v7x: 64 MiB per TensorCore
    return 128 * 1024 * 1024      # v5e / v6e


def _choose_tile_n(n_pad, r_rows, f, graph_itemsize, out_itemsize,
                   *, max_tn, vmem_budget_bytes):
    """Largest column tile (multiple of 128 dividing n_pad, <= max_tn) whose
    pipelined working set fits the chip-aware VMEM budget."""
    best = 128
    tn = 128
    while tn <= min(n_pad, max_tn):
        if n_pad % tn == 0:
            need = (2 * n_pad * tn * graph_itemsize   # double-buffered graph tile
                    + n_pad * tn * 2                  # in-kernel bf16 widen of a tile
                    + 2 * f * tn * out_itemsize       # double-buffered output tile
                    + 2 * r_rows * n_pad * 2)         # resident bf16 WE slab (2 bufs)
            if need <= vmem_budget_bytes:
                best = tn
        tn += 128
    return best


def _aggregate_kernel(we_ref, graph_ref, out_ref, *, f):
    # we_ref:    [R, n_pad] bf16, grid-invariant. Rows [0:f] = weight @ embedding,
    #            row f = ones (degree probe), rows [f+1:R] = zero padding.
    # graph_ref: [n_pad, tn] int8 (or bf16) column tile of the adjacency.
    # out_ref:   [f, tn] output dtype (f32).
    g = graph_ref[...].astype(jnp.bfloat16)        # VPU widen; hidden under DMA
    agg = jnp.dot(we_ref[...], g,
                  preferred_element_type=jnp.float32)            # [R, tn] on MXU
    deg = agg[f:f + 1, :]                          # [1, tn] exact column degrees
    inv = pl.reciprocal(deg + 1.0, approx=True)    # EUP slot, ~free
    out_ref[...] = jnp.maximum(agg[:f, :] * inv, 0.0).astype(out_ref.dtype)


def aggregate_forward(embedding, graph, weight, *, tn=None, graph_is_binary=True):
    """Forward pass of AggregateModule.

    NOTE: graph_is_binary=True streams the adjacency as int8; that is exact only
    if every graph entry is a small integer (e.g. a 0/1 adjacency). For
    weighted / normalized graphs pass graph_is_binary=False (bf16 stream).
    """
    f, n = embedding.shape
    assert graph.shape == (n, n)
    assert weight.shape == (f, f)

    out_dtype = embedding.dtype
    graph_dtype = jnp.int8 if graph_is_binary else jnp.bfloat16

    n_pad = max(_round_up(n, 128), 128)
    r_rows = _round_up(f + 1, 16)      # bf16 sublane pack; extra rows are zeros

    kind = _device_kind()
    is_v7x = kind is not None and "7" in kind
    vmem_budget = (_vmem_capacity_bytes(kind) * 3) // 8   # 48 MiB v5e/v6e, 24 MiB v7x

    if tn is None:
        # max_tn=512: ~85% of HBM roofline per tile-size measurements, and keeps
        # >=4 grid steps at n=2048 so each v7x core still double-buffers its DMA.
        tn = _choose_tile_n(n_pad, r_rows, f,
                            jnp.dtype(graph_dtype).itemsize,
                            jnp.dtype(out_dtype).itemsize,
                            max_tn=512, vmem_budget_bytes=vmem_budget)
    assert n_pad % tn == 0 and tn % 128 == 0
    grid_n = n_pad // tn

    # Fold W out of the per-tile loop: W @ (E @ G) * diag(s) == (W @ E) @ G * diag(s).
    we = jnp.matmul(weight, embedding, precision=jax.lax.Precision.HIGHEST)

    # Augmented, row/column-padded bf16 LHS: (W E) rows, then a ones row for deg.
    we_aug = jnp.zeros((r_rows, n_pad), dtype=jnp.bfloat16)
    we_aug = we_aug.at[:f, :n].set(we.astype(jnp.bfloat16))
    we_aug = we_aug.at[f, :n].set(jnp.ones((n,), dtype=jnp.bfloat16))

    # Zero-pad the adjacency to a 128-aligned node count (padded cols: deg=0 -> safe).
    if n_pad == n:
        g_store = graph.astype(graph_dtype)
    else:
        g_store = jnp.zeros((n_pad, n_pad), dtype=graph_dtype)
        g_store = g_store.at[:n, :n].set(graph.astype(graph_dtype))

    cost = pl.CostEstimate(
        flops=2 * r_rows * n_pad * n_pad,
        transcendentals=n_pad,
        bytes_accessed=(n_pad * n_pad * jnp.dtype(graph_dtype).itemsize
                        + r_rows * n_pad * 2
                        + f * n_pad * jnp.dtype(out_dtype).itemsize),
    )

    # TODO(synk): for very large n (WE slab + graph column tile no longer VMEM
    # resident) add a k-axis over the contraction with a VMEM accumulator and
    # pl.when init/finalize (that axis "arbitrary"); single-buffer the grid-
    # invariant WE slab (pipeline_mode) once buffer-count control is needed.
    # TODO(synk): the MXU M-dim is only r_rows (48) of 128/256 rows; if multiple
    # graphs/layers/feature blocks share this adjacency, batch their rows into
    # the LHS of the matmul to lift the MXU-occupancy ceiling (v7x).
    def _call(node_sem):
        return pl.pallas_call(
            functools.partial(_aggregate_kernel, f=f),
            out_shape=jax.ShapeDtypeStruct((f, n_pad), out_dtype),
            grid_spec=pltpu.PrefetchScalarGridSpec(
                num_scalar_prefetch=0,
                grid=(grid_n,),
                in_specs=[
                    pl.BlockSpec((r_rows, n_pad), lambda i: (0, 0)),  # resident WE
                    pl.BlockSpec((n_pad, tn), lambda i: (0, i)),      # graph tile
                ],
                out_specs=pl.BlockSpec((f, tn), lambda i: (0, i)),
            ),
            compiler_params=pltpu.CompilerParams(
                dimension_semantics=(node_sem,),
                vmem_limit_bytes=vmem_budget,
            ),
            cost_estimate=cost,
        )(we_aug, g_store)

    node_sem = pltpu.CORE_PARALLEL if (is_v7x and grid_n >= 2) else pltpu.PARALLEL
    try:
        out_padded = _call(node_sem)
    except Exception:
        if node_sem is pltpu.PARALLEL:
            raise
        out_padded = _call(pltpu.PARALLEL)   # conservative fallback on v7x

    return out_padded if n_pad == n else out_padded[:, :n]


def aggregate_reference(embedding, graph, weight):
    deg = jnp.sum(graph, axis=0)
    e = jnp.matmul(embedding, graph, precision=jax.lax.Precision.HIGHEST)
    e = e / (deg[None, :] + 1.0)
    e = jnp.matmul(weight, e, precision=jax.lax.Precision.HIGHEST)
    return jnp.maximum(e, 0.0)


if __name__ == "__main__":
    # n nodes, f features; n chosen so the column-tiled grid has >=4 steps.
    n, f = 2048, 32

    key = jax.random.PRNGKey(0)
    k_emb, k_graph, k_w = jax.random.split(key, 3)

    embedding = jax.random.normal(k_emb, (f, n), dtype=jnp.float32)
    # Sparse 0/1 adjacency (non-negative degrees), exact in int8 / bf16.
    graph = (jax.random.uniform(k_graph, (n, n)) < 0.05).astype(jnp.float32)
    # weight ~ Normal(0, 1), matching torch.nn.init.normal_(std=1)
    weight = jax.random.normal(k_w, (f, f), dtype=jnp.float32)

    out = aggregate_forward(embedding, graph, weight)
    out = jax.block_until_ready(out)

    ref = aggregate_reference(embedding, graph, weight)
    assert out.shape == (f, n)
    # Tolerance sized for bf16 MXU operands (degrees / accumulation stay exact).
    assert jnp.allclose(out, ref, atol=3e-2, rtol=3e-2), "mismatch vs reference"

    print("KERNEL_OK")
</pallas_src>

<mosaic_0001>
module attributes {stable_mosaic.version = 11 : i64} {
  func.func @_aggregate_kernel(%arg0: i32, %arg1: memref<48x2048xbf16, #tpu.memory_space<vmem>>, %arg2: memref<2048x512xi8, #tpu.memory_space<vmem>>, %arg3: memref<32x512xf32, #tpu.memory_space<vmem>>) attributes {dimension_semantics = [#tpu.dimension_semantics<parallel>], iteration_bounds = array<i64: 4>, scalar_prefetch = 0 : i64, scratch_operands = 0 : i64, tpu.core_type = #tpu.core_type<tc>, window_params = [{pipeline_mode = #tpu.pipeline_mode<synchronous>, transform_indices = @transform_0, window_bounds = array<i64: 48, 2048>}, {transform_indices = @transform_1, window_bounds = array<i64: 2048, 512>}, {transform_indices = @transform_2, window_bounds = array<i64: 32, 512>}]} {
    %c0 = arith.constant 0 : index
    %c0_0 = arith.constant 0 : index
    %0 = vector.load %arg2[%c0, %c0_0] : memref<2048x512xi8, #tpu.memory_space<vmem>>, vector<2048x512xi8>
    %1 = arith.sitofp %0 : vector<2048x512xi8> to vector<2048x512xbf16>
    %c0_1 = arith.constant 0 : index
    %c0_2 = arith.constant 0 : index
    %2 = vector.load %arg1[%c0_1, %c0_2] : memref<48x2048xbf16, #tpu.memory_space<vmem>>, vector<48x2048xbf16>
    %cst = arith.constant dense<0.000000e+00> : vector<48x512xf32>
    %3 = tpu.matmul %2, %1, %cst {dimension_numbers = #tpu.dot_dimension_numbers<[1], [0], [0], [1], [0, 0, 1, 1], [], []>} : vector<48x2048xbf16>, vector<2048x512xbf16>, vector<48x512xf32> -> vector<48x512xf32>
    %4 = vector.extract_strided_slice %3 {offsets = [32, 0], sizes = [1, 512], strides = [1, 1]} : vector<48x512xf32> to vector<1x512xf32>
    %cst_3 = arith.constant 1.000000e+00 : f32
    %5 = vector.broadcast %cst_3 : f32 to vector<1x512xf32>
    %6 = arith.addf %4, %5 : vector<1x512xf32>
    %7 = tpu.reciprocal %6 {approx = true} : vector<1x512xf32> -> vector<1x512xf32>
    %8 = vector.extract_strided_slice %3 {offsets = [0, 0], sizes = [32, 512], strides = [1, 1]} : vector<48x512xf32> to vector<32x512xf32>
    %9 = vector.broadcast %7 : vector<1x512xf32> to vector<32x512xf32>
    %10 = arith.mulf %8, %9 : vector<32x512xf32>
    %cst_4 = arith.constant 0.000000e+00 : f32
    %11 = vector.broadcast %cst_4 : f32 to vector<32x512xf32>
    %12 = arith.maximumf %10, %11 : vector<32x512xf32>
    %c0_5 = arith.constant 0 : index
    %c0_6 = arith.constant 0 : index
    %13 = vector.load %arg3[%c0_5, %c0_6] : memref<32x512xf32, #tpu.memory_space<vmem>>, vector<32x512xf32>
    tpu.vector_store %arg3[%c0_5, %c0_6], %12 {strides = array<i32>} : memref<32x512xf32, #tpu.memory_space<vmem>>, vector<32x512xf32>,
    return
  }
  func.func @transform_0(%arg0: i32) -> (i32, i32) {
    %c0_i32 = arith.constant 0 : i32
    %c0_i32_0 = arith.constant 0 : i32
    %c0_i32_1 = arith.constant 0 : i32
    return %c0_i32, %c0_i32_0 : i32, i32
  }
  func.func @transform_1(%arg0: i32) -> (i32, i32) {
    %c0_i32 = arith.constant 0 : i32
    %c0_i32_0 = arith.constant 0 : i32
    return %c0_i32, %arg0 : i32, i32
  }
  func.func @transform_2(%arg0: i32) -> (i32, i32) {
    %c0_i32 = arith.constant 0 : i32
    %c0_i32_0 = arith.constant 0 : i32
    return %c0_i32, %arg0 : i32, i32
  }
}

</mosaic_0001>

<bundles_post_ra>
// kernel: tpu_custom_call.1
= control target key start
LH: loop header
LB: loop body
LE: loop exit
PB: predicated region body
PF: predicated region fallthrough
CT: control target
= control target key end

     0   :  { %7 = vsyncpa [#allocation3], 0  ;;  %s6884_s0 = inlined_call_operand.hbm [shape: bf16[48,2048], index: 0, kind: input, shape index: {}]   ;;  %s6885_s1 = inlined_call_operand.hbm [shape: s8[2048,2048], index: 1, kind: input, shape index: {}]   ;;  %s6886_s2 = inlined_call_operand.hbm [shape: f32[32,2048], index: 2, kind: output, shape index: {}]  }
   0x1   :  { %8 = vsyncpa [#allocation6], 0 }
   0x2   :  { %10 = vsyncpa [#allocation6 + $0x1], 0 }
   0x3   :  { %11 = vsyncpa [#allocation4], 0 }
   0x4   :  { %13 = vsyncpa [#allocation4 + $0x1], 0  ;;  %s5407_s9 = smov 0   ;;  %s5409_s10 = smov 0  }
   0x5   :  { %s5411_s11 = smov 0   ;;  %s5413_s12 = smov 0  }
   0x6 LB: > { %s5428_s13 = sadd.s32 4294967295, %s5381_s12   ;;  %s4920_s14 = sadd.s32 4294967294, %s5381_s12   ;;  %s5381_s12 = sphi %s5413_s12, %s7037_s12   ;;  %s5377_s11 = sphi %s5411_s11, %s7036_s11   ;;  %s5373_s10 = sphi %s5409_s10, %s7035_s10   ;;  %s5369_s9 = sphi %s5407_s9, %s7034_s9  }
   0x7   : > { %p60_p0 = scmp.ne.s32.totalorder %s5373_s10, %s5369_s9  ;;  %p61_p1 = scmp.eq.s32.totalorder %s5428_s13, 0 }
   0x8   : > { %p84_p2 = scmp.eq.s32.totalorder %s5428_s13, 3  ;;  %p90_p3 = scmp.eq.s32.totalorder %s4920_s14, 3 }
   0x9   : > { %p5437_p4 = por %p61_p1, %p60_p0  ;;  %p4921_p5 = scmp.ge.s32.totalorder %s5381_s12, 1 }
   0xa   : > { %p5442_p6 = por %p90_p3, %p60_p0  ;;  %p97_p7 = scmp.lt.s32.totalorder %s5381_s12, 5 }
   0xb   : > { %s108_s19 = sshll.u32 %s6884_s0, 4  ;;  %s5383_s21 = smov [#allocation2]   ;;  %s109_s19 = int_to_ptr.hbm [resolvable:$true] %s108_s19 }
   0xc   : > { %p5450_p8 = pnand %p4921_p5, %p97_p7  ;;  %s110_s22 = sshll.u32 %s5383_s21, 4  ;;  %s111_s22 = int_to_ptr.vmem [resolvable:$true] %s110_s22 }
   0xd   : > { %s5459_s23 = sadd.s32 1, %s5381_s12   ;;  %s5384_s24 = smov 1024  }
   0xe   : > { %p5186_p9 = pneg %p5450_p8  ;;  %s5385_s25 = smov 64  }
   0xf   : > { %s44_s26 = ssub.s32 %s5381_s12, %s5459_s23  ;;  %s47_s27 = sadd.s32 1, %s5377_s11 }
  0x10   : > { %p5187_p10 = pnand %p5186_p9, %p61_p1  ;;  %p45_p11 = scmp.eq.s32.totalorder %s44_s26, 0 }
  0x11   : > { %p54_p12 = scmp.ne.s32.totalorder %s5377_s11, %s5373_s10  ;;  %p55_p13 = scmp.eq.s32.totalorder %s5381_s12, 0 }
  0x12   : > { %5189 = dma.hbm_to_vmem [thread:$0]  (!%p5187_p10), %s109_s19, 6144, %s111_s22, [#allocation3], %s5384_s24, %s5384_s24, %s5385_s25  }
  0x13   : > { %p5199_p0 = scmp.lt.s32.totalorder %s5381_s12, 4  ;;  %p56_p3 = por %p55_p13, %p54_p12 }
  0x14   : > { %s5469_s28 = scalar_select %p45_p11, %s5377_s11, %s47_s27  }
  0x15   : > { %p5473_p5 = por %p84_p2, %p54_p12  ;;  %s124_s30 = sand.u32 1, %s5377_s11  }
  0x16   : > { %s5128_s3 = sshll.u32 %s5381_s12, 5  ;;  %s4924_s4 = sshll.u32 %s124_s30, 11 }
  0x17   : > { %s133_s7 = scalar_lea.hbm %s6885_s1, %s5128_s3  ;;  %s128_s14 = scalar_lea.vmem [#allocation5], %s4924_s4 }
  0x18   : > { %s134_s8 = sshll.u32 %s133_s7, 4  ;;  %s136_s17 = sshll.u32 %s128_s14, 4  ;;  %s135_s8 = int_to_ptr.hbm [resolvable:$true] %s134_s8  ;;  %s137_s17 = int_to_ptr.vmem [resolvable:$true] %s136_s17 }
  0x19   : > { %p5484_p7 = pnand %p5199_p0, %p56_p3  ;;  %s125_s19 = scalar_lea.sflag [#allocation6], %s124_s30 }
  0x1a   : > { %s5281_s21 = sshra.s32 %s135_s8, 4  ;;  %s5288_s26 = scalar_lea.hbm %s6885_s1, 8192  ;;  %s5282_s21 = int_to_ptr.hbm [resolvable:$true] %s5281_s21 }
  0x1b   : > { %s5283_s22 = scalar_lea.hbm %s5282_s21, 2048  ;;  %p5285_p9 = pneg %p5484_p7 }
  0x1c   : > { %p5284_p2 = scmp.ne.s32.totalorder %s5282_s21, %s5283_s22  ;;  %p5289_p12 = scmp.lt.s32.totalorder %s5282_s21, %s6885_s1 }
  0x1d   : > { %p5290_p13 = scmp.lt.s32.totalorder %s5288_s26, %s5283_s22 }
  0x1e   : > { %p5286_p10 = pnand %p5285_p9, %p5284_p2 }
  0x1f   : > { %p5291_p0 = por %p5290_p13, %p5289_p12 }
  0x20   : > { %p5287_p11 = pneg %p5286_p10 }
  0x22   : > { %p5292_p3 = pnand %p5291_p0, %p5287_p11 }
  0x24   : > { %5295 = shalt.err (!%p5292_p3)
}
  0x25   : > { %s5386_s30 = smov 2048   ;;  %s5387_s4 = smov 512  }
  0x26   : > { %s5388_s5 = smov 32   ;;  %148 = sbr.rel (%p5450_p8) target bundleno = 1005 (0x3ed), region = 28 }
  0x27   : > { %5193 = dma.hbm_to_vmem [thread:$0]  (!%p5484_p7), %s135_s8, 32768, %s137_s17, %s125_s19, %s5386_s30, %s5387_s4, %s5388_s5  }
  0x2b   : > { %5356 = dma.done.wait (%p61_p1), [#allocation3], 6144  }
  0x2c   : > { %5358 = vsyncadd (%p61_p1), [#allocation3], 4294961152  ;;  %s5505_s6 = sand.u32 1, %s5373_s10  }
  0x2d   : > { %s4929_s7 = sshll.u32 %s5505_s6, 11  ;;  %s156_s14 = scalar_lea.sflag [#allocation6], %s5505_s6 }
  0x2e   : > { %s5509_s21 = scalar_lea.vmem [#allocation5], %s4929_s7 }
  0x2f   : > { %5360 = dma.done.wait (%p5437_p4), %s156_s14, 32768  }
  0x30   : > { %5362 = vsyncadd (%p5437_p4), %s156_s14, 4294934528  ;;  %v195_v0 = vld [vmem:[%s5509_s21 + $0x60] sm:$0xff]  ;;  %s4930_s15 = sshll.u32 %s5505_s6, 7  ;;  %s5177_s8 = sshll.u32 %s5428_s13, 5 }
  0x31   : > { %v211_v1 = vld [vmem:[%s5509_s21 + $0xe0] sm:$0xff]  ;;  %v495_v3 = vunpack.c.2.s8 %v195_v0  ;;  %v499_v4 = vunpack.c.3.s8 %v195_v0  ;;  %v487_v22 = vunpack.c.0.s8 %v195_v0  ;;  %v491_v23 = vunpack.c.1.s8 %v195_v0  ;;  %s6229_s20 = scalar_lea.vmem [#allocation7], %s4930_s15  ;;  %s4831_s19 = scalar_lea.hbm %s6886_s2, %s5177_s8 }
  0x32   : > { %v227_v2 = vld [vmem:[%s5509_s21 + $0x160] sm:$0xff]  ;;  %v559_v5 = vunpack.c.2.s8 %v211_v1  ;;  %v563_v6 = vunpack.c.3.s8 %v211_v1  ;;  %v551_v26 = vunpack.c.0.s8 %v211_v1  ;;  %v555_v27 = vunpack.c.1.s8 %v211_v1  ;;  %s4832_s13 = sshll.u32 %s6229_s20, 4  ;;  %s4834_s22 = sshll.u32 %s4831_s19, 4  ;;  %s4833_s13 = int_to_ptr.vmem [resolvable:$true] %s4832_s13  ;;  %s4835_s22 = int_to_ptr.hbm [resolvable:$true] %s4834_s22 }
  0x33   : > { %v243_v7 = vld [vmem:[%s5509_s21 + $0x1e0] sm:$0xff]  ;;  %v623_v8 = vunpack.c.2.s8 %v227_v2  ;;  %v627_v9 = vunpack.c.3.s8 %v227_v2  ;;  %v1519_v12 = vcvt.s32.f32 %v495_v3  ;;  %v1523_v13 = vcvt.s32.f32 %v499_v4  ;;  %s4820_s24 = scalar_lea.sflag [#allocation4], %s5505_s6  ;;  %s5325_s25 = sshra.s32 %s4835_s22, 4  ;;  %s5326_s25 = int_to_ptr.hbm [resolvable:$true] %s5325_s25 }
  0x34   : > { %v687_v10 = vunpack.c.2.s8 %v243_v7  ;;  %v691_v11 = vunpack.c.3.s8 %v243_v7  ;;  %v1583_v14 = vcvt.s32.f32 %v559_v5  ;;  %v1587_v15 = vcvt.s32.f32 %v563_v6  ;;  %v191_v28 = vld [vmem:[%s5509_s21 + $0x40] sm:$0xff]  ;;  %s5327_s26 = scalar_lea.hbm %s5326_s25, 128  ;;  %s5331_s30 = scalar_lea.hbm %s6886_s2, 512 }
  0x35   : > { %v1647_v16 = vcvt.s32.f32 %v623_v8  ;;  %v1651_v17 = vcvt.s32.f32 %v627_v9  ;;  %v2515_v20 = vpack.c.bf16 %v1523_v13, %v1519_v12  ;;  %v1511_v29 = vcvt.s32.f32 %v487_v22  ;;  %v207_v37 = vld [vmem:[%s5509_s21 + $0xc0] sm:$0xff]  ;;  %p5328_p1 = scmp.ne.s32.totalorder %s5326_s25, %s5327_s26  ;;  %p5332_p7 = scmp.lt.s32.totalorder %s5326_s25, %s6886_s2 }
  0x36   : > { %v1711_v18 = vcvt.s32.f32 %v687_v10  ;;  %v1715_v19 = vcvt.s32.f32 %v691_v11  ;;  %v2547_v21 = vpack.c.bf16 %v1587_v15, %v1583_v14  ;;  %v1515_v30 = vcvt.s32.f32 %v491_v23  ;;  %v223_v42 = vld [vmem:[%s5509_s21 + $0x140] sm:$0xff]  ;;  %p5333_p2 = scmp.lt.s32.totalorder %s5331_s30, %s5327_s26 }
  0x37   : > { %v2579_v24 = vpack.c.bf16 %v1651_v17, %v1647_v16  ;;  %3287 = vmatpush.bf16.msra.mxu0 %v2515_v20  ;;  %v615_v31 = vunpack.c.0.s8 %v227_v2  ;;  %v619_v32 = vunpack.c.1.s8 %v227_v2  ;;  %v1575_v33 = vcvt.s32.f32 %v551_v26  ;;  %v239_v47 = vld [vmem:[%s5509_s21 + $0x1c0] sm:$0xff]  ;;  %p5329_p4 = pnand %p5328_p1, %p5473_p5 }
  0x38   : > { %v2611_v25 = vpack.c.bf16 %v1715_v19, %v1711_v18  ;;  %3310 = vmatpush.bf16.msra.mxu1 %v2547_v21  ;;  %v1579_v34 = vcvt.s32.f32 %v555_v27  ;;  %v679_v35 = vunpack.c.0.s8 %v243_v7  ;;  %v683_v36 = vunpack.c.1.s8 %v243_v7  ;;  %v187_v8 = vld [vmem:[%s5509_s21 + $0x20] sm:$0xff]  ;;  %p5334_p9 = por %p5333_p2, %p5332_p7 }
  0x39   : > { %3333 = vmatpush.bf16.msra.mxu2 %v2579_v24  ;;  %v2511_v38 = vpack.c.bf16 %v1515_v30, %v1511_v29  ;;  %v1639_v39 = vcvt.s32.f32 %v615_v31  ;;  %v1643_v40 = vcvt.s32.f32 %v619_v32  ;;  %v479_v41 = vunpack.c.2.s8 %v191_v28  ;;  %v203_v17 = vld [vmem:[%s5509_s21 + $0xa0] sm:$0xff]  ;;  %p5330_p8 = pneg %p5329_p4 }
  0x3a   : > { %3356 = vmatpush.bf16.msra.mxu3 %v2611_v25  ;;  %v2543_v43 = vpack.c.bf16 %v1579_v34, %v1575_v33  ;;  %v1703_v44 = vcvt.s32.f32 %v679_v35  ;;  %v1707_v45 = vcvt.s32.f32 %v683_v36  ;;  %v483_v46 = vunpack.c.3.s8 %v191_v28  ;;  %v219_v22 = vld [vmem:[%s5509_s21 + $0x120] sm:$0xff] }
  0x3b   : > { %3288 = vmatpush.bf16.msra.mxu0 %v2511_v38  ;;  %v2575_v48 = vpack.c.bf16 %v1643_v40, %v1639_v39  ;;  %v1503_v49 = vcvt.s32.f32 %v479_v41  ;;  %v543_v50 = vunpack.c.2.s8 %v207_v37  ;;  %v547_v51 = vunpack.c.3.s8 %v207_v37  ;;  %v235_v27 = vld [vmem:[%s5509_s21 + $0x1a0] sm:$0xff]  ;;  %p5335_p10 = pnand %p5334_p9, %p5330_p8 }
  0x3c   : > { %3311 = vmatpush.bf16.msra.mxu1 %v2543_v43  ;;  %v2607_v52 = vpack.c.bf16 %v1707_v45, %v1703_v44  ;;  %v1507_v53 = vcvt.s32.f32 %v483_v46  ;;  %v607_v54 = vunpack.c.2.s8 %v223_v42  ;;  %v611_v55 = vunpack.c.3.s8 %v223_v42 }
  0x3d   : > { %3334 = vmatpush.bf16.msra.mxu2 %v2575_v48  ;;  %v1567_v56 = vcvt.s32.f32 %v543_v50  ;;  %v1571_v57 = vcvt.s32.f32 %v547_v51  ;;  %v671_v58 = vunpack.c.2.s8 %v239_v47  ;;  %v675_v59 = vunpack.c.3.s8 %v239_v47 }
  0x3e   : > { %3357 = vmatpush.bf16.msra.mxu3 %v2607_v52  ;;  %v2507_v60 = vpack.c.bf16 %v1507_v53, %v1503_v49  ;;  %v1631_v61 = vcvt.s32.f32 %v607_v54  ;;  %v1635_v62 = vcvt.s32.f32 %v611_v55  ;;  %v471_v63 = vunpack.c.0.s8 %v191_v28  ;;  %v183_v52 = vld [vmem:[%s5509_s21] sm:$0xff] }
  0x3f   : > { %v2539_v0 = vpack.c.bf16 %v1571_v57, %v1567_v56  ;;  %v1695_v1 = vcvt.s32.f32 %v671_v58  ;;  %v1699_v2 = vcvt.s32.f32 %v675_v59  ;;  %v475_v3 = vunpack.c.1.s8 %v191_v28 }
  0x40   : > { %3289 = vmatpush.bf16.msra.mxu0 %v2507_v60  ;;  %v2571_v4 = vpack.c.bf16 %v1635_v62, %v1631_v61  ;;  %v1495_v5 = vcvt.s32.f32 %v471_v63  ;;  %v535_v6 = vunpack.c.0.s8 %v207_v37  ;;  %v539_v7 = vunpack.c.1.s8 %v207_v37  ;;  %v199_v61 = vld [vmem:[%s5509_s21 + $0x80] sm:$0xff] }
  0x41   : > { %3312 = vmatpush.bf16.msra.mxu1 %v2539_v0  ;;  %v2603_v9 = vpack.c.bf16 %v1699_v2, %v1695_v1  ;;  %v1499_v10 = vcvt.s32.f32 %v475_v3  ;;  %v599_v11 = vunpack.c.0.s8 %v223_v42  ;;  %v603_v12 = vunpack.c.1.s8 %v223_v42  ;;  %v215_v2 = vld [vmem:[%s5509_s21 + $0x100] sm:$0xff] }
  0x42   : > { %3335 = vmatpush.bf16.msra.mxu2 %v2571_v4  ;;  %v1559_v13 = vcvt.s32.f32 %v535_v6  ;;  %v1563_v14 = vcvt.s32.f32 %v539_v7  ;;  %v663_v15 = vunpack.c.0.s8 %v239_v47  ;;  %v667_v16 = vunpack.c.1.s8 %v239_v47  ;;  %v231_v7 = vld [vmem:[%s5509_s21 + $0x180] sm:$0xff] }
  0x43   : > { %3358 = vmatpush.bf16.msra.mxu3 %v2603_v9  ;;  %v2503_v18 = vpack.c.bf16 %v1499_v10, %v1495_v5  ;;  %v1623_v19 = vcvt.s32.f32 %v599_v11  ;;  %v1627_v20 = vcvt.s32.f32 %v603_v12  ;;  %v463_v21 = vunpack.c.2.s8 %v187_v8 }
  0x44   : > { %v2535_v23 = vpack.c.bf16 %v1563_v14, %v1559_v13  ;;  %v1687_v24 = vcvt.s32.f32 %v663_v15  ;;  %v1691_v25 = vcvt.s32.f32 %v667_v16  ;;  %v467_v26 = vunpack.c.3.s8 %v187_v8 }
  0x45   : > { %3290 = vmatpush.bf16.msra.mxu0 %v2503_v18  ;;  %v2567_v28 = vpack.c.bf16 %v1627_v20, %v1623_v19  ;;  %v1487_v29 = vcvt.s32.f32 %v463_v21  ;;  %v527_v30 = vunpack.c.2.s8 %v203_v17  ;;  %v531_v31 = vunpack.c.3.s8 %v203_v17 }
  0x46   : > { %3313 = vmatpush.bf16.msra.mxu1 %v2535_v23  ;;  %v2599_v32 = vpack.c.bf16 %v1691_v25, %v1687_v24  ;;  %v1491_v33 = vcvt.s32.f32 %v467_v26  ;;  %v591_v34 = vunpack.c.2.s8 %v219_v22  ;;  %v595_v35 = vunpack.c.3.s8 %v219_v22 }
  0x47   : > { %3336 = vmatpush.bf16.msra.mxu2 %v2567_v28  ;;  %v1551_v36 = vcvt.s32.f32 %v527_v30  ;;  %v1555_v37 = vcvt.s32.f32 %v531_v31  ;;  %v655_v38 = vunpack.c.2.s8 %v235_v27  ;;  %v659_v39 = vunpack.c.3.s8 %v235_v27 }
  0x48   : > { %3359 = vmatpush.bf16.msra.mxu3 %v2599_v32  ;;  %v2499_v40 = vpack.c.bf16 %v1491_v33, %v1487_v29  ;;  %v1615_v41 = vcvt.s32.f32 %v591_v34  ;;  %v1619_v42 = vcvt.s32.f32 %v595_v35  ;;  %v455_v43 = vunpack.c.0.s8 %v187_v8  ;;  %v4933_v32 = vld [vmem:[#allocation2] sm:$0xf]  ;;  %v5129_v34 = vld [vmem:[#allocation2 + $0x4] sm:$0xf] }
  0x49   : > { %v2531_v44 = vpack.c.bf16 %v1555_v37, %v1551_v36  ;;  %v1679_v45 = vcvt.s32.f32 %v655_v38  ;;  %v1683_v46 = vcvt.s32.f32 %v659_v39  ;;  %v459_v47 = vunpack.c.1.s8 %v187_v8  ;;  %v5137_v33 = vld [vmem:[#allocation2 + $0x3c] sm:$0xf0]  ;;  %v4935_v39 = vld [vmem:[#allocation2 + $0x40] sm:$0xf0] }
  0x4a   : > { %3291 = vmatpush.bf16.msra.mxu0 %v2499_v40  ;;  %v2563_v48 = vpack.c.bf16 %v1619_v42, %v1615_v41  ;;  %v1479_v49 = vcvt.s32.f32 %v455_v43  ;;  %v519_v50 = vunpack.c.0.s8 %v203_v17  ;;  %v523_v51 = vunpack.c.1.s8 %v203_v17  ;;  %v4941_v40 = vld [vmem:[#allocation2 + $0x8] sm:$0xf] }
  0x4b   : > { %3314 = vmatpush.bf16.msra.mxu1 %v2531_v44  ;;  %v2595_v53 = vpack.c.bf16 %v1683_v46, %v1679_v45  ;;  %v1483_v54 = vcvt.s32.f32 %v459_v47  ;;  %v583_v55 = vunpack.c.0.s8 %v219_v22  ;;  %v587_v56 = vunpack.c.1.s8 %v219_v22  ;;  %v5138_v41 = vld [vmem:[#allocation2 + $0x44] sm:$0xf0]  ;;  %v5130_v46 = vld [vmem:[#allocation2 + $0xc] sm:$0xf] }
  0x4c   : > { %3337 = vmatpush.bf16.msra.mxu2 %v2563_v48  ;;  %v1543_v57 = vcvt.s32.f32 %v519_v50  ;;  %v1547_v58 = vcvt.s32.f32 %v523_v51  ;;  %v647_v59 = vunpack.c.0.s8 %v235_v27  ;;  %v651_v60 = vunpack.c.1.s8 %v235_v27  ;;  %v4943_v47 = vld [vmem:[#allocation2 + $0x48] sm:$0xf0]  ;;  %v291_v48 = vld [vmem:[%s5509_s21 + $0x360] sm:$0xff] }
  0x4d   : > { %3360 = vmatpush.bf16.msra.mxu3 %v2595_v53  ;;  %v2495_v62 = vpack.c.bf16 %v1483_v54, %v1479_v49  ;;  %v1607_v63 = vcvt.s32.f32 %v583_v55  ;;  %v1611_v0 = vcvt.s32.f32 %v587_v56  ;;  %v447_v1 = vunpack.c.2.s8 %v183_v52  ;;  %v259_v53 = vld [vmem:[%s5509_s21 + $0x260] sm:$0xff] }
  0x4e   : > { %v2527_v3 = vpack.c.bf16 %v1547_v58, %v1543_v57  ;;  %v1671_v4 = vcvt.s32.f32 %v647_v59  ;;  %v1675_v5 = vcvt.s32.f32 %v651_v60  ;;  %v451_v6 = vunpack.c.3.s8 %v183_v52  ;;  %v307_v58 = vld [vmem:[%s5509_s21 + $0x3e0] sm:$0xff] }
  0x4f   : > { %3292 = vmatpush.bf16.msra.mxu0 %v2495_v62  ;;  %v2559_v8 = vpack.c.bf16 %v1611_v0, %v1607_v63  ;;  %v1471_v9 = vcvt.s32.f32 %v447_v1  ;;  %v511_v10 = vunpack.c.2.s8 %v199_v61  ;;  %v515_v11 = vunpack.c.3.s8 %v199_v61  ;;  %v275_v59 = vld [vmem:[%s5509_s21 + $0x2e0] sm:$0xff] }
  0x50   : > { %3315 = vmatpush.bf16.msra.mxu1 %v2527_v3  ;;  %v2591_v12 = vpack.c.bf16 %v1675_v5, %v1671_v4  ;;  %v1475_v13 = vcvt.s32.f32 %v451_v6  ;;  %v575_v14 = vunpack.c.2.s8 %v215_v2  ;;  %v579_v15 = vunpack.c.3.s8 %v215_v2 }
  0x51   : > { %3338 = vmatpush.bf16.msra.mxu2 %v2559_v8  ;;  %v1535_v16 = vcvt.s32.f32 %v511_v10  ;;  %v1539_v17 = vcvt.s32.f32 %v515_v11  ;;  %v639_v18 = vunpack.c.2.s8 %v231_v7  ;;  %v643_v19 = vunpack.c.3.s8 %v231_v7 }
  0x52   : > { %3361 = vmatpush.bf16.msra.mxu3 %v2591_v12  ;;  %v2491_v20 = vpack.c.bf16 %v1475_v13, %v1471_v9  ;;  %v1599_v21 = vcvt.s32.f32 %v575_v14  ;;  %v1603_v22 = vcvt.s32.f32 %v579_v15  ;;  %v439_v23 = vunpack.c.0.s8 %v183_v52 }
  0x53   : > { %v2523_v24 = vpack.c.bf16 %v1539_v17, %v1535_v16  ;;  %v1663_v25 = vcvt.s32.f32 %v639_v18  ;;  %v1667_v26 = vcvt.s32.f32 %v643_v19  ;;  %v443_v27 = vunpack.c.1.s8 %v183_v52 }
  0x54   : > { %3293 = vmatpush.bf16.msra.mxu0 %v2491_v20  ;;  %v2555_v28 = vpack.c.bf16 %v1603_v22, %v1599_v21  ;;  %v1463_v29 = vcvt.s32.f32 %v439_v23  ;;  %v503_v30 = vunpack.c.0.s8 %v199_v61  ;;  %v507_v31 = vunpack.c.1.s8 %v199_v61 }
  0x55   : > { %3316 = vmatpush.bf16.msra.mxu1 %v2523_v24  ;;  %v2587_v35 = vpack.c.bf16 %v1667_v26, %v1663_v25  ;;  %v1467_v36 = vcvt.s32.f32 %v443_v27  ;;  %v567_v37 = vunpack.c.0.s8 %v215_v2  ;;  %v571_v38 = vunpack.c.1.s8 %v215_v2  ;;  %v5548_v24 = vld [vmem:[%s5509_s21 + $0x340] sm:$0xff] }
  0x56   : > { %3339 = vmatpush.bf16.msra.mxu2 %v2555_v28  ;;  %v1527_v42 = vcvt.s32.f32 %v503_v30  ;;  %v1531_v43 = vcvt.s32.f32 %v507_v31  ;;  %v631_v44 = vunpack.c.0.s8 %v231_v7  ;;  %v635_v45 = vunpack.c.1.s8 %v231_v7 }
  0x57   : > { %3362 = vmatpush.bf16.msra.mxu3 %v2587_v35  ;;  %v2487_v49 = vpack.c.bf16 %v1467_v36, %v1463_v29  ;;  %v1591_v50 = vcvt.s32.f32 %v567_v37  ;;  %v1595_v51 = vcvt.s32.f32 %v571_v38  ;;  %v5532_v52 = vor.u32 %v5137_v33, %v4933_v32  ;;  %v5551_v33 = vld [vmem:[%s5509_s21 + $0x240] sm:$0xff] }
  0x58   : > { %v2519_v54 = vpack.c.bf16 %v1531_v43, %v1527_v42  ;;  %v1655_v55 = vcvt.s32.f32 %v631_v44  ;;  %v1659_v56 = vcvt.s32.f32 %v635_v45  ;;  %v5535_v57 = vor.u32 %v5129_v34, %v4935_v39  ;;  %v303_v38 = vld [vmem:[%s5509_s21 + $0x3c0] sm:$0xff] }
  0x59   : > { %3294 = vmatpush.bf16.msra.mxu0 %v2487_v49  ;;  %v2551_v60 = vpack.c.bf16 %v1595_v51, %v1591_v50  ;;  %v5539_v61 = vor.u32 %v5138_v41, %v4941_v40  ;;  %v5541_v62 = vor.u32 %v5130_v46, %v4943_v47  ;;  %v879_v63 = vunpack.c.2.s8 %v291_v48  ;;  %v4997_v39 = vld [vmem:[#allocation2 + $0x80] sm:$0xf]  ;;  %v5145_v45 = vld [vmem:[#allocation2 + $0x84] sm:$0xf]  ;;  %v5005_v51 = vld [vmem:[#allocation2 + $0x88] sm:$0xf] }
  0x5a   : > { %3317 = vmatpush.bf16.msra.mxu1 %v2519_v54  ;;  %v2583_v0 = vpack.c.bf16 %v1659_v56, %v1655_v55  ;;  %v883_v1 = vunpack.c.3.s8 %v291_v48  ;;  %v751_v2 = vunpack.c.2.s8 %v259_v53  ;;  %v755_v3 = vunpack.c.3.s8 %v259_v53  ;;  %v5153_v44 = vld [vmem:[#allocation2 + $0xbc] sm:$0xf0]  ;;  %v4999_v46 = vld [vmem:[#allocation2 + $0xc0] sm:$0xf0] }
  0x5b   : > { %6947 = vst [vmem:[#allocation11_spill] sm:$0xff] %v5541_v62  ;;  %3340 = vmatpush.bf16.msra.mxu2 %v2551_v60  ;;  %v1903_v4 = vcvt.s32.f32 %v879_v63  ;;  %v943_v5 = vunpack.c.2.s8 %v307_v58  ;;  %v947_v6 = vunpack.c.3.s8 %v307_v58  ;;  %v815_v7 = vunpack.c.2.s8 %v275_v59  ;;  %v5007_v60 = vld [vmem:[#allocation2 + $0xc8] sm:$0xf0]  ;;  %v271_v63 = vld [vmem:[%s5509_s21 + $0x2c0] sm:$0xff] }
  0x5c   : > { %3363 = vmatpush.bf16.msra.mxu3 %v2583_v0  ;;  %3295 = vmatmul.bf16.vlgmr.msra.gmra.mxu0 %v5532_v52  ;;  %v1907_v8 = vcvt.s32.f32 %v883_v1  ;;  %v1775_v9 = vcvt.s32.f32 %v751_v2  ;;  %v1779_v10 = vcvt.s32.f32 %v755_v3  ;;  %v819_v11 = vunpack.c.3.s8 %v275_v59 }
  0x5d   : > { %3318 = vmatmul.bf16.vlgmr.msra.gmra.mxu1 %v5535_v57  ;;  %v1967_v12 = vcvt.s32.f32 %v943_v5  ;;  %v1971_v13 = vcvt.s32.f32 %v947_v6  ;;  %v1839_v14 = vcvt.s32.f32 %v815_v7  ;;  %v871_v15 = vunpack.c.0.s8 %v291_v48 }
  0x5e   : > { %3341 = vmatmul.bf16.vlgmr.msra.gmra.mxu2 %v5539_v61  ;;  %v2707_v16 = vpack.c.bf16 %v1907_v8, %v1903_v4  ;;  %v2643_v17 = vpack.c.bf16 %v1779_v10, %v1775_v9  ;;  %v1843_v18 = vcvt.s32.f32 %v819_v11  ;;  %v875_v19 = vunpack.c.1.s8 %v291_v48 }
  0x5f   : > { %3364 = vmatmul.bf16.vlgmr.msra.gmra.mxu3 %v5541_v62  ;;  %v2739_v20 = vpack.c.bf16 %v1971_v13, %v1967_v12  ;;  %v1895_v21 = vcvt.s32.f32 %v871_v15  ;;  %v743_v22 = vunpack.c.0.s8 %v259_v53  ;;  %v747_v23 = vunpack.c.1.s8 %v259_v53  ;;  %v5154_v53 = vld [vmem:[#allocation2 + $0xc4] sm:$0xf0] }
  0x60   : > { %3425 = vmatpush.bf16.msrb.mxu2 %v2707_v16  ;;  %3379 = vmatpush.bf16.msrb.mxu0 %v2643_v17  ;;  %v2675_v25 = vpack.c.bf16 %v1843_v18, %v1839_v14  ;;  %v1899_v26 = vcvt.s32.f32 %v875_v19  ;;  %v935_v27 = vunpack.c.0.s8 %v307_v58  ;;  %v939_v28 = vunpack.c.1.s8 %v307_v58 }
  0x61   : > { %3448 = vmatpush.bf16.msrb.mxu3 %v2739_v20  ;;  %v1767_v29 = vcvt.s32.f32 %v743_v22  ;;  %v1771_v30 = vcvt.s32.f32 %v747_v23  ;;  %v807_v31 = vunpack.c.0.s8 %v275_v59  ;;  %v811_v32 = vunpack.c.1.s8 %v275_v59  ;;  %v5146_v59 = vld [vmem:[#allocation2 + $0x8c] sm:$0xf]  ;;  %v5572_v20 = vld [vmem:[%s5509_s21 + $0x320] sm:$0xff] }
  0x62   : > { %3402 = vmatpush.bf16.msrb.mxu1 %v2675_v25  ;;  %v2703_v34 = vpack.c.bf16 %v1899_v26, %v1895_v21  ;;  %v1959_v35 = vcvt.s32.f32 %v935_v27  ;;  %v1963_v36 = vcvt.s32.f32 %v939_v28  ;;  %v863_v37 = vunpack.c.2.s8 %v5548_v24  ;;  %v5575_v26 = vld [vmem:[%s5509_s21 + $0x220] sm:$0xff] }
  0x63   : > { %v2639_v40 = vpack.c.bf16 %v1771_v30, %v1767_v29  ;;  %v1831_v41 = vcvt.s32.f32 %v807_v31  ;;  %v1835_v42 = vcvt.s32.f32 %v811_v32  ;;  %v867_v43 = vunpack.c.3.s8 %v5548_v24 }
  0x64   : > { %3426 = vmatpush.bf16.msrb.mxu2 %v2703_v34  ;;  %v2735_v47 = vpack.c.bf16 %v1963_v36, %v1959_v35  ;;  %v1887_v48 = vcvt.s32.f32 %v863_v37  ;;  %v735_v49 = vunpack.c.2.s8 %v5551_v33  ;;  %v739_v50 = vunpack.c.3.s8 %v5551_v33  ;;  %v5581_v34 = vld [vmem:[%s5509_s21 + $0x3a0] sm:$0xff] }
  0x65   : > { %3380 = vmatpush.bf16.msrb.mxu0 %v2639_v40  ;;  %v2671_v54 = vpack.c.bf16 %v1835_v42, %v1831_v41  ;;  %v1891_v55 = vcvt.s32.f32 %v867_v43  ;;  %v927_v56 = vunpack.c.2.s8 %v303_v38  ;;  %v931_v58 = vunpack.c.3.s8 %v303_v38 }
  0x66   : > { %3449 = vmatpush.bf16.msrb.mxu3 %v2735_v47  ;;  %v1759_v0 = vcvt.s32.f32 %v735_v49  ;;  %v1763_v1 = vcvt.s32.f32 %v739_v50  ;;  %v5559_v2 = vor.u32 %v5153_v44, %v4997_v39  ;;  %v5561_v3 = vor.u32 %v5145_v45, %v4999_v46  ;;  %v5587_v39 = vld [vmem:[%s5509_s21 + $0x2a0] sm:$0xff] }
  0x67   : > { %3403 = vmatpush.bf16.msrb.mxu1 %v2671_v54  ;;  %v2699_v4 = vpack.c.bf16 %v1891_v55, %v1887_v48  ;;  %v1951_v5 = vcvt.s32.f32 %v927_v56  ;;  %v1955_v6 = vcvt.s32.f32 %v931_v58  ;;  %v5563_v7 = vor.u32 %v5154_v53, %v5005_v51  ;;  %v5061_v48 = vld [vmem:[#allocation2 + $0x100] sm:$0xf]  ;;  %v5161_v55 = vld [vmem:[#allocation2 + $0x104] sm:$0xf]  ;;  %v5069_v58 = vld [vmem:[#allocation2 + $0x108] sm:$0xf] }
  0x68   : > { %v2635_v8 = vpack.c.bf16 %v1763_v1, %v1759_v0  ;;  %v5565_v9 = vor.u32 %v5146_v59, %v5007_v60  ;;  %v799_v10 = vunpack.c.2.s8 %v271_v63  ;;  %v803_v11 = vunpack.c.3.s8 %v271_v63  ;;  %v5169_v49 = vld [vmem:[#allocation2 + $0x13c] sm:$0xf0]  ;;  %v5063_v56 = vld [vmem:[#allocation2 + $0x140] sm:$0xf0]  ;;  %v5170_v1 = vld [vmem:[#allocation2 + $0x144] sm:$0xf0] }
  0x69   : > { %3427 = vmatpush.bf16.msrb.mxu2 %v2699_v4  ;;  %v2731_v12 = vpack.c.bf16 %v1955_v6, %v1951_v5  ;;  %v855_v13 = vunpack.c.0.s8 %v5548_v24  ;;  %v859_v14 = vunpack.c.1.s8 %v5548_v24  ;;  %v727_v15 = vunpack.c.0.s8 %v5551_v33  ;;  %v5162_v4 = vld [vmem:[#allocation2 + $0x10c] sm:$0xf] }
  0x6a   : > { %3381 = vmatpush.bf16.msrb.mxu0 %v2635_v8  ;;  %v1823_v16 = vcvt.s32.f32 %v799_v10  ;;  %v1827_v17 = vcvt.s32.f32 %v803_v11  ;;  %v731_v18 = vunpack.c.1.s8 %v5551_v33  ;;  %v919_v19 = vunpack.c.0.s8 %v303_v38  ;;  %v5071_v5 = vld [vmem:[#allocation2 + $0x148] sm:$0xf0] }
  0x6b   : > { %3450 = vmatpush.bf16.msrb.mxu3 %v2731_v12  ;;  %v1879_v21 = vcvt.s32.f32 %v855_v13  ;;  %v1883_v22 = vcvt.s32.f32 %v859_v14  ;;  %v1751_v23 = vcvt.s32.f32 %v727_v15  ;;  %v923_v25 = vunpack.c.1.s8 %v303_v38 }
  0x6c   : > { %3300 = vmatmul.bf16.gmra.mxu0 %v5559_v2  ;;  %v2667_v24 = vpack.c.bf16 %v1827_v17, %v1823_v16  ;;  %v1755_v27 = vcvt.s32.f32 %v731_v18  ;;  %v1943_v28 = vcvt.s32.f32 %v919_v19  ;;  %v791_v29 = vunpack.c.0.s8 %v271_v63  ;;  %v5602_v16 = vld [vmem:[%s5509_s21 + $0x300] sm:$0xff] }
  0x6d   : > { %3323 = vmatmul.bf16.gmra.mxu1 %v5561_v3  ;;  %v2695_v30 = vpack.c.bf16 %v1883_v22, %v1879_v21  ;;  %v1947_v31 = vcvt.s32.f32 %v923_v25  ;;  %v795_v32 = vunpack.c.1.s8 %v271_v63  ;;  %v847_v33 = vunpack.c.2.s8 %v5572_v20 }
  0x6e   : > { %3346 = vmatmul.bf16.gmra.mxu2 %v5563_v7  ;;  %3404 = vmatpush.bf16.msrb.mxu1 %v2667_v24  ;;  %v2631_v35 = vpack.c.bf16 %v1755_v27, %v1751_v23  ;;  %v1815_v36 = vcvt.s32.f32 %v791_v29  ;;  %v851_v37 = vunpack.c.3.s8 %v5572_v20  ;;  %v719_v38 = vunpack.c.2.s8 %v5575_v26 }
  0x6f   : > { %3369 = vmatmul.bf16.gmra.mxu3 %v5565_v9  ;;  %3428 = vmatpush.bf16.msrb.mxu2 %v2695_v30  ;;  %v2727_v40 = vpack.c.bf16 %v1947_v31, %v1943_v28  ;;  %v1819_v41 = vcvt.s32.f32 %v795_v32  ;;  %v1871_v42 = vcvt.s32.f32 %v847_v33  ;;  %v723_v43 = vunpack.c.3.s8 %v5575_v26  ;;  %v247_v30 = vld [vmem:[%s5509_s21 + $0x200] sm:$0xff] }
  0x70   : > { %3382 = vmatpush.bf16.msrb.mxu0 %v2631_v35  ;;  %v1875_v44 = vcvt.s32.f32 %v851_v37  ;;  %v1743_v45 = vcvt.s32.f32 %v719_v38  ;;  %v911_v46 = vunpack.c.2.s8 %v5581_v34  ;;  %v915_v47 = vunpack.c.3.s8 %v5581_v34 }
  0x71   : > { %3451 = vmatpush.bf16.msrb.mxu3 %v2727_v40  ;;  %v2663_v50 = vpack.c.bf16 %v1819_v41, %v1815_v36  ;;  %v1747_v51 = vcvt.s32.f32 %v723_v43  ;;  %v783_v53 = vunpack.c.2.s8 %v5587_v39  ;;  %v787_v54 = vunpack.c.3.s8 %v5587_v39  ;;  %v295_v36 = vld [vmem:[%s5509_s21 + $0x380] sm:$0xff] }
  0x72   : > { %v2691_v59 = vpack.c.bf16 %v1875_v44, %v1871_v42  ;;  %v1935_v60 = vcvt.s32.f32 %v911_v46  ;;  %v1939_v63 = vcvt.s32.f32 %v915_v47  ;;  %v839_v0 = vunpack.c.0.s8 %v5572_v20  ;;  %v263_v40 = vld [vmem:[%s5509_s21 + $0x280] sm:$0xff] }
  0x73   : > { %3405 = vmatpush.bf16.msrb.mxu1 %v2663_v50  ;;  %v2627_v6 = vpack.c.bf16 %v1747_v51, %v1743_v45  ;;  %v1807_v8 = vcvt.s32.f32 %v783_v53  ;;  %v1811_v10 = vcvt.s32.f32 %v787_v54  ;;  %v843_v11 = vunpack.c.1.s8 %v5572_v20 }
  0x74   : > { %3429 = vmatpush.bf16.msrb.mxu2 %v2691_v59  ;;  %v2723_v12 = vpack.c.bf16 %v1939_v63, %v1935_v60  ;;  %v1863_v13 = vcvt.s32.f32 %v839_v0  ;;  %v5597_v14 = vor.u32 %v5169_v49, %v5061_v48  ;;  %v5599_v15 = vor.u32 %v5161_v55, %v5063_v56 }
  0x75   : > { %3383 = vmatpush.bf16.msrb.mxu0 %v2627_v6  ;;  %v2659_v17 = vpack.c.bf16 %v1811_v10, %v1807_v8  ;;  %v1867_v18 = vcvt.s32.f32 %v843_v11  ;;  %v5604_v19 = vor.u32 %v5170_v1, %v5069_v58  ;;  %v5606_v21 = vor.u32 %v5162_v4, %v5071_v5  ;;  %v4949_v6 = vld [vmem:[#allocation2 + $0x10] sm:$0xf]  ;;  %v5131_v10 = vld [vmem:[#allocation2 + $0x14] sm:$0xf] }
  0x76   : > { %3452 = vmatpush.bf16.msrb.mxu3 %v2723_v12  ;;  %v711_v20 = vunpack.c.0.s8 %v5575_v26  ;;  %v715_v22 = vunpack.c.1.s8 %v5575_v26  ;;  %v903_v23 = vunpack.c.0.s8 %v5581_v34  ;;  %v907_v25 = vunpack.c.1.s8 %v5581_v34  ;;  %v5139_v8 = vld [vmem:[#allocation2 + $0x4c] sm:$0xf0] }
  0x77   : > { %6948 = vst [vmem:[#allocation12_spill] sm:$0xff] %v5606_v21  ;;  %3406 = vmatpush.bf16.msrb.mxu1 %v2659_v17  ;;  %v2687_v24 = vpack.c.bf16 %v1867_v18, %v1863_v13  ;;  %v775_v27 = vunpack.c.0.s8 %v5587_v39  ;;  %v779_v28 = vunpack.c.1.s8 %v5587_v39  ;;  %v831_v29 = vunpack.c.2.s8 %v5602_v16  ;;  %v4951_v18 = vld [vmem:[#allocation2 + $0x50] sm:$0xf0] }
  0x78   : > { %v1735_v31 = vcvt.s32.f32 %v711_v20  ;;  %v1739_v32 = vcvt.s32.f32 %v715_v22  ;;  %v1927_v33 = vcvt.s32.f32 %v903_v23  ;;  %v1931_v35 = vcvt.s32.f32 %v907_v25  ;;  %v4957_v20 = vld [vmem:[#allocation2 + $0x18] sm:$0xf] }
  0x79   : > { %3430 = vmatpush.bf16.msrb.mxu2 %v2687_v24  ;;  %v1799_v26 = vcvt.s32.f32 %v775_v27  ;;  %v1803_v37 = vcvt.s32.f32 %v779_v28  ;;  %v835_v34 = vunpack.c.3.s8 %v5602_v16  ;;  %v1855_v38 = vcvt.s32.f32 %v831_v29  ;;  %v5140_v22 = vld [vmem:[#allocation2 + $0x54] sm:$0xf0]  ;;  %v5132_v27 = vld [vmem:[#allocation2 + $0x1c] sm:$0xf]  ;;  %v355_v29 = vld [vmem:[%s5509_s21 + $0x560] sm:$0xff] }
  0x7a   : > { %v2623_v41 = vpack.c.bf16 %v1739_v32, %v1735_v31  ;;  %v2719_v42 = vpack.c.bf16 %v1931_v35, %v1927_v33  ;;  %v703_v43 = vunpack.c.2.s8 %v247_v30  ;;  %v707_v44 = vunpack.c.3.s8 %v247_v30  ;;  %v4959_v28 = vld [vmem:[#allocation2 + $0x58] sm:$0xf0]  ;;  %v323_v35 = vld [vmem:[%s5509_s21 + $0x460] sm:$0xff] }
  0x7b   : > { %v2655_v39 = vpack.c.bf16 %v1803_v37, %v1799_v26  ;;  %v1859_v45 = vcvt.s32.f32 %v835_v34  ;;  %v895_v46 = vunpack.c.2.s8 %v295_v36  ;;  %v899_v47 = vunpack.c.3.s8 %v295_v36 }
  0x7c   : > { %3305 = vmatmul.bf16.gmra.mxu0 %v5597_v14  ;;  %3453 = vmatpush.bf16.msrb.mxu3 %v2719_v42  ;;  %v1727_v48 = vcvt.s32.f32 %v703_v43  ;;  %v1731_v49 = vcvt.s32.f32 %v707_v44  ;;  %v767_v50 = vunpack.c.2.s8 %v263_v40  ;;  %v771_v51 = vunpack.c.3.s8 %v263_v40 }
  0x7d   : > { %3328 = vmatmul.bf16.gmra.mxu1 %v5599_v15  ;;  %3384 = vmatpush.bf16.msrb.mxu0 %v2623_v41  ;;  %v2683_v53 = vpack.c.bf16 %v1859_v45, %v1855_v38  ;;  %v1919_v54 = vcvt.s32.f32 %v895_v46  ;;  %v1923_v55 = vcvt.s32.f32 %v899_v47  ;;  %v823_v56 = vunpack.c.0.s8 %v5602_v16  ;;  %v371_v38 = vld [vmem:[%s5509_s21 + $0x5e0] sm:$0xff] }
  0x7e   : > { %3351 = vmatmul.bf16.gmra.mxu2 %v5604_v19  ;;  %3407 = vmatpush.bf16.msrb.mxu1 %v2655_v39  ;;  %v2619_v58 = vpack.c.bf16 %v1731_v49, %v1727_v48  ;;  %v1791_v59 = vcvt.s32.f32 %v767_v50  ;;  %v1795_v60 = vcvt.s32.f32 %v771_v51  ;;  %v827_v63 = vunpack.c.1.s8 %v5602_v16  ;;  %v339_v41 = vld [vmem:[%s5509_s21 + $0x4e0] sm:$0xff] }
  0x7f   : > { %3374 = vmatmul.bf16.gmra.mxu3 %v5606_v21  ;;  %3431 = vmatpush.bf16.msrb.mxu2 %v2683_v53  ;;  %v2715_v0 = vpack.c.bf16 %v1923_v55, %v1919_v54  ;;  %v1847_v1 = vcvt.s32.f32 %v823_v56  ;;  %v695_v4 = vunpack.c.0.s8 %v247_v30  ;;  %v699_v5 = vunpack.c.1.s8 %v247_v30 }
  0x80   : > { %v2651_v11 = vpack.c.bf16 %v1795_v60, %v1791_v59  ;;  %v1851_v12 = vcvt.s32.f32 %v827_v63  ;;  %v887_v13 = vunpack.c.0.s8 %v295_v36  ;;  %v891_v17 = vunpack.c.1.s8 %v295_v36 }
  0x81   : > { %3385 = vmatpush.bf16.msrb.mxu0 %v2619_v58  ;;  %3454 = vmatpush.bf16.msrb.mxu3 %v2715_v0  ;;  %v1719_v16 = vcvt.s32.f32 %v695_v4  ;;  %v1723_v23 = vcvt.s32.f32 %v699_v5  ;;  %v759_v25 = vunpack.c.0.s8 %v263_v40  ;;  %v763_v24 = vunpack.c.1.s8 %v263_v40 }
  0x82   : > { %3408 = vmatpush.bf16.msrb.mxu1 %v2651_v11  ;;  %v2679_v30 = vpack.c.bf16 %v1851_v12, %v1847_v1  ;;  %v1911_v31 = vcvt.s32.f32 %v887_v13  ;;  %v1915_v32 = vcvt.s32.f32 %v891_v17  ;;  %v5626_v33 = vor.u32 %v5139_v8, %v4949_v6  ;;  %v5638_v12 = vld [vmem:[%s5509_s21 + $0x540] sm:$0xff] }
  0x83   : > { %v2615_v36 = vpack.c.bf16 %v1723_v23, %v1719_v16  ;;  %v1783_v26 = vcvt.s32.f32 %v759_v25  ;;  %v1787_v37 = vcvt.s32.f32 %v763_v24  ;;  %v5629_v34 = vor.u32 %v5131_v10, %v4951_v18  ;;  %v5642_v24 = vld [vmem:[%s5509_s21 + $0x440] sm:$0xff] }
  0x84   : > { %6949 = vst [vmem:[#allocation13_spill] sm:$0xff] %v5626_v33  ;;  %3432 = vmatpush.bf16.msrb.mxu2 %v2679_v30  ;;  %v2711_v42 = vpack.c.bf16 %v1915_v32, %v1911_v31  ;;  %v5633_v40 = vor.u32 %v5140_v22, %v4957_v20  ;;  %v5635_v43 = vor.u32 %v5132_v27, %v4959_v28  ;;  %v1135_v44 = vunpack.c.2.s8 %v355_v29  ;;  %v5647_v31 = vld [vmem:[%s5509_s21 + $0x5c0] sm:$0xff]  ;;  %v5013_v32 = vld [vmem:[#allocation2 + $0x90] sm:$0xf] }
  0x85   : > { %6950 = vst [vmem:[#allocation14_spill] sm:$0xff] %v5629_v34  ;;  %3386 = vmatpush.bf16.msrb.mxu0 %v2615_v36  ;;  %v2647_v39 = vpack.c.bf16 %v1787_v37, %v1783_v26  ;;  %v1139_v45 = vunpack.c.3.s8 %v355_v29  ;;  %v1007_v46 = vunpack.c.2.s8 %v323_v35  ;;  %v1011_v47 = vunpack.c.3.s8 %v323_v35 }
  0x86   : > { %6951 = vst [vmem:[#allocation15_spill] sm:$0xff] %v5633_v40  ;;  %3455 = vmatpush.bf16.msrb.mxu3 %v2711_v42  ;;  %v2159_v48 = vcvt.s32.f32 %v1135_v44  ;;  %v1199_v49 = vunpack.c.2.s8 %v371_v38  ;;  %v1203_v50 = vunpack.c.3.s8 %v371_v38  ;;  %v1071_v51 = vunpack.c.2.s8 %v339_v41  ;;  %v5015_v42 = vld [vmem:[#allocation2 + $0xd0] sm:$0xf0] }
  0x87   : > { %6952 = vst [vmem:[#allocation16_spill] sm:$0xff] %v5635_v43  ;;  %3409 = vmatpush.bf16.msrb.mxu1 %v2647_v39  ;;  %v2163_v53 = vcvt.s32.f32 %v1139_v45  ;;  %v2031_v54 = vcvt.s32.f32 %v1007_v46  ;;  %v2035_v55 = vcvt.s32.f32 %v1011_v47  ;;  %v1075_v56 = vunpack.c.3.s8 %v339_v41  ;;  %v5021_v47 = vld [vmem:[#allocation2 + $0x98] sm:$0xf] }
  0x88   : > { %v2223_v58 = vcvt.s32.f32 %v1199_v49  ;;  %v2227_v59 = vcvt.s32.f32 %v1203_v50  ;;  %v2095_v60 = vcvt.s32.f32 %v1071_v51  ;;  %v1127_v63 = vunpack.c.0.s8 %v355_v29 }
  0x89   : > { %v2835_v0 = vpack.c.bf16 %v2163_v53, %v2159_v48  ;;  %v2771_v1 = vpack.c.bf16 %v2035_v55, %v2031_v54  ;;  %v2099_v4 = vcvt.s32.f32 %v1075_v56  ;;  %v1131_v5 = vunpack.c.1.s8 %v355_v29  ;;  %v5156_v48 = vld [vmem:[#allocation2 + $0xd4] sm:$0xf0]  ;;  %v5148_v54 = vld [vmem:[#allocation2 + $0x9c] sm:$0xf]  ;;  %v335_v56 = vld [vmem:[%s5509_s21 + $0x4c0] sm:$0xff] }
  0x8a   : > { %v2867_v6 = vpack.c.bf16 %v2227_v59, %v2223_v58  ;;  %v2151_v8 = vcvt.s32.f32 %v1127_v63  ;;  %v999_v10 = vunpack.c.0.s8 %v323_v35  ;;  %v1003_v11 = vunpack.c.1.s8 %v323_v35  ;;  %v5023_v55 = vld [vmem:[#allocation2 + $0xd8] sm:$0xf0] }
  0x8b   : > { %3517 = vmatpush.bf16.msra.mxu2 %v2835_v0  ;;  %3471 = vmatpush.bf16.msra.mxu0 %v2771_v1  ;;  %v2803_v13 = vpack.c.bf16 %v2099_v4, %v2095_v60  ;;  %v2155_v17 = vcvt.s32.f32 %v1131_v5  ;;  %v1191_v18 = vunpack.c.0.s8 %v371_v38  ;;  %v1195_v20 = vunpack.c.1.s8 %v371_v38  ;;  %v5155_v38 = vld [vmem:[#allocation2 + $0xcc] sm:$0xf0] }
  0x8c   : > { %3387 = vmatmul.bf16.vlgmr.msrb.gmra.mxu0 %v5626_v33  ;;  %3540 = vmatpush.bf16.msra.mxu3 %v2867_v6  ;;  %v2023_v22 = vcvt.s32.f32 %v999_v10  ;;  %v2027_v16 = vcvt.s32.f32 %v1003_v11  ;;  %v1063_v23 = vunpack.c.0.s8 %v339_v41  ;;  %v1067_v25 = vunpack.c.1.s8 %v339_v41  ;;  %v5147_v41 = vld [vmem:[#allocation2 + $0x94] sm:$0xf] }
  0x8d   : > { %3410 = vmatmul.bf16.vlgmr.msrb.gmra.mxu1 %v5629_v34  ;;  %v2831_v27 = vpack.c.bf16 %v2155_v17, %v2151_v8  ;;  %v2215_v28 = vcvt.s32.f32 %v1191_v18  ;;  %v2219_v29 = vcvt.s32.f32 %v1195_v20  ;;  %v1119_v30 = vunpack.c.2.s8 %v5638_v12 }
  0x8e   : > { %3433 = vmatmul.bf16.vlgmr.msrb.gmra.mxu2 %v5633_v40  ;;  %3494 = vmatpush.bf16.msra.mxu1 %v2803_v13  ;;  %v2767_v35 = vpack.c.bf16 %v2027_v16, %v2023_v22  ;;  %v2087_v36 = vcvt.s32.f32 %v1063_v23  ;;  %v2091_v26 = vcvt.s32.f32 %v1067_v25  ;;  %v1123_v37 = vunpack.c.3.s8 %v5638_v12 }
  0x8f   : > { %3456 = vmatmul.bf16.vlgmr.msrb.gmra.mxu3 %v5635_v43  ;;  %3518 = vmatpush.bf16.msra.mxu2 %v2831_v27  ;;  %v2863_v44 = vpack.c.bf16 %v2219_v29, %v2215_v28  ;;  %v2143_v39 = vcvt.s32.f32 %v1119_v30  ;;  %v991_v45 = vunpack.c.2.s8 %v5642_v24  ;;  %v995_v46 = vunpack.c.3.s8 %v5642_v24  ;;  %v5671_v27 = vld [vmem:[%s5509_s21 + $0x520] sm:$0xff] }
  0x90   : > { %3472 = vmatpush.bf16.msra.mxu0 %v2767_v35  ;;  %v2799_v49 = vpack.c.bf16 %v2091_v26, %v2087_v36  ;;  %v2147_v50 = vcvt.s32.f32 %v1123_v37  ;;  %v1183_v51 = vunpack.c.2.s8 %v5647_v31  ;;  %v1187_v53 = vunpack.c.3.s8 %v5647_v31 }
  0x91   : > { %3541 = vmatpush.bf16.msra.mxu3 %v2863_v44  ;;  %v2015_v58 = vcvt.s32.f32 %v991_v45  ;;  %v2019_v59 = vcvt.s32.f32 %v995_v46  ;;  %v5657_v60 = vor.u32 %v5155_v38, %v5013_v32  ;;  %v5659_v63 = vor.u32 %v5147_v41, %v5015_v42  ;;  %v5679_v44 = vld [vmem:[%s5509_s21 + $0x5a0] sm:$0xff] }
  0x92   : > { %3495 = vmatpush.bf16.msra.mxu1 %v2799_v49  ;;  %v2827_v0 = vpack.c.bf16 %v2147_v50, %v2143_v39  ;;  %v2207_v1 = vcvt.s32.f32 %v1183_v51  ;;  %v2211_v4 = vcvt.s32.f32 %v1187_v53  ;;  %v5661_v5 = vor.u32 %v5156_v48, %v5021_v47  ;;  %v5684_v47 = vld [vmem:[%s5509_s21 + $0x4a0] sm:$0xff] }
  0x93   : > { %6953 = vst [vmem:[#allocation17_spill] sm:$0xff] %v5657_v60  ;;  %v2763_v6 = vpack.c.bf16 %v2019_v59, %v2015_v58  ;;  %v5663_v8 = vor.u32 %v5148_v54, %v5023_v55  ;;  %v1055_v10 = vunpack.c.2.s8 %v335_v56  ;;  %v1059_v11 = vunpack.c.3.s8 %v335_v56  ;;  %v5077_v58 = vld [vmem:[#allocation2 + $0x110] sm:$0xf] }
  0x94   : > { %6954 = vst [vmem:[#allocation18_spill] sm:$0xff] %v5659_v63  ;;  %3519 = vmatpush.bf16.msra.mxu2 %v2827_v0  ;;  %v2859_v13 = vpack.c.bf16 %v2211_v4, %v2207_v1  ;;  %v1111_v17 = vunpack.c.0.s8 %v5638_v12  ;;  %v1115_v18 = vunpack.c.1.s8 %v5638_v12  ;;  %v983_v20 = vunpack.c.0.s8 %v5642_v24  ;;  %v5675_v12 = vld [vmem:[%s5509_s21 + $0x420] sm:$0xff]  ;;  %v5171_v59 = vld [vmem:[#allocation2 + $0x14c] sm:$0xf0] }
  0x95   : > { %6955 = vst [vmem:[#allocation19_spill] sm:$0xff] %v5661_v5  ;;  %3473 = vmatpush.bf16.msra.mxu0 %v2763_v6  ;;  %v2079_v22 = vcvt.s32.f32 %v1055_v10  ;;  %v2083_v16 = vcvt.s32.f32 %v1059_v11  ;;  %v987_v23 = vunpack.c.1.s8 %v5642_v24  ;;  %v1175_v25 = vunpack.c.0.s8 %v5647_v31  ;;  %v5163_v10 = vld [vmem:[#allocation2 + $0x114] sm:$0xf] }
  0x96   : > { %6956 = vst [vmem:[#allocation20_spill] sm:$0xff] %v5663_v8  ;;  %3542 = vmatpush.bf16.msra.mxu3 %v2859_v13  ;;  %v2135_v28 = vcvt.s32.f32 %v1111_v17  ;;  %v2139_v29 = vcvt.s32.f32 %v1115_v18  ;;  %v2007_v30 = vcvt.s32.f32 %v983_v20  ;;  %v1179_v32 = vunpack.c.1.s8 %v5647_v31  ;;  %v5079_v11 = vld [vmem:[#allocation2 + $0x150] sm:$0xf0]  ;;  %v5085_v13 = vld [vmem:[#allocation2 + $0x118] sm:$0xf] }
  0x97   : > { %v2795_v35 = vpack.c.bf16 %v2083_v16, %v2079_v22  ;;  %v2011_v36 = vcvt.s32.f32 %v987_v23  ;;  %v2199_v26 = vcvt.s32.f32 %v1175_v25  ;;  %v1047_v37 = vunpack.c.0.s8 %v335_v56  ;;  %v5172_v16 = vld [vmem:[#allocation2 + $0x154] sm:$0xf0]  ;;  %v5164_v23 = vld [vmem:[#allocation2 + $0x11c] sm:$0xf] }
  0x98   : > { %v2823_v38 = vpack.c.bf16 %v2139_v29, %v2135_v28  ;;  %v2203_v24 = vcvt.s32.f32 %v1179_v32  ;;  %v1051_v41 = vunpack.c.1.s8 %v335_v56  ;;  %v1103_v42 = vunpack.c.2.s8 %v5671_v27  ;;  %v5087_v25 = vld [vmem:[#allocation2 + $0x158] sm:$0xf0] }
  0x99   : > { %3496 = vmatpush.bf16.msra.mxu1 %v2795_v35  ;;  %v2759_v39 = vpack.c.bf16 %v2011_v36, %v2007_v30  ;;  %v2071_v45 = vcvt.s32.f32 %v1047_v37  ;;  %v1107_v46 = vunpack.c.3.s8 %v5671_v27  ;;  %v975_v31 = vunpack.c.2.s8 %v5675_v12 }
  0x9a   : > { %3520 = vmatpush.bf16.msra.mxu2 %v2823_v38  ;;  %v2855_v48 = vpack.c.bf16 %v2203_v24, %v2199_v26  ;;  %v2075_v49 = vcvt.s32.f32 %v1051_v41  ;;  %v2127_v50 = vcvt.s32.f32 %v1103_v42  ;;  %v979_v51 = vunpack.c.3.s8 %v5675_v12  ;;  %v343_v38 = vld [vmem:[%s5509_s21 + $0x500] sm:$0xff] }
  0x9b   : > { %3474 = vmatpush.bf16.msra.mxu0 %v2759_v39  ;;  %v2131_v53 = vcvt.s32.f32 %v1107_v46  ;;  %v1999_v54 = vcvt.s32.f32 %v975_v31  ;;  %v1167_v55 = vunpack.c.2.s8 %v5679_v44  ;;  %v1171_v56 = vunpack.c.3.s8 %v5679_v44 }
  0x9c   : > { %3392 = vmatmul.bf16.gmra.mxu0 %v5657_v60  ;;  %3543 = vmatpush.bf16.msra.mxu3 %v2855_v48  ;;  %v2791_v0 = vpack.c.bf16 %v2075_v49, %v2071_v45  ;;  %v2003_v1 = vcvt.s32.f32 %v979_v51  ;;  %v1039_v4 = vunpack.c.2.s8 %v5684_v47  ;;  %v1043_v6 = vunpack.c.3.s8 %v5684_v47 }
  0x9d   : > { %3415 = vmatmul.bf16.gmra.mxu1 %v5659_v63  ;;  %v2819_v17 = vpack.c.bf16 %v2131_v53, %v2127_v50  ;;  %v2191_v18 = vcvt.s32.f32 %v1167_v55  ;;  %v2195_v20 = vcvt.s32.f32 %v1171_v56  ;;  %v1095_v22 = vunpack.c.0.s8 %v5671_v27  ;;  %v311_v53 = vld [vmem:[%s5509_s21 + $0x400] sm:$0xff] }
  0x9e   : > { %3438 = vmatmul.bf16.gmra.mxu2 %v5661_v5  ;;  %3497 = vmatpush.bf16.msra.mxu1 %v2791_v0  ;;  %v2755_v28 = vpack.c.bf16 %v2003_v1, %v1999_v54  ;;  %v2063_v29 = vcvt.s32.f32 %v1039_v4  ;;  %v2067_v30 = vcvt.s32.f32 %v1043_v6  ;;  %v1099_v32 = vunpack.c.1.s8 %v5671_v27 }
  0x9f   : > { %3461 = vmatmul.bf16.gmra.mxu3 %v5663_v8  ;;  %3521 = vmatpush.bf16.msra.mxu2 %v2819_v17  ;;  %v2851_v35 = vpack.c.bf16 %v2195_v20, %v2191_v18  ;;  %v2119_v36 = vcvt.s32.f32 %v1095_v22  ;;  %v5697_v26 = vor.u32 %v5171_v59, %v5077_v58  ;;  %v5699_v37 = vor.u32 %v5163_v10, %v5079_v11  ;;  %v359_v59 = vld [vmem:[%s5509_s21 + $0x580] sm:$0xff] }
  0xa0   : > { %3475 = vmatpush.bf16.msra.mxu0 %v2755_v28  ;;  %v2787_v24 = vpack.c.bf16 %v2067_v30, %v2063_v29  ;;  %v2123_v41 = vcvt.s32.f32 %v1099_v32  ;;  %v5702_v42 = vor.u32 %v5172_v16, %v5085_v13  ;;  %v5704_v39 = vor.u32 %v5164_v23, %v5087_v25 }
  0xa1   : > { %3544 = vmatpush.bf16.msra.mxu3 %v2851_v35  ;;  %v967_v27 = vunpack.c.0.s8 %v5675_v12  ;;  %v971_v45 = vunpack.c.1.s8 %v5675_v12  ;;  %v1159_v46 = vunpack.c.0.s8 %v5679_v44  ;;  %v1163_v31 = vunpack.c.1.s8 %v5679_v44  ;;  %v327_v44 = vld [vmem:[%s5509_s21 + $0x480] sm:$0xff] }
  0xa2   : > { %6957 = vst [vmem:[#allocation21_spill] sm:$0xff] %v5702_v42  ;;  %3498 = vmatpush.bf16.msra.mxu1 %v2787_v24  ;;  %v2815_v48 = vpack.c.bf16 %v2123_v41, %v2119_v36  ;;  %v1031_v49 = vunpack.c.0.s8 %v5684_v47  ;;  %v1035_v50 = vunpack.c.1.s8 %v5684_v47  ;;  %v1087_v51 = vunpack.c.2.s8 %v343_v38 }
  0xa3   : > { %6958 = vst [vmem:[#allocation22_spill] sm:$0xff] %v5704_v39  ;;  %v1991_v54 = vcvt.s32.f32 %v967_v27  ;;  %v1995_v55 = vcvt.s32.f32 %v971_v45  ;;  %v2183_v56 = vcvt.s32.f32 %v1159_v46  ;;  %v2187_v58 = vcvt.s32.f32 %v1163_v31 }
  0xa4   : > { %3522 = vmatpush.bf16.msra.mxu2 %v2815_v48  ;;  %v2055_v12 = vcvt.s32.f32 %v1031_v49  ;;  %v2059_v0 = vcvt.s32.f32 %v1035_v50  ;;  %v1091_v1 = vunpack.c.3.s8 %v343_v38  ;;  %v2111_v4 = vcvt.s32.f32 %v1087_v51  ;;  %v4965_v48 = vld [vmem:[#allocation2 + $0x20] sm:$0xf]  ;;  %v5133_v50 = vld [vmem:[#allocation2 + $0x24] sm:$0xf] }
  0xa5   : > { %v2751_v6 = vpack.c.bf16 %v1995_v55, %v1991_v54  ;;  %v2847_v10 = vpack.c.bf16 %v2187_v58, %v2183_v56  ;;  %v959_v11 = vunpack.c.2.s8 %v311_v53  ;;  %v963_v13 = vunpack.c.3.s8 %v311_v53  ;;  %v5141_v49 = vld [vmem:[#allocation2 + $0x5c] sm:$0xf0]  ;;  %v4967_v58 = vld [vmem:[#allocation2 + $0x60] sm:$0xf0] }
  0xa6   : > { %v2783_v17 = vpack.c.bf16 %v2059_v0, %v2055_v12  ;;  %v2115_v18 = vcvt.s32.f32 %v1091_v1  ;;  %v1151_v47 = vunpack.c.2.s8 %v359_v59  ;;  %v1155_v20 = vunpack.c.3.s8 %v359_v59  ;;  %v4973_v12 = vld [vmem:[#allocation2 + $0x28] sm:$0xf] }
  0xa7   : > { %3476 = vmatpush.bf16.msra.mxu0 %v2751_v6  ;;  %3545 = vmatpush.bf16.msra.mxu3 %v2847_v10  ;;  %v1983_v22 = vcvt.s32.f32 %v959_v11  ;;  %v1987_v16 = vcvt.s32.f32 %v963_v13  ;;  %v1023_v23 = vunpack.c.2.s8 %v327_v44  ;;  %v1027_v25 = vunpack.c.3.s8 %v327_v44  ;;  %v5142_v0 = vld [vmem:[#allocation2 + $0x64] sm:$0xf0]  ;;  %v5134_v6 = vld [vmem:[#allocation2 + $0x2c] sm:$0xf]  ;;  %v419_v11 = vld [vmem:[%s5509_s21 + $0x760] sm:$0xff] }
  0xa8   : > { %3499 = vmatpush.bf16.msra.mxu1 %v2783_v17  ;;  %v2811_v28 = vpack.c.bf16 %v2115_v18, %v2111_v4  ;;  %v2175_v29 = vcvt.s32.f32 %v1151_v47  ;;  %v2179_v30 = vcvt.s32.f32 %v1155_v20  ;;  %v1079_v32 = vunpack.c.0.s8 %v343_v38  ;;  %v4975_v10 = vld [vmem:[#allocation2 + $0x68] sm:$0xf0]  ;;  %v387_v47 = vld [vmem:[%s5509_s21 + $0x660] sm:$0xff] }
  0xa9   : > { %v2747_v35 = vpack.c.bf16 %v1987_v16, %v1983_v22  ;;  %v2047_v36 = vcvt.s32.f32 %v1023_v23  ;;  %v2051_v24 = vcvt.s32.f32 %v1027_v25  ;;  %v1083_v41 = vunpack.c.1.s8 %v343_v38  ;;  %v435_v23 = vld [vmem:[%s5509_s21 + $0x7e0] sm:$0xff] }
  0xaa   : > { %3523 = vmatpush.bf16.msra.mxu2 %v2811_v28  ;;  %v2843_v27 = vpack.c.bf16 %v2179_v30, %v2175_v29  ;;  %v2103_v45 = vcvt.s32.f32 %v1079_v32  ;;  %v951_v46 = vunpack.c.0.s8 %v311_v53  ;;  %v955_v31 = vunpack.c.1.s8 %v311_v53  ;;  %v403_v25 = vld [vmem:[%s5509_s21 + $0x6e0] sm:$0xff] }
  0xab   : > { %3477 = vmatpush.bf16.msra.mxu0 %v2747_v35  ;;  %v2779_v51 = vpack.c.bf16 %v2051_v24, %v2047_v36  ;;  %v2107_v54 = vcvt.s32.f32 %v1083_v41  ;;  %v1143_v55 = vunpack.c.0.s8 %v359_v59  ;;  %v1147_v56 = vunpack.c.1.s8 %v359_v59 }
  0xac   : > { %3397 = vmatmul.bf16.gmra.mxu0 %v5697_v26  ;;  %3546 = vmatpush.bf16.msra.mxu3 %v2843_v27  ;;  %v1975_v38 = vcvt.s32.f32 %v951_v46  ;;  %v1979_v1 = vcvt.s32.f32 %v955_v31  ;;  %v1015_v4 = vunpack.c.0.s8 %v327_v44  ;;  %v1019_v53 = vunpack.c.1.s8 %v327_v44 }
  0xad   : > { %3420 = vmatmul.bf16.gmra.mxu1 %v5699_v37  ;;  %v2807_v13 = vpack.c.bf16 %v2107_v54, %v2103_v45  ;;  %v2167_v59 = vcvt.s32.f32 %v1143_v55  ;;  %v2171_v17 = vcvt.s32.f32 %v1147_v56  ;;  %v5718_v18 = vor.u32 %v5141_v49, %v4965_v48 }
  0xae   : > { %3443 = vmatmul.bf16.gmra.mxu2 %v5702_v42  ;;  %3500 = vmatpush.bf16.msra.mxu1 %v2779_v51  ;;  %v2743_v20 = vpack.c.bf16 %v1979_v1, %v1975_v38  ;;  %v2039_v22 = vcvt.s32.f32 %v1015_v4  ;;  %v2043_v16 = vcvt.s32.f32 %v1019_v53  ;;  %v5722_v44 = vor.u32 %v5133_v50, %v4967_v58 }
  0xaf   : > { %6959 = vst [vmem:[#allocation23_spill] sm:$0xff] %v5718_v18  ;;  %3466 = vmatmul.bf16.gmra.mxu3 %v5704_v39  ;;  %3524 = vmatpush.bf16.msra.mxu2 %v2807_v13  ;;  %v2839_v28 = vpack.c.bf16 %v2171_v17, %v2167_v59  ;;  %v5727_v29 = vor.u32 %v5142_v0, %v4973_v12  ;;  %v1391_v32 = vunpack.c.2.s8 %v419_v11  ;;  %v1395_v36 = vunpack.c.3.s8 %v419_v11  ;;  %v5732_v13 = vld [vmem:[%s5509_s21 + $0x740] sm:$0xff] }
  0xb0   : > { %6960 = vst [vmem:[#allocation24_spill] sm:$0xff] %v5722_v44  ;;  %v5729_v30 = vor.u32 %v5134_v6, %v4975_v10  ;;  %3478 = vmatpush.bf16.msra.mxu0 %v2743_v20  ;;  %v2775_v35 = vpack.c.bf16 %v2043_v16, %v2039_v22  ;;  %v1263_v24 = vunpack.c.2.s8 %v387_v47  ;;  %v1267_v41 = vunpack.c.3.s8 %v387_v47 }
  0xb1   : > { %6961 = vst [vmem:[#allocation25_spill] sm:$0xff] %v5727_v29  ;;  %3547 = vmatpush.bf16.msra.mxu3 %v2839_v28  ;;  %v2415_v27 = vcvt.s32.f32 %v1391_v32  ;;  %v1455_v45 = vunpack.c.2.s8 %v435_v23  ;;  %v1459_v46 = vunpack.c.3.s8 %v435_v23  ;;  %v1327_v31 = vunpack.c.2.s8 %v403_v25 }
  0xb2   : > { %6962 = vst [vmem:[#allocation26_spill] sm:$0xff] %v5729_v30  ;;  %3501 = vmatpush.bf16.msra.mxu1 %v2775_v35  ;;  %v2419_v48 = vcvt.s32.f32 %v1395_v36  ;;  %v2287_v49 = vcvt.s32.f32 %v1263_v24  ;;  %v2291_v50 = vcvt.s32.f32 %v1267_v41  ;;  %v1331_v51 = vunpack.c.3.s8 %v403_v25 }
  0xb3   : > { %v2479_v54 = vcvt.s32.f32 %v1455_v45  ;;  %v2483_v55 = vcvt.s32.f32 %v1459_v46  ;;  %v2351_v56 = vcvt.s32.f32 %v1327_v31  ;;  %v1383_v58 = vunpack.c.0.s8 %v419_v11  ;;  %v5029_v45 = vld [vmem:[#allocation2 + $0xa0] sm:$0xf] }
  0xb4   : > { %v2963_v12 = vpack.c.bf16 %v2419_v48, %v2415_v27  ;;  %v2899_v0 = vpack.c.bf16 %v2291_v50, %v2287_v49  ;;  %v2355_v38 = vcvt.s32.f32 %v1331_v51  ;;  %v1387_v1 = vunpack.c.1.s8 %v419_v11  ;;  %v5735_v11 = vld [vmem:[%s5509_s21 + $0x640] sm:$0xff] }
  0xb5   : > { %v2995_v4 = vpack.c.bf16 %v2483_v55, %v2479_v54  ;;  %v2407_v53 = vcvt.s32.f32 %v1383_v58  ;;  %v1255_v6 = vunpack.c.0.s8 %v387_v47  ;;  %v1259_v10 = vunpack.c.1.s8 %v387_v47  ;;  %v5739_v27 = vld [vmem:[%s5509_s21 + $0x7c0] sm:$0xff]  ;;  %v5037_v58 = vld [vmem:[#allocation2 + $0xa8] sm:$0xf] }
  0xb6   : > { %3609 = vmatpush.bf16.msrb.mxu2 %v2963_v12  ;;  %3563 = vmatpush.bf16.msrb.mxu0 %v2899_v0  ;;  %v2931_v59 = vpack.c.bf16 %v2355_v38, %v2351_v56  ;;  %v2411_v17 = vcvt.s32.f32 %v1387_v1  ;;  %v1447_v20 = vunpack.c.0.s8 %v435_v23  ;;  %v1451_v22 = vunpack.c.1.s8 %v435_v23  ;;  %v5157_v49 = vld [vmem:[#allocation2 + $0xdc] sm:$0xf0]  ;;  %v5149_v50 = vld [vmem:[#allocation2 + $0xa4] sm:$0xf]  ;;  %v5158_v12 = vld [vmem:[#allocation2 + $0xe4] sm:$0xf0] }
  0xb7   : > { %3632 = vmatpush.bf16.msrb.mxu3 %v2995_v4  ;;  %v2279_v16 = vcvt.s32.f32 %v1255_v6  ;;  %v2283_v28 = vcvt.s32.f32 %v1259_v10  ;;  %v1319_v32 = vunpack.c.0.s8 %v403_v25  ;;  %v1323_v35 = vunpack.c.1.s8 %v403_v25  ;;  %v5031_v25 = vld [vmem:[#allocation2 + $0xe0] sm:$0xf0]  ;;  %v5039_v6 = vld [vmem:[#allocation2 + $0xe8] sm:$0xf0] }
  0xb8   : > { %3586 = vmatpush.bf16.msrb.mxu1 %v2931_v59  ;;  %v2959_v36 = vpack.c.bf16 %v2411_v17, %v2407_v53  ;;  %v2471_v24 = vcvt.s32.f32 %v1447_v20  ;;  %v2475_v47 = vcvt.s32.f32 %v1451_v22  ;;  %v1375_v41 = vunpack.c.2.s8 %v5732_v13  ;;  %v5150_v53 = vld [vmem:[#allocation2 + $0xac] sm:$0xf]  ;;  %v399_v10 = vld [vmem:[%s5509_s21 + $0x6c0] sm:$0xff] }
  0xb9   : > { %v2895_v46 = vpack.c.bf16 %v2283_v28, %v2279_v16  ;;  %v2343_v31 = vcvt.s32.f32 %v1319_v32  ;;  %v2347_v48 = vcvt.s32.f32 %v1323_v35  ;;  %v1379_v23 = vunpack.c.3.s8 %v5732_v13 }
  0xba   : > { %3610 = vmatpush.bf16.msrb.mxu2 %v2959_v36  ;;  %v2991_v51 = vpack.c.bf16 %v2475_v47, %v2471_v24  ;;  %v2399_v54 = vcvt.s32.f32 %v1375_v41  ;;  %v1247_v55 = vunpack.c.2.s8 %v5735_v11  ;;  %v1251_v56 = vunpack.c.3.s8 %v5735_v11 }
  0xbb   : > { %3564 = vmatpush.bf16.msrb.mxu0 %v2895_v46  ;;  %v2927_v0 = vpack.c.bf16 %v2347_v48, %v2343_v31  ;;  %v2403_v38 = vcvt.s32.f32 %v1379_v23  ;;  %v1439_v1 = vunpack.c.2.s8 %v5739_v27  ;;  %v1443_v4 = vunpack.c.3.s8 %v5739_v27 }
  0xbc   : > { %3479 = vmatmul.bf16.vlgmr.msra.gmra.mxu0 %v5718_v18  ;;  %3633 = vmatpush.bf16.msrb.mxu3 %v2991_v51  ;;  %v2271_v59 = vcvt.s32.f32 %v1247_v55  ;;  %v2275_v17 = vcvt.s32.f32 %v1251_v56  ;;  %v5748_v20 = vor.u32 %v5157_v49, %v5029_v45  ;;  %v5750_v22 = vor.u32 %v5149_v50, %v5031_v25  ;;  %v411_v51 = vld [vmem:[%s5509_s21 + $0x720] sm:$0xff] }
  0xbd   : > { %3502 = vmatmul.bf16.vlgmr.msra.gmra.mxu1 %v5722_v44  ;;  %v2955_v16 = vpack.c.bf16 %v2403_v38, %v2399_v54  ;;  %v2463_v28 = vcvt.s32.f32 %v1439_v1  ;;  %v2467_v32 = vcvt.s32.f32 %v1443_v4  ;;  %v5753_v35 = vor.u32 %v5158_v12, %v5037_v58  ;;  %v5767_v12 = vld [vmem:[%s5509_s21 + $0x620] sm:$0xff] }
  0xbe   : > { %6963 = vst [vmem:[#allocation27_spill] sm:$0xff] %v5748_v20  ;;  %3525 = vmatmul.bf16.vlgmr.msra.gmra.mxu2 %v5727_v29  ;;  %3587 = vmatpush.bf16.msrb.mxu1 %v2927_v0  ;;  %v2891_v36 = vpack.c.bf16 %v2275_v17, %v2271_v59  ;;  %v5756_v24 = vor.u32 %v5150_v53, %v5039_v6  ;;  %v1311_v47 = vunpack.c.2.s8 %v399_v10  ;;  %v1315_v41 = vunpack.c.3.s8 %v399_v10  ;;  %v5770_v59 = vld [vmem:[%s5509_s21 + $0x7a0] sm:$0xff] }
  0xbf   : > { %6964 = vst [vmem:[#allocation28_spill] sm:$0xff] %v5750_v22  ;;  %3548 = vmatmul.bf16.vlgmr.msra.gmra.mxu3 %v5729_v30  ;;  %3611 = vmatpush.bf16.msrb.mxu2 %v2955_v16  ;;  %v2987_v45 = vpack.c.bf16 %v2467_v32, %v2463_v28  ;;  %v1367_v46 = vunpack.c.0.s8 %v5732_v13  ;;  %v1371_v31 = vunpack.c.1.s8 %v5732_v13  ;;  %v1239_v48 = vunpack.c.0.s8 %v5735_v11 }
  0xc0   : > { %6965 = vst [vmem:[#allocation29_spill] sm:$0xff] %v5753_v35  ;;  %3565 = vmatpush.bf16.msrb.mxu0 %v2891_v36  ;;  %v2335_v23 = vcvt.s32.f32 %v1311_v47  ;;  %v2339_v49 = vcvt.s32.f32 %v1315_v41  ;;  %v1243_v50 = vunpack.c.1.s8 %v5735_v11  ;;  %v1431_v25 = vunpack.c.0.s8 %v5739_v27 }
  0xc1   : > { %6966 = vst [vmem:[#allocation30_spill] sm:$0xff] %v5756_v24  ;;  %3634 = vmatpush.bf16.msrb.mxu3 %v2987_v45  ;;  %v2391_v54 = vcvt.s32.f32 %v1367_v46  ;;  %v2395_v55 = vcvt.s32.f32 %v1371_v31  ;;  %v2263_v56 = vcvt.s32.f32 %v1239_v48  ;;  %v1435_v58 = vunpack.c.1.s8 %v5739_v27  ;;  %v5774_v27 = vld [vmem:[%s5509_s21 + $0x6a0] sm:$0xff] }
  0xc2   : > { %v2923_v13 = vpack.c.bf16 %v2339_v49, %v2335_v23  ;;  %v2267_v0 = vcvt.s32.f32 %v1243_v50  ;;  %v2455_v38 = vcvt.s32.f32 %v1431_v25  ;;  %v1303_v1 = vunpack.c.0.s8 %v399_v10  ;;  %v5093_v23 = vld [vmem:[#allocation2 + $0x120] sm:$0xf] }
  0xc3   : > { %v2951_v4 = vpack.c.bf16 %v2395_v55, %v2391_v54  ;;  %v2459_v53 = vcvt.s32.f32 %v1435_v58  ;;  %v1307_v11 = vunpack.c.1.s8 %v399_v10  ;;  %v1359_v6 = vunpack.c.2.s8 %v411_v51  ;;  %v5173_v49 = vld [vmem:[#allocation2 + $0x15c] sm:$0xf0]  ;;  %v5095_v58 = vld [vmem:[#allocation2 + $0x160] sm:$0xf0] }
  0xc4   : > { %3588 = vmatpush.bf16.msrb.mxu1 %v2923_v13  ;;  %v2887_v17 = vpack.c.bf16 %v2267_v0, %v2263_v56  ;;  %v2327_v16 = vcvt.s32.f32 %v1303_v1  ;;  %v1363_v28 = vunpack.c.3.s8 %v411_v51  ;;  %v1231_v32 = vunpack.c.2.s8 %v5767_v12  ;;  %v5165_v56 = vld [vmem:[#allocation2 + $0x124] sm:$0xf]  ;;  %v5101_v13 = vld [vmem:[#allocation2 + $0x128] sm:$0xf] }
  0xc5   : > { %3612 = vmatpush.bf16.msrb.mxu2 %v2951_v4  ;;  %v2983_v36 = vpack.c.bf16 %v2459_v53, %v2455_v38  ;;  %v2331_v47 = vcvt.s32.f32 %v1307_v11  ;;  %v2383_v41 = vcvt.s32.f32 %v1359_v6  ;;  %v1235_v45 = vunpack.c.3.s8 %v5767_v12  ;;  %v5174_v53 = vld [vmem:[#allocation2 + $0x164] sm:$0xf0]  ;;  %v5166_v11 = vld [vmem:[#allocation2 + $0x12c] sm:$0xf] }
  0xc6   : > { %3566 = vmatpush.bf16.msrb.mxu0 %v2887_v17  ;;  %v2387_v46 = vcvt.s32.f32 %v1363_v28  ;;  %v2255_v10 = vcvt.s32.f32 %v1231_v32  ;;  %v1423_v31 = vunpack.c.2.s8 %v5770_v59  ;;  %v1427_v48 = vunpack.c.3.s8 %v5770_v59  ;;  %v5103_v6 = vld [vmem:[#allocation2 + $0x168] sm:$0xf0] }
  0xc7   : > { %3635 = vmatpush.bf16.msrb.mxu3 %v2983_v36  ;;  %v2919_v50 = vpack.c.bf16 %v2331_v47, %v2327_v16  ;;  %v2259_v25 = vcvt.s32.f32 %v1235_v45  ;;  %v1295_v54 = vunpack.c.2.s8 %v5774_v27  ;;  %v1299_v55 = vunpack.c.3.s8 %v5774_v27 }
  0xc8   : > { %v2947_v0 = vpack.c.bf16 %v2387_v46, %v2383_v41  ;;  %v2447_v38 = vcvt.s32.f32 %v1423_v31  ;;  %v2451_v1 = vcvt.s32.f32 %v1427_v48  ;;  %v1351_v4 = vunpack.c.0.s8 %v411_v51  ;;  %v5786_v41 = vld [vmem:[%s5509_s21 + $0x700] sm:$0xff] }
  0xc9   : > { %3589 = vmatpush.bf16.msrb.mxu1 %v2919_v50  ;;  %v2883_v17 = vpack.c.bf16 %v2259_v25, %v2255_v10  ;;  %v2319_v28 = vcvt.s32.f32 %v1295_v54  ;;  %v2323_v16 = vcvt.s32.f32 %v1299_v55  ;;  %v1355_v32 = vunpack.c.1.s8 %v411_v51 }
  0xca   : > { %3613 = vmatpush.bf16.msrb.mxu2 %v2947_v0  ;;  %v2979_v36 = vpack.c.bf16 %v2451_v1, %v2447_v38  ;;  %v2375_v47 = vcvt.s32.f32 %v1351_v4  ;;  %v5781_v45 = vor.u32 %v5173_v49, %v5093_v23  ;;  %v5783_v30 = vor.u32 %v5165_v56, %v5095_v58  ;;  %v375_v58 = vld [vmem:[%s5509_s21 + $0x600] sm:$0xff] }
  0xcb   : > { %3567 = vmatpush.bf16.msrb.mxu0 %v2883_v17  ;;  %v2915_v46 = vpack.c.bf16 %v2323_v16, %v2319_v28  ;;  %v2379_v31 = vcvt.s32.f32 %v1355_v32  ;;  %v5788_v48 = vor.u32 %v5174_v53, %v5101_v13  ;;  %v5790_v50 = vor.u32 %v5166_v11, %v5103_v6  ;;  %v423_v1 = vld [vmem:[%s5509_s21 + $0x780] sm:$0xff] }
  0xcc   : > { %6967 = vst [vmem:[#allocation31_spill] sm:$0xff] %v5781_v45  ;;  %3484 = vmatmul.bf16.gmra.mxu0 %v5748_v20  ;;  %3636 = vmatpush.bf16.msrb.mxu3 %v2979_v36  ;;  %v1223_v51 = vunpack.c.0.s8 %v5767_v12  ;;  %v1227_v10 = vunpack.c.1.s8 %v5767_v12  ;;  %v1415_v23 = vunpack.c.0.s8 %v5770_v59  ;;  %v1419_v49 = vunpack.c.1.s8 %v5770_v59  ;;  %v391_v11 = vld [vmem:[%s5509_s21 + $0x680] sm:$0xff] }
  0xcd   : > { %6968 = vst [vmem:[#allocation32_spill] sm:$0xff] %v5783_v30  ;;  %3507 = vmatmul.bf16.gmra.mxu1 %v5750_v22  ;;  %v2943_v25 = vpack.c.bf16 %v2379_v31, %v2375_v47  ;;  %v1287_v54 = vunpack.c.0.s8 %v5774_v27  ;;  %v1291_v55 = vunpack.c.1.s8 %v5774_v27  ;;  %v1343_v56 = vunpack.c.2.s8 %v5786_v41 }
  0xce   : > { %6969 = vst [vmem:[#allocation33_spill] sm:$0xff] %v5788_v48  ;;  %3530 = vmatmul.bf16.gmra.mxu2 %v5753_v35  ;;  %3590 = vmatpush.bf16.msrb.mxu1 %v2915_v46  ;;  %v2247_v13 = vcvt.s32.f32 %v1223_v51  ;;  %v2251_v12 = vcvt.s32.f32 %v1227_v10  ;;  %v2439_v0 = vcvt.s32.f32 %v1415_v23  ;;  %v2443_v38 = vcvt.s32.f32 %v1419_v49 }
  0xcf   : > { %6970 = vst [vmem:[#allocation34_spill] sm:$0xff] %v5790_v50  ;;  %3553 = vmatmul.bf16.gmra.mxu3 %v5756_v24  ;;  %3614 = vmatpush.bf16.msrb.mxu2 %v2943_v25  ;;  %v2311_v59 = vcvt.s32.f32 %v1287_v54  ;;  %v2315_v4 = vcvt.s32.f32 %v1291_v55  ;;  %v1347_v53 = vunpack.c.3.s8 %v5786_v41  ;;  %v2367_v27 = vcvt.s32.f32 %v1343_v56  ;;  %v5818_v24 = vld [vmem:[%s5509_s21 + $0x1e8] sm:$0xff] }
  0xd0   : > { %v2879_v6 = vpack.c.bf16 %v2251_v12, %v2247_v13  ;;  %v2975_v17 = vpack.c.bf16 %v2443_v38, %v2439_v0  ;;  %v1215_v28 = vunpack.c.2.s8 %v375_v58  ;;  %v1219_v16 = vunpack.c.3.s8 %v375_v58 }
  0xd1   : > { %v2911_v32 = vpack.c.bf16 %v2315_v4, %v2311_v59  ;;  %v2371_v36 = vcvt.s32.f32 %v1347_v53  ;;  %v1407_v47 = vunpack.c.2.s8 %v423_v1  ;;  %v1411_v46 = vunpack.c.3.s8 %v423_v1 }
  0xd2   : > { %3568 = vmatpush.bf16.msrb.mxu0 %v2879_v6  ;;  %3637 = vmatpush.bf16.msrb.mxu3 %v2975_v17  ;;  %v2239_v31 = vcvt.s32.f32 %v1215_v28  ;;  %v2243_v51 = vcvt.s32.f32 %v1219_v16  ;;  %v1279_v10 = vunpack.c.2.s8 %v391_v11  ;;  %v1283_v23 = vunpack.c.3.s8 %v391_v11  ;;  %v4981_v6 = vld [vmem:[#allocation2 + $0x30] sm:$0xf]  ;;  %v5135_v28 = vld [vmem:[#allocation2 + $0x34] sm:$0xf] }
  0xd3   : > { %3591 = vmatpush.bf16.msrb.mxu1 %v2911_v32  ;;  %v2939_v49 = vpack.c.bf16 %v2371_v36, %v2367_v27  ;;  %v2431_v25 = vcvt.s32.f32 %v1407_v47  ;;  %v2435_v54 = vcvt.s32.f32 %v1411_v46  ;;  %v1335_v55 = vunpack.c.0.s8 %v5786_v41  ;;  %v5143_v17 = vld [vmem:[#allocation2 + $0x6c] sm:$0xf0]  ;;  %v4983_v47 = vld [vmem:[#allocation2 + $0x70] sm:$0xf0]  ;;  %v4989_v46 = vld [vmem:[#allocation2 + $0x38] sm:$0xf] }
  0xd4   : > { %v2875_v56 = vpack.c.bf16 %v2243_v51, %v2239_v31  ;;  %v2303_v13 = vcvt.s32.f32 %v1279_v10  ;;  %v2307_v12 = vcvt.s32.f32 %v1283_v23  ;;  %v1339_v0 = vunpack.c.1.s8 %v5786_v41  ;;  %v5144_v31 = vld [vmem:[#allocation2 + $0x74] sm:$0xf0] }
  0xd5   : > { %3615 = vmatpush.bf16.msrb.mxu2 %v2939_v49  ;;  %v2971_v38 = vpack.c.bf16 %v2435_v54, %v2431_v25  ;;  %v2359_v59 = vcvt.s32.f32 %v1335_v55  ;;  %v1207_v4 = vunpack.c.0.s8 %v375_v58  ;;  %v1211_v53 = vunpack.c.1.s8 %v375_v58  ;;  %v5136_v58 = vld [vmem:[#allocation2 + $0x3c] sm:$0xf]  ;;  %v228_v25 = vld [vmem:[%s5509_s21 + $0x168] sm:$0xff] }
  0xd6   : > { %3569 = vmatpush.bf16.msrb.mxu0 %v2875_v56  ;;  %v2907_v27 = vpack.c.bf16 %v2307_v12, %v2303_v13  ;;  %v2363_v16 = vcvt.s32.f32 %v1339_v0  ;;  %v1399_v32 = vunpack.c.0.s8 %v423_v1  ;;  %v1403_v36 = vunpack.c.1.s8 %v423_v1  ;;  %v4991_v49 = vld [vmem:[#allocation2 + $0x78] sm:$0xf0]  ;;  %v5813_v1 = vld [vmem:[%s5509_s21 + $0x68] sm:$0xff] }
  0xd7   : > { %3638 = vmatpush.bf16.msrb.mxu3 %v2971_v38  ;;  %v2231_v41 = vcvt.s32.f32 %v1207_v4  ;;  %v2235_v51 = vcvt.s32.f32 %v1211_v53  ;;  %v1271_v10 = vunpack.c.0.s8 %v391_v11  ;;  %v1275_v23 = vunpack.c.1.s8 %v391_v11 }
  0xd8   : > { %3592 = vmatpush.bf16.msrb.mxu1 %v2907_v27  ;;  %v2935_v54 = vpack.c.bf16 %v2363_v16, %v2359_v59  ;;  %v2423_v55 = vcvt.s32.f32 %v1399_v32  ;;  %v2427_v56 = vcvt.s32.f32 %v1403_v36  ;;  %v5810_v13 = vor.u32 %v5143_v17, %v4981_v6  ;;  %v5825_v6 = vld [vmem:[%s5509_s21 + $0xe8] sm:$0xff] }
  0xd9   : > { %v3296_v12 = vpop.f32.mrf.mxu0  ;;  %v2871_v0 = vpack.c.bf16 %v2235_v51, %v2231_v41  ;;  %v2295_v38 = vcvt.s32.f32 %v1271_v10  ;;  %v2299_v4 = vcvt.s32.f32 %v1275_v23  ;;  %v5815_v53 = vor.u32 %v5135_v28, %v4983_v47 }
  0xda   : > { %v3319_v11 = vpop.f32.mrf.mxu1  ;;  %3616 = vmatpush.bf16.msrb.mxu2 %v2935_v54  ;;  %v2967_v35 = vpack.c.bf16 %v2427_v56, %v2423_v55  ;;  %v5820_v27 = vor.u32 %v5144_v31, %v4989_v46  ;;  %v5822_v59 = vor.u32 %v5136_v58, %v4991_v49  ;;  %v624_v16 = vunpack.c.2.s8 %v228_v25 }
  0xdb   : > { %6971 = vst [vmem:[#allocation35_spill] sm:$0xff] %v5815_v53  ;;  %v3320_v17 = vadd.f32 %v3319_v11, %v3296_v12  ;;  %3570 = vmatpush.bf16.msrb.mxu0 %v2871_v0  ;;  %v2903_v32 = vpack.c.bf16 %v2299_v4, %v2295_v38  ;;  %v628_v36 = vunpack.c.3.s8 %v228_v25  ;;  %v496_v41 = vunpack.c.2.s8 %v5813_v1 }
  0xdc   : > { %6972 = vst [vmem:[#allocation36_spill] sm:$0xff] %v5820_v27  ;;  %3489 = vmatmul.bf16.gmra.mxu0 %v5781_v45  ;;  %3639 = vmatpush.bf16.msrb.mxu3 %v2967_v35  ;;  %v1648_v28 = vcvt.s32.f32 %v624_v16  ;;  %v500_v47 = vunpack.c.3.s8 %v5813_v1  ;;  %v688_v46 = vunpack.c.2.s8 %v5818_v24  ;;  %v692_v31 = vunpack.c.3.s8 %v5818_v24 }
  0xdd   : > { %6973 = vst [vmem:[#allocation37_spill] sm:$0xff] %v5822_v59  ;;  %3512 = vmatmul.bf16.gmra.mxu1 %v5783_v30  ;;  %v1652_v51 = vcvt.s32.f32 %v628_v36  ;;  %v1520_v10 = vcvt.s32.f32 %v496_v41  ;;  %v560_v23 = vunpack.c.2.s8 %v5825_v6  ;;  %v564_v58 = vunpack.c.3.s8 %v5825_v6  ;;  %v208_v30 = vld [vmem:[%s5509_s21 + $0xc8] sm:$0xff] }
  0xde   : > { %3535 = vmatmul.bf16.gmra.mxu2 %v5788_v48  ;;  %3593 = vmatpush.bf16.msrb.mxu1 %v2903_v32  ;;  %v1524_v49 = vcvt.s32.f32 %v500_v47  ;;  %v1712_v35 = vcvt.s32.f32 %v688_v46  ;;  %v1716_v54 = vcvt.s32.f32 %v692_v31  ;;  %v616_v55 = vunpack.c.0.s8 %v228_v25 }
  0xdf   : > { %3558 = vmatmul.bf16.gmra.mxu3 %v5790_v50  ;;  %v2580_v56 = vpack.c.bf16 %v1652_v51, %v1648_v28  ;;  %v1584_v12 = vcvt.s32.f32 %v560_v23  ;;  %v1588_v0 = vcvt.s32.f32 %v564_v58  ;;  %v620_v38 = vunpack.c.1.s8 %v228_v25  ;;  %v5055_v50 = vld [vmem:[#allocation2 + $0xf8] sm:$0xf0] }
  0xe0   : > { %v2516_v4 = vpack.c.bf16 %v1524_v49, %v1520_v10  ;;  %v2612_v11 = vpack.c.bf16 %v1716_v54, %v1712_v35  ;;  %v1640_v16 = vcvt.s32.f32 %v616_v55  ;;  %v488_v36 = vunpack.c.0.s8 %v5813_v1  ;;  %v5843_v49 = vld [vmem:[%s5509_s21 + $0x148] sm:$0xff] }
  0xe1   : > { %v3342_v41 = vpop.f32.mrf.mxu2  ;;  %v3298_v48 = vpop.f32.mrf.mxu0  ;;  %3701 = vmatpush.bf16.msra.mxu2 %v2580_v56  ;;  %v2548_v32 = vpack.c.bf16 %v1588_v0, %v1584_v12  ;;  %v1644_v47 = vcvt.s32.f32 %v620_v38  ;;  %v492_v46 = vunpack.c.1.s8 %v5813_v1  ;;  %v680_v31 = vunpack.c.0.s8 %v5818_v24  ;;  %v5846_v35 = vld [vmem:[%s5509_s21 + $0x48] sm:$0xff] }
  0xe2   : > { %v3343_v28 = vadd.f32 %v3342_v41, %v3320_v17  ;;  %v3365_v51 = vpop.f32.mrf.mxu3  ;;  %v3321_v25 = vpop.f32.mrf.mxu1  ;;  %3655 = vmatpush.bf16.msra.mxu0 %v2516_v4  ;;  %3724 = vmatpush.bf16.msra.mxu3 %v2612_v11  ;;  %v1512_v10 = vcvt.s32.f32 %v488_v36  ;;  %v684_v23 = vunpack.c.1.s8 %v5818_v24  ;;  %v552_v58 = vunpack.c.0.s8 %v5825_v6  ;;  %v5849_v12 = vld [vmem:[%s5509_s21 + $0x1c8] sm:$0xff]  ;;  %v5045_v41 = vld [vmem:[#allocation2 + $0xb0] sm:$0xf] }
  0xe3   : > { %v3322_v54 = vadd.f32 %v3321_v25, %v3298_v48  ;;  %3678 = vmatpush.bf16.msra.mxu1 %v2548_v32  ;;  %v2576_v1 = vpack.c.bf16 %v1644_v47, %v1640_v16  ;;  %v1516_v55 = vcvt.s32.f32 %v492_v46  ;;  %v1704_v56 = vcvt.s32.f32 %v680_v31  ;;  %v5159_v16 = vld [vmem:[#allocation2 + $0xec] sm:$0xf0]  ;;  %v5151_v32 = vld [vmem:[#allocation2 + $0xb4] sm:$0xf]  ;;  %v5160_v25 = vld [vmem:[#allocation2 + $0xf4] sm:$0xf0] }
  0xe4   : > { %v5851_v17 = vadd.f32 %v3365_v51, %v3343_v28  ;;  %v1708_v0 = vcvt.s32.f32 %v684_v23  ;;  %v556_v38 = vunpack.c.1.s8 %v5825_v6  ;;  %v1576_v4 = vcvt.s32.f32 %v552_v58  ;;  %v5047_v6 = vld [vmem:[#allocation2 + $0xf0] sm:$0xf0]  ;;  %v5053_v51 = vld [vmem:[#allocation2 + $0xb8] sm:$0xf] }
  0xe5   : > { %3702 = vmatpush.bf16.msra.mxu2 %v2576_v1  ;;  %v2512_v24 = vpack.c.bf16 %v1516_v55, %v1512_v10  ;;  %v608_v11 = vunpack.c.2.s8 %v5843_v49  ;;  %v612_v36 = vunpack.c.3.s8 %v5843_v49  ;;  %v480_v48 = vunpack.c.2.s8 %v5846_v35  ;;  %v5152_v55 = vld [vmem:[#allocation2 + $0xbc] sm:$0xf] }
  0xe6   : > { %v2608_v47 = vpack.c.bf16 %v1708_v0, %v1704_v56  ;;  %v1580_v46 = vcvt.s32.f32 %v556_v38  ;;  %v484_v31 = vunpack.c.3.s8 %v5846_v35  ;;  %v672_v28 = vunpack.c.2.s8 %v5849_v12 }
  0xe7   : > { %3656 = vmatpush.bf16.msra.mxu0 %v2512_v24  ;;  %v1632_v10 = vcvt.s32.f32 %v608_v11  ;;  %v1636_v23 = vcvt.s32.f32 %v612_v36  ;;  %v1504_v58 = vcvt.s32.f32 %v480_v48  ;;  %v676_v1 = vunpack.c.3.s8 %v5849_v12 }
  0xe8   : > { %3725 = vmatpush.bf16.msra.mxu3 %v2608_v47  ;;  %v2544_v45 = vpack.c.bf16 %v1580_v46, %v1576_v4  ;;  %v1508_v56 = vcvt.s32.f32 %v484_v31  ;;  %v1696_v0 = vcvt.s32.f32 %v672_v28  ;;  %v5861_v38 = vor.u32 %v5159_v16, %v5045_v41 }
  0xe9   : > { %v3344_v22 = vpop.f32.mrf.mxu2  ;;  %v3301_v20 = vpop.f32.mrf.mxu0  ;;  %v2572_v29 = vpack.c.bf16 %v1636_v23, %v1632_v10  ;;  %v1700_v44 = vcvt.s32.f32 %v676_v1  ;;  %v5863_v18 = vor.u32 %v5151_v32, %v5047_v6  ;;  %v5865_v24 = vor.u32 %v5160_v25, %v5053_v51  ;;  %v5884_v25 = vld [vmem:[%s5509_s21 + $0x28] sm:$0xff] }
  0xea   : > { %6974 = vst [vmem:[#allocation38_spill] sm:$0xff] %v5861_v38  ;;  %v3345_v11 = vadd.f32 %v3344_v22, %v3322_v54  ;;  %v3367_v36 = vpop.f32.mrf.mxu3  ;;  %v3324_v48 = vpop.f32.mrf.mxu1  ;;  %3679 = vmatpush.bf16.msra.mxu1 %v2544_v45  ;;  %v2508_v39 = vpack.c.bf16 %v1508_v56, %v1504_v58  ;;  %v5867_v42 = vor.u32 %v5152_v55, %v5055_v50  ;;  %v544_v4 = vunpack.c.2.s8 %v208_v30  ;;  %v5879_v54 = vld [vmem:[%s5509_s21 + $0x128] sm:$0xff] }
  0xeb   : > { %6975 = vst [vmem:[#allocation39_spill] sm:$0xff] %v5863_v18  ;;  %v3325_v47 = vadd.f32 %v3324_v48, %v3301_v20  ;;  %3703 = vmatpush.bf16.msra.mxu2 %v2572_v29  ;;  %v2604_v41 = vpack.c.bf16 %v1700_v44, %v1696_v0  ;;  %v548_v16 = vunpack.c.3.s8 %v208_v30  ;;  %v600_v46 = vunpack.c.0.s8 %v5843_v49 }
  0xec   : > { %6976 = vst [vmem:[#allocation40_spill] sm:$0xff] %v5865_v24  ;;  %v5870_v31 = vadd.f32 %v3367_v36, %v3345_v11  ;;  %3571 = vmatmul.bf16.vlgmr.msrb.gmra.mxu0 %v5810_v13  ;;  %v1568_v32 = vcvt.s32.f32 %v544_v4  ;;  %v604_v22 = vunpack.c.1.s8 %v5843_v49  ;;  %v472_v45 = vunpack.c.0.s8 %v5846_v35 }
  0xed   : > { %6977 = vst [vmem:[#allocation41_spill] sm:$0xff] %v5867_v42  ;;  %3594 = vmatmul.bf16.vlgmr.msrb.gmra.mxu1 %v5815_v53  ;;  %3657 = vmatpush.bf16.msra.mxu0 %v2508_v39  ;;  %v1572_v20 = vcvt.s32.f32 %v548_v16  ;;  %v1624_v50 = vcvt.s32.f32 %v600_v46  ;;  %v476_v44 = vunpack.c.1.s8 %v5846_v35  ;;  %v664_v29 = vunpack.c.0.s8 %v5849_v12 }
  0xee   : > { %3617 = vmatmul.bf16.vlgmr.msrb.gmra.mxu2 %v5820_v27  ;;  %3726 = vmatpush.bf16.msra.mxu3 %v2604_v41  ;;  %v1628_v28 = vcvt.s32.f32 %v604_v22  ;;  %v1496_v6 = vcvt.s32.f32 %v472_v45  ;;  %v668_v49 = vunpack.c.1.s8 %v5849_v12  ;;  %v536_v51 = vunpack.c.0.s8 %v208_v30  ;;  %v5891_v41 = vld [vmem:[%s5509_s21 + $0x1a8] sm:$0xff] }
  0xef   : > { %3640 = vmatmul.bf16.vlgmr.msrb.gmra.mxu3 %v5822_v59  ;;  %v2540_v39 = vpack.c.bf16 %v1572_v20, %v1568_v32  ;;  %v1500_v10 = vcvt.s32.f32 %v476_v44  ;;  %v1688_v35 = vcvt.s32.f32 %v664_v29  ;;  %v540_v23 = vunpack.c.1.s8 %v208_v30  ;;  %v5895_v20 = vld [vmem:[%s5509_s21 + $0xa8] sm:$0xff] }
  0xf0   : > { %v2568_v58 = vpack.c.bf16 %v1628_v28, %v1624_v50  ;;  %v1692_v1 = vcvt.s32.f32 %v668_v49  ;;  %v1560_v55 = vcvt.s32.f32 %v536_v51  ;;  %v592_v56 = vunpack.c.2.s8 %v5879_v54 }
  0xf1   : > { %v3347_v0 = vpop.f32.mrf.mxu2  ;;  %v3303_v11 = vpop.f32.mrf.mxu0  ;;  %3680 = vmatpush.bf16.msra.mxu1 %v2540_v39  ;;  %v2504_v12 = vpack.c.bf16 %v1500_v10, %v1496_v6  ;;  %v1564_v36 = vcvt.s32.f32 %v540_v23  ;;  %v596_v48 = vunpack.c.3.s8 %v5879_v54  ;;  %v464_v4 = vunpack.c.2.s8 %v5884_v25  ;;  %v5109_v39 = vld [vmem:[#allocation2 + $0x130] sm:$0xf] }
  0xf2   : > { %v3348_v16 = vadd.f32 %v3347_v0, %v3325_v47  ;;  %v3370_v46 = vpop.f32.mrf.mxu3  ;;  %v3326_v30 = vpop.f32.mrf.mxu1  ;;  %3704 = vmatpush.bf16.msra.mxu2 %v2568_v58  ;;  %v2600_v32 = vpack.c.bf16 %v1692_v1, %v1688_v35  ;;  %v1616_v22 = vcvt.s32.f32 %v592_v56  ;;  %v468_v45 = vunpack.c.3.s8 %v5884_v25  ;;  %v5175_v10 = vld [vmem:[#allocation2 + $0x16c] sm:$0xf0]  ;;  %v5167_v35 = vld [vmem:[#allocation2 + $0x134] sm:$0xf]  ;;  %v5117_v0 = vld [vmem:[#allocation2 + $0x138] sm:$0xf] }
  0xf3   : > { %v3327_v50 = vadd.f32 %v3326_v30, %v3303_v11  ;;  %3658 = vmatpush.bf16.msra.mxu0 %v2504_v12  ;;  %v2536_v44 = vpack.c.bf16 %v1564_v36, %v1560_v55  ;;  %v1620_v29 = vcvt.s32.f32 %v596_v48  ;;  %v1488_v28 = vcvt.s32.f32 %v464_v4  ;;  %v5111_v56 = vld [vmem:[#allocation2 + $0x170] sm:$0xf0]  ;;  %v5176_v11 = vld [vmem:[#allocation2 + $0x174] sm:$0xf0] }
  0xf4   : > { %v5897_v6 = vadd.f32 %v3370_v46, %v3348_v16  ;;  %3727 = vmatpush.bf16.msra.mxu3 %v2600_v32  ;;  %v1492_v49 = vcvt.s32.f32 %v468_v45  ;;  %v656_v47 = vunpack.c.2.s8 %v5891_v41  ;;  %v660_v51 = vunpack.c.3.s8 %v5891_v41  ;;  %v5168_v16 = vld [vmem:[#allocation2 + $0x13c] sm:$0xf] }
  0xf5   : > { %3681 = vmatpush.bf16.msra.mxu1 %v2536_v44  ;;  %v2564_v23 = vpack.c.bf16 %v1620_v29, %v1616_v22  ;;  %v528_v58 = vunpack.c.2.s8 %v5895_v20  ;;  %v532_v1 = vunpack.c.3.s8 %v5895_v20  ;;  %v584_v55 = vunpack.c.0.s8 %v5879_v54  ;;  %v5119_v46 = vld [vmem:[#allocation2 + $0x178] sm:$0xf0] }
  0xf6   : > { %v2500_v12 = vpack.c.bf16 %v1492_v49, %v1488_v28  ;;  %v1680_v36 = vcvt.s32.f32 %v656_v47  ;;  %v1684_v48 = vcvt.s32.f32 %v660_v51  ;;  %v588_v4 = vunpack.c.1.s8 %v5879_v54 }
  0xf7   : > { %3705 = vmatpush.bf16.msra.mxu2 %v2564_v23  ;;  %v1552_v30 = vcvt.s32.f32 %v528_v58  ;;  %v1556_v32 = vcvt.s32.f32 %v532_v1  ;;  %v1608_v22 = vcvt.s32.f32 %v584_v55  ;;  %v5905_v45 = vor.u32 %v5175_v10, %v5109_v39 }
  0xf8   : > { %3659 = vmatpush.bf16.msra.mxu0 %v2500_v12  ;;  %v2596_v44 = vpack.c.bf16 %v1684_v48, %v1680_v36  ;;  %v1612_v29 = vcvt.s32.f32 %v588_v4  ;;  %v5907_v59 = vor.u32 %v5167_v35, %v5111_v56  ;;  %v5909_v27 = vor.u32 %v5176_v11, %v5117_v0  ;;  %v216_v56 = vld [vmem:[%s5509_s21 + $0x108] sm:$0xff] }
  0xf9   : > { %v3349_v28 = vpop.f32.mrf.mxu2  ;;  %v3306_v49 = vpop.f32.mrf.mxu0  ;;  %v2532_v47 = vpack.c.bf16 %v1556_v32, %v1552_v30  ;;  %v5911_v54 = vor.u32 %v5168_v16, %v5119_v46  ;;  %v456_v51 = vunpack.c.0.s8 %v5884_v25  ;;  %v460_v23 = vunpack.c.1.s8 %v5884_v25  ;;  %v184_v48 = vld [vmem:[%s5509_s21 + $0x8] sm:$0xff] }
  0xfa   : > { %v3350_v39 = vadd.f32 %v3349_v28, %v3327_v50  ;;  %v3372_v10 = vpop.f32.mrf.mxu3  ;;  %v3329_v58 = vpop.f32.mrf.mxu1  ;;  %3728 = vmatpush.bf16.msra.mxu3 %v2596_v44  ;;  %v2560_v1 = vpack.c.bf16 %v1612_v29, %v1608_v22  ;;  %v648_v35 = vunpack.c.0.s8 %v5891_v41  ;;  %v652_v55 = vunpack.c.1.s8 %v5891_v41  ;;  %v232_v46 = vld [vmem:[%s5509_s21 + $0x188] sm:$0xff] }
  0xfb   : > { %v3330_v0 = vadd.f32 %v3329_v58, %v3306_v49  ;;  %3682 = vmatpush.bf16.msra.mxu1 %v2532_v47  ;;  %v1480_v11 = vcvt.s32.f32 %v456_v51  ;;  %v1484_v12 = vcvt.s32.f32 %v460_v23  ;;  %v520_v36 = vunpack.c.0.s8 %v5895_v20  ;;  %v200_v44 = vld [vmem:[%s5509_s21 + $0x88] sm:$0xff] }
  0xfc   : > { %v5920_v25 = vadd.f32 %v3372_v10, %v3350_v39  ;;  %3576 = vmatmul.bf16.gmra.mxu0 %v5861_v38  ;;  %3706 = vmatpush.bf16.msra.mxu2 %v2560_v1  ;;  %v1672_v50 = vcvt.s32.f32 %v648_v35  ;;  %v1676_v4 = vcvt.s32.f32 %v652_v55  ;;  %v524_v16 = vunpack.c.1.s8 %v5895_v20 }
  0xfd   : > { %3599 = vmatmul.bf16.gmra.mxu1 %v5863_v18  ;;  %v2496_v41 = vpack.c.bf16 %v1484_v12, %v1480_v11  ;;  %v1544_v30 = vcvt.s32.f32 %v520_v36  ;;  %v576_v32 = vunpack.c.2.s8 %v216_v56  ;;  %v580_v22 = vunpack.c.3.s8 %v216_v56 }
  0xfe   : > { %3622 = vmatmul.bf16.gmra.mxu2 %v5865_v24  ;;  %v2592_v29 = vpack.c.bf16 %v1676_v4, %v1672_v50  ;;  %v1548_v28 = vcvt.s32.f32 %v524_v16  ;;  %v448_v49 = vunpack.c.2.s8 %v184_v48  ;;  %v452_v47 = vunpack.c.3.s8 %v184_v48 }
  0xff   : > { %3645 = vmatmul.bf16.gmra.mxu3 %v5867_v42  ;;  %3660 = vmatpush.bf16.msra.mxu0 %v2496_v41  ;;  %v1600_v51 = vcvt.s32.f32 %v576_v32  ;;  %v1604_v23 = vcvt.s32.f32 %v580_v22  ;;  %v640_v20 = vunpack.c.2.s8 %v232_v46  ;;  %v644_v39 = vunpack.c.3.s8 %v232_v46 }
 0x100   : > { %3729 = vmatpush.bf16.msra.mxu3 %v2592_v29  ;;  %v2528_v10 = vpack.c.bf16 %v1548_v28, %v1544_v30  ;;  %v1472_v58 = vcvt.s32.f32 %v448_v49  ;;  %v1476_v1 = vcvt.s32.f32 %v452_v47  ;;  %v512_v35 = vunpack.c.2.s8 %v200_v44 }
 0x101   : > { %v3352_v55 = vpop.f32.mrf.mxu2  ;;  %v3308_v11 = vpop.f32.mrf.mxu0  ;;  %v2556_v12 = vpack.c.bf16 %v1604_v23, %v1600_v51  ;;  %v1664_v36 = vcvt.s32.f32 %v640_v20  ;;  %v1668_v50 = vcvt.s32.f32 %v644_v39  ;;  %v516_v4 = vunpack.c.3.s8 %v200_v44 }
 0x102   : > { %v3353_v16 = vadd.f32 %v3352_v55, %v3330_v0  ;;  %v3375_v24 = vpop.f32.mrf.mxu3  ;;  %v3331_v42 = vpop.f32.mrf.mxu1  ;;  %3683 = vmatpush.bf16.msra.mxu1 %v2528_v10  ;;  %v2492_v41 = vpack.c.bf16 %v1476_v1, %v1472_v58  ;;  %v1536_v32 = vcvt.s32.f32 %v512_v35  ;;  %v568_v22 = vunpack.c.0.s8 %v216_v56  ;;  %v292_v0 = vld [vmem:[%s5509_s21 + $0x368] sm:$0xff] }
 0x103   : > { %3707 = vmatpush.bf16.msra.mxu2 %v2556_v12  ;;  %v2588_v30 = vpack.c.bf16 %v1668_v50, %v1664_v36  ;;  %v1540_v29 = vcvt.s32.f32 %v516_v4  ;;  %v572_v28 = vunpack.c.1.s8 %v216_v56  ;;  %v440_v49 = vunpack.c.0.s8 %v184_v48  ;;  %v260_v1 = vld [vmem:[%s5509_s21 + $0x268] sm:$0xff] }
 0x104   : > { %v5929_v47 = vadd.f32 %v3375_v24, %v3353_v16  ;;  %3661 = vmatpush.bf16.msra.mxu0 %v2492_v41  ;;  %v1592_v51 = vcvt.s32.f32 %v568_v22  ;;  %v444_v23 = vunpack.c.1.s8 %v184_v48  ;;  %v632_v20 = vunpack.c.0.s8 %v232_v46  ;;  %v308_v48 = vld [vmem:[%s5509_s21 + $0x3e8] sm:$0xff] }
 0x105   : > { %3730 = vmatpush.bf16.msra.mxu3 %v2588_v30  ;;  %v2524_v42 = vpack.c.bf16 %v1540_v29, %v1536_v32  ;;  %v1596_v39 = vcvt.s32.f32 %v572_v28  ;;  %v1464_v10 = vcvt.s32.f32 %v440_v49  ;;  %v636_v58 = vunpack.c.1.s8 %v232_v46  ;;  %v5935_v32 = vld [vmem:[%s5509_s21 + $0x2e8] sm:$0xff] }
 0x106   : > { %v1468_v35 = vcvt.s32.f32 %v444_v23  ;;  %v1656_v55 = vcvt.s32.f32 %v632_v20  ;;  %v504_v11 = vunpack.c.0.s8 %v200_v44  ;;  %v508_v56 = vunpack.c.1.s8 %v200_v44 }
 0x107   : > { %3684 = vmatpush.bf16.msra.mxu1 %v2524_v42  ;;  %v2552_v24 = vpack.c.bf16 %v1596_v39, %v1592_v51  ;;  %v1660_v12 = vcvt.s32.f32 %v636_v58  ;;  %v880_v36 = vunpack.c.2.s8 %v292_v0  ;;  %v884_v50 = vunpack.c.3.s8 %v292_v0 }
 0x108   : > { %v2488_v4 = vpack.c.bf16 %v1468_v35, %v1464_v10  ;;  %v1528_v16 = vcvt.s32.f32 %v504_v11  ;;  %v1532_v41 = vcvt.s32.f32 %v508_v56  ;;  %v752_v22 = vunpack.c.2.s8 %v260_v1 }
 0x109   : > { %v3354_v30 = vpop.f32.mrf.mxu2  ;;  %v3388_v46 = vpop.f32.mrf.mxu0  ;;  %3708 = vmatpush.bf16.msra.mxu2 %v2552_v24  ;;  %v2584_v29 = vpack.c.bf16 %v1660_v12, %v1656_v55  ;;  %v1904_v28 = vcvt.s32.f32 %v880_v36  ;;  %v1908_v49 = vcvt.s32.f32 %v884_v50  ;;  %v756_v23 = vunpack.c.3.s8 %v260_v1 }
 0x10a   : > { %v3377_v44 = vpop.f32.mrf.mxu3  ;;  %v3389_v51 = vadd.f32 %v3388_v46, %v5851_v17  ;;  %v3411_v20 = vpop.f32.mrf.mxu1  ;;  %3662 = vmatpush.bf16.msra.mxu0 %v2488_v4  ;;  %v2520_v42 = vpack.c.bf16 %v1532_v41, %v1528_v16  ;;  %v1776_v39 = vcvt.s32.f32 %v752_v22  ;;  %v944_v10 = vunpack.c.2.s8 %v308_v48 }
 0x10b   : > { %3731 = vmatpush.bf16.msra.mxu3 %v2584_v29  ;;  %v2708_v58 = vpack.c.bf16 %v1908_v49, %v1904_v28  ;;  %v1780_v35 = vcvt.s32.f32 %v756_v23  ;;  %v948_v11 = vunpack.c.3.s8 %v308_v48  ;;  %v816_v56 = vunpack.c.2.s8 %v5935_v32 }
 0x10c   : > { %v3412_v30 = vadd.f32 %v3411_v20, %v3389_v51  ;;  %3581 = vmatmul.bf16.gmra.mxu0 %v5905_v45  ;;  %3685 = vmatpush.bf16.msra.mxu1 %v2520_v42  ;;  %v1968_v55 = vcvt.s32.f32 %v944_v10  ;;  %v820_v24 = vunpack.c.3.s8 %v5935_v32  ;;  %v872_v12 = vunpack.c.0.s8 %v292_v0  ;;  %v288_v42 = vld [vmem:[%s5509_s21 + $0x348] sm:$0xff] }
 0x10d   : > { %3604 = vmatmul.bf16.gmra.mxu1 %v5907_v59  ;;  %3793 = vmatpush.bf16.msrb.mxu2 %v2708_v58  ;;  %v2644_v17 = vpack.c.bf16 %v1780_v35, %v1776_v39  ;;  %v1972_v36 = vcvt.s32.f32 %v948_v11  ;;  %v1840_v50 = vcvt.s32.f32 %v816_v56  ;;  %v876_v4 = vunpack.c.1.s8 %v292_v0  ;;  %v256_v56 = vld [vmem:[%s5509_s21 + $0x248] sm:$0xff] }
 0x10e   : > { %3627 = vmatmul.bf16.gmra.mxu2 %v5909_v27  ;;  %v1844_v16 = vcvt.s32.f32 %v820_v24  ;;  %v1896_v41 = vcvt.s32.f32 %v872_v12  ;;  %v744_v22 = vunpack.c.0.s8 %v260_v1  ;;  %v748_v46 = vunpack.c.1.s8 %v260_v1 }
 0x10f   : > { %3650 = vmatmul.bf16.gmra.mxu3 %v5911_v54  ;;  %3747 = vmatpush.bf16.msrb.mxu0 %v2644_v17  ;;  %v2740_v29 = vpack.c.bf16 %v1972_v36, %v1968_v55  ;;  %v1900_v28 = vcvt.s32.f32 %v876_v4  ;;  %v936_v49 = vunpack.c.0.s8 %v308_v48  ;;  %v940_v23 = vunpack.c.1.s8 %v308_v48 }
 0x110   : > { %v2676_v44 = vpack.c.bf16 %v1844_v16, %v1840_v50  ;;  %v1768_v51 = vcvt.s32.f32 %v744_v22  ;;  %v1772_v20 = vcvt.s32.f32 %v748_v46  ;;  %v808_v0 = vunpack.c.0.s8 %v5935_v32  ;;  %v5950_v50 = vld [vmem:[%s5509_s21 + $0x3c8] sm:$0xff] }
 0x111   : > { %v3434_v39 = vpop.f32.mrf.mxu2  ;;  %v3390_v10 = vpop.f32.mrf.mxu0  ;;  %3816 = vmatpush.bf16.msrb.mxu3 %v2740_v29  ;;  %v2704_v58 = vpack.c.bf16 %v1900_v28, %v1896_v41  ;;  %v1960_v1 = vcvt.s32.f32 %v936_v49  ;;  %v1964_v35 = vcvt.s32.f32 %v940_v23  ;;  %v812_v11 = vunpack.c.1.s8 %v5935_v32  ;;  %v5953_v46 = vld [vmem:[%s5509_s21 + $0x2c8] sm:$0xff] }
 0x112   : > { %v3435_v55 = vadd.f32 %v3434_v39, %v3412_v30  ;;  %v3457_v24 = vpop.f32.mrf.mxu3  ;;  %v3391_v48 = vadd.f32 %v3390_v10, %v5870_v31  ;;  %v3413_v12 = vpop.f32.mrf.mxu1  ;;  %3770 = vmatpush.bf16.msrb.mxu1 %v2676_v44  ;;  %v2640_v17 = vpack.c.bf16 %v1772_v20, %v1768_v51  ;;  %v1832_v36 = vcvt.s32.f32 %v808_v0 }
 0x113   : > { %3794 = vmatpush.bf16.msrb.mxu2 %v2704_v58  ;;  %v2736_v4 = vpack.c.bf16 %v1964_v35, %v1960_v1  ;;  %v1836_v16 = vcvt.s32.f32 %v812_v11  ;;  %v864_v41 = vunpack.c.2.s8 %v288_v42  ;;  %v868_v22 = vunpack.c.3.s8 %v288_v42 }
 0x114   : > { %v5955_v29 = vadd.f32 %v3457_v24, %v3435_v55  ;;  %v3414_v32 = vadd.f32 %v3413_v12, %v3391_v48  ;;  %3748 = vmatpush.bf16.msrb.mxu0 %v2640_v17  ;;  %v736_v30 = vunpack.c.2.s8 %v256_v56  ;;  %v740_v28 = vunpack.c.3.s8 %v256_v56 }
 0x115   : > { %3817 = vmatpush.bf16.msrb.mxu3 %v2736_v4  ;;  %v2672_v31 = vpack.c.bf16 %v1836_v16, %v1832_v36  ;;  %v1888_v49 = vcvt.s32.f32 %v864_v41  ;;  %v1892_v23 = vcvt.s32.f32 %v868_v22  ;;  %v928_v44 = vunpack.c.2.s8 %v5950_v50 }
 0x116   : > { %v1760_v51 = vcvt.s32.f32 %v736_v30  ;;  %v1764_v20 = vcvt.s32.f32 %v740_v28  ;;  %v932_v0 = vunpack.c.3.s8 %v5950_v50  ;;  %v800_v39 = vunpack.c.2.s8 %v5953_v46 }
 0x117   : > { %3771 = vmatpush.bf16.msrb.mxu1 %v2672_v31  ;;  %v2700_v10 = vpack.c.bf16 %v1892_v23, %v1888_v49  ;;  %v1952_v58 = vcvt.s32.f32 %v928_v44  ;;  %v804_v1 = vunpack.c.3.s8 %v5953_v46  ;;  %v856_v35 = vunpack.c.0.s8 %v288_v42 }
 0x118   : > { %v2636_v11 = vpack.c.bf16 %v1764_v20, %v1760_v51  ;;  %v1956_v55 = vcvt.s32.f32 %v932_v0  ;;  %v1824_v24 = vcvt.s32.f32 %v800_v39  ;;  %v860_v48 = vunpack.c.1.s8 %v288_v42  ;;  %v284_v0 = vld [vmem:[%s5509_s21 + $0x328] sm:$0xff] }
 0x119   : > { %v3436_v12 = vpop.f32.mrf.mxu2  ;;  %v3393_v17 = vpop.f32.mrf.mxu0  ;;  %3795 = vmatpush.bf16.msrb.mxu2 %v2700_v10  ;;  %v1828_v36 = vcvt.s32.f32 %v804_v1  ;;  %v1880_v4 = vcvt.s32.f32 %v856_v35  ;;  %v728_v16 = vunpack.c.0.s8 %v256_v56  ;;  %v732_v41 = vunpack.c.1.s8 %v256_v56  ;;  %v5965_v39 = vld [vmem:[%s5509_s21 + $0x228] sm:$0xff] }
 0x11a   : > { %v3437_v22 = vadd.f32 %v3436_v12, %v3414_v32  ;;  %v3459_v30 = vpop.f32.mrf.mxu3  ;;  %v3394_v28 = vadd.f32 %v3393_v17, %v5897_v6  ;;  %v3416_v31 = vpop.f32.mrf.mxu1  ;;  %3749 = vmatpush.bf16.msrb.mxu0 %v2636_v11  ;;  %v2732_v49 = vpack.c.bf16 %v1956_v55, %v1952_v58  ;;  %v1884_v23 = vcvt.s32.f32 %v860_v48  ;;  %v5972_v1 = vld [vmem:[%s5509_s21 + $0x3a8] sm:$0xff] }
 0x11b   : > { %v2668_v44 = vpack.c.bf16 %v1828_v36, %v1824_v24  ;;  %v1752_v42 = vcvt.s32.f32 %v728_v16  ;;  %v1756_v51 = vcvt.s32.f32 %v732_v41  ;;  %v920_v20 = vunpack.c.0.s8 %v5950_v50  ;;  %v268_v41 = vld [vmem:[%s5509_s21 + $0x2a8] sm:$0xff] }
 0x11c   : > { %v5967_v10 = vadd.f32 %v3459_v30, %v3437_v22  ;;  %v3417_v56 = vadd.f32 %v3416_v31, %v3394_v28  ;;  %3663 = vmatmul.bf16.vlgmr.msra.gmra.mxu0 %v5532_v52  ;;  %3818 = vmatpush.bf16.msrb.mxu3 %v2732_v49  ;;  %v2696_v6 = vpack.c.bf16 %v1884_v23, %v1880_v4  ;;  %v924_v32 = vunpack.c.1.s8 %v5950_v50 }
 0x11d   : > { %3686 = vmatmul.bf16.vlgmr.msra.gmra.mxu1 %v5535_v57  ;;  %v2632_v58 = vpack.c.bf16 %v1756_v51, %v1752_v42  ;;  %v1944_v35 = vcvt.s32.f32 %v920_v20  ;;  %v792_v11 = vunpack.c.0.s8 %v5953_v46  ;;  %v796_v55 = vunpack.c.1.s8 %v5953_v46 }
 0x11e   : > { %3709 = vmatmul.bf16.vlgmr.msra.gmra.mxu2 %v5539_v61  ;;  %3772 = vmatpush.bf16.msrb.mxu1 %v2668_v44  ;;  %v1948_v24 = vcvt.s32.f32 %v924_v32  ;;  %v848_v48 = vunpack.c.2.s8 %v284_v0  ;;  %v852_v12 = vunpack.c.3.s8 %v284_v0  ;;  %v720_v17 = vunpack.c.2.s8 %v5965_v39 }
 0x11f   : > { %3732 = vmatmul.bf16.vlgmr.msra.gmra.mxu3 %v5541_v62  ;;  %3796 = vmatpush.bf16.msrb.mxu2 %v2696_v6  ;;  %v1816_v50 = vcvt.s32.f32 %v792_v11  ;;  %v1820_v36 = vcvt.s32.f32 %v796_v55  ;;  %v724_v4 = vunpack.c.3.s8 %v5965_v39  ;;  %v912_v16 = vunpack.c.2.s8 %v5972_v1 }
 0x120   : > { %3750 = vmatpush.bf16.msrb.mxu0 %v2632_v58  ;;  %v2728_v46 = vpack.c.bf16 %v1948_v24, %v1944_v35  ;;  %v1872_v22 = vcvt.s32.f32 %v848_v48  ;;  %v1876_v30 = vcvt.s32.f32 %v852_v12  ;;  %v1744_v28 = vcvt.s32.f32 %v720_v17 }
 0x121   : > { %v3439_v31 = vpop.f32.mrf.mxu2  ;;  %v3395_v49 = vpop.f32.mrf.mxu0  ;;  %v2664_v23 = vpack.c.bf16 %v1820_v36, %v1816_v50  ;;  %v1748_v44 = vcvt.s32.f32 %v724_v4  ;;  %v916_v42 = vunpack.c.3.s8 %v5972_v1  ;;  %v1936_v51 = vcvt.s32.f32 %v912_v16 }
 0x122   : > { %v3440_v20 = vadd.f32 %v3439_v31, %v3417_v56  ;;  %v3462_v6 = vpop.f32.mrf.mxu3  ;;  %v3396_v32 = vadd.f32 %v3395_v49, %v5920_v25  ;;  %v3418_v11 = vpop.f32.mrf.mxu1  ;;  %3819 = vmatpush.bf16.msrb.mxu3 %v2728_v46  ;;  %v2692_v55 = vpack.c.bf16 %v1876_v30, %v1872_v22  ;;  %v784_v62 = vunpack.c.2.s8 %v268_v41  ;;  %v280_v31 = vld [vmem:[%s5509_s21 + $0x308] sm:$0xff] }
 0x123   : > { %3773 = vmatpush.bf16.msrb.mxu1 %v2664_v23  ;;  %v2628_v58 = vpack.c.bf16 %v1748_v44, %v1744_v28  ;;  %v1940_v35 = vcvt.s32.f32 %v916_v42  ;;  %v788_v24 = vunpack.c.3.s8 %v268_v41  ;;  %v840_v48 = vunpack.c.0.s8 %v284_v0 }
 0x124   : > { %v5985_v12 = vadd.f32 %v3462_v6, %v3440_v20  ;;  %v3419_v17 = vadd.f32 %v3418_v11, %v3396_v32  ;;  %3797 = vmatpush.bf16.msrb.mxu2 %v2692_v55  ;;  %v1808_v50 = vcvt.s32.f32 %v784_v62  ;;  %v844_v36 = vunpack.c.1.s8 %v284_v0  ;;  %v248_v6 = vld [vmem:[%s5509_s21 + $0x208] sm:$0xff] }
 0x125   : > { %3751 = vmatpush.bf16.msrb.mxu0 %v2628_v58  ;;  %v2724_v56 = vpack.c.bf16 %v1940_v35, %v1936_v51  ;;  %v1812_v4 = vcvt.s32.f32 %v788_v24  ;;  %v1864_v25 = vcvt.s32.f32 %v840_v48  ;;  %v712_v16 = vunpack.c.0.s8 %v5965_v39  ;;  %v5994_v35 = vld [vmem:[%s5509_s21 + $0x388] sm:$0xff] }
 0x126   : > { %v1868_v46 = vcvt.s32.f32 %v844_v36  ;;  %v716_v22 = vunpack.c.1.s8 %v5965_v39  ;;  %v904_v30 = vunpack.c.0.s8 %v5972_v1  ;;  %v908_v28 = vunpack.c.1.s8 %v5972_v1 }
 0x127   : > { %3820 = vmatpush.bf16.msrb.mxu3 %v2724_v56  ;;  %v2660_v49 = vpack.c.bf16 %v1812_v4, %v1808_v50  ;;  %v1736_v62 = vcvt.s32.f32 %v712_v16  ;;  %v776_v0 = vunpack.c.0.s8 %v268_v41  ;;  %v780_v23 = vunpack.c.1.s8 %v268_v41  ;;  %v264_v4 = vld [vmem:[%s5509_s21 + $0x288] sm:$0xff] }
 0x128   : > { %v2688_v44 = vpack.c.bf16 %v1868_v46, %v1864_v25  ;;  %v1740_v42 = vcvt.s32.f32 %v716_v22  ;;  %v1928_v51 = vcvt.s32.f32 %v904_v30  ;;  %v1932_v20 = vcvt.s32.f32 %v908_v28 }
 0x129   : > { %v3441_v32 = vpop.f32.mrf.mxu2  ;;  %v3398_v11 = vpop.f32.mrf.mxu0  ;;  %3774 = vmatpush.bf16.msrb.mxu1 %v2660_v49  ;;  %v1800_v39 = vcvt.s32.f32 %v776_v0  ;;  %v1804_v55 = vcvt.s32.f32 %v780_v23  ;;  %v832_v58 = vunpack.c.2.s8 %v280_v31  ;;  %v836_v1 = vunpack.c.3.s8 %v280_v31 }
 0x12a   : > { %v3442_v24 = vadd.f32 %v3441_v32, %v3419_v17  ;;  %v3464_v48 = vpop.f32.mrf.mxu3  ;;  %v3399_v50 = vadd.f32 %v3398_v11, %v5929_v47  ;;  %v3421_v41 = vpop.f32.mrf.mxu1  ;;  %3798 = vmatpush.bf16.msrb.mxu2 %v2688_v44  ;;  %v2624_v36 = vpack.c.bf16 %v1740_v42, %v1736_v62  ;;  %v2720_v56 = vpack.c.bf16 %v1932_v20, %v1928_v51 }
 0x12b   : > { %v2656_v25 = vpack.c.bf16 %v1804_v55, %v1800_v39  ;;  %v1856_v16 = vcvt.s32.f32 %v832_v58  ;;  %v1860_v46 = vcvt.s32.f32 %v836_v1  ;;  %v704_v22 = vunpack.c.2.s8 %v248_v6 }
 0x12c   : > { %v5998_v30 = vadd.f32 %v3464_v48, %v3442_v24  ;;  %v3422_v28 = vadd.f32 %v3421_v41, %v3399_v50  ;;  %3668 = vmatmul.bf16.gmra.mxu0 %v5559_v2  ;;  %3821 = vmatpush.bf16.msrb.mxu3 %v2720_v56  ;;  %v708_v49 = vunpack.c.3.s8 %v248_v6  ;;  %v896_v17 = vunpack.c.2.s8 %v5994_v35 }
 0x12d   : > { %3691 = vmatmul.bf16.gmra.mxu1 %v5561_v3  ;;  %3752 = vmatpush.bf16.msrb.mxu0 %v2624_v36  ;;  %v2684_v47 = vpack.c.bf16 %v1860_v46, %v1856_v16  ;;  %v1728_v62 = vcvt.s32.f32 %v704_v22  ;;  %v900_v0 = vunpack.c.3.s8 %v5994_v35  ;;  %v768_v23 = vunpack.c.2.s8 %v264_v4  ;;  %v356_v46 = vld [vmem:[%s5509_s21 + $0x568] sm:$0xff] }
 0x12e   : > { %3714 = vmatmul.bf16.gmra.mxu2 %v5563_v7  ;;  %3775 = vmatpush.bf16.msrb.mxu1 %v2656_v25  ;;  %v1732_v44 = vcvt.s32.f32 %v708_v49  ;;  %v1920_v42 = vcvt.s32.f32 %v896_v17  ;;  %v772_v51 = vunpack.c.3.s8 %v264_v4  ;;  %v824_v20 = vunpack.c.0.s8 %v280_v31 }
 0x12f   : > { %3737 = vmatmul.bf16.gmra.mxu3 %v5565_v9  ;;  %3799 = vmatpush.bf16.msrb.mxu2 %v2684_v47  ;;  %v1924_v32 = vcvt.s32.f32 %v900_v0  ;;  %v1792_v11 = vcvt.s32.f32 %v768_v23  ;;  %v828_v39 = vunpack.c.1.s8 %v280_v31  ;;  %v696_v55 = vunpack.c.0.s8 %v248_v6  ;;  %v6010_v0 = vld [vmem:[%s5509_s21 + $0x468] sm:$0xff] }
 0x130   : > { %v2620_v58 = vpack.c.bf16 %v1732_v44, %v1728_v62  ;;  %v1796_v1 = vcvt.s32.f32 %v772_v51  ;;  %v1848_v24 = vcvt.s32.f32 %v824_v20  ;;  %v700_v48 = vunpack.c.1.s8 %v248_v6  ;;  %v6013_v51 = vld [vmem:[%s5509_s21 + $0x5e8] sm:$0xff] }
 0x131   : > { %v3444_v50 = vpop.f32.mrf.mxu2  ;;  %v3400_v41 = vpop.f32.mrf.mxu0  ;;  %v2716_v36 = vpack.c.bf16 %v1924_v32, %v1920_v42  ;;  %v1852_v56 = vcvt.s32.f32 %v828_v39  ;;  %v1720_v25 = vcvt.s32.f32 %v696_v55  ;;  %v888_v16 = vunpack.c.0.s8 %v5994_v35 }
 0x132   : > { %v3445_v22 = vadd.f32 %v3444_v50, %v3422_v28  ;;  %v3467_v49 = vpop.f32.mrf.mxu3  ;;  %v3423_v17 = vpop.f32.mrf.mxu1  ;;  %3753 = vmatpush.bf16.msrb.mxu0 %v2620_v58  ;;  %v2652_v31 = vpack.c.bf16 %v1796_v1, %v1792_v11  ;;  %v1724_v47 = vcvt.s32.f32 %v700_v48  ;;  %v892_v62 = vunpack.c.1.s8 %v5994_v35  ;;  %v340_v1 = vld [vmem:[%s5509_s21 + $0x4e8] sm:$0xff] }
 0x133   : > { %3822 = vmatpush.bf16.msrb.mxu3 %v2716_v36  ;;  %v2680_v6 = vpack.c.bf16 %v1852_v56, %v1848_v24  ;;  %v1912_v23 = vcvt.s32.f32 %v888_v16  ;;  %v760_v44 = vunpack.c.0.s8 %v264_v4  ;;  %v764_v42 = vunpack.c.1.s8 %v264_v4 }
 0x134   : > { %v6015_v20 = vadd.f32 %v3467_v49, %v3445_v22  ;;  %3776 = vmatpush.bf16.msrb.mxu1 %v2652_v31  ;;  %v2616_v28 = vpack.c.bf16 %v1724_v47, %v1720_v25  ;;  %v1916_v32 = vcvt.s32.f32 %v892_v62  ;;  %v1136_v39 = vunpack.c.2.s8 %v356_v46 }
 0x135   : > { %3800 = vmatpush.bf16.msrb.mxu2 %v2680_v6  ;;  %v1784_v11 = vcvt.s32.f32 %v760_v44  ;;  %v1788_v55 = vcvt.s32.f32 %v764_v42  ;;  %v1140_v35 = vunpack.c.3.s8 %v356_v46  ;;  %v1008_v58 = vunpack.c.2.s8 %v6010_v0 }
 0x136   : > { %3754 = vmatpush.bf16.msrb.mxu0 %v2616_v28  ;;  %v2712_v24 = vpack.c.bf16 %v1916_v32, %v1912_v23  ;;  %v2160_v48 = vcvt.s32.f32 %v1136_v39  ;;  %v1012_v4 = vunpack.c.3.s8 %v6010_v0  ;;  %v1200_v50 = vunpack.c.2.s8 %v6013_v51 }
 0x137   : > { %v2648_v41 = vpack.c.bf16 %v1788_v55, %v1784_v11  ;;  %v2164_v36 = vcvt.s32.f32 %v1140_v35  ;;  %v2032_v56 = vcvt.s32.f32 %v1008_v58  ;;  %v1204_v25 = vunpack.c.3.s8 %v6013_v51 }
 0x138   : > { %3823 = vmatpush.bf16.msrb.mxu3 %v2712_v24  ;;  %v2036_v16 = vcvt.s32.f32 %v1012_v4  ;;  %v2224_v22 = vcvt.s32.f32 %v1200_v50  ;;  %v1072_v49 = vunpack.c.2.s8 %v340_v1  ;;  %v1076_v17 = vunpack.c.3.s8 %v340_v1 }
 0x139   : > { %v3446_v31 = vpop.f32.mrf.mxu2  ;;  %v3480_v47 = vpop.f32.mrf.mxu0  ;;  %3777 = vmatpush.bf16.msrb.mxu1 %v2648_v41  ;;  %v2836_v62 = vpack.c.bf16 %v2164_v36, %v2160_v48  ;;  %v2228_v6 = vcvt.s32.f32 %v1204_v25  ;;  %v1128_v23 = vunpack.c.0.s8 %v356_v46  ;;  %v1132_v44 = vunpack.c.1.s8 %v356_v46  ;;  %v352_v41 = vld [vmem:[%s5509_s21 + $0x548] sm:$0xff] }
 0x13a   : > { %v3469_v42 = vpop.f32.mrf.mxu3  ;;  %v3481_v28 = vadd.f32 %v3480_v47, %v5955_v29  ;;  %v3503_v32 = vpop.f32.mrf.mxu1  ;;  %v2772_v39 = vpack.c.bf16 %v2036_v16, %v2032_v56  ;;  %v2096_v11 = vcvt.s32.f32 %v1072_v49  ;;  %v2100_v55 = vcvt.s32.f32 %v1076_v17  ;;  %v6029_v36 = vld [vmem:[%s5509_s21 + $0x448] sm:$0xff] }
 0x13b   : > { %3885 = vmatpush.bf16.msra.mxu2 %v2836_v62  ;;  %v2868_v35 = vpack.c.bf16 %v2228_v6, %v2224_v22  ;;  %v2152_v58 = vcvt.s32.f32 %v1128_v23  ;;  %v2156_v24 = vcvt.s32.f32 %v1132_v44  ;;  %v1000_v4 = vunpack.c.0.s8 %v6010_v0  ;;  %v368_v47 = vld [vmem:[%s5509_s21 + $0x5c8] sm:$0xff] }
 0x13c   : > { %v3504_v50 = vadd.f32 %v3503_v32, %v3481_v28  ;;  %3673 = vmatmul.bf16.gmra.mxu0 %v5597_v14  ;;  %v2804_v48 = vpack.c.bf16 %v2100_v55, %v2096_v11  ;;  %v1004_v46 = vunpack.c.1.s8 %v6010_v0  ;;  %v1192_v29 = vunpack.c.0.s8 %v6013_v51 }
 0x13d   : > { %3696 = vmatmul.bf16.gmra.mxu1 %v5599_v15  ;;  %3839 = vmatpush.bf16.msra.mxu0 %v2772_v39  ;;  %v2832_v56 = vpack.c.bf16 %v2156_v24, %v2152_v58  ;;  %v2024_v25 = vcvt.s32.f32 %v1000_v4  ;;  %v1196_v16 = vunpack.c.1.s8 %v6013_v51  ;;  %v1064_v22 = vunpack.c.0.s8 %v340_v1  ;;  %v336_v39 = vld [vmem:[%s5509_s21 + $0x4c8] sm:$0xff] }
 0x13e   : > { %3719 = vmatmul.bf16.gmra.mxu2 %v5604_v19  ;;  %3908 = vmatpush.bf16.msra.mxu3 %v2868_v35  ;;  %v2028_v49 = vcvt.s32.f32 %v1004_v46  ;;  %v2216_v0 = vcvt.s32.f32 %v1192_v29  ;;  %v1068_v17 = vunpack.c.1.s8 %v340_v1  ;;  %v1120_v31 = vunpack.c.2.s8 %v352_v41 }
 0x13f   : > { %3742 = vmatmul.bf16.gmra.mxu3 %v5606_v21  ;;  %3862 = vmatpush.bf16.msra.mxu1 %v2804_v48  ;;  %v2220_v62 = vcvt.s32.f32 %v1196_v16  ;;  %v2088_v6 = vcvt.s32.f32 %v1064_v22  ;;  %v1124_v23 = vunpack.c.3.s8 %v352_v41  ;;  %v992_v44 = vunpack.c.2.s8 %v6029_v36 }
 0x140   : > { %3886 = vmatpush.bf16.msra.mxu2 %v2832_v56  ;;  %v2768_v51 = vpack.c.bf16 %v2028_v49, %v2024_v25  ;;  %v2092_v42 = vcvt.s32.f32 %v1068_v17  ;;  %v2144_v28 = vcvt.s32.f32 %v1120_v31  ;;  %v996_v32 = vunpack.c.3.s8 %v6029_v36 }
 0x141   : > { %v3526_v11 = vpop.f32.mrf.mxu2  ;;  %v3482_v55 = vpop.f32.mrf.mxu0  ;;  %v2864_v1 = vpack.c.bf16 %v2220_v62, %v2216_v0  ;;  %v2148_v35 = vcvt.s32.f32 %v1124_v23  ;;  %v2016_v58 = vcvt.s32.f32 %v992_v44  ;;  %v1184_v24 = vunpack.c.2.s8 %v368_v47 }
 0x142   : > { %v3527_v4 = vadd.f32 %v3526_v11, %v3504_v50  ;;  %v3549_v48 = vpop.f32.mrf.mxu3  ;;  %v3483_v46 = vadd.f32 %v3482_v55, %v5967_v10  ;;  %v3505_v29 = vpop.f32.mrf.mxu1  ;;  %3840 = vmatpush.bf16.msra.mxu0 %v2768_v51  ;;  %v2800_v16 = vpack.c.bf16 %v2092_v42, %v2088_v6  ;;  %v2020_v56 = vcvt.s32.f32 %v996_v32 }
 0x143   : > { %3909 = vmatpush.bf16.msra.mxu3 %v2864_v1  ;;  %v2828_v25 = vpack.c.bf16 %v2148_v35, %v2144_v28  ;;  %v1188_v22 = vunpack.c.3.s8 %v368_v47  ;;  %v2208_v49 = vcvt.s32.f32 %v1184_v24  ;;  %v1056_v17 = vunpack.c.2.s8 %v336_v39  ;;  %v6045_v35 = vld [vmem:[%s5509_s21 + $0x528] sm:$0xff] }
 0x144   : > { %v6040_v31 = vadd.f32 %v3549_v48, %v3527_v4  ;;  %v3506_v21 = vadd.f32 %v3505_v29, %v3483_v46  ;;  %3863 = vmatpush.bf16.msra.mxu1 %v2800_v16  ;;  %v2764_v0 = vpack.c.bf16 %v2020_v56, %v2016_v58  ;;  %v1060_v62 = vunpack.c.3.s8 %v336_v39 }
 0x145   : > { %3887 = vmatpush.bf16.msra.mxu2 %v2828_v25  ;;  %v2212_v50 = vcvt.s32.f32 %v1188_v22  ;;  %v2080_v23 = vcvt.s32.f32 %v1056_v17  ;;  %v1112_v10 = vunpack.c.0.s8 %v352_v41  ;;  %v1116_v44 = vunpack.c.1.s8 %v352_v41  ;;  %v316_v25 = vld [vmem:[%s5509_s21 + $0x428] sm:$0xff] }
 0x146   : > { %3841 = vmatpush.bf16.msra.mxu0 %v2764_v0  ;;  %v2084_v6 = vcvt.s32.f32 %v1060_v62  ;;  %v984_v51 = vunpack.c.0.s8 %v6029_v36  ;;  %v988_v42 = vunpack.c.1.s8 %v6029_v36  ;;  %v1176_v28 = vunpack.c.0.s8 %v368_v47 }
 0x147   : > { %v2860_v32 = vpack.c.bf16 %v2212_v50, %v2208_v49  ;;  %v2136_v11 = vcvt.s32.f32 %v1112_v10  ;;  %v2140_v55 = vcvt.s32.f32 %v1116_v44  ;;  %v1180_v1 = vunpack.c.1.s8 %v368_v47  ;;  %v6051_v50 = vld [vmem:[%s5509_s21 + $0x5a8] sm:$0xff] }
 0x148   : > { %v2796_v58 = vpack.c.bf16 %v2084_v6, %v2080_v23  ;;  %v2008_v24 = vcvt.s32.f32 %v984_v51  ;;  %v2012_v4 = vcvt.s32.f32 %v988_v42  ;;  %v2200_v48 = vcvt.s32.f32 %v1176_v28  ;;  %v6055_v51 = vld [vmem:[%s5509_s21 + $0x4a8] sm:$0xff] }
 0x149   : > { %v3528_v41 = vpop.f32.mrf.mxu2  ;;  %v3485_v46 = vpop.f32.mrf.mxu0  ;;  %3910 = vmatpush.bf16.msra.mxu3 %v2860_v32  ;;  %v2824_v29 = vpack.c.bf16 %v2140_v55, %v2136_v11  ;;  %v2204_v16 = vcvt.s32.f32 %v1180_v1  ;;  %v1048_v56 = vunpack.c.0.s8 %v336_v39  ;;  %v1052_v36 = vunpack.c.1.s8 %v336_v39 }
 0x14a   : > { %v3529_v22 = vadd.f32 %v3528_v41, %v3506_v21  ;;  %v3551_v49 = vpop.f32.mrf.mxu3  ;;  %v3486_v47 = vadd.f32 %v3485_v46, %v5985_v12  ;;  %v3508_v17 = vpop.f32.mrf.mxu1  ;;  %3864 = vmatpush.bf16.msra.mxu1 %v2796_v58  ;;  %v2760_v0 = vpack.c.bf16 %v2012_v4, %v2008_v24  ;;  %v1104_v62 = vunpack.c.2.s8 %v6045_v35 }
 0x14b   : > { %3888 = vmatpush.bf16.msra.mxu2 %v2824_v29  ;;  %v2856_v23 = vpack.c.bf16 %v2204_v16, %v2200_v48  ;;  %v2072_v10 = vcvt.s32.f32 %v1048_v56  ;;  %v2076_v44 = vcvt.s32.f32 %v1052_v36  ;;  %v1108_v6 = vunpack.c.3.s8 %v6045_v35 }
 0x14c   : > { %v6057_v39 = vadd.f32 %v3551_v49, %v3529_v22  ;;  %v3509_v21 = vadd.f32 %v3508_v17, %v3486_v47  ;;  %3755 = vmatmul.bf16.vlgmr.msrb.gmra.mxu0 %v5626_v33  ;;  %v2128_v12 = vcvt.s32.f32 %v1104_v62  ;;  %v976_v42 = vunpack.c.2.s8 %v316_v25 }
 0x14d   : > { %3778 = vmatmul.bf16.vlgmr.msrb.gmra.mxu1 %v5629_v34  ;;  %3842 = vmatpush.bf16.msra.mxu0 %v2760_v0  ;;  %v2792_v28 = vpack.c.bf16 %v2076_v44, %v2072_v10  ;;  %v2132_v32 = vcvt.s32.f32 %v1108_v6  ;;  %v980_v11 = vunpack.c.3.s8 %v316_v25  ;;  %v1168_v55 = vunpack.c.2.s8 %v6051_v50 }
 0x14e   : > { %3801 = vmatmul.bf16.vlgmr.msrb.gmra.mxu2 %v5633_v40  ;;  %3911 = vmatpush.bf16.msra.mxu3 %v2856_v23  ;;  %v2000_v1 = vcvt.s32.f32 %v976_v42  ;;  %v1172_v58 = vunpack.c.3.s8 %v6051_v50  ;;  %v1040_v24 = vunpack.c.2.s8 %v6055_v51  ;;  %v1044_v4 = vunpack.c.3.s8 %v6055_v51 }
 0x14f   : > { %3824 = vmatmul.bf16.vlgmr.msrb.gmra.mxu3 %v5635_v43  ;;  %3865 = vmatpush.bf16.msra.mxu1 %v2792_v28  ;;  %v2820_v48 = vpack.c.bf16 %v2132_v32, %v2128_v12  ;;  %v2004_v41 = vcvt.s32.f32 %v980_v11  ;;  %v2192_v46 = vcvt.s32.f32 %v1168_v55  ;;  %v1096_v29 = vunpack.c.0.s8 %v6045_v35 }
 0x150   : > { %v2196_v16 = vcvt.s32.f32 %v1172_v58  ;;  %v2064_v56 = vcvt.s32.f32 %v1040_v24  ;;  %v2068_v36 = vcvt.s32.f32 %v1044_v4  ;;  %v1100_v22 = vunpack.c.1.s8 %v6045_v35  ;;  %v344_v58 = vld [vmem:[%s5509_s21 + $0x508] sm:$0xff] }
 0x151   : > { %v3531_v49 = vpop.f32.mrf.mxu2  ;;  %v3487_v47 = vpop.f32.mrf.mxu0  ;;  %3889 = vmatpush.bf16.msra.mxu2 %v2820_v48  ;;  %v2756_v17 = vpack.c.bf16 %v2004_v41, %v2000_v1  ;;  %v2120_v0 = vcvt.s32.f32 %v1096_v29  ;;  %v968_v62 = vunpack.c.0.s8 %v316_v25  ;;  %v972_v23 = vunpack.c.1.s8 %v316_v25  ;;  %v360_v4 = vld [vmem:[%s5509_s21 + $0x588] sm:$0xff] }
 0x152   : > { %v3532_v10 = vadd.f32 %v3531_v49, %v3509_v21  ;;  %v3554_v44 = vpop.f32.mrf.mxu3  ;;  %v3488_v6 = vadd.f32 %v3487_v47, %v5998_v30  ;;  %v3510_v12 = vpop.f32.mrf.mxu1  ;;  %v2852_v42 = vpack.c.bf16 %v2196_v16, %v2192_v46  ;;  %v2788_v28 = vpack.c.bf16 %v2068_v36, %v2064_v56  ;;  %v312_v21 = vld [vmem:[%s5509_s21 + $0x408] sm:$0xff] }
 0x153   : > { %3843 = vmatpush.bf16.msra.mxu0 %v2756_v17  ;;  %v2124_v32 = vcvt.s32.f32 %v1100_v22  ;;  %v1992_v35 = vcvt.s32.f32 %v968_v62  ;;  %v1996_v11 = vcvt.s32.f32 %v972_v23  ;;  %v1160_v55 = vunpack.c.0.s8 %v6051_v50 }
 0x154   : > { %v6072_v1 = vadd.f32 %v3554_v44, %v3532_v10  ;;  %v6074_v24 = vadd.f32 %v3510_v12, %v3488_v6  ;;  %3912 = vmatpush.bf16.msra.mxu3 %v2852_v42  ;;  %3866 = vmatpush.bf16.msra.mxu1 %v2788_v28  ;;  %v1164_v30 = vunpack.c.1.s8 %v6051_v50  ;;  %v1032_v25 = vunpack.c.0.s8 %v6055_v51 }
 0x155   : > { %v2816_v48 = vpack.c.bf16 %v2124_v32, %v2120_v0  ;;  %v2752_v41 = vpack.c.bf16 %v1996_v11, %v1992_v35  ;;  %v2184_v46 = vcvt.s32.f32 %v1160_v55  ;;  %v1036_v29 = vunpack.c.1.s8 %v6055_v51  ;;  %v328_v0 = vld [vmem:[%s5509_s21 + $0x488] sm:$0xff] }
 0x156   : > { %v2188_v16 = vcvt.s32.f32 %v1164_v30  ;;  %v2056_v56 = vcvt.s32.f32 %v1032_v25  ;;  %v1088_v36 = vunpack.c.2.s8 %v344_v58  ;;  %v1092_v22 = vunpack.c.3.s8 %v344_v58 }
 0x157   : > { %3890 = vmatpush.bf16.msra.mxu2 %v2816_v48  ;;  %3844 = vmatpush.bf16.msra.mxu0 %v2752_v41  ;;  %v2060_v49 = vcvt.s32.f32 %v1036_v29  ;;  %v960_v47 = vunpack.c.2.s8 %v312_v21  ;;  %v964_v17 = vunpack.c.3.s8 %v312_v21  ;;  %v1152_v50 = vunpack.c.2.s8 %v360_v4 }
 0x158   : > { %v2848_v62 = vpack.c.bf16 %v2188_v16, %v2184_v46  ;;  %v2112_v23 = vcvt.s32.f32 %v1088_v36  ;;  %v2116_v10 = vcvt.s32.f32 %v1092_v22  ;;  %v1156_v44 = vunpack.c.3.s8 %v360_v4 }
 0x159   : > { %v6082_v6 = vpop.f32.mrf.mxu2  ;;  %v3490_v12 = vpop.f32.mrf.mxu0  ;;  %v2784_v42 = vpack.c.bf16 %v2060_v49, %v2056_v56  ;;  %v1984_v51 = vcvt.s32.f32 %v960_v47  ;;  %v1988_v28 = vcvt.s32.f32 %v964_v17  ;;  %v2176_v32 = vcvt.s32.f32 %v1152_v50 }
 0x15a   : > { %v6084_v35 = vpop.f32.mrf.mxu3  ;;  %v6086_v11 = vpop.f32.mrf.mxu1  ;;  %3913 = vmatpush.bf16.msra.mxu3 %v2848_v62  ;;  %v2812_v55 = vpack.c.bf16 %v2116_v10, %v2112_v23  ;;  %v2180_v30 = vcvt.s32.f32 %v1156_v44  ;;  %v1024_v48 = vunpack.c.2.s8 %v328_v0  ;;  %v1028_v41 = vunpack.c.3.s8 %v328_v0 }
 0x15b   : > { %3867 = vmatpush.bf16.msra.mxu1 %v2784_v42  ;;  %v2748_v25 = vpack.c.bf16 %v1988_v28, %v1984_v51  ;;  %v1080_v46 = vunpack.c.0.s8 %v344_v58  ;;  %v1084_v16 = vunpack.c.1.s8 %v344_v58  ;;  %v952_v49 = vunpack.c.0.s8 %v312_v21  ;;  %v420_v42 = vld [vmem:[%s5509_s21 + $0x768] sm:$0xff] }
 0x15c   : > { %3760 = vmatmul.bf16.gmra.mxu0 %v5657_v60  ;;  %3891 = vmatpush.bf16.msra.mxu2 %v2812_v55  ;;  %v2844_v29 = vpack.c.bf16 %v2180_v30, %v2176_v32  ;;  %v2048_v56 = vcvt.s32.f32 %v1024_v48  ;;  %v2052_v36 = vcvt.s32.f32 %v1028_v41  ;;  %v956_v17 = vunpack.c.1.s8 %v312_v21  ;;  %v388_v51 = vld [vmem:[%s5509_s21 + $0x668] sm:$0xff] }
 0x15d   : > { %3783 = vmatmul.bf16.gmra.mxu1 %v5659_v63  ;;  %3845 = vmatpush.bf16.msra.mxu0 %v2748_v25  ;;  %v2104_v22 = vcvt.s32.f32 %v1080_v46  ;;  %v2108_v47 = vcvt.s32.f32 %v1084_v16  ;;  %v1144_v50 = vunpack.c.0.s8 %v360_v4  ;;  %v1148_v62 = vunpack.c.1.s8 %v360_v4 }
 0x15e   : > { %3806 = vmatmul.bf16.gmra.mxu2 %v5661_v5  ;;  %3914 = vmatpush.bf16.msra.mxu3 %v2844_v29  ;;  %v2780_v23 = vpack.c.bf16 %v2052_v36, %v2048_v56  ;;  %v1976_v58 = vcvt.s32.f32 %v952_v49  ;;  %v1016_v10 = vunpack.c.0.s8 %v328_v0  ;;  %v1020_v44 = vunpack.c.1.s8 %v328_v0  ;;  %v436_v29 = vld [vmem:[%s5509_s21 + $0x7e8] sm:$0xff] }
 0x15f   : > { %3829 = vmatmul.bf16.gmra.mxu3 %v5663_v8  ;;  %v2808_v28 = vpack.c.bf16 %v2108_v47, %v2104_v22  ;;  %v1980_v32 = vcvt.s32.f32 %v956_v17  ;;  %v2168_v55 = vcvt.s32.f32 %v1144_v50  ;;  %v2172_v30 = vcvt.s32.f32 %v1148_v62 }
 0x160   : > { %3868 = vmatpush.bf16.msra.mxu1 %v2780_v23  ;;  %v2040_v21 = vcvt.s32.f32 %v1016_v10  ;;  %v2044_v41 = vcvt.s32.f32 %v1020_v44  ;;  %v1392_v4 = vunpack.c.2.s8 %v420_v42  ;;  %v1396_v46 = vunpack.c.3.s8 %v420_v42 }
 0x161   : > { %v6094_v25 = vpop.f32.mrf.mxu2  ;;  %v3492_v48 = vpop.f32.mrf.mxu0  ;;  %3892 = vmatpush.bf16.msra.mxu2 %v2808_v28  ;;  %v2744_v0 = vpack.c.bf16 %v1980_v32, %v1976_v58  ;;  %v2840_v36 = vpack.c.bf16 %v2172_v30, %v2168_v55  ;;  %v1264_v22 = vunpack.c.2.s8 %v388_v51  ;;  %v1268_v50 = vunpack.c.3.s8 %v388_v51 }
 0x162   : > { %v6097_v16 = vpop.f32.mrf.mxu3  ;;  %v3515_v56 = vpop.f32.mrf.mxu1  ;;  %v2776_v49 = vpack.c.bf16 %v2044_v41, %v2040_v21  ;;  %v2416_v47 = vcvt.s32.f32 %v1392_v4  ;;  %v2420_v17 = vcvt.s32.f32 %v1396_v46  ;;  %v3491_v62 = vadd.f32 %v3490_v12, %v6015_v20  ;;  %v404_v48 = vld [vmem:[%s5509_s21 + $0x6e8] sm:$0xff] }
 0x163   : > { %3846 = vmatpush.bf16.msra.mxu0 %v2744_v0  ;;  %3915 = vmatpush.bf16.msra.mxu3 %v2840_v36  ;;  %v2288_v23 = vcvt.s32.f32 %v1264_v22  ;;  %v1456_v10 = vunpack.c.2.s8 %v436_v29  ;;  %v1460_v44 = vunpack.c.3.s8 %v436_v29  ;;  %v2292_v5 = vcvt.s32.f32 %v1268_v50 }
 0x164   : > { %3869 = vmatpush.bf16.msra.mxu1 %v2776_v49  ;;  %v2964_v8 = vpack.c.bf16 %v2420_v17, %v2416_v47  ;;  %v1328_v56 = vunpack.c.2.s8 %v404_v48  ;;  %v1332_v28 = vunpack.c.3.s8 %v404_v48  ;;  %v1384_v55 = vunpack.c.0.s8 %v420_v42 }
 0x165   : > { %v2480_v58 = vcvt.s32.f32 %v1456_v10  ;;  %v2484_v32 = vcvt.s32.f32 %v1460_v44  ;;  %v1388_v30 = vunpack.c.1.s8 %v420_v42  ;;  %v2900_v21 = vpack.c.bf16 %v2292_v5, %v2288_v23 }
 0x166   : > { %3977 = vmatpush.bf16.msrb.mxu2 %v2964_v8  ;;  %v2352_v41 = vcvt.s32.f32 %v1328_v56  ;;  %v2356_v4 = vcvt.s32.f32 %v1332_v28  ;;  %v1256_v20 = vunpack.c.0.s8 %v388_v51  ;;  %v2408_v46 = vcvt.s32.f32 %v1384_v55 }
 0x167   : > { %v2996_v12 = vpack.c.bf16 %v2484_v32, %v2480_v58  ;;  %v2412_v0 = vcvt.s32.f32 %v1388_v30  ;;  %v1260_v36 = vunpack.c.1.s8 %v388_v51  ;;  %3931 = vmatpush.bf16.msrb.mxu0 %v2900_v21  ;;  %v1448_v17 = vunpack.c.0.s8 %v436_v29  ;;  %v416_v30 = vld [vmem:[%s5509_s21 + $0x748] sm:$0xff] }
 0x168   : > { %v2932_v49 = vpack.c.bf16 %v2356_v4, %v2352_v41  ;;  %v2280_v47 = vcvt.s32.f32 %v1256_v20  ;;  %v1452_v50 = vunpack.c.1.s8 %v436_v29  ;;  %v1320_v42 = vunpack.c.0.s8 %v404_v48  ;;  %v6108_v21 = vld [vmem:[%s5509_s21 + $0x648] sm:$0xff] }
 0x169   : > { %v3538_v22 = vpop.f32.mrf.mxu2  ;;  %v3572_v63 = vpop.f32.mrf.mxu0  ;;  %4000 = vmatpush.bf16.msrb.mxu3 %v2996_v12  ;;  %v2960_v5 = vpack.c.bf16 %v2412_v0, %v2408_v46  ;;  %v2284_v8 = vcvt.s32.f32 %v1260_v36  ;;  %v3534_v23 = vadd.f32 %v6082_v6, %v6074_v24  ;;  %v2472_v51 = vcvt.s32.f32 %v1448_v17  ;;  %v6111_v41 = vld [vmem:[%s5509_s21 + $0x7c8] sm:$0xff]  ;;  %v6979_v12 = vld [vmem:[#allocation22_spill] sm:$0xff] }
 0x16a   : > { %v3561_v10 = vpop.f32.mrf.mxu3  ;;  %v3595_v44 = vpop.f32.mrf.mxu1  ;;  %3954 = vmatpush.bf16.msrb.mxu1 %v2932_v49  ;;  %v2476_v56 = vcvt.s32.f32 %v1452_v50  ;;  %v1324_v28 = vunpack.c.1.s8 %v404_v48  ;;  %v3514_v58 = vadd.f32 %v6086_v11, %v3491_v62  ;;  %v3573_v29 = vadd.f32 %v3572_v63, %v6040_v31  ;;  %v6978_v11 = vld [vmem:[#allocation21_spill] sm:$0xff]  ;;  %v400_v22 = vld [vmem:[%s5509_s21 + $0x6c8] sm:$0xff] }
 0x16b   : > { %3978 = vmatpush.bf16.msrb.mxu2 %v2960_v5  ;;  %v2896_v32 = vpack.c.bf16 %v2284_v8, %v2280_v47  ;;  %v2344_v55 = vcvt.s32.f32 %v1320_v42  ;;  %v1376_v48 = vunpack.c.2.s8 %v416_v30  ;;  %v1380_v4 = vunpack.c.3.s8 %v416_v30 }
 0x16c   : > { %3765 = vmatmul.bf16.gmra.mxu0 %v5697_v26  ;;  %v2992_v24 = vpack.c.bf16 %v2476_v56, %v2472_v51  ;;  %v2348_v6 = vcvt.s32.f32 %v1324_v28  ;;  %v1248_v63 = vunpack.c.2.s8 %v6108_v21  ;;  %v1252_v31 = vunpack.c.3.s8 %v6108_v21 }
 0x16d   : > { %3788 = vmatmul.bf16.gmra.mxu1 %v5699_v37  ;;  %3932 = vmatpush.bf16.msrb.mxu0 %v2896_v32  ;;  %v1440_v62 = vunpack.c.2.s8 %v6111_v41  ;;  %v1444_v20 = vunpack.c.3.s8 %v6111_v41  ;;  %v2400_v0 = vcvt.s32.f32 %v1376_v48  ;;  %v2404_v36 = vcvt.s32.f32 %v1380_v4 }
 0x16e   : > { %3811 = vmatmul.bf16.gmra.mxu2 %v6978_v11  ;;  %v2928_v46 = vpack.c.bf16 %v2348_v6, %v2344_v55  ;;  %v1368_v49 = vunpack.c.0.s8 %v416_v30  ;;  %4001 = vmatpush.bf16.msrb.mxu3 %v2992_v24  ;;  %v2272_v47 = vcvt.s32.f32 %v1248_v63  ;;  %v2276_v17 = vcvt.s32.f32 %v1252_v31 }
 0x16f   : > { %3834 = vmatmul.bf16.gmra.mxu3 %v6979_v12  ;;  %v2464_v50 = vcvt.s32.f32 %v1440_v62  ;;  %v2468_v10 = vcvt.s32.f32 %v1444_v20  ;;  %v2956_v42 = vpack.c.bf16 %v2404_v36, %v2400_v0  ;;  %v1312_v51 = vunpack.c.2.s8 %v400_v22 }
 0x170   : > { %3955 = vmatpush.bf16.msrb.mxu1 %v2928_v46  ;;  %v1316_v56 = vunpack.c.3.s8 %v400_v22  ;;  %v1372_v28 = vunpack.c.1.s8 %v416_v30  ;;  %v3596_v32 = vadd.f32 %v3595_v44, %v3573_v29  ;;  %v2892_v48 = vpack.c.bf16 %v2276_v17, %v2272_v47 }
 0x171   : > { %v3618_v5 = vpop.f32.mrf.mxu2  ;;  %v3574_v8 = vpop.f32.mrf.mxu0  ;;  %v2988_v4 = vpack.c.bf16 %v2468_v10, %v2464_v50  ;;  %3979 = vmatpush.bf16.msrb.mxu2 %v2956_v42  ;;  %v2336_v24 = vcvt.s32.f32 %v1312_v51  ;;  %v2392_v31 = vcvt.s32.f32 %v1368_v49  ;;  %v3537_v20 = vadd.f32 %v6094_v25, %v3514_v58 }
 0x172   : > { %v3641_v11 = vpop.f32.mrf.mxu3  ;;  %v3575_v55 = vadd.f32 %v3574_v8, %v6057_v39  ;;  %v3597_v6 = vpop.f32.mrf.mxu1  ;;  %v2340_v63 = vcvt.s32.f32 %v1316_v56  ;;  %v2396_v62 = vcvt.s32.f32 %v1372_v28  ;;  %3933 = vmatpush.bf16.msrb.mxu0 %v2892_v48  ;;  %v3619_v46 = vadd.f32 %v3618_v5, %v3596_v32  ;;  %v380_v32 = vld [vmem:[%s5509_s21 + $0x628] sm:$0xff] }
 0x173   : > { %4002 = vmatpush.bf16.msrb.mxu3 %v2988_v4  ;;  %v6124_v44 = vadd.f32 %v6084_v35, %v3534_v23  ;;  %v1240_v39 = vunpack.c.0.s8 %v6108_v21  ;;  %v1244_v30 = vunpack.c.1.s8 %v6108_v21  ;;  %v1432_v49 = vunpack.c.0.s8 %v6111_v41 }
 0x174   : > { %v2924_v0 = vpack.c.bf16 %v2340_v63, %v2336_v24  ;;  %v2952_v36 = vpack.c.bf16 %v2396_v62, %v2392_v31  ;;  %v3598_v29 = vadd.f32 %v3597_v6, %v3575_v55  ;;  %v1436_v47 = vunpack.c.1.s8 %v6111_v41  ;;  %v6139_v55 = vld [vmem:[%s5509_s21 + $0x7a8] sm:$0xff] }
 0x175   : > { %v6131_v17 = vadd.f32 %v6097_v16, %v3537_v20  ;;  %v6133_v25 = vadd.f32 %v3641_v11, %v3619_v46  ;;  %v1304_v58 = vunpack.c.0.s8 %v400_v22  ;;  %v1308_v50 = vunpack.c.1.s8 %v400_v22  ;;  %v412_v11 = vld [vmem:[%s5509_s21 + $0x728] sm:$0xff]  ;;  %v6980_v22 = vld [vmem:[#allocation23_spill] sm:$0xff] }
 0x176   : > { %3956 = vmatpush.bf16.msrb.mxu1 %v2924_v0  ;;  %3980 = vmatpush.bf16.msrb.mxu2 %v2952_v36  ;;  %v2264_v42 = vcvt.s32.f32 %v1240_v39  ;;  %v2268_v41 = vcvt.s32.f32 %v1244_v30  ;;  %v2456_v51 = vcvt.s32.f32 %v1432_v49  ;;  %v2460_v16 = vcvt.s32.f32 %v1436_v47  ;;  %v6981_v63 = vld [vmem:[#allocation24_spill] sm:$0xff]  ;;  %v6982_v0 = vld [vmem:[#allocation25_spill] sm:$0xff]  ;;  %v6983_v49 = vld [vmem:[#allocation26_spill] sm:$0xff] }
 0x177   : > { %v2328_v56 = vcvt.s32.f32 %v1304_v58  ;;  %v2332_v28 = vcvt.s32.f32 %v1308_v50  ;;  %v1360_v24 = vunpack.c.2.s8 %v412_v11  ;;  %v1364_v20 = vunpack.c.3.s8 %v412_v11 }
 0x178   : > { %v2888_v4 = vpack.c.bf16 %v2268_v41, %v2264_v42  ;;  %v2984_v31 = vpack.c.bf16 %v2460_v16, %v2456_v51  ;;  %v1232_v46 = vunpack.c.2.s8 %v380_v32  ;;  %v1424_v39 = vunpack.c.2.s8 %v6139_v55 }
 0x179   : > { %v3620_v35 = vpop.f32.mrf.mxu2  ;;  %v3577_v23 = vpop.f32.mrf.mxu0  ;;  %v2920_v62 = vpack.c.bf16 %v2332_v28, %v2328_v56  ;;  %v2384_v36 = vcvt.s32.f32 %v1360_v24  ;;  %v1428_v30 = vunpack.c.3.s8 %v6139_v55  ;;  %v2388_v47 = vcvt.s32.f32 %v1364_v20 }
 0x17a   : > { %v3621_v10 = vadd.f32 %v3620_v35, %v3598_v29  ;;  %v3643_v5 = vpop.f32.mrf.mxu3  ;;  %v3578_v21 = vadd.f32 %v3577_v23, %v6072_v1  ;;  %v3600_v8 = vpop.f32.mrf.mxu1  ;;  %v6145_v1 = vld [vmem:[%s5509_s21 + $0x6a8] sm:$0xff]  ;;  %3934 = vmatpush.bf16.msrb.mxu0 %v2888_v4  ;;  %v1236_v29 = vunpack.c.3.s8 %v380_v32  ;;  %v2256_v35 = vcvt.s32.f32 %v1232_v46  ;;  %4003 = vmatpush.bf16.msrb.mxu3 %v2984_v31 }
 0x17b   : > { %3957 = vmatpush.bf16.msrb.mxu1 %v2920_v62  ;;  %v1296_v23 = vunpack.c.2.s8 %v6145_v1  ;;  %v1300_v58 = vunpack.c.3.s8 %v6145_v1  ;;  %v2948_v41 = vpack.c.bf16 %v2388_v47, %v2384_v36  ;;  %v1356_v56 = vunpack.c.1.s8 %v412_v11 }
 0x17c   : > { %v6141_v6 = vadd.f32 %v3643_v5, %v3621_v10  ;;  %v3601_v48 = vadd.f32 %v3600_v8, %v3578_v21  ;;  %3847 = vmatmul.bf16.vlgmr.msra.gmra.mxu0 %v6980_v22  ;;  %v2260_v50 = vcvt.s32.f32 %v1236_v29  ;;  %v2448_v10 = vcvt.s32.f32 %v1424_v39 }
 0x17d   : > { %3870 = vmatmul.bf16.vlgmr.msra.gmra.mxu1 %v6981_v63  ;;  %v2452_v5 = vcvt.s32.f32 %v1428_v30  ;;  %v1352_v21 = vunpack.c.0.s8 %v412_v11  ;;  %v2320_v51 = vcvt.s32.f32 %v1296_v23  ;;  %v2324_v16 = vcvt.s32.f32 %v1300_v58  ;;  %3981 = vmatpush.bf16.msrb.mxu2 %v2948_v41 }
 0x17e   : > { %3893 = vmatmul.bf16.vlgmr.msra.gmra.mxu2 %v6982_v0  ;;  %v2884_v20 = vpack.c.bf16 %v2260_v50, %v2256_v35  ;;  %v2380_v39 = vcvt.s32.f32 %v1356_v56  ;;  %v1224_v30 = vunpack.c.0.s8 %v380_v32  ;;  %v1228_v11 = vunpack.c.1.s8 %v380_v32 }
 0x17f   : > { %3916 = vmatmul.bf16.vlgmr.msra.gmra.mxu3 %v6983_v49  ;;  %v2980_v46 = vpack.c.bf16 %v2452_v5, %v2448_v10  ;;  %v2916_v31 = vpack.c.bf16 %v2324_v16, %v2320_v51  ;;  %v2376_v29 = vcvt.s32.f32 %v1352_v21  ;;  %v6156_v49 = vld [vmem:[%s5509_s21 + $0x708] sm:$0xff]  ;;  %v1420_v23 = vunpack.c.1.s8 %v6139_v55 }
 0x180   : > { %3935 = vmatpush.bf16.msrb.mxu0 %v2884_v20  ;;  %v2248_v35 = vcvt.s32.f32 %v1224_v30  ;;  %v1288_v58 = vunpack.c.0.s8 %v6145_v1  ;;  %v2252_v50 = vcvt.s32.f32 %v1228_v11  ;;  %v1292_v5 = vunpack.c.1.s8 %v6145_v1 }
 0x181   : > { %v3623_v8 = vpop.f32.mrf.mxu2  ;;  %v3579_v42 = vpop.f32.mrf.mxu0  ;;  %4004 = vmatpush.bf16.msrb.mxu3 %v2980_v46  ;;  %3958 = vmatpush.bf16.msrb.mxu1 %v2916_v31  ;;  %v2944_v47 = vpack.c.bf16 %v2380_v39, %v2376_v29  ;;  %v1344_v21 = vunpack.c.2.s8 %v6156_v49  ;;  %v2444_v32 = vcvt.s32.f32 %v1420_v23  ;;  %v1348_v41 = vunpack.c.3.s8 %v6156_v49 }
 0x182   : > { %v3624_v28 = vadd.f32 %v3623_v8, %v3601_v48  ;;  %v3646_v4 = vpop.f32.mrf.mxu3  ;;  %v3580_v24 = vadd.f32 %v3579_v42, %v6124_v44  ;;  %v3602_v62 = vpop.f32.mrf.mxu1  ;;  %v1416_v44 = vunpack.c.0.s8 %v6139_v55  ;;  %v6162_v48 = vld [vmem:[%s5509_s21 + $0x608] sm:$0xff]  ;;  %v2312_v42 = vcvt.s32.f32 %v1288_v58 }
 0x183   : > { %v424_v8 = vld [vmem:[%s5509_s21 + $0x788] sm:$0xff]  ;;  %3982 = vmatpush.bf16.msrb.mxu2 %v2944_v47  ;;  %v1216_v51 = vunpack.c.2.s8 %v6162_v48  ;;  %v2880_v16 = vpack.c.bf16 %v2252_v50, %v2248_v35  ;;  %v2316_v56 = vcvt.s32.f32 %v1292_v5  ;;  %v2368_v55 = vcvt.s32.f32 %v1344_v21  ;;  %v6984_v21 = vld [vmem:[#allocation27_spill] sm:$0xff] }
 0x184   : > { %v6158_v0 = vadd.f32 %v3646_v4, %v3624_v28  ;;  %v3603_v36 = vadd.f32 %v3602_v62, %v3580_v24  ;;  %v2440_v10 = vcvt.s32.f32 %v1416_v44  ;;  %v1220_v28 = vunpack.c.3.s8 %v6162_v48  ;;  %v6173_v4 = vld [vmem:[%s5509_s21 + $0x688] sm:$0xff] }
 0x185   : > { %v2372_v20 = vcvt.s32.f32 %v1348_v41  ;;  %v2240_v46 = vcvt.s32.f32 %v1216_v51  ;;  %v1408_v31 = vunpack.c.2.s8 %v424_v8  ;;  %3936 = vmatpush.bf16.msrb.mxu0 %v2880_v16  ;;  %v2912_v44 = vpack.c.bf16 %v2316_v56, %v2312_v42  ;;  %v6986_v56 = vld [vmem:[#allocation29_spill] sm:$0xff] }
 0x186   : > { %v2976_v1 = vpack.c.bf16 %v2444_v32, %v2440_v10  ;;  %v2244_v47 = vcvt.s32.f32 %v1220_v28  ;;  %v1412_v23 = vunpack.c.3.s8 %v424_v8  ;;  %v1280_v50 = vunpack.c.2.s8 %v6173_v4 }
 0x187   : > { %v2940_v35 = vpack.c.bf16 %v2372_v20, %v2368_v55  ;;  %v2432_v58 = vcvt.s32.f32 %v1408_v31  ;;  %3959 = vmatpush.bf16.msrb.mxu1 %v2912_v44  ;;  %v1284_v32 = vunpack.c.3.s8 %v6173_v4  ;;  %v1336_v51 = vunpack.c.0.s8 %v6156_v49 }
 0x188   : > { %4005 = vmatpush.bf16.msrb.mxu3 %v2976_v1  ;;  %v2436_v42 = vcvt.s32.f32 %v1412_v23  ;;  %v2304_v41 = vcvt.s32.f32 %v1280_v50  ;;  %v1340_v16 = vunpack.c.1.s8 %v6156_v49  ;;  %v1208_v28 = vunpack.c.0.s8 %v6162_v48  ;;  %v6987_v1 = vld [vmem:[#allocation30_spill] sm:$0xff] }
 0x189   : > { %v3625_v24 = vpop.f32.mrf.mxu2  ;;  %v3582_v62 = vpop.f32.mrf.mxu0  ;;  %3983 = vmatpush.bf16.msrb.mxu2 %v2940_v35  ;;  %v2308_v55 = vcvt.s32.f32 %v1284_v32 }
 0x18a   : > { %v3626_v29 = vadd.f32 %v3625_v24, %v3603_v36  ;;  %v3648_v39 = vpop.f32.mrf.mxu3  ;;  %v3583_v30 = vadd.f32 %v3582_v62, %v6131_v17  ;;  %v3605_v11 = vpop.f32.mrf.mxu1  ;;  %v2876_v36 = vpack.c.bf16 %v2244_v47, %v2240_v46  ;;  %v6985_v17 = vld [vmem:[#allocation28_spill] sm:$0xff]  ;;  %v1212_v24 = vunpack.c.1.s8 %v6162_v48  ;;  %v6190_v47 = vld [vmem:[%s5509_s21 + $0x70] sm:$0xff] }
 0x18b   : > { %v1400_v62 = vunpack.c.0.s8 %v424_v8  ;;  %v2972_v20 = vpack.c.bf16 %v2436_v42, %v2432_v58  ;;  %v2360_v46 = vcvt.s32.f32 %v1336_v51  ;;  %v2364_v31 = vcvt.s32.f32 %v1340_v16 }
 0x18c   : > { %v6177_v5 = vadd.f32 %v3648_v39, %v3626_v29  ;;  %v3606_v10 = vadd.f32 %v3605_v11, %v3583_v30  ;;  %3852 = vmatmul.bf16.gmra.mxu0 %v6984_v21  ;;  %v1404_v29 = vunpack.c.1.s8 %v424_v8  ;;  %v229_v39 = vld [vmem:[%s5509_s21 + $0x170] sm:$0xff]  ;;  %v2908_v30 = vpack.c.bf16 %v2308_v55, %v2304_v41 }
 0x18d   : > { %3875 = vmatmul.bf16.gmra.mxu1 %v6985_v17  ;;  %3937 = vmatpush.bf16.msrb.mxu0 %v2876_v36  ;;  %v2232_v11 = vcvt.s32.f32 %v1208_v28  ;;  %v2236_v49 = vcvt.s32.f32 %v1212_v24  ;;  %v2424_v44 = vcvt.s32.f32 %v1400_v62  ;;  %v2936_v50 = vpack.c.bf16 %v2364_v31, %v2360_v46  ;;  %v245_v55 = vld [vmem:[%s5509_s21 + $0x1f0] sm:$0xff] }
 0x18e   : > { %3898 = vmatmul.bf16.gmra.mxu2 %v6986_v56  ;;  %4006 = vmatpush.bf16.msrb.mxu3 %v2972_v20  ;;  %v2428_v48 = vcvt.s32.f32 %v1404_v29  ;;  %v1272_v36 = vunpack.c.0.s8 %v6173_v4  ;;  %v1276_v58 = vunpack.c.1.s8 %v6173_v4  ;;  %v625_v51 = vunpack.c.2.s8 %v229_v39 }
 0x18f   : > { %3921 = vmatmul.bf16.gmra.mxu3 %v6987_v1  ;;  %3960 = vmatpush.bf16.msrb.mxu1 %v2908_v30  ;;  %v2872_v41 = vpack.c.bf16 %v2236_v49, %v2232_v11  ;;  %v629_v16 = vunpack.c.3.s8 %v229_v39  ;;  %v497_v20 = vunpack.c.2.s8 %v6190_v47  ;;  %v501_v4 = vunpack.c.3.s8 %v6190_v47 }
 0x190   : > { %3984 = vmatpush.bf16.msrb.mxu2 %v2936_v50  ;;  %v2968_v28 = vpack.c.bf16 %v2428_v48, %v2424_v44  ;;  %v2296_v24 = vcvt.s32.f32 %v1272_v36  ;;  %v2300_v62 = vcvt.s32.f32 %v1276_v58  ;;  %v1649_v31 = vcvt.s32.f32 %v625_v51 }
 0x191   : > { %v3628_v35 = vpop.f32.mrf.mxu2  ;;  %v3584_v23 = vpop.f32.mrf.mxu0  ;;  %3938 = vmatpush.bf16.msrb.mxu0 %v2872_v41  ;;  %v1653_v29 = vcvt.s32.f32 %v629_v16  ;;  %v1521_v30 = vcvt.s32.f32 %v497_v20  ;;  %v689_v11 = vunpack.c.2.s8 %v245_v55  ;;  %v693_v49 = vunpack.c.3.s8 %v245_v55 }
 0x192   : > { %v3629_v32 = vadd.f32 %v3628_v35, %v3606_v10  ;;  %v3651_v42 = vpop.f32.mrf.mxu3  ;;  %v3607_v8 = vpop.f32.mrf.mxu1  ;;  %v213_v10 = vld [vmem:[%s5509_s21 + $0xf0] sm:$0xff]  ;;  %4007 = vmatpush.bf16.msrb.mxu3 %v2968_v28  ;;  %v2904_v35 = vpack.c.bf16 %v2300_v62, %v2296_v24  ;;  %v1525_v50 = vcvt.s32.f32 %v501_v4  ;;  %v621_v51 = vunpack.c.1.s8 %v229_v39 }
 0x193   : > { %v2581_v8 = vpack.c.bf16 %v1653_v29, %v1649_v31  ;;  %v561_v44 = vunpack.c.2.s8 %v213_v10  ;;  %v1713_v48 = vcvt.s32.f32 %v689_v11  ;;  %v1717_v36 = vcvt.s32.f32 %v693_v49 }
 0x194   : > { %v3652_v46 = vadd.f32 %v3651_v42, %v3629_v32  ;;  %3961 = vmatpush.bf16.msrb.mxu1 %v2904_v35  ;;  %v565_v58 = vunpack.c.3.s8 %v213_v10  ;;  %v617_v32 = vunpack.c.0.s8 %v229_v39  ;;  %v2517_v42 = vpack.c.bf16 %v1525_v50, %v1521_v30  ;;  %v6988_v50 = vld [vmem:[#allocation31_spill] sm:$0xff] }
 0x195   : > { %4069 = vmatpush.bf16.msra.mxu2 %v2581_v8  ;;  %v1585_v41 = vcvt.s32.f32 %v561_v44  ;;  %v2613_v24 = vpack.c.bf16 %v1717_v36, %v1713_v48  ;;  %v1645_v4 = vcvt.s32.f32 %v621_v51  ;;  %v493_v35 = vunpack.c.1.s8 %v6190_v47 }
 0x196   : > { %v4759_v23 = vadd.f32 1.0, %v3652_v46  ;;  %v1589_v62 = vcvt.s32.f32 %v565_v58  ;;  %v1641_v20 = vcvt.s32.f32 %v617_v32  ;;  %v489_v46 = vunpack.c.0.s8 %v6190_v47  ;;  %4023 = vmatpush.bf16.msra.mxu0 %v2517_v42  ;;  %v6202_v32 = vld [vmem:[%s5509_s21 + $0x150] sm:$0xff]  ;;  %v6989_v47 = vld [vmem:[#allocation32_spill] sm:$0xff] }
 0x197   : > { %v681_v11 = vunpack.c.0.s8 %v245_v55  ;;  %v685_v49 = vunpack.c.1.s8 %v245_v55  ;;  %4092 = vmatpush.bf16.msra.mxu3 %v2613_v24  ;;  %v553_v8 = vunpack.c.0.s8 %v213_v10  ;;  %v1517_v48 = vcvt.s32.f32 %v493_v35  ;;  %v6205_v42 = vld [vmem:[%s5509_s21 + $0x50] sm:$0xff] }
 0x198   : > { %5243 = vrcp.f32 %v4759_v23  ;;  %v2549_v39 = vpack.c.bf16 %v1589_v62, %v1585_v41  ;;  %v1513_v23 = vcvt.s32.f32 %v489_v46  ;;  %v2577_v44 = vpack.c.bf16 %v1645_v4, %v1641_v20  ;;  %v6990_v62 = vld [vmem:[#allocation33_spill] sm:$0xff] }
 0x199   : > { %v3630_v16 = vpop.f32.mrf.mxu2  ;;  %v3664_v28 = vpop.f32.mrf.mxu0  ;;  %v1705_v36 = vcvt.s32.f32 %v681_v11  ;;  %v1709_v58 = vcvt.s32.f32 %v685_v49  ;;  %v557_v55 = vunpack.c.1.s8 %v213_v10  ;;  %v1577_v51 = vcvt.s32.f32 %v553_v8  ;;  %v6991_v10 = vld [vmem:[#allocation34_spill] sm:$0xff] }
 0x19a   : > { %v3653_v31 = vpop.f32.mrf.mxu3  ;;  %v3687_v29 = vpop.f32.mrf.mxu1  ;;  %v609_v16 = vunpack.c.2.s8 %v6202_v32  ;;  %v613_v41 = vunpack.c.3.s8 %v6202_v32  ;;  %4046 = vmatpush.bf16.msra.mxu1 %v2549_v39  ;;  %v2513_v20 = vpack.c.bf16 %v1517_v48, %v1513_v23  ;;  %4070 = vmatpush.bf16.msra.mxu2 %v2577_v44 }
 0x19b   : > { %v3688_v30 = vadd.f32 %v3687_v29, %v3664_v28  ;;  %v6211_v28 = vld [vmem:[%s5509_s21 + $0x1d0] sm:$0xff]  ;;  %v2609_v46 = vpack.c.bf16 %v1709_v58, %v1705_v36  ;;  %v481_v31 = vunpack.c.2.s8 %v6205_v42  ;;  %v485_v29 = vunpack.c.3.s8 %v6205_v42 }
 0x19c   : > { %3857 = vmatmul.bf16.gmra.mxu0 %v6988_v50  ;;  %v1581_v35 = vcvt.s32.f32 %v557_v55  ;;  %v1633_v11 = vcvt.s32.f32 %v609_v16  ;;  %v1637_v49 = vcvt.s32.f32 %v613_v41  ;;  %v673_v39 = vunpack.c.2.s8 %v6211_v28 }
 0x19d   : > { %3880 = vmatmul.bf16.gmra.mxu1 %v6989_v47  ;;  %4024 = vmatpush.bf16.msra.mxu0 %v2513_v20  ;;  %v1505_v8 = vcvt.s32.f32 %v481_v31  ;;  %v677_v23 = vunpack.c.3.s8 %v6211_v28 }
 0x19e   : > { %v5244_v24 = vpop.eup %5243  ;;  %3903 = vmatmul.bf16.gmra.mxu2 %v6990_v62  ;;  %4093 = vmatpush.bf16.msra.mxu3 %v2609_v46  ;;  %v1509_v62 = vcvt.s32.f32 %v485_v29  ;;  %v2545_v46 = vpack.c.bf16 %v1581_v35, %v1577_v51  ;;  %v2573_v31 = vpack.c.bf16 %v1637_v49, %v1633_v11  ;;  %v473_v11 = vunpack.c.0.s8 %v6205_v42 }
 0x19f   : > { %v4767_v4 = vperm.slane %v5244_v24, 0  ;;  %3926 = vmatmul.bf16.gmra.mxu3 %v6991_v10  ;;  %v209_v10 = vld [vmem:[%s5509_s21 + $0xd0] sm:$0xff]  ;;  %v477_v49 = vunpack.c.1.s8 %v6205_v42 }
 0x1a0   : > { %v2509_v29 = vpack.c.bf16 %v1509_v62, %v1505_v8  ;;  %4047 = vmatpush.bf16.msra.mxu1 %v2545_v46  ;;  %4071 = vmatpush.bf16.msra.mxu2 %v2573_v31  ;;  %v549_v51 = vunpack.c.3.s8 %v209_v10  ;;  %v601_v62 = vunpack.c.0.s8 %v6202_v32  ;;  %v665_v8 = vunpack.c.0.s8 %v6211_v28 }
 0x1a1   : > { %v4771_v48 = vmul.f32 %v4767_v4, %v6133_v25  ;;  %v4775_v36 = vmul.f32 %v4767_v4, %v6141_v6  ;;  %v4779_v58 = vmul.f32 %v4767_v4, %v6158_v0  ;;  %v4783_v44 = vmul.f32 %v4767_v4, %v6177_v5  ;;  %v3710_v55 = vpop.f32.mrf.mxu2  ;;  %v3666_v16 = vpop.f32.mrf.mxu0 }
 0x1a2   : > { %v3711_v41 = vadd.f32 %v3710_v55, %v3688_v30  ;;  %v3733_v24 = vpop.f32.mrf.mxu3  ;;  %v3689_v20 = vpop.f32.mrf.mxu1  ;;  %v1697_v0 = vcvt.s32.f32 %v673_v39  ;;  %v1701_v5 = vcvt.s32.f32 %v677_v23  ;;  %4025 = vmatpush.bf16.msra.mxu0 %v2509_v29  ;;  %v545_v30 = vunpack.c.2.s8 %v209_v10 }
 0x1a3   : > { %v4787_v47 = vmax.f32 %v4771_v48, 0.0  ;;  %v4791_v50 = vmax.f32 %v4775_v36, 0.0  ;;  %v4795_v1 = vmax.f32 %v4779_v58, 0.0  ;;  %v4799_v25 = vmax.f32 %v4783_v44, 0.0  ;;  %v6240_v36 = vld [vmem:[%s5509_s21 + $0x130] sm:$0xff] }
 0x1a4   : > { %v6225_v56 = vadd.f32 %v3733_v24, %v3711_v41  ;;  %v3690_v6 = vadd.f32 %v3689_v20, %v3666_v16  ;;  %v605_v4 = vunpack.c.1.s8 %v6202_v32  ;;  %v2605_v35 = vpack.c.bf16 %v1701_v5, %v1697_v0  ;;  %v189_v20 = vld [vmem:[%s5509_s21 + $0x30] sm:$0xff] }
 0x1a5   : > { %4803 = vst [vmem:[%s6229_s20] sm:$0xff] %v4787_v47  ;;  %v1569_v39 = vcvt.s32.f32 %v545_v30  ;;  %v1573_v47 = vcvt.s32.f32 %v549_v51  ;;  %v1625_v23 = vcvt.s32.f32 %v601_v62  ;;  %v1497_v58 = vcvt.s32.f32 %v473_v11  ;;  %v6247_v30 = vld [vmem:[%s5509_s21 + $0x1b0] sm:$0xff] }
 0x1a6   : > { %4807 = vst [vmem:[%s6229_s20 + $0x20] sm:$0xff] %v4791_v50  ;;  %v1629_v48 = vcvt.s32.f32 %v605_v4  ;;  %4094 = vmatpush.bf16.msra.mxu3 %v2605_v35  ;;  %v1501_v32 = vcvt.s32.f32 %v477_v49  ;;  %v669_v50 = vunpack.c.1.s8 %v6211_v28  ;;  %v1689_v44 = vcvt.s32.f32 %v665_v8  ;;  %v6251_v35 = vld [vmem:[%s5509_s21 + $0xb0] sm:$0xff] }
 0x1a7   : > { %4811 = vst [vmem:[%s6229_s20 + $0x40] sm:$0xff] %v4795_v1  ;;  %v2541_v16 = vpack.c.bf16 %v1573_v47, %v1569_v39  ;;  %v537_v1 = vunpack.c.0.s8 %v209_v10  ;;  %v541_v24 = vunpack.c.1.s8 %v209_v10  ;;  %v593_v5 = vunpack.c.2.s8 %v6240_v36 }
 0x1a8   : > { %4815 = vst [vmem:[%s6229_s20 + $0x60] sm:$0xff] %v4799_v25  ;;  %v2569_v41 = vpack.c.bf16 %v1629_v48, %v1625_v23  ;;  %v2505_v0 = vpack.c.bf16 %v1501_v32, %v1497_v58  ;;  %v1693_v25 = vcvt.s32.f32 %v669_v50  ;;  %v597_v4 = vunpack.c.3.s8 %v6240_v36  ;;  %v6992_v48 = vld [vmem:[#allocation36_spill] sm:$0xff] }
 0x1a9   : > { %v3712_v55 = vpop.f32.mrf.mxu2  ;;  %v3669_v42 = vpop.f32.mrf.mxu0  ;;  %4048 = vmatpush.bf16.msra.mxu1 %v2541_v16  ;;  %v1561_v28 = vcvt.s32.f32 %v537_v1  ;;  %v1565_v62 = vcvt.s32.f32 %v541_v24  ;;  %v1617_v11 = vcvt.s32.f32 %v593_v5  ;;  %v465_v49 = vunpack.c.2.s8 %v189_v20 }
 0x1aa   : > { %v3713_v46 = vadd.f32 %v3712_v55, %v3690_v6  ;;  %v3735_v31 = vpop.f32.mrf.mxu3  ;;  %v3692_v29 = vpop.f32.mrf.mxu1  ;;  %4072 = vmatpush.bf16.msra.mxu2 %v2569_v41  ;;  %v2601_v6 = vpack.c.bf16 %v1693_v25, %v1689_v44  ;;  %4026 = vmatpush.bf16.msra.mxu0 %v2505_v0  ;;  %v1621_v39 = vcvt.s32.f32 %v597_v4  ;;  %v469_v47 = vunpack.c.3.s8 %v189_v20  ;;  %v6993_v55 = vld [vmem:[#allocation37_spill] sm:$0xff] }
 0x1ab   : > { %v3693_v51 = vadd.f32 %v3692_v29, %v3669_v42  ;;  %v2537_v8 = vpack.c.bf16 %v1565_v62, %v1561_v28  ;;  %v657_v23 = vunpack.c.2.s8 %v6247_v30  ;;  %v1489_v58 = vcvt.s32.f32 %v465_v49 }
 0x1ac   : > { %v6253_v10 = vadd.f32 %v3735_v31, %v3713_v46  ;;  %3939 = vmatmul.bf16.vlgmr.msrb.gmra.mxu0 %v5810_v13  ;;  %4095 = vmatpush.bf16.msra.mxu3 %v2601_v6  ;;  %v661_v32 = vunpack.c.3.s8 %v6247_v30  ;;  %v529_v50 = vunpack.c.2.s8 %v6251_v35  ;;  %v533_v44 = vunpack.c.3.s8 %v6251_v35 }
 0x1ad   : > { %3962 = vmatmul.bf16.vlgmr.msrb.gmra.mxu1 %v5815_v53  ;;  %v2565_v42 = vpack.c.bf16 %v1621_v39, %v1617_v11  ;;  %v1493_v16 = vcvt.s32.f32 %v469_v47  ;;  %v1681_v41 = vcvt.s32.f32 %v657_v23  ;;  %v585_v1 = vunpack.c.0.s8 %v6240_v36 }
 0x1ae   : > { %3985 = vmatmul.bf16.vlgmr.msrb.gmra.mxu2 %v6992_v48  ;;  %4049 = vmatpush.bf16.msra.mxu1 %v2537_v8  ;;  %v1685_v24 = vcvt.s32.f32 %v661_v32  ;;  %v1553_v46 = vcvt.s32.f32 %v529_v50  ;;  %v1557_v31 = vcvt.s32.f32 %v533_v44  ;;  %v589_v29 = vunpack.c.1.s8 %v6240_v36  ;;  %v217_v44 = vld [vmem:[%s5509_s21 + $0x110] sm:$0xff] }
 0x1af   : > { %4008 = vmatmul.bf16.vlgmr.msrb.gmra.mxu3 %v6993_v55  ;;  %4073 = vmatpush.bf16.msra.mxu2 %v2565_v42  ;;  %v2501_v5 = vpack.c.bf16 %v1493_v16, %v1489_v58  ;;  %v1609_v28 = vcvt.s32.f32 %v585_v1  ;;  %v457_v62 = vunpack.c.0.s8 %v189_v20  ;;  %v461_v4 = vunpack.c.1.s8 %v189_v20  ;;  %v6268_v42 = vld [vmem:[%s5509_s21 + $0x10] sm:$0xff] }
 0x1b0   : > { %v2597_v8 = vpack.c.bf16 %v1685_v24, %v1681_v41  ;;  %v2533_v39 = vpack.c.bf16 %v1557_v31, %v1553_v46  ;;  %v1613_v47 = vcvt.s32.f32 %v589_v29  ;;  %v649_v50 = vunpack.c.0.s8 %v6247_v30  ;;  %v6275_v41 = vld [vmem:[%s5509_s21 + $0x190] sm:$0xff] }
 0x1b1   : > { %v3715_v0 = vpop.f32.mrf.mxu2  ;;  %v3671_v25 = vpop.f32.mrf.mxu0  ;;  %4027 = vmatpush.bf16.msra.mxu0 %v2501_v5  ;;  %v1481_v32 = vcvt.s32.f32 %v457_v62  ;;  %v1485_v36 = vcvt.s32.f32 %v461_v4  ;;  %v521_v16 = vunpack.c.0.s8 %v6251_v35  ;;  %v525_v46 = vunpack.c.1.s8 %v6251_v35  ;;  %v201_v62 = vld [vmem:[%s5509_s21 + $0x90] sm:$0xff] }
 0x1b2   : > { %v3716_v6 = vadd.f32 %v3715_v0, %v3693_v51  ;;  %v3738_v11 = vpop.f32.mrf.mxu3  ;;  %v3694_v49 = vpop.f32.mrf.mxu1  ;;  %4096 = vmatpush.bf16.msra.mxu3 %v2597_v8  ;;  %4050 = vmatpush.bf16.msra.mxu1 %v2533_v39  ;;  %v2561_v20 = vpack.c.bf16 %v1613_v47, %v1609_v28  ;;  %v653_v51 = vunpack.c.1.s8 %v6247_v30  ;;  %v1673_v24 = vcvt.s32.f32 %v649_v50 }
 0x1b3   : > { %v3695_v23 = vadd.f32 %v3694_v49, %v3671_v25  ;;  %v2497_v1 = vpack.c.bf16 %v1485_v36, %v1481_v32  ;;  %v577_v31 = vunpack.c.2.s8 %v217_v44  ;;  %v1545_v0 = vcvt.s32.f32 %v521_v16 }
 0x1b4   : > { %v6270_v58 = vadd.f32 %v3738_v11, %v3716_v6  ;;  %4074 = vmatpush.bf16.msra.mxu2 %v2561_v20  ;;  %v1677_v29 = vcvt.s32.f32 %v653_v51  ;;  %v581_v25 = vunpack.c.3.s8 %v217_v44  ;;  %v449_v5 = vunpack.c.2.s8 %v6268_v42 }
 0x1b5   : > { %4028 = vmatpush.bf16.msra.mxu0 %v2497_v1  ;;  %v1549_v28 = vcvt.s32.f32 %v525_v46  ;;  %v1601_v4 = vcvt.s32.f32 %v577_v31  ;;  %v453_v30 = vunpack.c.3.s8 %v6268_v42  ;;  %v641_v6 = vunpack.c.2.s8 %v6275_v41 }
 0x1b6   : > { %v2593_v11 = vpack.c.bf16 %v1677_v29, %v1673_v24  ;;  %v1605_v49 = vcvt.s32.f32 %v581_v25  ;;  %v1473_v8 = vcvt.s32.f32 %v449_v5  ;;  %v645_v35 = vunpack.c.3.s8 %v6275_v41 }
 0x1b7   : > { %v2529_v32 = vpack.c.bf16 %v1549_v28, %v1545_v0  ;;  %v1477_v36 = vcvt.s32.f32 %v453_v30  ;;  %v1665_v50 = vcvt.s32.f32 %v641_v6  ;;  %v513_v20 = vunpack.c.2.s8 %v201_v62 }
 0x1b8   : > { %4097 = vmatpush.bf16.msra.mxu3 %v2593_v11  ;;  %v2557_v46 = vpack.c.bf16 %v1605_v49, %v1601_v4  ;;  %v1669_v31 = vcvt.s32.f32 %v645_v35  ;;  %v517_v55 = vunpack.c.3.s8 %v201_v62  ;;  %v569_v25 = vunpack.c.0.s8 %v217_v44  ;;  %v6994_v49 = vld [vmem:[#allocation40_spill] sm:$0xff] }
 0x1b9   : > { %v3717_v39 = vpop.f32.mrf.mxu2  ;;  %v3674_v47 = vpop.f32.mrf.mxu0  ;;  %4051 = vmatpush.bf16.msra.mxu1 %v2529_v32  ;;  %v2493_v24 = vpack.c.bf16 %v1477_v36, %v1473_v8  ;;  %v1537_v29 = vcvt.s32.f32 %v513_v20  ;;  %v573_v30 = vunpack.c.1.s8 %v217_v44  ;;  %v441_v4 = vunpack.c.0.s8 %v6268_v42  ;;  %v293_v20 = vld [vmem:[%s5509_s21 + $0x370] sm:$0xff] }
 0x1ba   : > { %v3718_v51 = vadd.f32 %v3717_v39, %v3695_v23  ;;  %v3740_v16 = vpop.f32.mrf.mxu3  ;;  %v3697_v1 = vpop.f32.mrf.mxu1  ;;  %4075 = vmatpush.bf16.msra.mxu2 %v2557_v46  ;;  %v2589_v0 = vpack.c.bf16 %v1669_v31, %v1665_v50  ;;  %v1541_v28 = vcvt.s32.f32 %v517_v55  ;;  %v1593_v23 = vcvt.s32.f32 %v569_v25  ;;  %v6995_v39 = vld [vmem:[#allocation41_spill] sm:$0xff] }
 0x1bb   : > { %v3698_v48 = vadd.f32 %v3697_v1, %v3674_v47  ;;  %4029 = vmatpush.bf16.msra.mxu0 %v2493_v24  ;;  %v445_v6 = vunpack.c.1.s8 %v6268_v42  ;;  %v633_v11 = vunpack.c.0.s8 %v6275_v41  ;;  %v1597_v35 = vcvt.s32.f32 %v573_v30  ;;  %v309_v31 = vld [vmem:[%s5509_s21 + $0x3f0] sm:$0xff] }
 0x1bc   : > { %v6283_v5 = vadd.f32 %v3740_v16, %v3718_v51  ;;  %3944 = vmatmul.bf16.gmra.mxu0 %v5861_v38  ;;  %4098 = vmatpush.bf16.msra.mxu3 %v2589_v0  ;;  %v2525_v8 = vpack.c.bf16 %v1541_v28, %v1537_v29  ;;  %v637_v55 = vunpack.c.1.s8 %v6275_v41  ;;  %v505_v44 = vunpack.c.0.s8 %v201_v62  ;;  %v261_v51 = vld [vmem:[%s5509_s21 + $0x270] sm:$0xff] }
 0x1bd   : > { %3967 = vmatmul.bf16.gmra.mxu1 %v5863_v18  ;;  %v1465_v47 = vcvt.s32.f32 %v441_v4  ;;  %v1469_v32 = vcvt.s32.f32 %v445_v6  ;;  %v1657_v36 = vcvt.s32.f32 %v633_v11  ;;  %v509_v50 = vunpack.c.1.s8 %v201_v62 }
 0x1be   : > { %3990 = vmatmul.bf16.gmra.mxu2 %v6994_v49  ;;  %4052 = vmatpush.bf16.msra.mxu1 %v2525_v8  ;;  %v2553_v42 = vpack.c.bf16 %v1597_v35, %v1593_v23  ;;  %v1661_v16 = vcvt.s32.f32 %v637_v55  ;;  %v1529_v1 = vcvt.s32.f32 %v505_v44  ;;  %v881_v46 = vunpack.c.2.s8 %v293_v20 }
 0x1bf   : > { %4013 = vmatmul.bf16.gmra.mxu3 %v6995_v39  ;;  %v2489_v25 = vpack.c.bf16 %v1469_v32, %v1465_v47  ;;  %v1533_v0 = vcvt.s32.f32 %v509_v50  ;;  %v885_v41 = vunpack.c.3.s8 %v293_v20  ;;  %v753_v28 = vunpack.c.2.s8 %v261_v51  ;;  %v277_v50 = vld [vmem:[%s5509_s21 + $0x2f0] sm:$0xff] }
 0x1c0   : > { %4076 = vmatpush.bf16.msra.mxu2 %v2553_v42  ;;  %v2585_v62 = vpack.c.bf16 %v1661_v16, %v1657_v36  ;;  %v1905_v11 = vcvt.s32.f32 %v881_v46  ;;  %v757_v39 = vunpack.c.3.s8 %v261_v51  ;;  %v945_v55 = vunpack.c.2.s8 %v309_v31 }
 0x1c1   : > { %v3720_v24 = vpop.f32.mrf.mxu2  ;;  %v3676_v29 = vpop.f32.mrf.mxu0  ;;  %4030 = vmatpush.bf16.msra.mxu0 %v2489_v25  ;;  %v2521_v23 = vpack.c.bf16 %v1533_v0, %v1529_v1  ;;  %v1909_v8 = vcvt.s32.f32 %v885_v41  ;;  %v1777_v35 = vcvt.s32.f32 %v753_v28  ;;  %v949_v32 = vunpack.c.3.s8 %v309_v31 }
 0x1c2   : > { %v3721_v30 = vadd.f32 %v3720_v24, %v3698_v48  ;;  %v3743_v4 = vpop.f32.mrf.mxu3  ;;  %v3699_v6 = vpop.f32.mrf.mxu1  ;;  %4099 = vmatpush.bf16.msra.mxu3 %v2585_v62  ;;  %v1781_v47 = vcvt.s32.f32 %v757_v39  ;;  %v873_v29 = vunpack.c.0.s8 %v293_v20  ;;  %v1969_v24 = vcvt.s32.f32 %v945_v55 }
 0x1c3   : > { %4053 = vmatpush.bf16.msra.mxu1 %v2521_v23  ;;  %v2709_v48 = vpack.c.bf16 %v1909_v8, %v1905_v11  ;;  %v817_v6 = vunpack.c.2.s8 %v277_v50  ;;  %v821_v42 = vunpack.c.3.s8 %v277_v50  ;;  %v1973_v16 = vcvt.s32.f32 %v949_v32 }
 0x1c4   : > { %v6296_v44 = vadd.f32 %v3743_v4, %v3721_v30  ;;  %v2645_v36 = vpack.c.bf16 %v1781_v47, %v1777_v35  ;;  %v877_v46 = vunpack.c.1.s8 %v293_v20  ;;  %v1897_v25 = vcvt.s32.f32 %v873_v29 }
 0x1c5   : > { %4161 = vmatpush.bf16.msrb.mxu2 %v2709_v48  ;;  %v1841_v1 = vcvt.s32.f32 %v817_v6  ;;  %v1845_v0 = vcvt.s32.f32 %v821_v42  ;;  %v745_v41 = vunpack.c.0.s8 %v261_v51  ;;  %v749_v28 = vunpack.c.1.s8 %v261_v51  ;;  %v289_v42 = vld [vmem:[%s5509_s21 + $0x350] sm:$0xff] }
 0x1c6   : > { %4115 = vmatpush.bf16.msrb.mxu0 %v2645_v36  ;;  %v2741_v30 = vpack.c.bf16 %v1973_v16, %v1969_v24  ;;  %v1901_v39 = vcvt.s32.f32 %v877_v46  ;;  %v937_v4 = vunpack.c.0.s8 %v309_v31  ;;  %v941_v62 = vunpack.c.1.s8 %v309_v31  ;;  %v257_v36 = vld [vmem:[%s5509_s21 + $0x250] sm:$0xff] }
 0x1c7   : > { %v2677_v11 = vpack.c.bf16 %v1845_v0, %v1841_v1  ;;  %v1769_v8 = vcvt.s32.f32 %v745_v41  ;;  %v1773_v55 = vcvt.s32.f32 %v749_v28  ;;  %v809_v18 = vunpack.c.0.s8 %v277_v50  ;;  %v305_v16 = vld [vmem:[%s5509_s21 + $0x3d0] sm:$0xff] }
 0x1c8   : > { %4184 = vmatpush.bf16.msrb.mxu3 %v2741_v30  ;;  %v2705_v51 = vpack.c.bf16 %v1901_v39, %v1897_v25  ;;  %v1961_v32 = vcvt.s32.f32 %v937_v4  ;;  %v1965_v29 = vcvt.s32.f32 %v941_v62  ;;  %v813_v31 = vunpack.c.1.s8 %v277_v50  ;;  %v273_v4 = vld [vmem:[%s5509_s21 + $0x2d0] sm:$0xff] }
 0x1c9   : > { %v3722_v49 = vpop.f32.mrf.mxu2  ;;  %v3756_v23 = vpop.f32.mrf.mxu0  ;;  %4138 = vmatpush.bf16.msrb.mxu1 %v2677_v11  ;;  %v2641_v48 = vpack.c.bf16 %v1773_v55, %v1769_v8  ;;  %v865_v46 = vunpack.c.2.s8 %v289_v42  ;;  %v869_v25 = vunpack.c.3.s8 %v289_v42  ;;  %v737_v1 = vunpack.c.2.s8 %v257_v36 }
 0x1ca   : > { %v3745_v35 = vpop.f32.mrf.mxu3  ;;  %v3757_v20 = vadd.f32 %v3756_v23, %v6225_v56  ;;  %v3779_v47 = vpop.f32.mrf.mxu1  ;;  %v1833_v49 = vcvt.s32.f32 %v809_v18  ;;  %4162 = vmatpush.bf16.msrb.mxu2 %v2705_v51  ;;  %v2737_v6 = vpack.c.bf16 %v1965_v29, %v1961_v32  ;;  %v1837_v56 = vcvt.s32.f32 %v813_v31 }
 0x1cb   : > { %4116 = vmatpush.bf16.msrb.mxu0 %v2641_v48  ;;  %v741_v18 = vunpack.c.3.s8 %v257_v36  ;;  %v929_v50 = vunpack.c.2.s8 %v305_v16  ;;  %v933_v0 = vunpack.c.3.s8 %v305_v16  ;;  %v1889_v28 = vcvt.s32.f32 %v865_v46 }
 0x1cc   : > { %v3780_v24 = vadd.f32 %v3779_v47, %v3757_v20  ;;  %3949 = vmatmul.bf16.gmra.mxu0 %v5905_v45  ;;  %4185 = vmatpush.bf16.msrb.mxu3 %v2737_v6  ;;  %v2673_v41 = vpack.c.bf16 %v1837_v56, %v1833_v49  ;;  %v1893_v30 = vcvt.s32.f32 %v869_v25  ;;  %v1761_v39 = vcvt.s32.f32 %v737_v1 }
 0x1cd   : > { %3972 = vmatmul.bf16.gmra.mxu1 %v5907_v59  ;;  %v1765_v62 = vcvt.s32.f32 %v741_v18  ;;  %v1953_v23 = vcvt.s32.f32 %v929_v50  ;;  %v1957_v11 = vcvt.s32.f32 %v933_v0  ;;  %v801_v8 = vunpack.c.2.s8 %v273_v4 }
 0x1ce   : > { %3995 = vmatmul.bf16.gmra.mxu2 %v5909_v27  ;;  %4139 = vmatpush.bf16.msrb.mxu1 %v2673_v41  ;;  %v2701_v20 = vpack.c.bf16 %v1893_v30, %v1889_v28  ;;  %v805_v47 = vunpack.c.3.s8 %v273_v4  ;;  %v857_v51 = vunpack.c.0.s8 %v289_v42  ;;  %v861_v32 = vunpack.c.1.s8 %v289_v42  ;;  %v6312_v41 = vld [vmem:[%s5509_s21 + $0x330] sm:$0xff] }
 0x1cf   : > { %4018 = vmatmul.bf16.gmra.mxu3 %v5911_v54  ;;  %v2637_v6 = vpack.c.bf16 %v1765_v62, %v1761_v39  ;;  %v2733_v56 = vpack.c.bf16 %v1957_v11, %v1953_v23  ;;  %v1825_v46 = vcvt.s32.f32 %v801_v8  ;;  %v729_v42 = vunpack.c.0.s8 %v257_v36  ;;  %v6315_v62 = vld [vmem:[%s5509_s21 + $0x230] sm:$0xff] }
 0x1d0   : > { %4163 = vmatpush.bf16.msrb.mxu2 %v2701_v20  ;;  %v1829_v25 = vcvt.s32.f32 %v805_v47  ;;  %v1881_v1 = vcvt.s32.f32 %v857_v51  ;;  %v1885_v18 = vcvt.s32.f32 %v861_v32  ;;  %v921_v30 = vunpack.c.0.s8 %v305_v16 }
 0x1d1   : > { %v3802_v55 = vpop.f32.mrf.mxu2  ;;  %v3758_v35 = vpop.f32.mrf.mxu0  ;;  %4117 = vmatpush.bf16.msrb.mxu0 %v2637_v6  ;;  %4186 = vmatpush.bf16.msrb.mxu3 %v2733_v56  ;;  %v925_v39 = vunpack.c.1.s8 %v305_v16  ;;  %v1753_v23 = vcvt.s32.f32 %v729_v42  ;;  %v793_v8 = vunpack.c.0.s8 %v273_v4  ;;  %v849_v47 = vunpack.c.2.s8 %v6312_v41 }
 0x1d2   : > { %v3803_v29 = vadd.f32 %v3802_v55, %v3780_v24  ;;  %v3825_v48 = vpop.f32.mrf.mxu3  ;;  %v3759_v31 = vadd.f32 %v3758_v35, %v6253_v10  ;;  %v3781_v49 = vpop.f32.mrf.mxu1  ;;  %v733_v24 = vunpack.c.1.s8 %v257_v36  ;;  %v2669_v28 = vpack.c.bf16 %v1829_v25, %v1825_v46 }
 0x1d3   : > { %v2697_v10 = vpack.c.bf16 %v1885_v18, %v1881_v1  ;;  %v797_v55 = vunpack.c.1.s8 %v273_v4  ;;  %v1945_v35 = vcvt.s32.f32 %v921_v30  ;;  %v1949_v20 = vcvt.s32.f32 %v925_v39 }
 0x1d4   : > { %v6309_v50 = vadd.f32 %v3825_v48, %v3803_v29  ;;  %v3782_v0 = vadd.f32 %v3781_v49, %v3759_v31  ;;  %v1757_v11 = vcvt.s32.f32 %v733_v24  ;;  %4140 = vmatpush.bf16.msrb.mxu1 %v2669_v28  ;;  %v853_v36 = vunpack.c.3.s8 %v6312_v41  ;;  %v301_v48 = vld [vmem:[%s5509_s21 + $0x3b0] sm:$0xff] }
 0x1d5   : > { %4164 = vmatpush.bf16.msrb.mxu2 %v2697_v10  ;;  %v1817_v32 = vcvt.s32.f32 %v793_v8  ;;  %v1821_v29 = vcvt.s32.f32 %v797_v55  ;;  %v721_v16 = vunpack.c.2.s8 %v6315_v62  ;;  %v2729_v6 = vpack.c.bf16 %v1949_v20, %v1945_v35  ;;  %v269_v10 = vld [vmem:[%s5509_s21 + $0x2b0] sm:$0xff] }
 0x1d6   : > { %v2633_v51 = vpack.c.bf16 %v1757_v11, %v1753_v23  ;;  %v1873_v56 = vcvt.s32.f32 %v849_v47  ;;  %v1877_v4 = vcvt.s32.f32 %v853_v36  ;;  %v725_v46 = vunpack.c.3.s8 %v6315_v62 }
 0x1d7   : > { %v2665_v24 = vpack.c.bf16 %v1821_v29, %v1817_v32  ;;  %v1745_v28 = vcvt.s32.f32 %v721_v16  ;;  %4187 = vmatpush.bf16.msrb.mxu3 %v2729_v6  ;;  %v913_v23 = vunpack.c.2.s8 %v301_v48  ;;  %v917_v11 = vunpack.c.3.s8 %v301_v48  ;;  %v6996_v16 = vld [vmem:[#allocation11_spill] sm:$0xff] }
 0x1d8   : > { %4118 = vmatpush.bf16.msrb.mxu0 %v2633_v51  ;;  %v2693_v30 = vpack.c.bf16 %v1877_v4, %v1873_v56  ;;  %v1749_v39 = vcvt.s32.f32 %v725_v46  ;;  %v789_v35 = vunpack.c.3.s8 %v269_v10  ;;  %v841_v36 = vunpack.c.0.s8 %v6312_v41 }
 0x1d9   : > { %v3804_v31 = vpop.f32.mrf.mxu2  ;;  %v3761_v49 = vpop.f32.mrf.mxu0  ;;  %4141 = vmatpush.bf16.msrb.mxu1 %v2665_v24  ;;  %v1937_v20 = vcvt.s32.f32 %v913_v23  ;;  %v1941_v47 = vcvt.s32.f32 %v917_v11  ;;  %v845_v29 = vunpack.c.1.s8 %v6312_v41  ;;  %v713_v6 = vunpack.c.0.s8 %v6315_v62 }
 0x1da   : > { %v3805_v25 = vadd.f32 %v3804_v31, %v3782_v0  ;;  %v3827_v1 = vpop.f32.mrf.mxu3  ;;  %v3762_v18 = vadd.f32 %v3761_v49, %v6270_v58  ;;  %v3784_v42 = vpop.f32.mrf.mxu1  ;;  %v785_v0 = vunpack.c.2.s8 %v269_v10  ;;  %4165 = vmatpush.bf16.msrb.mxu2 %v2693_v30  ;;  %v2629_v58 = vpack.c.bf16 %v1749_v39, %v1745_v28 }
 0x1db   : > { %v1813_v32 = vcvt.s32.f32 %v789_v35  ;;  %v2725_v31 = vpack.c.bf16 %v1941_v47, %v1937_v20  ;;  %v1865_v49 = vcvt.s32.f32 %v841_v36  ;;  %v717_v56 = vunpack.c.1.s8 %v6315_v62  ;;  %v281_v36 = vld [vmem:[%s5509_s21 + $0x310] sm:$0xff] }
 0x1dc   : > { %v6324_v8 = vadd.f32 %v3827_v1, %v3805_v25  ;;  %v3785_v55 = vadd.f32 %v3784_v42, %v3762_v18  ;;  %4031 = vmatmul.bf16.vlgmr.msra.gmra.mxu0 %v5532_v52  ;;  %v1809_v51 = vcvt.s32.f32 %v785_v0  ;;  %v1869_v46 = vcvt.s32.f32 %v845_v29 }
 0x1dd   : > { %4054 = vmatmul.bf16.vlgmr.msra.gmra.mxu1 %v5535_v57  ;;  %4119 = vmatpush.bf16.msrb.mxu0 %v2629_v58  ;;  %v905_v25 = vunpack.c.0.s8 %v301_v48  ;;  %v909_v1 = vunpack.c.1.s8 %v301_v48  ;;  %v1737_v24 = vcvt.s32.f32 %v713_v6  ;;  %v1741_v41 = vcvt.s32.f32 %v717_v56  ;;  %v265_v6 = vld [vmem:[%s5509_s21 + $0x290] sm:$0xff] }
 0x1de   : > { %4077 = vmatmul.bf16.vlgmr.msra.gmra.mxu2 %v5539_v61  ;;  %v2661_v4 = vpack.c.bf16 %v1813_v32, %v1809_v51  ;;  %4188 = vmatpush.bf16.msrb.mxu3 %v2725_v31  ;;  %v777_v28 = vunpack.c.0.s8 %v269_v10  ;;  %v781_v30 = vunpack.c.1.s8 %v269_v10  ;;  %v2689_v62 = vpack.c.bf16 %v1869_v46, %v1865_v49  ;;  %v249_v51 = vld [vmem:[%s5509_s21 + $0x210] sm:$0xff] }
 0x1df   : > { %4100 = vmatmul.bf16.vlgmr.msra.gmra.mxu3 %v6996_v16  ;;  %v1929_v35 = vcvt.s32.f32 %v905_v25  ;;  %v2625_v48 = vpack.c.bf16 %v1741_v41, %v1737_v24  ;;  %v1933_v58 = vcvt.s32.f32 %v909_v1  ;;  %v297_v32 = vld [vmem:[%s5509_s21 + $0x390] sm:$0xff]  ;;  %v833_v10 = vunpack.c.2.s8 %v281_v36 }
 0x1e0   : > { %4142 = vmatpush.bf16.msrb.mxu1 %v2661_v4  ;;  %v1801_v20 = vcvt.s32.f32 %v777_v28  ;;  %v1805_v47 = vcvt.s32.f32 %v781_v30  ;;  %4166 = vmatpush.bf16.msrb.mxu2 %v2689_v62  ;;  %v705_v4 = vunpack.c.2.s8 %v249_v51  ;;  %v709_v49 = vunpack.c.3.s8 %v249_v51 }
 0x1e1   : > { %v3807_v18 = vpop.f32.mrf.mxu2  ;;  %v3763_v42 = vpop.f32.mrf.mxu0  ;;  %4120 = vmatpush.bf16.msrb.mxu0 %v2625_v48  ;;  %v1857_v46 = vcvt.s32.f32 %v833_v10  ;;  %v897_v1 = vunpack.c.2.s8 %v297_v32  ;;  %v769_v41 = vunpack.c.2.s8 %v265_v6  ;;  %v773_v28 = vunpack.c.3.s8 %v265_v6 }
 0x1e2   : > { %v3808_v39 = vadd.f32 %v3807_v18, %v3785_v55  ;;  %v3830_v23 = vpop.f32.mrf.mxu3  ;;  %v3764_v11 = vadd.f32 %v3763_v42, %v6283_v5  ;;  %v3786_v0 = vpop.f32.mrf.mxu1  ;;  %v837_v55 = vunpack.c.3.s8 %v281_v36  ;;  %v2721_v5 = vpack.c.bf16 %v1933_v58, %v1929_v35 }
 0x1e3   : > { %v2657_v56 = vpack.c.bf16 %v1805_v47, %v1801_v20  ;;  %v901_v18 = vunpack.c.3.s8 %v297_v32  ;;  %v1729_v42 = vcvt.s32.f32 %v705_v4  ;;  %v1733_v24 = vcvt.s32.f32 %v709_v49 }
 0x1e4   : > { %v6338_v29 = vadd.f32 %v3830_v23, %v3808_v39  ;;  %v3787_v31 = vadd.f32 %v3786_v0, %v3764_v11  ;;  %v1861_v25 = vcvt.s32.f32 %v837_v55  ;;  %4189 = vmatpush.bf16.msrb.mxu3 %v2721_v5  ;;  %v1921_v39 = vcvt.s32.f32 %v897_v1 }
 0x1e5   : > { %4143 = vmatpush.bf16.msrb.mxu1 %v2657_v56  ;;  %v1925_v23 = vcvt.s32.f32 %v901_v18  ;;  %v825_v11 = vunpack.c.0.s8 %v281_v36  ;;  %v2621_v35 = vpack.c.bf16 %v1733_v24, %v1729_v42  ;;  %v1793_v48 = vcvt.s32.f32 %v769_v41 }
 0x1e6   : > { %v2685_v30 = vpack.c.bf16 %v1861_v25, %v1857_v46  ;;  %v1797_v58 = vcvt.s32.f32 %v773_v28  ;;  %v829_v20 = vunpack.c.1.s8 %v281_v36  ;;  %v697_v25 = vunpack.c.0.s8 %v249_v51 }
 0x1e7   : > { %v2717_v56 = vpack.c.bf16 %v1925_v23, %v1921_v39  ;;  %v1849_v4 = vcvt.s32.f32 %v825_v11  ;;  %4121 = vmatpush.bf16.msrb.mxu0 %v2621_v35  ;;  %v701_v1 = vunpack.c.1.s8 %v249_v51  ;;  %v889_v36 = vunpack.c.0.s8 %v297_v32  ;;  %v325_v11 = vld [vmem:[%s5509_s21 + $0x470] sm:$0xff] }
 0x1e8   : > { %4167 = vmatpush.bf16.msrb.mxu2 %v2685_v30  ;;  %v2653_v49 = vpack.c.bf16 %v1797_v58, %v1793_v48  ;;  %v1853_v46 = vcvt.s32.f32 %v829_v20  ;;  %v1721_v42 = vcvt.s32.f32 %v697_v25  ;;  %v761_v41 = vunpack.c.0.s8 %v265_v6 }
 0x1e9   : > { %v3809_v0 = vpop.f32.mrf.mxu2  ;;  %v3766_v62 = vpop.f32.mrf.mxu0  ;;  %4190 = vmatpush.bf16.msrb.mxu3 %v2717_v56  ;;  %v1725_v24 = vcvt.s32.f32 %v701_v1  ;;  %v1913_v51 = vcvt.s32.f32 %v889_v36  ;;  %v765_v30 = vunpack.c.1.s8 %v265_v6 }
 0x1ea   : > { %v3810_v47 = vadd.f32 %v3809_v0, %v3787_v31  ;;  %v3832_v10 = vpop.f32.mrf.mxu3  ;;  %v3767_v55 = vadd.f32 %v3766_v62, %v6296_v44  ;;  %v3789_v5 = vpop.f32.mrf.mxu1  ;;  %v893_v31 = vunpack.c.1.s8 %v297_v32  ;;  %v2681_v44 = vpack.c.bf16 %v1853_v46, %v1849_v4  ;;  %4144 = vmatpush.bf16.msrb.mxu1 %v2653_v49  ;;  %v357_v32 = vld [vmem:[%s5509_s21 + $0x570] sm:$0xff] }
 0x1eb   : > { %v2617_v39 = vpack.c.bf16 %v1725_v24, %v1721_v42  ;;  %v1785_v23 = vcvt.s32.f32 %v761_v41  ;;  %v373_v0 = vld [vmem:[%s5509_s21 + $0x5f0] sm:$0xff]  ;;  %v1789_v35 = vcvt.s32.f32 %v765_v30  ;;  %v1137_v48 = vunpack.c.2.s8 %v357_v32 }
 0x1ec   : > { %v6342_v18 = vadd.f32 %v3832_v10, %v3810_v47  ;;  %v3790_v16 = vadd.f32 %v3789_v5, %v3767_v55  ;;  %4036 = vmatmul.bf16.gmra.mxu0 %v5559_v2  ;;  %v1917_v28 = vcvt.s32.f32 %v893_v31  ;;  %4168 = vmatpush.bf16.msrb.mxu2 %v2681_v44  ;;  %v1141_v58 = vunpack.c.3.s8 %v357_v32 }
 0x1ed   : > { %4059 = vmatmul.bf16.gmra.mxu1 %v5561_v3  ;;  %4122 = vmatpush.bf16.msrb.mxu0 %v2617_v39  ;;  %v1009_v10 = vunpack.c.2.s8 %v325_v11  ;;  %v1013_v55 = vunpack.c.3.s8 %v325_v11  ;;  %v1201_v5 = vunpack.c.2.s8 %v373_v0  ;;  %v1205_v6 = vunpack.c.3.s8 %v373_v0 }
 0x1ee   : > { %4082 = vmatmul.bf16.gmra.mxu2 %v5563_v7  ;;  %v2713_v62 = vpack.c.bf16 %v1917_v28, %v1913_v51  ;;  %v2649_v46 = vpack.c.bf16 %v1789_v35, %v1785_v23  ;;  %v2161_v25 = vcvt.s32.f32 %v1137_v48  ;;  %v2165_v1 = vcvt.s32.f32 %v1141_v58  ;;  %v341_v51 = vld [vmem:[%s5509_s21 + $0x4f0] sm:$0xff] }
 0x1ef   : > { %4105 = vmatmul.bf16.gmra.mxu3 %v5565_v9  ;;  %v2033_v36 = vcvt.s32.f32 %v1009_v10  ;;  %v2037_v31 = vcvt.s32.f32 %v1013_v55  ;;  %v2225_v44 = vcvt.s32.f32 %v1201_v5  ;;  %v2229_v42 = vcvt.s32.f32 %v1205_v6 }
 0x1f0   : > { %4191 = vmatpush.bf16.msrb.mxu3 %v2713_v62  ;;  %4145 = vmatpush.bf16.msrb.mxu1 %v2649_v46  ;;  %v2837_v41 = vpack.c.bf16 %v2165_v1, %v2161_v25  ;;  %v1129_v28 = vunpack.c.0.s8 %v357_v32  ;;  %v1133_v30 = vunpack.c.1.s8 %v357_v32  ;;  %v1001_v35 = vunpack.c.0.s8 %v325_v11 }
 0x1f1   : > { %v3812_v20 = vpop.f32.mrf.mxu2  ;;  %v3768_v47 = vpop.f32.mrf.mxu0  ;;  %v2773_v39 = vpack.c.bf16 %v2037_v31, %v2033_v36  ;;  %v1005_v48 = vunpack.c.1.s8 %v325_v11  ;;  %v1193_v55 = vunpack.c.0.s8 %v373_v0  ;;  %v1197_v5 = vunpack.c.1.s8 %v373_v0 }
 0x1f2   : > { %v3813_v56 = vadd.f32 %v3812_v20, %v3790_v16  ;;  %v3835_v4 = vpop.f32.mrf.mxu3  ;;  %v3791_v49 = vpop.f32.mrf.mxu1  ;;  %v2869_v47 = vpack.c.bf16 %v2229_v42, %v2225_v44  ;;  %v1073_v16 = vunpack.c.2.s8 %v341_v51  ;;  %v1077_v20 = vunpack.c.3.s8 %v341_v51  ;;  %4253 = vmatpush.bf16.msra.mxu2 %v2837_v41 }
 0x1f3   : > { %v2153_v62 = vcvt.s32.f32 %v1129_v28  ;;  %v2157_v23 = vcvt.s32.f32 %v1133_v30  ;;  %4207 = vmatpush.bf16.msra.mxu0 %v2773_v39  ;;  %v1065_v49 = vunpack.c.0.s8 %v341_v51  ;;  %v2217_v1 = vcvt.s32.f32 %v1193_v55 }
 0x1f4   : > { %v6351_v24 = vadd.f32 %v3835_v4, %v3813_v56  ;;  %4276 = vmatpush.bf16.msra.mxu3 %v2869_v47  ;;  %v2097_v58 = vcvt.s32.f32 %v1073_v16  ;;  %v2101_v10 = vcvt.s32.f32 %v1077_v20  ;;  %v2025_v56 = vcvt.s32.f32 %v1001_v35  ;;  %v353_v47 = vld [vmem:[%s5509_s21 + $0x550] sm:$0xff] }
 0x1f5   : > { %v2833_v6 = vpack.c.bf16 %v2157_v23, %v2153_v62  ;;  %v2029_v4 = vcvt.s32.f32 %v1005_v48  ;;  %v2221_v36 = vcvt.s32.f32 %v1197_v5  ;;  %v1069_v31 = vunpack.c.1.s8 %v341_v51  ;;  %v321_v16 = vld [vmem:[%s5509_s21 + $0x450] sm:$0xff] }
 0x1f6   : > { %v2805_v25 = vpack.c.bf16 %v2101_v10, %v2097_v58  ;;  %v2089_v0 = vcvt.s32.f32 %v1065_v49  ;;  %v369_v20 = vld [vmem:[%s5509_s21 + $0x5d0] sm:$0xff]  ;;  %v1121_v62 = vunpack.c.2.s8 %v353_v47  ;;  %v993_v23 = vunpack.c.2.s8 %v321_v16  ;;  %v6997_v10 = vld [vmem:[#allocation12_spill] sm:$0xff] }
 0x1f7   : > { %4254 = vmatpush.bf16.msra.mxu2 %v2833_v6  ;;  %v2769_v41 = vpack.c.bf16 %v2029_v4, %v2025_v56  ;;  %v2865_v28 = vpack.c.bf16 %v2221_v36, %v2217_v1  ;;  %v2093_v30 = vcvt.s32.f32 %v1069_v31  ;;  %v997_v35 = vunpack.c.3.s8 %v321_v16  ;;  %v337_v56 = vld [vmem:[%s5509_s21 + $0x4d0] sm:$0xff] }
 0x1f8   : > { %4230 = vmatpush.bf16.msra.mxu1 %v2805_v25  ;;  %v1185_v48 = vunpack.c.2.s8 %v369_v20  ;;  %v1189_v58 = vunpack.c.3.s8 %v369_v20  ;;  %v2145_v55 = vcvt.s32.f32 %v1121_v62  ;;  %v2017_v6 = vcvt.s32.f32 %v993_v23 }
 0x1f9   : > { %v3814_v32 = vpop.f32.mrf.mxu2  ;;  %v3848_v46 = vpop.f32.mrf.mxu0  ;;  %4208 = vmatpush.bf16.msra.mxu0 %v2769_v41  ;;  %v2801_v51 = vpack.c.bf16 %v2093_v30, %v2089_v0  ;;  %4277 = vmatpush.bf16.msra.mxu3 %v2865_v28  ;;  %v1113_v4 = vunpack.c.0.s8 %v353_v47  ;;  %v2021_v49 = vcvt.s32.f32 %v997_v35  ;;  %v1057_v25 = vunpack.c.2.s8 %v337_v56 }
 0x1fa   : > { %v3837_v11 = vpop.f32.mrf.mxu3  ;;  %v3849_v44 = vadd.f32 %v3848_v46, %v6309_v50  ;;  %v3871_v42 = vpop.f32.mrf.mxu1  ;;  %v1125_v50 = vunpack.c.3.s8 %v353_v47  ;;  %v2209_v32 = vcvt.s32.f32 %v1185_v48  ;;  %v2213_v46 = vcvt.s32.f32 %v1189_v58 }
 0x1fb   : > { %v1061_v11 = vunpack.c.3.s8 %v337_v56 }
 0x1fc   : > { %v3872_v39 = vadd.f32 %v3871_v42, %v3849_v44  ;;  %4041 = vmatmul.bf16.gmra.mxu0 %v5597_v14  ;;  %4231 = vmatpush.bf16.msra.mxu1 %v2801_v51  ;;  %v2149_v5 = vcvt.s32.f32 %v1125_v50  ;;  %v1117_v44 = vunpack.c.1.s8 %v353_v47  ;;  %v2137_v42 = vcvt.s32.f32 %v1113_v4 }
 0x1fd   : > { %4064 = vmatmul.bf16.gmra.mxu1 %v5599_v15  ;;  %v2765_v51 = vpack.c.bf16 %v2021_v49, %v2017_v6  ;;  %v2861_v62 = vpack.c.bf16 %v2213_v46, %v2209_v32  ;;  %v2081_v50 = vcvt.s32.f32 %v1057_v25  ;;  %v2085_v23 = vcvt.s32.f32 %v1061_v11  ;;  %v6370_v6 = vld [vmem:[%s5509_s21 + $0x430] sm:$0xff] }
 0x1fe   : > { %4087 = vmatmul.bf16.gmra.mxu2 %v5604_v19  ;;  %v2829_v31 = vpack.c.bf16 %v2149_v5, %v2145_v55  ;;  %v2141_v35 = vcvt.s32.f32 %v1117_v44  ;;  %v985_v47 = vunpack.c.0.s8 %v321_v16  ;;  %v989_v55 = vunpack.c.1.s8 %v321_v16 }
 0x1ff   : > { %4110 = vmatmul.bf16.gmra.mxu3 %v6997_v10  ;;  %4209 = vmatpush.bf16.msra.mxu0 %v2765_v51  ;;  %v2797_v5 = vpack.c.bf16 %v2085_v23, %v2081_v50  ;;  %v1049_v46 = vunpack.c.0.s8 %v337_v56  ;;  %v1053_v25 = vunpack.c.1.s8 %v337_v56  ;;  %v981_v50 = vunpack.c.3.s8 %v6370_v6 }
 0x200   : > { %4255 = vmatpush.bf16.msra.mxu2 %v2829_v31  ;;  %4278 = vmatpush.bf16.msra.mxu3 %v2861_v62  ;;  %v2825_v4 = vpack.c.bf16 %v2141_v35, %v2137_v42  ;;  %v2009_v49 = vcvt.s32.f32 %v985_v47  ;;  %v2013_v32 = vcvt.s32.f32 %v989_v55 }
 0x201   : > { %v3894_v1 = vpop.f32.mrf.mxu2  ;;  %v3850_v36 = vpop.f32.mrf.mxu0  ;;  %4232 = vmatpush.bf16.msra.mxu1 %v2797_v5  ;;  %v2077_v42 = vcvt.s32.f32 %v1053_v25 }
 0x202   : > { %v3895_v41 = vadd.f32 %v3894_v1, %v3872_v39  ;;  %v3917_v0 = vpop.f32.mrf.mxu3  ;;  %v3851_v28 = vadd.f32 %v3850_v36, %v6324_v8  ;;  %v3873_v30 = vpop.f32.mrf.mxu1  ;;  %v6367_v39 = vld [vmem:[%s5509_s21 + $0x530] sm:$0xff]  ;;  %v1177_v8 = vunpack.c.0.s8 %v369_v20  ;;  %v1181_v1 = vunpack.c.1.s8 %v369_v20 }
 0x203   : > { %v1105_v11 = vunpack.c.2.s8 %v6367_v39  ;;  %v1109_v16 = vunpack.c.3.s8 %v6367_v39  ;;  %v2761_v44 = vpack.c.bf16 %v2013_v32, %v2009_v49  ;;  %v977_v20 = vunpack.c.2.s8 %v6370_v6 }
 0x204   : > { %v6364_v48 = vadd.f32 %v3917_v0, %v3895_v41  ;;  %v3874_v58 = vadd.f32 %v3873_v30, %v3851_v28  ;;  %4256 = vmatpush.bf16.msra.mxu2 %v2825_v4  ;;  %v2201_v36 = vcvt.s32.f32 %v1177_v8  ;;  %v2205_v31 = vcvt.s32.f32 %v1181_v1  ;;  %v365_v0 = vld [vmem:[%s5509_s21 + $0x5b0] sm:$0xff] }
 0x205   : > { %v2073_v41 = vcvt.s32.f32 %v1049_v46  ;;  %v2129_v62 = vcvt.s32.f32 %v1105_v11  ;;  %v2133_v56 = vcvt.s32.f32 %v1109_v16  ;;  %4210 = vmatpush.bf16.msra.mxu0 %v2761_v44  ;;  %v2001_v4 = vcvt.s32.f32 %v977_v20  ;;  %v333_v8 = vld [vmem:[%s5509_s21 + $0x4b0] sm:$0xff] }
 0x206   : > { %v2857_v51 = vpack.c.bf16 %v2205_v31, %v2201_v36  ;;  %v2005_v49 = vcvt.s32.f32 %v981_v50  ;;  %v1169_v32 = vunpack.c.2.s8 %v365_v0  ;;  %v1173_v46 = vunpack.c.3.s8 %v365_v0 }
 0x207   : > { %v2793_v5 = vpack.c.bf16 %v2077_v42, %v2073_v41  ;;  %v2821_v1 = vpack.c.bf16 %v2133_v56, %v2129_v62  ;;  %v1045_v31 = vunpack.c.3.s8 %v333_v8  ;;  %v1097_v44 = vunpack.c.0.s8 %v6367_v39 }
 0x208   : > { %4279 = vmatpush.bf16.msra.mxu3 %v2857_v51  ;;  %v2193_v11 = vcvt.s32.f32 %v1169_v32  ;;  %v2197_v16 = vcvt.s32.f32 %v1173_v46  ;;  %v1101_v20 = vunpack.c.1.s8 %v6367_v39  ;;  %v969_v51 = vunpack.c.0.s8 %v6370_v6 }
 0x209   : > { %v3896_v28 = vpop.f32.mrf.mxu2  ;;  %v3853_v30 = vpop.f32.mrf.mxu0  ;;  %4233 = vmatpush.bf16.msra.mxu1 %v2793_v5  ;;  %4257 = vmatpush.bf16.msra.mxu2 %v2821_v1  ;;  %v2069_v42 = vcvt.s32.f32 %v1045_v31  ;;  %v973_v62 = vunpack.c.1.s8 %v6370_v6  ;;  %v1037_v1 = vunpack.c.1.s8 %v333_v8 }
 0x20a   : > { %v3897_v23 = vadd.f32 %v3896_v28, %v3874_v58  ;;  %v3919_v35 = vpop.f32.mrf.mxu3  ;;  %v3854_v47 = vadd.f32 %v3853_v30, %v6338_v29  ;;  %v3876_v55 = vpop.f32.mrf.mxu1  ;;  %v1041_v58 = vunpack.c.2.s8 %v333_v8  ;;  %v2757_v29 = vpack.c.bf16 %v2005_v49, %v2001_v4 }
 0x20b   : > { %v2853_v28 = vpack.c.bf16 %v2197_v16, %v2193_v11  ;;  %v2121_v30 = vcvt.s32.f32 %v1097_v44  ;;  %v2125_v50 = vcvt.s32.f32 %v1101_v20  ;;  %v1993_v5 = vcvt.s32.f32 %v969_v51  ;;  %v345_v44 = vld [vmem:[%s5509_s21 + $0x510] sm:$0xff] }
 0x20c   : > { %v6379_v25 = vadd.f32 %v3919_v35, %v3897_v23  ;;  %v3877_v36 = vadd.f32 %v3876_v55, %v3854_v47  ;;  %4123 = vmatmul.bf16.vlgmr.msrb.gmra.mxu0 %v5626_v33  ;;  %v2065_v41 = vcvt.s32.f32 %v1041_v58  ;;  %v1161_v23 = vunpack.c.0.s8 %v365_v0 }
 0x20d   : > { %4146 = vmatmul.bf16.vlgmr.msrb.gmra.mxu1 %v5629_v34  ;;  %4211 = vmatpush.bf16.msra.mxu0 %v2757_v29  ;;  %v1165_v35 = vunpack.c.1.s8 %v365_v0  ;;  %v1997_v39 = vcvt.s32.f32 %v973_v62  ;;  %v1033_v4 = vunpack.c.0.s8 %v333_v8  ;;  %v2817_v6 = vpack.c.bf16 %v2125_v50, %v2121_v30 }
 0x20e   : > { %4169 = vmatmul.bf16.vlgmr.msrb.gmra.mxu2 %v5633_v40  ;;  %v2789_v56 = vpack.c.bf16 %v2069_v42, %v2065_v41  ;;  %4280 = vmatpush.bf16.msra.mxu3 %v2853_v28  ;;  %v2185_v31 = vcvt.s32.f32 %v1161_v23  ;;  %v2061_v16 = vcvt.s32.f32 %v1037_v1  ;;  %v313_v41 = vld [vmem:[%s5509_s21 + $0x410] sm:$0xff]  ;;  %v1089_v8 = vunpack.c.2.s8 %v345_v44 }
 0x20f   : > { %4192 = vmatmul.bf16.vlgmr.msrb.gmra.mxu3 %v5635_v43  ;;  %v2753_v0 = vpack.c.bf16 %v1997_v39, %v1993_v5  ;;  %v2189_v29 = vcvt.s32.f32 %v1165_v35  ;;  %v2057_v11 = vcvt.s32.f32 %v1033_v4  ;;  %v361_v42 = vld [vmem:[%s5509_s21 + $0x590] sm:$0xff]  ;;  %4258 = vmatpush.bf16.msra.mxu2 %v2817_v6  ;;  %v961_v30 = vunpack.c.2.s8 %v313_v41 }
 0x210   : > { %4234 = vmatpush.bf16.msra.mxu1 %v2789_v56  ;;  %v965_v56 = vunpack.c.3.s8 %v313_v41  ;;  %v2113_v50 = vcvt.s32.f32 %v1089_v8  ;;  %v1153_v35 = vunpack.c.2.s8 %v361_v42 }
 0x211   : > { %v3899_v47 = vpop.f32.mrf.mxu2  ;;  %v3855_v55 = vpop.f32.mrf.mxu0  ;;  %4212 = vmatpush.bf16.msra.mxu0 %v2753_v0  ;;  %v2849_v51 = vpack.c.bf16 %v2189_v29, %v2185_v31  ;;  %v2785_v62 = vpack.c.bf16 %v2061_v16, %v2057_v11  ;;  %v1085_v11 = vunpack.c.1.s8 %v345_v44 }
 0x212   : > { %v3900_v49 = vadd.f32 %v3899_v47, %v3877_v36  ;;  %v3922_v32 = vpop.f32.mrf.mxu3  ;;  %v3856_v46 = vadd.f32 %v3855_v55, %v6342_v18  ;;  %v3878_v58 = vpop.f32.mrf.mxu1  ;;  %v1093_v36 = vunpack.c.3.s8 %v345_v44  ;;  %v329_v18 = vld [vmem:[%s5509_s21 + $0x490] sm:$0xff]  ;;  %v1157_v47 = vunpack.c.3.s8 %v361_v42 }
 0x213   : > { %4281 = vmatpush.bf16.msra.mxu3 %v2849_v51  ;;  %v1985_v55 = vcvt.s32.f32 %v961_v30  ;;  %v1989_v5 = vcvt.s32.f32 %v965_v56  ;;  %v1025_v39 = vunpack.c.2.s8 %v329_v18  ;;  %v1029_v4 = vunpack.c.3.s8 %v329_v18 }
 0x214   : > { %v6393_v20 = vadd.f32 %v3922_v32, %v3900_v49  ;;  %v6395_v28 = vadd.f32 %v3878_v58, %v3856_v46  ;;  %v2117_v23 = vcvt.s32.f32 %v1093_v36  ;;  %4235 = vmatpush.bf16.msra.mxu1 %v2785_v62  ;;  %v2177_v49 = vcvt.s32.f32 %v1153_v35 }
 0x215   : > { %v2181_v32 = vcvt.s32.f32 %v1157_v47  ;;  %v1081_v46 = vunpack.c.0.s8 %v345_v44  ;;  %v2749_v31 = vpack.c.bf16 %v1989_v5, %v1985_v55  ;;  %v2049_v0 = vcvt.s32.f32 %v1025_v39  ;;  %v6998_v47 = vld [vmem:[#allocation18_spill] sm:$0xff] }
 0x216   : > { %v2813_v1 = vpack.c.bf16 %v2117_v23, %v2113_v50  ;;  %v2053_v29 = vcvt.s32.f32 %v1029_v4  ;;  %v2109_v30 = vcvt.s32.f32 %v1085_v11  ;;  %v953_v56 = vunpack.c.0.s8 %v313_v41  ;;  %v6999_v4 = vld [vmem:[#allocation19_spill] sm:$0xff] }
 0x217   : > { %v2845_v36 = vpack.c.bf16 %v2181_v32, %v2177_v49  ;;  %v2105_v51 = vcvt.s32.f32 %v1081_v46  ;;  %4213 = vmatpush.bf16.msra.mxu0 %v2749_v31  ;;  %v957_v50 = vunpack.c.1.s8 %v313_v41  ;;  %v1145_v23 = vunpack.c.0.s8 %v361_v42  ;;  %v7000_v32 = vld [vmem:[#allocation20_spill] sm:$0xff] }
 0x218   : > { %4259 = vmatpush.bf16.msra.mxu2 %v2813_v1  ;;  %v2781_v62 = vpack.c.bf16 %v2053_v29, %v2049_v0  ;;  %v1149_v35 = vunpack.c.1.s8 %v361_v42  ;;  %v1977_v55 = vcvt.s32.f32 %v953_v56  ;;  %v1017_v39 = vunpack.c.0.s8 %v329_v18  ;;  %v421_v42 = vld [vmem:[%s5509_s21 + $0x770] sm:$0xff] }
 0x219   : > { %v6398_v58 = vpop.f32.mrf.mxu2  ;;  %v6400_v6 = vpop.f32.mrf.mxu0  ;;  %4282 = vmatpush.bf16.msra.mxu3 %v2845_v36  ;;  %v2809_v44 = vpack.c.bf16 %v2109_v30, %v2105_v51  ;;  %v1981_v5 = vcvt.s32.f32 %v957_v50  ;;  %v2169_v1 = vcvt.s32.f32 %v1145_v23  ;;  %v1021_v41 = vunpack.c.1.s8 %v329_v18  ;;  %v389_v0 = vld [vmem:[%s5509_s21 + $0x670] sm:$0xff] }
 0x21a   : > { %v6402_v16 = vpop.f32.mrf.mxu3  ;;  %v6404_v8 = vpop.f32.mrf.mxu1  ;;  %4236 = vmatpush.bf16.msra.mxu1 %v2781_v62  ;;  %v2173_v49 = vcvt.s32.f32 %v1149_v35  ;;  %v2041_v31 = vcvt.s32.f32 %v1017_v39  ;;  %v437_v29 = vld [vmem:[%s5509_s21 + $0x7f0] sm:$0xff]  ;;  %v1393_v51 = vunpack.c.2.s8 %v421_v42  ;;  %v1397_v30 = vunpack.c.3.s8 %v421_v42 }
 0x21b   : > { %v2745_v46 = vpack.c.bf16 %v1981_v5, %v1977_v55  ;;  %v2045_v36 = vcvt.s32.f32 %v1021_v41  ;;  %v1265_v62 = vunpack.c.2.s8 %v389_v0  ;;  %v1269_v23 = vunpack.c.3.s8 %v389_v0 }
 0x21c   : > { %4128 = vmatmul.bf16.gmra.mxu0 %v5657_v60  ;;  %4260 = vmatpush.bf16.msra.mxu2 %v2809_v44  ;;  %v2841_v11 = vpack.c.bf16 %v2173_v49, %v2169_v1  ;;  %v1457_v18 = vunpack.c.2.s8 %v437_v29  ;;  %v1461_v35 = vunpack.c.3.s8 %v437_v29  ;;  %v2417_v5 = vcvt.s32.f32 %v1393_v51 }
 0x21d   : > { %4151 = vmatmul.bf16.gmra.mxu1 %v6998_v47  ;;  %4214 = vmatpush.bf16.msra.mxu0 %v2745_v46  ;;  %v2777_v55 = vpack.c.bf16 %v2045_v36, %v2041_v31  ;;  %v2421_v39 = vcvt.s32.f32 %v1397_v30  ;;  %v2289_v1 = vcvt.s32.f32 %v1265_v62  ;;  %v2293_v49 = vcvt.s32.f32 %v1269_v23 }
 0x21e   : > { %4174 = vmatmul.bf16.gmra.mxu2 %v6999_v4  ;;  %4283 = vmatpush.bf16.msra.mxu3 %v2841_v11  ;;  %v2481_v41 = vcvt.s32.f32 %v1457_v18  ;;  %v2485_v4 = vcvt.s32.f32 %v1461_v35  ;;  %v1385_v46 = vunpack.c.0.s8 %v421_v42  ;;  %v1389_v60 = vunpack.c.1.s8 %v421_v42 }
 0x21f   : > { %4197 = vmatmul.bf16.gmra.mxu3 %v7000_v32  ;;  %4237 = vmatpush.bf16.msra.mxu1 %v2777_v55  ;;  %v2965_v47 = vpack.c.bf16 %v2421_v39, %v2417_v5  ;;  %v2901_v43 = vpack.c.bf16 %v2293_v49, %v2289_v1  ;;  %v1257_v11 = vunpack.c.0.s8 %v389_v0  ;;  %v1261_v31 = vunpack.c.1.s8 %v389_v0  ;;  %v417_v49 = vld [vmem:[%s5509_s21 + $0x750] sm:$0xff] }
 0x220   : > { %v2997_v40 = vpack.c.bf16 %v2485_v4, %v2481_v41  ;;  %v2409_v10 = vcvt.s32.f32 %v1385_v46  ;;  %v1449_v30 = vunpack.c.0.s8 %v437_v29  ;;  %v1453_v62 = vunpack.c.1.s8 %v437_v29  ;;  %v6425_v41 = vld [vmem:[%s5509_s21 + $0x650] sm:$0xff] }
 0x221   : > { %v6413_v56 = vpop.f32.mrf.mxu2  ;;  %v3860_v50 = vpop.f32.mrf.mxu0  ;;  %4345 = vmatpush.bf16.msrb.mxu2 %v2965_v47  ;;  %4299 = vmatpush.bf16.msrb.mxu0 %v2901_v43  ;;  %v2281_v18 = vcvt.s32.f32 %v1257_v11  ;;  %v2285_v35 = vcvt.s32.f32 %v1261_v31  ;;  %v3902_v29 = vadd.f32 %v6398_v58, %v6395_v28  ;;  %v3859_v1 = vadd.f32 %v6400_v6, %v6351_v24  ;;  %v7001_v58 = vld [vmem:[#allocation21_spill] sm:$0xff] }
 0x222   : > { %v6415_v32 = vpop.f32.mrf.mxu3  ;;  %v3883_v44 = vpop.f32.mrf.mxu1  ;;  %v405_v50 = vld [vmem:[%s5509_s21 + $0x6f0] sm:$0xff]  ;;  %4368 = vmatpush.bf16.msrb.mxu3 %v2997_v40  ;;  %v2473_v47 = vcvt.s32.f32 %v1449_v30  ;;  %v1381_v11 = vunpack.c.3.s8 %v417_v49  ;;  %v1249_v31 = vunpack.c.2.s8 %v6425_v41  ;;  %v1253_v24 = vunpack.c.3.s8 %v6425_v41 }
 0x223   : > { %v1329_v34 = vunpack.c.2.s8 %v405_v50  ;;  %v1333_v33 = vunpack.c.3.s8 %v405_v50  ;;  %v2413_v44 = vcvt.s32.f32 %v1389_v60  ;;  %v1321_v55 = vunpack.c.0.s8 %v405_v50 }
 0x224   : > { %v2477_v60 = vcvt.s32.f32 %v1453_v62  ;;  %v1325_v39 = vunpack.c.1.s8 %v405_v50  ;;  %v6428_v50 = vld [vmem:[%s5509_s21 + $0x7d0] sm:$0xff]  ;;  %v2405_v30 = vcvt.s32.f32 %v1381_v11  ;;  %v2273_v62 = vcvt.s32.f32 %v1249_v31 }
 0x225   : > { %v2353_v36 = vcvt.s32.f32 %v1329_v34  ;;  %v2357_v51 = vcvt.s32.f32 %v1333_v33  ;;  %v2961_v23 = vpack.c.bf16 %v2413_v44, %v2409_v10  ;;  %v2897_v34 = vpack.c.bf16 %v2285_v35, %v2281_v18 }
 0x226   : > { %v2345_v33 = vcvt.s32.f32 %v1321_v55  ;;  %v2993_v40 = vpack.c.bf16 %v2477_v60, %v2473_v47  ;;  %v2349_v10 = vcvt.s32.f32 %v1325_v39  ;;  %v1377_v44 = vunpack.c.2.s8 %v417_v49 }
 0x227   : > { %v2933_v4 = vpack.c.bf16 %v2357_v51, %v2353_v36  ;;  %4346 = vmatpush.bf16.msrb.mxu2 %v2961_v23  ;;  %4300 = vmatpush.bf16.msrb.mxu0 %v2897_v34  ;;  %v1441_v6 = vunpack.c.2.s8 %v6428_v50  ;;  %v1445_v36 = vunpack.c.3.s8 %v6428_v50  ;;  %v401_v23 = vld [vmem:[%s5509_s21 + $0x6d0] sm:$0xff]  ;;  %v1369_v18 = vunpack.c.0.s8 %v417_v49 }
 0x228   : > { %v2929_v46 = vpack.c.bf16 %v2349_v10, %v2345_v33  ;;  %4369 = vmatpush.bf16.msrb.mxu3 %v2993_v40  ;;  %v2401_v51 = vcvt.s32.f32 %v1377_v44  ;;  %v2277_v35 = vcvt.s32.f32 %v1253_v24  ;;  %v1317_v60 = vunpack.c.3.s8 %v401_v23 }
 0x229   : > { %v3906_v42 = vpop.f32.mrf.mxu2  ;;  %v3940_v5 = vpop.f32.mrf.mxu0  ;;  %4322 = vmatpush.bf16.msrb.mxu1 %v2933_v4  ;;  %v2465_v55 = vcvt.s32.f32 %v1441_v6  ;;  %v1373_v39 = vunpack.c.1.s8 %v417_v49  ;;  %v3882_v34 = vadd.f32 %v6404_v8, %v3859_v1  ;;  %v6443_v8 = vadd.f32 %v6402_v16, %v3902_v29 }
 0x22a   : > { %v3929_v0 = vpop.f32.mrf.mxu3  ;;  %v3963_v43 = vpop.f32.mrf.mxu1  ;;  %v3941_v28 = vadd.f32 %v3940_v5, %v6364_v48  ;;  %v2469_v48 = vcvt.s32.f32 %v1445_v36  ;;  %v1313_v42 = vunpack.c.2.s8 %v401_v23  ;;  %v2957_v47 = vpack.c.bf16 %v2405_v30, %v2401_v51 }
 0x22b   : > { %v2393_v0 = vcvt.s32.f32 %v1369_v18  ;;  %v2341_v24 = vcvt.s32.f32 %v1317_v60  ;;  %v2397_v6 = vcvt.s32.f32 %v1373_v39  ;;  %v3905_v36 = vadd.f32 %v6413_v56, %v3882_v34  ;;  %v381_v34 = vld [vmem:[%s5509_s21 + $0x630] sm:$0xff] }
 0x22c   : > { %4133 = vmatmul.bf16.gmra.mxu0 %v5697_v26  ;;  %v3964_v33 = vadd.f32 %v3963_v43, %v3941_v28  ;;  %v2989_v44 = vpack.c.bf16 %v2469_v48, %v2465_v55  ;;  %4347 = vmatpush.bf16.msrb.mxu2 %v2957_v47  ;;  %v2337_v31 = vcvt.s32.f32 %v1313_v42  ;;  %v1241_v1 = vunpack.c.0.s8 %v6425_v41 }
 0x22d   : > { %4156 = vmatmul.bf16.gmra.mxu1 %v5699_v37  ;;  %v2953_v30 = vpack.c.bf16 %v2397_v6, %v2393_v0  ;;  %v1433_v28 = vunpack.c.0.s8 %v6428_v50  ;;  %v6450_v18 = vadd.f32 %v6415_v32, %v3905_v36  ;;  %v1309_v55 = vunpack.c.1.s8 %v401_v23  ;;  %v413_v0 = vld [vmem:[%s5509_s21 + $0x730] sm:$0xff] }
 0x22e   : > { %4179 = vmatmul.bf16.gmra.mxu2 %v7001_v58  ;;  %4323 = vmatpush.bf16.msrb.mxu1 %v2929_v46  ;;  %v2893_v46 = vpack.c.bf16 %v2277_v35, %v2273_v62  ;;  %v2925_v49 = vpack.c.bf16 %v2341_v24, %v2337_v31  ;;  %v1437_v62 = vunpack.c.1.s8 %v6428_v50  ;;  %v1305_v35 = vunpack.c.0.s8 %v401_v23  ;;  %v7002_v6 = vld [vmem:[#allocation25_spill] sm:$0xff] }
 0x22f   : > { %4202 = vmatmul.bf16.gmra.mxu3 %v6979_v12  ;;  %v2457_v47 = vcvt.s32.f32 %v1433_v28  ;;  %v2333_v39 = vcvt.s32.f32 %v1309_v55  ;;  %v1365_v31 = vunpack.c.3.s8 %v413_v0  ;;  %v1233_v24 = vunpack.c.2.s8 %v381_v34 }
 0x230   : > { %4301 = vmatpush.bf16.msrb.mxu0 %v2893_v46  ;;  %4370 = vmatpush.bf16.msrb.mxu3 %v2989_v44  ;;  %v2461_v32 = vcvt.s32.f32 %v1437_v62  ;;  %v2329_v60 = vcvt.s32.f32 %v1305_v35  ;;  %v1361_v46 = vunpack.c.2.s8 %v413_v0  ;;  %v1353_v55 = vunpack.c.0.s8 %v413_v0 }
 0x231   : > { %v3986_v5 = vpop.f32.mrf.mxu2  ;;  %v3942_v4 = vpop.f32.mrf.mxu0  ;;  %4348 = vmatpush.bf16.msrb.mxu2 %v2953_v30 }
 0x232   : > { %v4009_v40 = vpop.f32.mrf.mxu3  ;;  %v3965_v10 = vpop.f32.mrf.mxu1  ;;  %v3943_v11 = vadd.f32 %v3942_v4, %v6379_v25  ;;  %v3987_v51 = vadd.f32 %v3986_v5, %v3964_v33  ;;  %4324 = vmatpush.bf16.msrb.mxu1 %v2925_v49  ;;  %v1245_v25 = vunpack.c.1.s8 %v6425_v41  ;;  %v2265_v4 = vcvt.s32.f32 %v1241_v1  ;;  %v6458_v33 = vld [vmem:[%s5509_s21 + $0x7b0] sm:$0xff] }
 0x233   : > { %v2985_v44 = vpack.c.bf16 %v2461_v32, %v2457_v47  ;;  %v2385_v36 = vcvt.s32.f32 %v1361_v46  ;;  %v1425_v49 = vunpack.c.2.s8 %v6458_v33  ;;  %v1429_v30 = vunpack.c.3.s8 %v6458_v33 }
 0x234   : > { %v3966_v43 = vadd.f32 %v3965_v10, %v3943_v11  ;;  %v6452_v56 = vadd.f32 %v4009_v40, %v3987_v51  ;;  %v2269_v50 = vcvt.s32.f32 %v1245_v25  ;;  %v2921_v11 = vpack.c.bf16 %v2333_v39, %v2329_v60 }
 0x235   : > { %v1237_v51 = vunpack.c.3.s8 %v381_v34  ;;  %v2389_v1 = vcvt.s32.f32 %v1365_v31  ;;  %v2257_v25 = vcvt.s32.f32 %v1233_v24  ;;  %4371 = vmatpush.bf16.msrb.mxu3 %v2985_v44  ;;  %v2453_v35 = vcvt.s32.f32 %v1429_v30 }
 0x236   : > { %v2889_v23 = vpack.c.bf16 %v2269_v50, %v2265_v4  ;;  %4325 = vmatpush.bf16.msrb.mxu1 %v2921_v11  ;;  %v1357_v50 = vunpack.c.1.s8 %v413_v0  ;;  %v2377_v11 = vcvt.s32.f32 %v1353_v55  ;;  %v1225_v24 = vunpack.c.0.s8 %v381_v34  ;;  %v425_v55 = vld [vmem:[%s5509_s21 + $0x790] sm:$0xff] }
 0x237   : > { %v1229_v0 = vunpack.c.1.s8 %v381_v34 }
 0x238   : > { %4302 = vmatpush.bf16.msrb.mxu0 %v2889_v23  ;;  %v2381_v31 = vcvt.s32.f32 %v1357_v50 }
 0x239   : > { %v3988_v16 = vpop.f32.mrf.mxu2  ;;  %v3945_v29 = vpop.f32.mrf.mxu0 }
 0x23a   : > { %v3989_v48 = vadd.f32 %v3988_v16, %v3966_v43  ;;  %v4011_v42 = vpop.f32.mrf.mxu3  ;;  %v3946_v41 = vadd.f32 %v3945_v29, %v6393_v20  ;;  %v3968_v5 = vpop.f32.mrf.mxu1  ;;  %v6464_v20 = vld [vmem:[%s5509_s21 + $0x6b0] sm:$0xff]  ;;  %v7003_v43 = vld [vmem:[#allocation26_spill] sm:$0xff]  ;;  %v2261_v16 = vcvt.s32.f32 %v1237_v51  ;;  %v2449_v29 = vcvt.s32.f32 %v1425_v49 }
 0x23b   : > { %v1297_v28 = vunpack.c.2.s8 %v6464_v20  ;;  %v1301_v62 = vunpack.c.3.s8 %v6464_v20  ;;  %v6475_v51 = vld [vmem:[%s5509_s21 + $0x710] sm:$0xff]  ;;  %v2945_v30 = vpack.c.bf16 %v2381_v31, %v2377_v11 }
 0x23c   : > { %v6460_v40 = vadd.f32 %v4011_v42, %v3989_v48  ;;  %v3969_v10 = vadd.f32 %v3968_v5, %v3946_v41  ;;  %4215 = vmatmul.bf16.vlgmr.msra.gmra.mxu0 %v6980_v22  ;;  %v2949_v41 = vpack.c.bf16 %v2389_v1, %v2385_v36  ;;  %v2885_v23 = vpack.c.bf16 %v2261_v16, %v2257_v25 }
 0x23d   : > { %4238 = vmatmul.bf16.vlgmr.msra.gmra.mxu1 %v6981_v63  ;;  %v2321_v5 = vcvt.s32.f32 %v1297_v28  ;;  %v2325_v4 = vcvt.s32.f32 %v1301_v62  ;;  %v2981_v46 = vpack.c.bf16 %v2453_v35, %v2449_v29  ;;  %v2249_v1 = vcvt.s32.f32 %v1225_v24 }
 0x23e   : > { %4261 = vmatmul.bf16.vlgmr.msra.gmra.mxu2 %v7002_v6  ;;  %4303 = vmatpush.bf16.msrb.mxu0 %v2885_v23  ;;  %v1421_v25 = vunpack.c.1.s8 %v6458_v33  ;;  %v1289_v28 = vunpack.c.0.s8 %v6464_v20  ;;  %v2253_v62 = vcvt.s32.f32 %v1229_v0  ;;  %v1293_v29 = vunpack.c.1.s8 %v6464_v20 }
 0x23f   : > { %4284 = vmatmul.bf16.vlgmr.msra.gmra.mxu3 %v7003_v43  ;;  %4349 = vmatpush.bf16.msrb.mxu2 %v2949_v41  ;;  %v2917_v44 = vpack.c.bf16 %v2325_v4, %v2321_v5  ;;  %v1345_v35 = vunpack.c.2.s8 %v6475_v51 }
 0x240   : > { %4372 = vmatpush.bf16.msrb.mxu3 %v2981_v46  ;;  %v2445_v34 = vcvt.s32.f32 %v1421_v25  ;;  %v2881_v5 = vpack.c.bf16 %v2253_v62, %v2249_v1  ;;  %v2317_v4 = vcvt.s32.f32 %v1293_v29  ;;  %v1409_v46 = vunpack.c.2.s8 %v425_v55 }
 0x241   : > { %v3991_v48 = vpop.f32.mrf.mxu2  ;;  %v3947_v42 = vpop.f32.mrf.mxu0  ;;  %4326 = vmatpush.bf16.msrb.mxu1 %v2917_v44  ;;  %v1413_v1 = vunpack.c.3.s8 %v425_v55 }
 0x242   : > { %v3992_v47 = vadd.f32 %v3991_v48, %v3969_v10  ;;  %v4014_v32 = vpop.f32.mrf.mxu3  ;;  %v3948_v60 = vadd.f32 %v3947_v42, %v6443_v8  ;;  %v3970_v39 = vpop.f32.mrf.mxu1  ;;  %v1417_v8 = vunpack.c.0.s8 %v6458_v33  ;;  %v6481_v10 = vld [vmem:[%s5509_s21 + $0x610] sm:$0xff]  ;;  %v2313_v48 = vcvt.s32.f32 %v1289_v28  ;;  %4304 = vmatpush.bf16.msrb.mxu0 %v2881_v5 }
 0x243   : > { %4350 = vmatpush.bf16.msrb.mxu2 %v2945_v30  ;;  %v1349_v42 = vunpack.c.3.s8 %v6475_v51  ;;  %v1217_v41 = vunpack.c.2.s8 %v6481_v10  ;;  %v2369_v33 = vcvt.s32.f32 %v1345_v35  ;;  %v1221_v50 = vunpack.c.3.s8 %v6481_v10 }
 0x244   : > { %v6477_v49 = vadd.f32 %v4014_v32, %v3992_v47  ;;  %v3971_v36 = vadd.f32 %v3970_v39, %v3948_v60  ;;  %v2441_v16 = vcvt.s32.f32 %v1417_v8  ;;  %v6492_v47 = vld [vmem:[%s5509_s21 + $0x690] sm:$0xff]  ;;  %v2913_v0 = vpack.c.bf16 %v2317_v4, %v2313_v48 }
 0x245   : > { %v2373_v39 = vcvt.s32.f32 %v1349_v42  ;;  %v2241_v23 = vcvt.s32.f32 %v1217_v41  ;;  %v2245_v8 = vcvt.s32.f32 %v1221_v50  ;;  %v2433_v25 = vcvt.s32.f32 %v1409_v46  ;;  %v7004_v42 = vld [vmem:[#allocation29_spill] sm:$0xff]  ;;  %v7005_v50 = vld [vmem:[#allocation30_spill] sm:$0xff] }
 0x246   : > { %v2977_v20 = vpack.c.bf16 %v2445_v34, %v2441_v16  ;;  %v1281_v28 = vunpack.c.2.s8 %v6492_v47  ;;  %4327 = vmatpush.bf16.msrb.mxu1 %v2913_v0  ;;  %v1285_v29 = vunpack.c.3.s8 %v6492_v47  ;;  %v1337_v34 = vunpack.c.0.s8 %v6475_v51 }
 0x247   : > { %v2941_v30 = vpack.c.bf16 %v2373_v39, %v2369_v33  ;;  %v1341_v48 = vunpack.c.1.s8 %v6475_v51  ;;  %v1209_v5 = vunpack.c.0.s8 %v6481_v10  ;;  %v1213_v4 = vunpack.c.1.s8 %v6481_v10 }
 0x248   : > { %4373 = vmatpush.bf16.msrb.mxu3 %v2977_v20  ;;  %v2305_v35 = vcvt.s32.f32 %v1281_v28  ;;  %v2309_v41 = vcvt.s32.f32 %v1285_v29  ;;  %v1401_v33 = vunpack.c.0.s8 %v425_v55  ;;  %v1405_v39 = vunpack.c.1.s8 %v425_v55 }
 0x249   : > { %v3993_v32 = vpop.f32.mrf.mxu2  ;;  %v3950_v60 = vpop.f32.mrf.mxu0  ;;  %4351 = vmatpush.bf16.msrb.mxu2 %v2941_v30  ;;  %v2365_v20 = vcvt.s32.f32 %v1341_v48  ;;  %v2237_v51 = vcvt.s32.f32 %v1213_v4  ;;  %v1273_v30 = vunpack.c.0.s8 %v6492_v47 }
 0x24a   : > { %v3994_v44 = vadd.f32 %v3993_v32, %v3971_v36  ;;  %v4016_v11 = vpop.f32.mrf.mxu3  ;;  %v3951_v31 = vadd.f32 %v3950_v60, %v6450_v18  ;;  %v3973_v24 = vpop.f32.mrf.mxu1  ;;  %v2877_v36 = vpack.c.bf16 %v2245_v8, %v2241_v23  ;;  %v2437_v18 = vcvt.s32.f32 %v1413_v1  ;;  %v230_v23 = vld [vmem:[%s5509_s21 + $0x178] sm:$0xff] }
 0x24b   : > { %v2361_v60 = vcvt.s32.f32 %v1337_v34  ;;  %v2909_v46 = vpack.c.bf16 %v2309_v41, %v2305_v35  ;;  %v2429_v10 = vcvt.s32.f32 %v1405_v39  ;;  %v1277_v1 = vunpack.c.1.s8 %v6492_v47  ;;  %v246_v35 = vld [vmem:[%s5509_s21 + $0x1f8] sm:$0xff] }
 0x24c   : > { %v6496_v62 = vadd.f32 %v4016_v11, %v3994_v44  ;;  %v3974_v16 = vadd.f32 %v3973_v24, %v3951_v31  ;;  %4220 = vmatmul.bf16.gmra.mxu0 %v6984_v21  ;;  %v2973_v32 = vpack.c.bf16 %v2437_v18, %v2433_v25  ;;  %v2233_v44 = vcvt.s32.f32 %v1209_v5  ;;  %v6509_v31 = vld [vmem:[%s5509_s21 + $0x78] sm:$0xff] }
 0x24d   : > { %4243 = vmatmul.bf16.gmra.mxu1 %v6985_v17  ;;  %4305 = vmatpush.bf16.msrb.mxu0 %v2877_v36  ;;  %v2425_v11 = vcvt.s32.f32 %v1401_v33  ;;  %v2937_v8 = vpack.c.bf16 %v2365_v20, %v2361_v60  ;;  %v626_v29 = vunpack.c.2.s8 %v230_v23  ;;  %v630_v18 = vunpack.c.3.s8 %v230_v23 }
 0x24e   : > { %4266 = vmatmul.bf16.gmra.mxu2 %v7004_v42  ;;  %4374 = vmatpush.bf16.msrb.mxu3 %v2973_v32  ;;  %v2873_v36 = vpack.c.bf16 %v2237_v51, %v2233_v44  ;;  %v2297_v48 = vcvt.s32.f32 %v1273_v30  ;;  %v2301_v41 = vcvt.s32.f32 %v1277_v1  ;;  %v498_v5 = vunpack.c.2.s8 %v6509_v31 }
 0x24f   : > { %4289 = vmatmul.bf16.gmra.mxu3 %v7005_v50  ;;  %4328 = vmatpush.bf16.msrb.mxu1 %v2909_v46  ;;  %v2969_v34 = vpack.c.bf16 %v2429_v10, %v2425_v11  ;;  %v1650_v33 = vcvt.s32.f32 %v626_v29  ;;  %v1654_v32 = vcvt.s32.f32 %v630_v18  ;;  %v502_v47 = vunpack.c.3.s8 %v6509_v31 }
 0x250   : > { %4352 = vmatpush.bf16.msrb.mxu2 %v2937_v8  ;;  %v2905_v60 = vpack.c.bf16 %v2301_v41, %v2297_v48  ;;  %v1522_v20 = vcvt.s32.f32 %v498_v5  ;;  %v690_v39 = vunpack.c.2.s8 %v246_v35  ;;  %v694_v46 = vunpack.c.3.s8 %v246_v35 }
 0x251   : > { %v3996_v24 = vpop.f32.mrf.mxu2  ;;  %v3952_v0 = vpop.f32.mrf.mxu0  ;;  %4306 = vmatpush.bf16.msrb.mxu0 %v2873_v36  ;;  %v2582_v51 = vpack.c.bf16 %v1654_v32, %v1650_v33  ;;  %v618_v30 = vunpack.c.0.s8 %v230_v23  ;;  %v490_v48 = vunpack.c.0.s8 %v6509_v31  ;;  %v494_v33 = vunpack.c.1.s8 %v6509_v31 }
 0x252   : > { %v3997_v25 = vadd.f32 %v3996_v24, %v3974_v16  ;;  %v4019_v28 = vpop.f32.mrf.mxu3  ;;  %v3975_v55 = vpop.f32.mrf.mxu1  ;;  %v214_v16 = vld [vmem:[%s5509_s21 + $0xf8] sm:$0xff]  ;;  %4375 = vmatpush.bf16.msrb.mxu3 %v2969_v34  ;;  %v1526_v24 = vcvt.s32.f32 %v502_v47  ;;  %v1714_v0 = vcvt.s32.f32 %v690_v39  ;;  %v1718_v8 = vcvt.s32.f32 %v694_v46  ;;  %v7006_v46 = vld [vmem:[#allocation31_spill] sm:$0xff] }
 0x253   : > { %v562_v11 = vunpack.c.2.s8 %v214_v16  ;;  %4329 = vmatpush.bf16.msrb.mxu1 %v2905_v60  ;;  %v566_v10 = vunpack.c.3.s8 %v214_v16  ;;  %v1642_v34 = vcvt.s32.f32 %v618_v30  ;;  %v682_v32 = vunpack.c.0.s8 %v246_v35 }
 0x254   : > { %v4020_v4 = vadd.f32 %v4019_v28, %v3997_v25  ;;  %4437 = vmatpush.bf16.msra.mxu2 %v2582_v51  ;;  %v2518_v1 = vpack.c.bf16 %v1526_v24, %v1522_v20  ;;  %v622_v28 = vunpack.c.1.s8 %v230_v23  ;;  %v2614_v29 = vpack.c.bf16 %v1718_v8, %v1714_v0  ;;  %v6521_v0 = vld [vmem:[%s5509_s21 + $0x158] sm:$0xff] }
 0x255   : > { %v1586_v25 = vcvt.s32.f32 %v562_v11  ;;  %v1590_v18 = vcvt.s32.f32 %v566_v10  ;;  %v686_v47 = vunpack.c.1.s8 %v246_v35  ;;  %v1514_v20 = vcvt.s32.f32 %v490_v48  ;;  %v6524_v8 = vld [vmem:[%s5509_s21 + $0x58] sm:$0xff]  ;;  %v7007_v10 = vld [vmem:[#allocation32_spill] sm:$0xff] }
 0x256   : > { %v4760_v44 = vadd.f32 1.0, %v4020_v4  ;;  %4391 = vmatpush.bf16.msra.mxu0 %v2518_v1  ;;  %v1646_v4 = vcvt.s32.f32 %v622_v28  ;;  %4460 = vmatpush.bf16.msra.mxu3 %v2614_v29  ;;  %v554_v39 = vunpack.c.0.s8 %v214_v16  ;;  %v1518_v51 = vcvt.s32.f32 %v494_v33 }
 0x257   : > { %v2550_v23 = vpack.c.bf16 %v1590_v18, %v1586_v25  ;;  %v1706_v24 = vcvt.s32.f32 %v682_v32  ;;  %v1710_v11 = vcvt.s32.f32 %v686_v47  ;;  %v558_v31 = vunpack.c.1.s8 %v214_v16  ;;  %v6530_v25 = vld [vmem:[%s5509_s21 + $0x1d8] sm:$0xff] }
 0x258   : > { %5245 = vrcp.f32 %v4760_v44  ;;  %v2578_v44 = vpack.c.bf16 %v1646_v4, %v1642_v34  ;;  %v1578_v35 = vcvt.s32.f32 %v554_v39  ;;  %v610_v30 = vunpack.c.2.s8 %v6521_v0 }
 0x259   : > { %v3998_v55 = vpop.f32.mrf.mxu2  ;;  %v4032_v36 = vpop.f32.mrf.mxu0  ;;  %v614_v1 = vunpack.c.3.s8 %v6521_v0  ;;  %4414 = vmatpush.bf16.msra.mxu1 %v2550_v23  ;;  %v2610_v29 = vpack.c.bf16 %v1710_v11, %v1706_v24  ;;  %v482_v18 = vunpack.c.2.s8 %v6524_v8  ;;  %v486_v34 = vunpack.c.3.s8 %v6524_v8 }
 0x25a   : > { %v4021_v41 = vpop.f32.mrf.mxu3  ;;  %v4055_v5 = vpop.f32.mrf.mxu1  ;;  %v7008_v55 = vld [vmem:[#allocation33_spill] sm:$0xff]  ;;  %4438 = vmatpush.bf16.msra.mxu2 %v2578_v44  ;;  %v1582_v16 = vcvt.s32.f32 %v558_v31  ;;  %v674_v47 = vunpack.c.2.s8 %v6530_v25  ;;  %v678_v23 = vunpack.c.3.s8 %v6530_v25 }
 0x25b   : > { %v4056_v60 = vadd.f32 %v4055_v5, %v4032_v36  ;;  %v2514_v36 = vpack.c.bf16 %v1518_v51, %v1514_v20  ;;  %v7009_v41 = vld [vmem:[#allocation34_spill] sm:$0xff]  ;;  %v1634_v5 = vcvt.s32.f32 %v610_v30  ;;  %v1638_v4 = vcvt.s32.f32 %v614_v1  ;;  %4461 = vmatpush.bf16.msra.mxu3 %v2610_v29 }
 0x25c   : > { %4225 = vmatmul.bf16.gmra.mxu0 %v7006_v46  ;;  %v1506_v33 = vcvt.s32.f32 %v482_v18  ;;  %v1510_v32 = vcvt.s32.f32 %v486_v34  ;;  %v210_v18 = vld [vmem:[%s5509_s21 + $0xd8] sm:$0xff] }
 0x25d   : > { %4248 = vmatmul.bf16.gmra.mxu1 %v7007_v10  ;;  %4392 = vmatpush.bf16.msra.mxu0 %v2514_v36  ;;  %v2574_v36 = vpack.c.bf16 %v1638_v4, %v1634_v5  ;;  %v606_v5 = vunpack.c.1.s8 %v6521_v0 }
 0x25e   : > { %v5246_v28 = vpop.eup %5245  ;;  %4271 = vmatmul.bf16.gmra.mxu2 %v7008_v55  ;;  %v2510_v29 = vpack.c.bf16 %v1510_v32, %v1506_v33  ;;  %v474_v33 = vunpack.c.0.s8 %v6524_v8  ;;  %v478_v32 = vunpack.c.1.s8 %v6524_v8 }
 0x25f   : > { %v4768_v48 = vperm.slane %v5246_v28, 0  ;;  %4294 = vmatmul.bf16.gmra.mxu3 %v7009_v41  ;;  %v2546_v28 = vpack.c.bf16 %v1582_v16, %v1578_v35  ;;  %4439 = vmatpush.bf16.msra.mxu2 %v2574_v36  ;;  %v546_v35 = vunpack.c.2.s8 %v210_v18  ;;  %v602_v16 = vunpack.c.0.s8 %v6521_v0 }
 0x260   : > { %v1502_v0 = vcvt.s32.f32 %v478_v32  ;;  %v542_v36 = vunpack.c.1.s8 %v210_v18 }
 0x261   : > { %v4772_v20 = vmul.f32 %v4768_v48, %v6452_v56  ;;  %v4776_v39 = vmul.f32 %v4768_v48, %v6460_v40  ;;  %v4780_v51 = vmul.f32 %v4768_v48, %v6477_v49  ;;  %v4784_v44 = vmul.f32 %v4768_v48, %v6496_v62  ;;  %v4078_v24 = vpop.f32.mrf.mxu2  ;;  %v4034_v11 = vpop.f32.mrf.mxu0  ;;  %4415 = vmatpush.bf16.msra.mxu1 %v2546_v28 }
 0x262   : > { %v4079_v31 = vadd.f32 %v4078_v24, %v4056_v60  ;;  %v4101_v30 = vpop.f32.mrf.mxu3  ;;  %v4057_v1 = vpop.f32.mrf.mxu1  ;;  %v1698_v62 = vcvt.s32.f32 %v674_v47  ;;  %v1702_v60 = vcvt.s32.f32 %v678_v23  ;;  %4393 = vmatpush.bf16.msra.mxu0 %v2510_v29  ;;  %v550_v48 = vunpack.c.3.s8 %v210_v18  ;;  %v190_v29 = vld [vmem:[%s5509_s21 + $0x38] sm:$0xff] }
 0x263   : > { %v4788_v34 = vmax.f32 %v4772_v20, 0.0  ;;  %v4792_v41 = vmax.f32 %v4776_v39, 0.0  ;;  %v4796_v56 = vmax.f32 %v4780_v51, 0.0  ;;  %v4800_v55 = vmax.f32 %v4784_v44, 0.0  ;;  %v6554_v44 = vld [vmem:[%s5509_s21 + $0x138] sm:$0xff] }
 0x264   : > { %v6543_v40 = vadd.f32 %v4101_v30, %v4079_v31  ;;  %v4058_v49 = vadd.f32 %v4057_v1, %v4034_v11  ;;  %v2606_v4 = vpack.c.bf16 %v1702_v60, %v1698_v62  ;;  %v666_v20 = vunpack.c.0.s8 %v6530_v25 }
 0x265   : > { %4804 = vst [vmem:[%s6229_s20 + $0x8] sm:$0xff] %v4788_v34  ;;  %v1570_v47 = vcvt.s32.f32 %v546_v35  ;;  %v1574_v23 = vcvt.s32.f32 %v550_v48  ;;  %v1626_v39 = vcvt.s32.f32 %v602_v16  ;;  %v1630_v51 = vcvt.s32.f32 %v606_v5  ;;  %v6561_v48 = vld [vmem:[%s5509_s21 + $0x1b8] sm:$0xff] }
 0x266   : > { %4808 = vst [vmem:[%s6229_s20 + $0x28] sm:$0xff] %v4792_v41  ;;  %4462 = vmatpush.bf16.msra.mxu3 %v2606_v4  ;;  %v1498_v24 = vcvt.s32.f32 %v474_v33  ;;  %v670_v41 = vunpack.c.1.s8 %v6530_v25  ;;  %v1690_v11 = vcvt.s32.f32 %v666_v20  ;;  %v538_v28 = vunpack.c.0.s8 %v210_v18  ;;  %v6565_v33 = vld [vmem:[%s5509_s21 + $0xb8] sm:$0xff] }
 0x267   : > { %4812 = vst [vmem:[%s6229_s20 + $0x48] sm:$0xff] %v4796_v56  ;;  %v2542_v30 = vpack.c.bf16 %v1574_v23, %v1570_v47  ;;  %v2570_v1 = vpack.c.bf16 %v1630_v51, %v1626_v39  ;;  %v594_v35 = vunpack.c.2.s8 %v6554_v44  ;;  %v1566_v5 = vcvt.s32.f32 %v542_v36 }
 0x268   : > { %4816 = vst [vmem:[%s6229_s20 + $0x68] sm:$0xff] %v4800_v55  ;;  %v2506_v60 = vpack.c.bf16 %v1502_v0, %v1498_v24  ;;  %v1694_v55 = vcvt.s32.f32 %v670_v41  ;;  %v1562_v25 = vcvt.s32.f32 %v538_v28  ;;  %v598_v4 = vunpack.c.3.s8 %v6554_v44  ;;  %v7010_v24 = vld [vmem:[#allocation36_spill] sm:$0xff] }
 0x269   : > { %v4080_v31 = vpop.f32.mrf.mxu2  ;;  %v4037_v8 = vpop.f32.mrf.mxu0  ;;  %4416 = vmatpush.bf16.msra.mxu1 %v2542_v30  ;;  %4440 = vmatpush.bf16.msra.mxu2 %v2570_v1  ;;  %v1618_v32 = vcvt.s32.f32 %v594_v35  ;;  %v466_v20 = vunpack.c.2.s8 %v190_v29  ;;  %v470_v39 = vunpack.c.3.s8 %v190_v29  ;;  %v658_v51 = vunpack.c.2.s8 %v6561_v48 }
 0x26a   : > { %v4081_v34 = vadd.f32 %v4080_v31, %v4058_v49  ;;  %v4103_v56 = vpop.f32.mrf.mxu3  ;;  %v4060_v62 = vpop.f32.mrf.mxu1  ;;  %v2602_v49 = vpack.c.bf16 %v1694_v55, %v1690_v11  ;;  %4394 = vmatpush.bf16.msra.mxu0 %v2506_v60  ;;  %v2538_v47 = vpack.c.bf16 %v1566_v5, %v1562_v25  ;;  %v1622_v23 = vcvt.s32.f32 %v598_v4 }
 0x26b   : > { %v4061_v16 = vadd.f32 %v4060_v62, %v4037_v8  ;;  %v1490_v0 = vcvt.s32.f32 %v466_v20  ;;  %v662_v41 = vunpack.c.3.s8 %v6561_v48  ;;  %v530_v31 = vunpack.c.2.s8 %v6565_v33  ;;  %v7011_v8 = vld [vmem:[#allocation37_spill] sm:$0xff] }
 0x26c   : > { %v6567_v18 = vadd.f32 %v4103_v56, %v4081_v34  ;;  %4307 = vmatmul.bf16.vlgmr.msrb.gmra.mxu0 %v5810_v13  ;;  %4463 = vmatpush.bf16.msra.mxu3 %v2602_v49  ;;  %v534_v11 = vunpack.c.3.s8 %v6565_v33  ;;  %v2566_v30 = vpack.c.bf16 %v1622_v23, %v1618_v32  ;;  %v1494_v1 = vcvt.s32.f32 %v470_v39 }
 0x26d   : > { %4330 = vmatmul.bf16.vlgmr.msrb.gmra.mxu1 %v5815_v53  ;;  %v1682_v28 = vcvt.s32.f32 %v658_v51  ;;  %v586_v36 = vunpack.c.0.s8 %v6554_v44  ;;  %v1686_v34 = vcvt.s32.f32 %v662_v41  ;;  %v1554_v56 = vcvt.s32.f32 %v530_v31 }
 0x26e   : > { %4353 = vmatmul.bf16.vlgmr.msrb.gmra.mxu2 %v7010_v24  ;;  %4417 = vmatpush.bf16.msra.mxu1 %v2538_v47  ;;  %v1558_v62 = vcvt.s32.f32 %v534_v11  ;;  %v590_v60 = vunpack.c.1.s8 %v6554_v44  ;;  %v2502_v25 = vpack.c.bf16 %v1494_v1, %v1490_v0  ;;  %v458_v4 = vunpack.c.0.s8 %v190_v29 }
 0x26f   : > { %4376 = vmatmul.bf16.vlgmr.msrb.gmra.mxu3 %v7011_v8  ;;  %4441 = vmatpush.bf16.msra.mxu2 %v2566_v30  ;;  %v1610_v5 = vcvt.s32.f32 %v586_v36  ;;  %v462_v49 = vunpack.c.1.s8 %v190_v29  ;;  %v2598_v23 = vpack.c.bf16 %v1686_v34, %v1682_v28  ;;  %v650_v11 = vunpack.c.0.s8 %v6561_v48  ;;  %v218_v30 = vld [vmem:[%s5509_s21 + $0x118] sm:$0xff] }
 0x270   : > { %v2534_v39 = vpack.c.bf16 %v1558_v62, %v1554_v56  ;;  %v1614_v51 = vcvt.s32.f32 %v590_v60  ;;  %4395 = vmatpush.bf16.msra.mxu0 %v2502_v25  ;;  %v1482_v31 = vcvt.s32.f32 %v458_v4  ;;  %v6582_v8 = vld [vmem:[%s5509_s21 + $0x18] sm:$0xff]  ;;  %v522_v1 = vunpack.c.0.s8 %v6565_v33 }
 0x271   : > { %v4083_v55 = vpop.f32.mrf.mxu2  ;;  %v4039_v35 = vpop.f32.mrf.mxu0  ;;  %v1486_v44 = vcvt.s32.f32 %v462_v49  ;;  %4464 = vmatpush.bf16.msra.mxu3 %v2598_v23  ;;  %v6589_v28 = vld [vmem:[%s5509_s21 + $0x198] sm:$0xff]  ;;  %v1674_v34 = vcvt.s32.f32 %v650_v11  ;;  %v526_v56 = vunpack.c.1.s8 %v6565_v33  ;;  %v578_v62 = vunpack.c.2.s8 %v218_v30 }
 0x272   : > { %v4084_v20 = vadd.f32 %v4083_v55, %v4061_v16  ;;  %v4106_v32 = vpop.f32.mrf.mxu3  ;;  %v4062_v47 = vpop.f32.mrf.mxu1  ;;  %4418 = vmatpush.bf16.msra.mxu1 %v2534_v39  ;;  %v2562_v29 = vpack.c.bf16 %v1614_v51, %v1610_v5  ;;  %v654_v16 = vunpack.c.1.s8 %v6561_v48  ;;  %v1546_v55 = vcvt.s32.f32 %v522_v1  ;;  %v202_v4 = vld [vmem:[%s5509_s21 + $0x98] sm:$0xff] }
 0x273   : > { %v4063_v41 = vadd.f32 %v4062_v47, %v4039_v35  ;;  %v2498_v36 = vpack.c.bf16 %v1486_v44, %v1482_v31  ;;  %v582_v35 = vunpack.c.3.s8 %v218_v30  ;;  %v450_v25 = vunpack.c.2.s8 %v6582_v8 }
 0x274   : > { %v6584_v0 = vadd.f32 %v4106_v32, %v4084_v20  ;;  %4442 = vmatpush.bf16.msra.mxu2 %v2562_v29  ;;  %v1678_v60 = vcvt.s32.f32 %v654_v16  ;;  %v1550_v5 = vcvt.s32.f32 %v526_v56  ;;  %v1602_v49 = vcvt.s32.f32 %v578_v62 }
 0x275   : > { %4396 = vmatpush.bf16.msra.mxu0 %v2498_v36  ;;  %v454_v48 = vunpack.c.3.s8 %v6582_v8  ;;  %v642_v20 = vunpack.c.2.s8 %v6589_v28  ;;  %v1606_v47 = vcvt.s32.f32 %v582_v35  ;;  %v1474_v23 = vcvt.s32.f32 %v450_v25 }
 0x276   : > { %v2594_v32 = vpack.c.bf16 %v1678_v60, %v1674_v34  ;;  %v646_v33 = vunpack.c.3.s8 %v6589_v28  ;;  %v2530_v31 = vpack.c.bf16 %v1550_v5, %v1546_v55  ;;  %v514_v29 = vunpack.c.2.s8 %v202_v4 }
 0x277   : > { %v1478_v44 = vcvt.s32.f32 %v454_v48  ;;  %v1666_v11 = vcvt.s32.f32 %v642_v20  ;;  %v2558_v56 = vpack.c.bf16 %v1606_v47, %v1602_v49  ;;  %v518_v24 = vunpack.c.3.s8 %v202_v4 }
 0x278   : > { %4465 = vmatpush.bf16.msra.mxu3 %v2594_v32  ;;  %v1670_v62 = vcvt.s32.f32 %v646_v33  ;;  %4419 = vmatpush.bf16.msra.mxu1 %v2530_v31  ;;  %v1538_v60 = vcvt.s32.f32 %v514_v29  ;;  %v570_v35 = vunpack.c.0.s8 %v218_v30  ;;  %v574_v48 = vunpack.c.1.s8 %v218_v30 }
 0x279   : > { %v4085_v39 = vpop.f32.mrf.mxu2  ;;  %v4042_v51 = vpop.f32.mrf.mxu0  ;;  %v2494_v34 = vpack.c.bf16 %v1478_v44, %v1474_v23  ;;  %4443 = vmatpush.bf16.msra.mxu2 %v2558_v56  ;;  %v1542_v5 = vcvt.s32.f32 %v518_v24  ;;  %v442_v20 = vunpack.c.0.s8 %v6582_v8  ;;  %v446_v32 = vunpack.c.1.s8 %v6582_v8  ;;  %v7013_v23 = vld [vmem:[#allocation40_spill] sm:$0xff] }
 0x27a   : > { %v4086_v16 = vadd.f32 %v4085_v39, %v4063_v41  ;;  %v4108_v1 = vpop.f32.mrf.mxu3  ;;  %v4065_v36 = vpop.f32.mrf.mxu1  ;;  %v2590_v55 = vpack.c.bf16 %v1670_v62, %v1666_v11  ;;  %v7012_v41 = vld [vmem:[#allocation39_spill] sm:$0xff]  ;;  %v1594_v49 = vcvt.s32.f32 %v570_v35  ;;  %v634_v47 = vunpack.c.0.s8 %v6589_v28 }
 0x27b   : > { %v4066_v53 = vadd.f32 %v4065_v36, %v4042_v51  ;;  %4397 = vmatpush.bf16.msra.mxu0 %v2494_v34  ;;  %v2526_v33 = vpack.c.bf16 %v1542_v5, %v1538_v60  ;;  %v1598_v39 = vcvt.s32.f32 %v574_v48  ;;  %v638_v24 = vunpack.c.1.s8 %v6589_v28  ;;  %v7014_v51 = vld [vmem:[#allocation41_spill] sm:$0xff]  ;;  %v310_v34 = vld [vmem:[%s5509_s21 + $0x3f8] sm:$0xff] }
 0x27c   : > { %v6597_v25 = vadd.f32 %v4108_v1, %v4086_v16  ;;  %4312 = vmatmul.bf16.gmra.mxu0 %v5861_v38  ;;  %4466 = vmatpush.bf16.msra.mxu3 %v2590_v55  ;;  %v506_v30 = vunpack.c.0.s8 %v202_v4  ;;  %v1466_v31 = vcvt.s32.f32 %v442_v20  ;;  %v1470_v44 = vcvt.s32.f32 %v446_v32  ;;  %v294_v16 = vld [vmem:[%s5509_s21 + $0x378] sm:$0xff] }
 0x27d   : > { %4335 = vmatmul.bf16.gmra.mxu1 %v7012_v41  ;;  %v1658_v11 = vcvt.s32.f32 %v634_v47  ;;  %v510_v29 = vunpack.c.1.s8 %v202_v4  ;;  %v262_v1 = vld [vmem:[%s5509_s21 + $0x278] sm:$0xff]  ;;  %v2554_v8 = vpack.c.bf16 %v1598_v39, %v1594_v49  ;;  %v1662_v36 = vcvt.s32.f32 %v638_v24 }
 0x27e   : > { %4358 = vmatmul.bf16.gmra.mxu2 %v7013_v23  ;;  %4420 = vmatpush.bf16.msra.mxu1 %v2526_v33  ;;  %v1530_v56 = vcvt.s32.f32 %v506_v30  ;;  %v882_v62 = vunpack.c.2.s8 %v294_v16  ;;  %v2490_v55 = vpack.c.bf16 %v1470_v44, %v1466_v31  ;;  %v886_v28 = vunpack.c.3.s8 %v294_v16 }
 0x27f   : > { %4381 = vmatmul.bf16.gmra.mxu3 %v7014_v51  ;;  %v1534_v5 = vcvt.s32.f32 %v510_v29  ;;  %v754_v48 = vunpack.c.2.s8 %v262_v1  ;;  %4444 = vmatpush.bf16.msra.mxu2 %v2554_v8  ;;  %v2586_v4 = vpack.c.bf16 %v1662_v36, %v1658_v11  ;;  %v758_v51 = vunpack.c.3.s8 %v262_v1  ;;  %v278_v29 = vld [vmem:[%s5509_s21 + $0x2f8] sm:$0xff] }
 0x280   : > { %v1906_v47 = vcvt.s32.f32 %v882_v62  ;;  %4398 = vmatpush.bf16.msra.mxu0 %v2490_v55  ;;  %v1910_v33 = vcvt.s32.f32 %v886_v28  ;;  %v946_v24 = vunpack.c.2.s8 %v310_v34  ;;  %v950_v44 = vunpack.c.3.s8 %v310_v34 }
 0x281   : > { %v4088_v60 = vpop.f32.mrf.mxu2  ;;  %v4044_v35 = vpop.f32.mrf.mxu0  ;;  %v2522_v49 = vpack.c.bf16 %v1534_v5, %v1530_v56  ;;  %v1778_v39 = vcvt.s32.f32 %v754_v48  ;;  %4467 = vmatpush.bf16.msra.mxu3 %v2586_v4  ;;  %v1782_v31 = vcvt.s32.f32 %v758_v51  ;;  %v822_v8 = vunpack.c.3.s8 %v278_v29 }
 0x282   : > { %v4089_v23 = vadd.f32 %v4088_v60, %v4066_v53  ;;  %v4111_v20 = vpop.f32.mrf.mxu3  ;;  %v4067_v32 = vpop.f32.mrf.mxu1  ;;  %v874_v35 = vunpack.c.0.s8 %v294_v16  ;;  %v2710_v53 = vpack.c.bf16 %v1910_v33, %v1906_v47  ;;  %v1970_v60 = vcvt.s32.f32 %v946_v24 }
 0x283   : > { %4421 = vmatpush.bf16.msra.mxu1 %v2522_v49  ;;  %v818_v32 = vunpack.c.2.s8 %v278_v29  ;;  %v2646_v11 = vpack.c.bf16 %v1782_v31, %v1778_v39  ;;  %v1974_v36 = vcvt.s32.f32 %v950_v44  ;;  %v878_v62 = vunpack.c.1.s8 %v294_v16 }
 0x284   : > { %v6610_v30 = vadd.f32 %v4111_v20, %v4089_v23  ;;  %v1898_v55 = vcvt.s32.f32 %v874_v35  ;;  %4529 = vmatpush.bf16.msrb.mxu2 %v2710_v53  ;;  %v1846_v5 = vcvt.s32.f32 %v822_v8  ;;  %v746_v28 = vunpack.c.0.s8 %v262_v1  ;;  %v290_v8 = vld [vmem:[%s5509_s21 + $0x358] sm:$0xff] }
 0x285   : > { %v1842_v56 = vcvt.s32.f32 %v818_v32  ;;  %v750_v23 = vunpack.c.1.s8 %v262_v1  ;;  %4483 = vmatpush.bf16.msrb.mxu0 %v2646_v11  ;;  %v2742_v48 = vpack.c.bf16 %v1974_v36, %v1970_v60  ;;  %v1902_v51 = vcvt.s32.f32 %v878_v62  ;;  %v258_v11 = vld [vmem:[%s5509_s21 + $0x258] sm:$0xff] }
 0x286   : > { %v938_v20 = vunpack.c.0.s8 %v310_v34  ;;  %v942_v4 = vunpack.c.1.s8 %v310_v34  ;;  %v1770_v33 = vcvt.s32.f32 %v746_v28  ;;  %v810_v38 = vunpack.c.0.s8 %v278_v29  ;;  %v306_v36 = vld [vmem:[%s5509_s21 + $0x3d8] sm:$0xff] }
 0x287   : > { %v2678_v47 = vpack.c.bf16 %v1846_v5, %v1842_v56  ;;  %v1774_v24 = vcvt.s32.f32 %v750_v23  ;;  %4552 = vmatpush.bf16.msrb.mxu3 %v2742_v48  ;;  %v2706_v1 = vpack.c.bf16 %v1902_v51, %v1898_v55  ;;  %v814_v34 = vunpack.c.1.s8 %v278_v29 }
 0x288   : > { %v1962_v44 = vcvt.s32.f32 %v938_v20  ;;  %v1966_v35 = vcvt.s32.f32 %v942_v4  ;;  %v866_v62 = vunpack.c.2.s8 %v290_v8  ;;  %v870_v55 = vunpack.c.3.s8 %v290_v8  ;;  %v274_v20 = vld [vmem:[%s5509_s21 + $0x2d8] sm:$0xff] }
 0x289   : > { %v4090_v41 = vpop.f32.mrf.mxu2  ;;  %v4124_v49 = vpop.f32.mrf.mxu0  ;;  %4506 = vmatpush.bf16.msrb.mxu1 %v2678_v47  ;;  %v2642_v53 = vpack.c.bf16 %v1774_v24, %v1770_v33  ;;  %4530 = vmatpush.bf16.msrb.mxu2 %v2706_v1  ;;  %v738_v56 = vunpack.c.2.s8 %v258_v11  ;;  %v930_v29 = vunpack.c.2.s8 %v306_v36  ;;  %v934_v5 = vunpack.c.3.s8 %v306_v36 }
 0x28a   : > { %v4113_v39 = vpop.f32.mrf.mxu3  ;;  %v4125_v16 = vadd.f32 %v4124_v49, %v6543_v40  ;;  %v4147_v31 = vpop.f32.mrf.mxu1  ;;  %v1834_v41 = vcvt.s32.f32 %v810_v38  ;;  %v2738_v32 = vpack.c.bf16 %v1966_v35, %v1962_v44  ;;  %v1838_v40 = vcvt.s32.f32 %v814_v34 }
 0x28b   : > { %4484 = vmatpush.bf16.msrb.mxu0 %v2642_v53  ;;  %v742_v38 = vunpack.c.3.s8 %v258_v11  ;;  %v1890_v23 = vcvt.s32.f32 %v866_v62  ;;  %v1894_v48 = vcvt.s32.f32 %v870_v55  ;;  %v1762_v51 = vcvt.s32.f32 %v738_v56 }
 0x28c   : > { %v4148_v60 = vadd.f32 %v4147_v31, %v4125_v16  ;;  %4317 = vmatmul.bf16.gmra.mxu0 %v5905_v45  ;;  %4553 = vmatpush.bf16.msrb.mxu3 %v2738_v32  ;;  %v2674_v28 = vpack.c.bf16 %v1838_v40, %v1834_v41  ;;  %v1954_v49 = vcvt.s32.f32 %v930_v29  ;;  %v1958_v47 = vcvt.s32.f32 %v934_v5 }
 0x28d   : > { %4340 = vmatmul.bf16.gmra.mxu1 %v5907_v59  ;;  %v1766_v4 = vcvt.s32.f32 %v742_v38  ;;  %v802_v33 = vunpack.c.2.s8 %v274_v20  ;;  %v2702_v16 = vpack.c.bf16 %v1894_v48, %v1890_v23  ;;  %v806_v31 = vunpack.c.3.s8 %v274_v20 }
 0x28e   : > { %4363 = vmatmul.bf16.gmra.mxu2 %v5909_v27  ;;  %4507 = vmatpush.bf16.msrb.mxu1 %v2674_v28  ;;  %v858_v1 = vunpack.c.0.s8 %v290_v8  ;;  %v862_v44 = vunpack.c.1.s8 %v290_v8  ;;  %v2734_v40 = vpack.c.bf16 %v1958_v47, %v1954_v49  ;;  %v730_v8 = vunpack.c.0.s8 %v258_v11  ;;  %v6626_v28 = vld [vmem:[%s5509_s21 + $0x338] sm:$0xff] }
 0x28f   : > { %4386 = vmatmul.bf16.gmra.mxu3 %v5911_v54  ;;  %v2638_v32 = vpack.c.bf16 %v1766_v4, %v1762_v51  ;;  %4531 = vmatpush.bf16.msrb.mxu2 %v2702_v16  ;;  %v1826_v62 = vcvt.s32.f32 %v802_v33  ;;  %v1830_v55 = vcvt.s32.f32 %v806_v31  ;;  %v922_v48 = vunpack.c.0.s8 %v306_v36  ;;  %v6629_v4 = vld [vmem:[%s5509_s21 + $0x238] sm:$0xff] }
 0x290   : > { %v1882_v56 = vcvt.s32.f32 %v858_v1  ;;  %v1886_v38 = vcvt.s32.f32 %v862_v44  ;;  %4554 = vmatpush.bf16.msrb.mxu3 %v2734_v40  ;;  %v926_v51 = vunpack.c.1.s8 %v306_v36  ;;  %v1754_v49 = vcvt.s32.f32 %v730_v8 }
 0x291   : > { %v4170_v24 = vpop.f32.mrf.mxu2  ;;  %v4126_v39 = vpop.f32.mrf.mxu0  ;;  %4485 = vmatpush.bf16.msrb.mxu0 %v2638_v32  ;;  %v2670_v23 = vpack.c.bf16 %v1830_v55, %v1826_v62  ;;  %v794_v33 = vunpack.c.0.s8 %v274_v20  ;;  %v850_v31 = vunpack.c.2.s8 %v6626_v28  ;;  %v722_v36 = vunpack.c.2.s8 %v6629_v4 }
 0x292   : > { %v4171_v35 = vadd.f32 %v4170_v24, %v4148_v60  ;;  %v4193_v53 = vpop.f32.mrf.mxu3  ;;  %v4127_v34 = vadd.f32 %v4126_v39, %v6567_v18  ;;  %v4149_v41 = vpop.f32.mrf.mxu1  ;;  %v734_v60 = vunpack.c.1.s8 %v258_v11  ;;  %v2698_v18 = vpack.c.bf16 %v1886_v38, %v1882_v56 }
 0x293   : > { %v798_v24 = vunpack.c.1.s8 %v274_v20  ;;  %4508 = vmatpush.bf16.msrb.mxu1 %v2670_v23  ;;  %v1946_v39 = vcvt.s32.f32 %v922_v48  ;;  %v1950_v16 = vcvt.s32.f32 %v926_v51  ;;  %v854_v11 = vunpack.c.3.s8 %v6626_v28 }
 0x294   : > { %v6623_v29 = vadd.f32 %v4193_v53, %v4171_v35  ;;  %v4150_v5 = vadd.f32 %v4149_v41, %v4127_v34  ;;  %v1758_v47 = vcvt.s32.f32 %v734_v60  ;;  %4532 = vmatpush.bf16.msrb.mxu2 %v2698_v18  ;;  %v1818_v44 = vcvt.s32.f32 %v794_v33  ;;  %v302_v53 = vld [vmem:[%s5509_s21 + $0x3b8] sm:$0xff] }
 0x295   : > { %v1822_v35 = vcvt.s32.f32 %v798_v24  ;;  %v2730_v32 = vpack.c.bf16 %v1950_v16, %v1946_v39  ;;  %v1874_v40 = vcvt.s32.f32 %v850_v31  ;;  %v1878_v20 = vcvt.s32.f32 %v854_v11  ;;  %v270_v18 = vld [vmem:[%s5509_s21 + $0x2b8] sm:$0xff] }
 0x296   : > { %v2634_v1 = vpack.c.bf16 %v1758_v47, %v1754_v49  ;;  %v726_v62 = vunpack.c.3.s8 %v6629_v4  ;;  %v1746_v23 = vcvt.s32.f32 %v722_v36  ;;  %v914_v49 = vunpack.c.2.s8 %v302_v53  ;;  %v7015_v36 = vld [vmem:[#allocation11_spill] sm:$0xff] }
 0x297   : > { %v2666_v60 = vpack.c.bf16 %v1822_v35, %v1818_v44  ;;  %4555 = vmatpush.bf16.msrb.mxu3 %v2730_v32  ;;  %v2694_v48 = vpack.c.bf16 %v1878_v20, %v1874_v40  ;;  %v918_v47 = vunpack.c.3.s8 %v302_v53  ;;  %v790_v39 = vunpack.c.3.s8 %v270_v18 }
 0x298   : > { %4486 = vmatpush.bf16.msrb.mxu0 %v2634_v1  ;;  %v1750_v51 = vcvt.s32.f32 %v726_v62  ;;  %v1938_v16 = vcvt.s32.f32 %v914_v49  ;;  %v842_v11 = vunpack.c.0.s8 %v6626_v28  ;;  %v846_v35 = vunpack.c.1.s8 %v6626_v28 }
 0x299   : > { %v4172_v34 = vpop.f32.mrf.mxu2  ;;  %v4129_v41 = vpop.f32.mrf.mxu0  ;;  %4509 = vmatpush.bf16.msrb.mxu1 %v2666_v60  ;;  %4533 = vmatpush.bf16.msrb.mxu2 %v2694_v48  ;;  %v1942_v31 = vcvt.s32.f32 %v918_v47  ;;  %v1814_v44 = vcvt.s32.f32 %v790_v39  ;;  %v906_v20 = vunpack.c.0.s8 %v302_v53  ;;  %v910_v62 = vunpack.c.1.s8 %v302_v53 }
 0x29a   : > { %v4173_v55 = vadd.f32 %v4172_v34, %v4150_v5  ;;  %v4195_v56 = vpop.f32.mrf.mxu3  ;;  %v4130_v38 = vadd.f32 %v4129_v41, %v6584_v0  ;;  %v4152_v8 = vpop.f32.mrf.mxu1  ;;  %v786_v5 = vunpack.c.2.s8 %v270_v18  ;;  %v2630_v0 = vpack.c.bf16 %v1750_v51, %v1746_v23 }
 0x29b   : > { %v1866_v34 = vcvt.s32.f32 %v842_v11  ;;  %v714_v41 = vunpack.c.0.s8 %v6629_v4  ;;  %v1870_v40 = vcvt.s32.f32 %v846_v35  ;;  %v1930_v49 = vcvt.s32.f32 %v906_v20 }
 0x29c   : > { %v6638_v33 = vadd.f32 %v4195_v56, %v4173_v55  ;;  %v4153_v24 = vadd.f32 %v4152_v8, %v4130_v38  ;;  %4399 = vmatmul.bf16.vlgmr.msra.gmra.mxu0 %v5532_v52  ;;  %v1810_v1 = vcvt.s32.f32 %v786_v5  ;;  %v2726_v52 = vpack.c.bf16 %v1942_v31, %v1938_v16  ;;  %v250_v16 = vld [vmem:[%s5509_s21 + $0x218] sm:$0xff] }
 0x29d   : > { %4422 = vmatmul.bf16.vlgmr.msra.gmra.mxu1 %v5535_v57  ;;  %4487 = vmatpush.bf16.msrb.mxu0 %v2630_v0  ;;  %v718_v57 = vunpack.c.1.s8 %v6629_v4  ;;  %v778_v38 = vunpack.c.0.s8 %v270_v18  ;;  %v782_v8 = vunpack.c.1.s8 %v270_v18  ;;  %v2690_v4 = vpack.c.bf16 %v1870_v40, %v1866_v34  ;;  %v282_v0 = vld [vmem:[%s5509_s21 + $0x318] sm:$0xff] }
 0x29e   : > { %4445 = vmatmul.bf16.vlgmr.msra.gmra.mxu2 %v5539_v61  ;;  %v2662_v32 = vpack.c.bf16 %v1814_v44, %v1810_v1  ;;  %4556 = vmatpush.bf16.msrb.mxu3 %v2726_v52  ;;  %v1738_v61 = vcvt.s32.f32 %v714_v41  ;;  %v1934_v47 = vcvt.s32.f32 %v910_v62  ;;  %v298_v31 = vld [vmem:[%s5509_s21 + $0x398] sm:$0xff]  ;;  %v834_v18 = vunpack.c.2.s8 %v282_v0 }
 0x29f   : > { %4468 = vmatmul.bf16.vlgmr.msra.gmra.mxu3 %v7015_v36  ;;  %v1742_v28 = vcvt.s32.f32 %v718_v57  ;;  %v1802_v5 = vcvt.s32.f32 %v778_v38  ;;  %v1806_v39 = vcvt.s32.f32 %v782_v8  ;;  %4534 = vmatpush.bf16.msrb.mxu2 %v2690_v4  ;;  %v266_v44 = vld [vmem:[%s5509_s21 + $0x298] sm:$0xff]  ;;  %v706_v36 = vunpack.c.2.s8 %v250_v16 }
 0x2a0   : > { %4510 = vmatpush.bf16.msrb.mxu1 %v2662_v32  ;;  %v710_v52 = vunpack.c.3.s8 %v250_v16  ;;  %v1858_v34 = vcvt.s32.f32 %v834_v18  ;;  %v898_v57 = vunpack.c.2.s8 %v298_v31  ;;  %v902_v32 = vunpack.c.3.s8 %v298_v31 }
 0x2a1   : > { %v4175_v55 = vpop.f32.mrf.mxu2  ;;  %v4131_v56 = vpop.f32.mrf.mxu0  ;;  %v2626_v53 = vpack.c.bf16 %v1742_v28, %v1738_v61  ;;  %v2658_v35 = vpack.c.bf16 %v1806_v39, %v1802_v5  ;;  %v1730_v40 = vcvt.s32.f32 %v706_v36  ;;  %v770_v62 = vunpack.c.2.s8 %v266_v44 }
 0x2a2   : > { %v4176_v60 = vadd.f32 %v4175_v55, %v4153_v24  ;;  %v4198_v23 = vpop.f32.mrf.mxu3  ;;  %v4132_v48 = vadd.f32 %v4131_v56, %v6597_v25  ;;  %v4154_v51 = vpop.f32.mrf.mxu1  ;;  %v838_v24 = vunpack.c.3.s8 %v282_v0  ;;  %v2722_v25 = vpack.c.bf16 %v1934_v47, %v1930_v49 }
 0x2a3   : > { %4488 = vmatpush.bf16.msrb.mxu0 %v2626_v53  ;;  %v1734_v20 = vcvt.s32.f32 %v710_v52  ;;  %v774_v55 = vunpack.c.3.s8 %v266_v44  ;;  %v1922_v61 = vcvt.s32.f32 %v898_v57  ;;  %v1926_v28 = vcvt.s32.f32 %v902_v32 }
 0x2a4   : > { %v6652_v11 = vadd.f32 %v4198_v23, %v4176_v60  ;;  %v4155_v1 = vadd.f32 %v4154_v51, %v4132_v48  ;;  %v1862_v41 = vcvt.s32.f32 %v838_v24  ;;  %4557 = vmatpush.bf16.msrb.mxu3 %v2722_v25  ;;  %4511 = vmatpush.bf16.msrb.mxu1 %v2658_v35  ;;  %v826_v38 = vunpack.c.0.s8 %v282_v0 }
 0x2a5   : > { %v2622_v23 = vpack.c.bf16 %v1734_v20, %v1730_v40  ;;  %v1794_v48 = vcvt.s32.f32 %v770_v62  ;;  %v1798_v51 = vcvt.s32.f32 %v774_v55  ;;  %v830_v4 = vunpack.c.1.s8 %v282_v0  ;;  %v326_v55 = vld [vmem:[%s5509_s21 + $0x478] sm:$0xff] }
 0x2a6   : > { %v2686_v56 = vpack.c.bf16 %v1862_v41, %v1858_v34  ;;  %v2718_v39 = vpack.c.bf16 %v1926_v28, %v1922_v61  ;;  %v1850_v18 = vcvt.s32.f32 %v826_v38  ;;  %v698_v35 = vunpack.c.0.s8 %v250_v16 }
 0x2a7   : > { %4489 = vmatpush.bf16.msrb.mxu0 %v2622_v23  ;;  %v2654_v24 = vpack.c.bf16 %v1798_v51, %v1794_v48  ;;  %v1854_v25 = vcvt.s32.f32 %v830_v4  ;;  %v702_v36 = vunpack.c.1.s8 %v250_v16  ;;  %v890_v0 = vunpack.c.0.s8 %v298_v31 }
 0x2a8   : > { %4535 = vmatpush.bf16.msrb.mxu2 %v2686_v56  ;;  %4558 = vmatpush.bf16.msrb.mxu3 %v2718_v39  ;;  %v1722_v41 = vcvt.s32.f32 %v698_v35  ;;  %v762_v32 = vunpack.c.0.s8 %v266_v44  ;;  %v766_v20 = vunpack.c.1.s8 %v266_v44  ;;  %v374_v56 = vld [vmem:[%s5509_s21 + $0x5f8] sm:$0xff]  ;;  %v1014_v23 = vunpack.c.3.s8 %v326_v55 }
 0x2a9   : > { %v4177_v8 = vpop.f32.mrf.mxu2  ;;  %v4134_v60 = vpop.f32.mrf.mxu0  ;;  %v1726_v57 = vcvt.s32.f32 %v702_v36  ;;  %4512 = vmatpush.bf16.msrb.mxu1 %v2654_v24  ;;  %v1914_v16 = vcvt.s32.f32 %v890_v0  ;;  %v1202_v48 = vunpack.c.2.s8 %v374_v56  ;;  %v1206_v44 = vunpack.c.3.s8 %v374_v56  ;;  %v342_v36 = vld [vmem:[%s5509_s21 + $0x4f8] sm:$0xff] }
 0x2aa   : > { %v4178_v49 = vadd.f32 %v4177_v8, %v4155_v1  ;;  %v4200_v53 = vpop.f32.mrf.mxu3  ;;  %v4135_v47 = vadd.f32 %v4134_v60, %v6610_v30  ;;  %v4157_v5 = vpop.f32.mrf.mxu1  ;;  %v894_v1 = vunpack.c.1.s8 %v298_v31  ;;  %v2682_v30 = vpack.c.bf16 %v1854_v25, %v1850_v18  ;;  %v358_v31 = vld [vmem:[%s5509_s21 + $0x578] sm:$0xff] }
 0x2ab   : > { %v1786_v62 = vcvt.s32.f32 %v762_v32  ;;  %v1790_v61 = vcvt.s32.f32 %v766_v20  ;;  %v1138_v28 = vunpack.c.2.s8 %v358_v31  ;;  %v1142_v38 = vunpack.c.3.s8 %v358_v31 }
 0x2ac   : > { %v6656_v52 = vadd.f32 %v4200_v53, %v4178_v49  ;;  %v4158_v34 = vadd.f32 %v4157_v5, %v4135_v47  ;;  %4404 = vmatmul.bf16.gmra.mxu0 %v5559_v2  ;;  %v1918_v40 = vcvt.s32.f32 %v894_v1  ;;  %4536 = vmatpush.bf16.msrb.mxu2 %v2682_v30  ;;  %v2618_v2 = vpack.c.bf16 %v1726_v57, %v1722_v41 }
 0x2ad   : > { %4427 = vmatmul.bf16.gmra.mxu1 %v5561_v3  ;;  %v2650_v49 = vpack.c.bf16 %v1790_v61, %v1786_v62  ;;  %v2162_v53 = vcvt.s32.f32 %v1138_v28  ;;  %v2166_v47 = vcvt.s32.f32 %v1142_v38  ;;  %v2038_v39 = vcvt.s32.f32 %v1014_v23 }
 0x2ae   : > { %4450 = vmatmul.bf16.gmra.mxu2 %v5563_v7  ;;  %v2714_v3 = vpack.c.bf16 %v1918_v40, %v1914_v16  ;;  %4490 = vmatpush.bf16.msrb.mxu0 %v2618_v2  ;;  %v1010_v7 = vunpack.c.2.s8 %v326_v55  ;;  %v2226_v18 = vcvt.s32.f32 %v1202_v48  ;;  %v2230_v24 = vcvt.s32.f32 %v1206_v44 }
 0x2af   : > { %4473 = vmatmul.bf16.gmra.mxu3 %v5565_v9  ;;  %4513 = vmatpush.bf16.msrb.mxu1 %v2650_v49  ;;  %v2838_v35 = vpack.c.bf16 %v2166_v47, %v2162_v53  ;;  %v1130_v0 = vunpack.c.0.s8 %v358_v31  ;;  %v1134_v1 = vunpack.c.1.s8 %v358_v31  ;;  %v1078_v57 = vunpack.c.3.s8 %v342_v36 }
 0x2b0   : > { %4559 = vmatpush.bf16.msrb.mxu3 %v2714_v3  ;;  %v2034_v5 = vcvt.s32.f32 %v1010_v7  ;;  %v2870_v41 = vpack.c.bf16 %v2230_v24, %v2226_v18  ;;  %v1002_v40 = vunpack.c.0.s8 %v326_v55  ;;  %v1006_v20 = vunpack.c.1.s8 %v326_v55  ;;  %v322_v18 = vld [vmem:[%s5509_s21 + $0x458] sm:$0xff] }
 0x2b1   : > { %v4180_v8 = vpop.f32.mrf.mxu2  ;;  %v4136_v60 = vpop.f32.mrf.mxu0  ;;  %4621 = vmatpush.bf16.msra.mxu2 %v2838_v35  ;;  %v2154_v32 = vcvt.s32.f32 %v1130_v0  ;;  %v2158_v16 = vcvt.s32.f32 %v1134_v1  ;;  %v2102_v62 = vcvt.s32.f32 %v1078_v57  ;;  %v1194_v3 = vunpack.c.0.s8 %v374_v56  ;;  %v370_v24 = vld [vmem:[%s5509_s21 + $0x5d8] sm:$0xff] }
 0x2b2   : > { %v4181_v51 = vadd.f32 %v4180_v8, %v4158_v34  ;;  %v4203_v9 = vpop.f32.mrf.mxu3  ;;  %v4159_v4 = vpop.f32.mrf.mxu1  ;;  %v2774_v30 = vpack.c.bf16 %v2038_v39, %v2034_v5  ;;  %v1074_v34 = vunpack.c.2.s8 %v342_v36  ;;  %v1198_v61 = vunpack.c.1.s8 %v374_v56  ;;  %v354_v39 = vld [vmem:[%s5509_s21 + $0x558] sm:$0xff] }
 0x2b3   : > { %v2834_v28 = vpack.c.bf16 %v2158_v16, %v2154_v32  ;;  %v2026_v38 = vcvt.s32.f32 %v1002_v40  ;;  %v2030_v8 = vcvt.s32.f32 %v1006_v20  ;;  %v1066_v60 = vunpack.c.0.s8 %v342_v36  ;;  %v338_v16 = vld [vmem:[%s5509_s21 + $0x4d8] sm:$0xff] }
 0x2b4   : > { %v6665_v25 = vadd.f32 %v4203_v9, %v4181_v51  ;;  %4575 = vmatpush.bf16.msra.mxu0 %v2774_v30  ;;  %4644 = vmatpush.bf16.msra.mxu3 %v2870_v41  ;;  %v2098_v2 = vcvt.s32.f32 %v1074_v34  ;;  %v2218_v48 = vcvt.s32.f32 %v1194_v3  ;;  %v2222_v44 = vcvt.s32.f32 %v1198_v61  ;;  %v7016_v34 = vld [vmem:[#allocation12_spill] sm:$0xff] }
 0x2b5   : > { %v1070_v51 = vunpack.c.1.s8 %v342_v36  ;;  %4622 = vmatpush.bf16.msra.mxu2 %v2834_v28  ;;  %v2770_v49 = vpack.c.bf16 %v2030_v8, %v2026_v38  ;;  %v2090_v56 = vcvt.s32.f32 %v1066_v60  ;;  %v1122_v36 = vunpack.c.2.s8 %v354_v39 }
 0x2b6   : > { %v2806_v23 = vpack.c.bf16 %v2102_v62, %v2098_v2  ;;  %v2866_v53 = vpack.c.bf16 %v2222_v44, %v2218_v48  ;;  %v994_v0 = vunpack.c.2.s8 %v322_v18  ;;  %v998_v1 = vunpack.c.3.s8 %v322_v18 }
 0x2b7   : > { %v2094_v47 = vcvt.s32.f32 %v1070_v51  ;;  %v1186_v30 = vunpack.c.2.s8 %v370_v24  ;;  %v1190_v41 = vunpack.c.3.s8 %v370_v24  ;;  %v1058_v62 = vunpack.c.2.s8 %v338_v16 }
 0x2b8   : > { %4598 = vmatpush.bf16.msra.mxu1 %v2806_v23  ;;  %4576 = vmatpush.bf16.msra.mxu0 %v2770_v49  ;;  %v2018_v32 = vcvt.s32.f32 %v994_v0  ;;  %v2022_v40 = vcvt.s32.f32 %v998_v1  ;;  %v1118_v38 = vunpack.c.1.s8 %v354_v39  ;;  %v1050_v1 = vunpack.c.0.s8 %v338_v16 }
 0x2b9   : > { %v4182_v31 = vpop.f32.mrf.mxu2  ;;  %v4216_v7 = vpop.f32.mrf.mxu0  ;;  %v2802_v35 = vpack.c.bf16 %v2094_v47, %v2090_v56  ;;  %4645 = vmatpush.bf16.msra.mxu3 %v2866_v53  ;;  %v2210_v20 = vcvt.s32.f32 %v1186_v30  ;;  %v2214_v2 = vcvt.s32.f32 %v1190_v41  ;;  %v2082_v51 = vcvt.s32.f32 %v1058_v62  ;;  %v6681_v47 = vld [vmem:[%s5509_s21 + $0x538] sm:$0xff] }
 0x2ba   : > { %v4205_v55 = vpop.f32.mrf.mxu3  ;;  %v4217_v9 = vadd.f32 %v4216_v7, %v6623_v29  ;;  %v4239_v4 = vpop.f32.mrf.mxu1  ;;  %v1126_v29 = vunpack.c.3.s8 %v354_v39  ;;  %v2766_v48 = vpack.c.bf16 %v2022_v40, %v2018_v32  ;;  %v986_v56 = vunpack.c.0.s8 %v322_v18  ;;  %v366_v40 = vld [vmem:[%s5509_s21 + $0x5b8] sm:$0xff] }
 0x2bb   : > { %v2862_v44 = vpack.c.bf16 %v2214_v2, %v2210_v20  ;;  %v990_v53 = vunpack.c.1.s8 %v322_v18  ;;  %v1054_v30 = vunpack.c.1.s8 %v338_v16  ;;  %v1110_v18 = vunpack.c.3.s8 %v6681_v47 }
 0x2bc   : > { %v4240_v5 = vadd.f32 %v4239_v4, %v4217_v9  ;;  %4409 = vmatmul.bf16.gmra.mxu0 %v5597_v14  ;;  %4599 = vmatpush.bf16.msra.mxu1 %v2802_v35  ;;  %v2146_v14 = vcvt.s32.f32 %v1122_v36  ;;  %v2150_v57 = vcvt.s32.f32 %v1126_v29  ;;  %v2142_v9 = vcvt.s32.f32 %v1118_v38  ;;  %v6684_v36 = vld [vmem:[%s5509_s21 + $0x438] sm:$0xff] }
 0x2bd   : > { %4432 = vmatmul.bf16.gmra.mxu1 %v5599_v15  ;;  %v1114_v15 = vunpack.c.0.s8 %v354_v39  ;;  %4577 = vmatpush.bf16.msra.mxu0 %v2766_v48  ;;  %v1182_v35 = vunpack.c.1.s8 %v370_v24  ;;  %v2010_v29 = vcvt.s32.f32 %v986_v56  ;;  %v2014_v0 = vcvt.s32.f32 %v990_v53  ;;  %v7017_v56 = vld [vmem:[#allocation13_spill] sm:$0xff] }
 0x2be   : > { %4455 = vmatmul.bf16.gmra.mxu2 %v5604_v19  ;;  %v2830_v28 = vpack.c.bf16 %v2150_v57, %v2146_v14  ;;  %v1062_v19 = vunpack.c.3.s8 %v338_v16  ;;  %4646 = vmatpush.bf16.msra.mxu3 %v2862_v44  ;;  %v1106_v14 = vunpack.c.2.s8 %v6681_v47  ;;  %v2074_v32 = vcvt.s32.f32 %v1050_v1 }
 0x2bf   : > { %4478 = vmatmul.bf16.gmra.mxu3 %v7016_v34  ;;  %v2138_v8 = vcvt.s32.f32 %v1114_v15  ;;  %v2206_v34 = vcvt.s32.f32 %v1182_v35  ;;  %v2762_v57 = vpack.c.bf16 %v2014_v0, %v2010_v29  ;;  %v2078_v15 = vcvt.s32.f32 %v1054_v30  ;;  %v7019_v29 = vld [vmem:[#allocation15_spill] sm:$0xff] }
 0x2c0   : > { %4623 = vmatpush.bf16.msra.mxu2 %v2830_v28  ;;  %v2086_v55 = vcvt.s32.f32 %v1062_v19  ;;  %v2134_v16 = vcvt.s32.f32 %v1110_v18  ;;  %v1170_v44 = vunpack.c.2.s8 %v366_v40  ;;  %v1098_v35 = vunpack.c.0.s8 %v6681_v47 }
 0x2c1   : > { %v4262_v3 = vpop.f32.mrf.mxu2  ;;  %v4218_v61 = vpop.f32.mrf.mxu0  ;;  %v2826_v39 = vpack.c.bf16 %v2142_v9, %v2138_v8  ;;  %4578 = vmatpush.bf16.msra.mxu0 %v2762_v57  ;;  %v1102_v30 = vunpack.c.1.s8 %v6681_v47  ;;  %v970_v18 = vunpack.c.0.s8 %v6684_v36  ;;  %v974_v57 = vunpack.c.1.s8 %v6684_v36 }
 0x2c2   : > { %v4263_v60 = vadd.f32 %v4262_v3, %v4240_v5  ;;  %v4285_v31 = vpop.f32.mrf.mxu3  ;;  %v4219_v7 = vadd.f32 %v4218_v61, %v6638_v33  ;;  %v4241_v23 = vpop.f32.mrf.mxu1  ;;  %v2798_v5 = vpack.c.bf16 %v2086_v55, %v2082_v51  ;;  %v1178_v33 = vunpack.c.0.s8 %v370_v24 }
 0x2c3   : > { %v978_v24 = vunpack.c.2.s8 %v6684_v36  ;;  %v2130_v3 = vcvt.s32.f32 %v1106_v14  ;;  %v982_v61 = vunpack.c.3.s8 %v6684_v36  ;;  %v1174_v51 = vunpack.c.3.s8 %v366_v40 }
 0x2c4   : > { %v6678_v4 = vadd.f32 %v4285_v31, %v4263_v60  ;;  %v4242_v49 = vadd.f32 %v4241_v23, %v4219_v7  ;;  %4600 = vmatpush.bf16.msra.mxu1 %v2798_v5  ;;  %4624 = vmatpush.bf16.msra.mxu2 %v2826_v39  ;;  %v2202_v41 = vcvt.s32.f32 %v1178_v33  ;;  %v2794_v60 = vpack.c.bf16 %v2078_v15, %v2074_v32  ;;  %v334_v7 = vld [vmem:[%s5509_s21 + $0x4b8] sm:$0xff] }
 0x2c5   : > { %v2002_v31 = vcvt.s32.f32 %v978_v24  ;;  %v2822_v23 = vpack.c.bf16 %v2134_v16, %v2130_v3  ;;  %v2006_v48 = vcvt.s32.f32 %v982_v61  ;;  %v1046_v53 = vunpack.c.3.s8 %v334_v7  ;;  %v7018_v5 = vld [vmem:[#allocation14_spill] sm:$0xff] }
 0x2c6   : > { %v2858_v62 = vpack.c.bf16 %v2206_v34, %v2202_v41  ;;  %v2194_v39 = vcvt.s32.f32 %v1170_v44  ;;  %v2198_v33 = vcvt.s32.f32 %v1174_v51  ;;  %v7020_v41 = vld [vmem:[#allocation16_spill] sm:$0xff]  ;;  %v2122_v14 = vcvt.s32.f32 %v1098_v35  ;;  %v346_v44 = vld [vmem:[%s5509_s21 + $0x518] sm:$0xff] }
 0x2c7   : > { %v2070_v1 = vcvt.s32.f32 %v1046_v53  ;;  %v2126_v15 = vcvt.s32.f32 %v1102_v30  ;;  %v1162_v24 = vunpack.c.0.s8 %v366_v40  ;;  %v1994_v3 = vcvt.s32.f32 %v970_v18  ;;  %v314_v51 = vld [vmem:[%s5509_s21 + $0x418] sm:$0xff] }
 0x2c8   : > { %4647 = vmatpush.bf16.msra.mxu3 %v2858_v62  ;;  %4601 = vmatpush.bf16.msra.mxu1 %v2794_v60  ;;  %v2854_v34 = vpack.c.bf16 %v2198_v33, %v2194_v39  ;;  %v1998_v47 = vcvt.s32.f32 %v974_v57  ;;  %v1034_v16 = vunpack.c.0.s8 %v334_v7  ;;  %v1038_v61 = vunpack.c.1.s8 %v334_v7 }
 0x2c9   : > { %v4264_v20 = vpop.f32.mrf.mxu2  ;;  %v4221_v2 = vpop.f32.mrf.mxu0  ;;  %4625 = vmatpush.bf16.msra.mxu2 %v2822_v23  ;;  %v2818_v36 = vpack.c.bf16 %v2126_v15, %v2122_v14  ;;  %v2186_v60 = vcvt.s32.f32 %v1162_v24  ;;  %v962_v39 = vunpack.c.2.s8 %v314_v51  ;;  %v966_v33 = vunpack.c.3.s8 %v314_v51 }
 0x2ca   : > { %v4265_v28 = vadd.f32 %v4264_v20, %v4242_v49  ;;  %v4287_v19 = vpop.f32.mrf.mxu3  ;;  %v4222_v38 = vadd.f32 %v4221_v2, %v6652_v11  ;;  %v4244_v8 = vpop.f32.mrf.mxu1  ;;  %v1042_v49 = vunpack.c.2.s8 %v334_v7  ;;  %v2758_v11 = vpack.c.bf16 %v2006_v48, %v2002_v31 }
 0x2cb   : > { %v1166_v20 = vunpack.c.1.s8 %v366_v40  ;;  %v2754_v40 = vpack.c.bf16 %v1998_v47, %v1994_v3  ;;  %v2058_v23 = vcvt.s32.f32 %v1034_v16  ;;  %v2062_v48 = vcvt.s32.f32 %v1038_v61 }
 0x2cc   : > { %v6693_v55 = vadd.f32 %v4287_v19, %v4265_v28  ;;  %v4245_v9 = vadd.f32 %v4244_v8, %v4222_v38  ;;  %4491 = vmatmul.bf16.vlgmr.msrb.gmra.mxu0 %v7017_v56  ;;  %v2066_v0 = vcvt.s32.f32 %v1042_v49  ;;  %4648 = vmatpush.bf16.msra.mxu3 %v2854_v34  ;;  %v362_v56 = vld [vmem:[%s5509_s21 + $0x598] sm:$0xff]  ;;  %v1090_v7 = vunpack.c.2.s8 %v346_v44 }
 0x2cd   : > { %4514 = vmatmul.bf16.vlgmr.msrb.gmra.mxu1 %v7018_v5  ;;  %4579 = vmatpush.bf16.msra.mxu0 %v2758_v11  ;;  %v2190_v31 = vcvt.s32.f32 %v1166_v20  ;;  %v2786_v11 = vpack.c.bf16 %v2062_v48, %v2058_v23  ;;  %v1986_v30 = vcvt.s32.f32 %v962_v39  ;;  %v1082_v15 = vunpack.c.0.s8 %v346_v44  ;;  %v7022_v48 = vld [vmem:[#allocation18_spill] sm:$0xff] }
 0x2ce   : > { %4537 = vmatmul.bf16.vlgmr.msrb.gmra.mxu2 %v7019_v29  ;;  %v2790_v32 = vpack.c.bf16 %v2070_v1, %v2066_v0  ;;  %v2114_v35 = vcvt.s32.f32 %v1090_v7  ;;  %v1154_v0 = vunpack.c.2.s8 %v362_v56  ;;  %v1158_v1 = vunpack.c.3.s8 %v362_v56 }
 0x2cf   : > { %4560 = vmatmul.bf16.vlgmr.msrb.gmra.mxu3 %v7020_v41  ;;  %4626 = vmatpush.bf16.msra.mxu2 %v2818_v36  ;;  %v2850_v5 = vpack.c.bf16 %v2190_v31, %v2186_v60  ;;  %v1990_v41 = vcvt.s32.f32 %v966_v33  ;;  %v1086_v47 = vunpack.c.1.s8 %v346_v44  ;;  %v954_v36 = vunpack.c.0.s8 %v314_v51 }
 0x2d0   : > { %4602 = vmatpush.bf16.msra.mxu1 %v2790_v32  ;;  %v2178_v57 = vcvt.s32.f32 %v1154_v0  ;;  %v2182_v32 = vcvt.s32.f32 %v1158_v1  ;;  %v958_v60 = vunpack.c.1.s8 %v314_v51  ;;  %v1146_v31 = vunpack.c.0.s8 %v362_v56  ;;  %v390_v1 = vld [vmem:[%s5509_s21 + $0x678] sm:$0xff] }
 0x2d1   : > { %v4267_v2 = vpop.f32.mrf.mxu2  ;;  %v4223_v62 = vpop.f32.mrf.mxu0  ;;  %4580 = vmatpush.bf16.msra.mxu0 %v2754_v40  ;;  %4649 = vmatpush.bf16.msra.mxu3 %v2850_v5  ;;  %v7021_v40 = vld [vmem:[#allocation17_spill] sm:$0xff]  ;;  %v1150_v23 = vunpack.c.1.s8 %v362_v56  ;;  %v1978_v7 = vcvt.s32.f32 %v954_v36  ;;  %v422_v56 = vld [vmem:[%s5509_s21 + $0x778] sm:$0xff] }
 0x2d2   : > { %v4268_v28 = vadd.f32 %v4267_v2, %v4245_v9  ;;  %v4290_v19 = vpop.f32.mrf.mxu3  ;;  %v4224_v38 = vadd.f32 %v4223_v62, %v6656_v52  ;;  %v4246_v8 = vpop.f32.mrf.mxu1  ;;  %v1094_v9 = vunpack.c.3.s8 %v346_v44  ;;  %v330_v52 = vld [vmem:[%s5509_s21 + $0x498] sm:$0xff]  ;;  %v2750_v2 = vpack.c.bf16 %v1990_v41, %v1986_v30 }
 0x2d3   : > { %v1026_v34 = vunpack.c.2.s8 %v330_v52  ;;  %v1030_v14 = vunpack.c.3.s8 %v330_v52  ;;  %v1018_v5 = vunpack.c.0.s8 %v330_v52  ;;  %v2170_v39 = vcvt.s32.f32 %v1146_v31  ;;  %v438_v30 = vld [vmem:[%s5509_s21 + $0x7f8] sm:$0xff] }
 0x2d4   : > { %v6707_v49 = vadd.f32 %v4290_v19, %v4268_v28  ;;  %v6709_v53 = vadd.f32 %v4246_v8, %v4224_v38  ;;  %v2118_v29 = vcvt.s32.f32 %v1094_v9  ;;  %4603 = vmatpush.bf16.msra.mxu1 %v2786_v11  ;;  %v2846_v28 = vpack.c.bf16 %v2182_v32, %v2178_v57  ;;  %v7023_v11 = vld [vmem:[#allocation19_spill] sm:$0xff] }
 0x2d5   : > { %v2050_v62 = vcvt.s32.f32 %v1026_v34  ;;  %v2054_v3 = vcvt.s32.f32 %v1030_v14  ;;  %v2106_v19 = vcvt.s32.f32 %v1082_v15  ;;  %4581 = vmatpush.bf16.msra.mxu0 %v2750_v2  ;;  %v2110_v8 = vcvt.s32.f32 %v1086_v47 }
 0x2d6   : > { %v2814_v18 = vpack.c.bf16 %v2118_v29, %v2114_v35  ;;  %4650 = vmatpush.bf16.msra.mxu3 %v2846_v28  ;;  %v1982_v9 = vcvt.s32.f32 %v958_v60  ;;  %v2174_v33 = vcvt.s32.f32 %v1150_v23  ;;  %v1022_v51 = vunpack.c.1.s8 %v330_v52  ;;  %v7024_v35 = vld [vmem:[#allocation20_spill] sm:$0xff]  ;;  %v406_v23 = vld [vmem:[%s5509_s21 + $0x6f8] sm:$0xff] }
 0x2d7   : > { %v2782_v38 = vpack.c.bf16 %v2054_v3, %v2050_v62  ;;  %v2810_v44 = vpack.c.bf16 %v2110_v8, %v2106_v19  ;;  %v2042_v0 = vcvt.s32.f32 %v1018_v5  ;;  %v1394_v14 = vunpack.c.2.s8 %v422_v56 }
 0x2d8   : > { %4627 = vmatpush.bf16.msra.mxu2 %v2814_v18  ;;  %v2746_v29 = vpack.c.bf16 %v1982_v9, %v1978_v7  ;;  %v2842_v41 = vpack.c.bf16 %v2174_v33, %v2170_v39  ;;  %v2046_v34 = vcvt.s32.f32 %v1022_v51  ;;  %v1398_v18 = vunpack.c.3.s8 %v422_v56 }
 0x2d9   : > { %v6712_v24 = vpop.f32.mrf.mxu2  ;;  %v6714_v20 = vpop.f32.mrf.mxu0  ;;  %4604 = vmatpush.bf16.msra.mxu1 %v2782_v38  ;;  %v1266_v15 = vunpack.c.2.s8 %v390_v1  ;;  %v1270_v2 = vunpack.c.3.s8 %v390_v1  ;;  %v1458_v52 = vunpack.c.2.s8 %v438_v30  ;;  %v1462_v62 = vunpack.c.3.s8 %v438_v30 }
 0x2da   : > { %v6716_v16 = vpop.f32.mrf.mxu3  ;;  %v6718_v61 = vpop.f32.mrf.mxu1  ;;  %4582 = vmatpush.bf16.msra.mxu0 %v2746_v29  ;;  %4651 = vmatpush.bf16.msra.mxu3 %v2842_v41  ;;  %v2778_v28 = vpack.c.bf16 %v2046_v34, %v2042_v0  ;;  %v2418_v19 = vcvt.s32.f32 %v1394_v14  ;;  %v2422_v38 = vcvt.s32.f32 %v1398_v18  ;;  %v1330_v5 = vunpack.c.2.s8 %v406_v23 }
 0x2db   : > { %v2290_v8 = vcvt.s32.f32 %v1266_v15  ;;  %v2294_v36 = vcvt.s32.f32 %v1270_v2  ;;  %v2482_v60 = vcvt.s32.f32 %v1458_v52  ;;  %v1258_v51 = vunpack.c.0.s8 %v390_v1 }
 0x2dc   : > { %4496 = vmatmul.bf16.gmra.mxu0 %v7021_v40  ;;  %4628 = vmatpush.bf16.msra.mxu2 %v2810_v44  ;;  %v2486_v40 = vcvt.s32.f32 %v1462_v62  ;;  %v2966_v31 = vpack.c.bf16 %v2422_v38, %v2418_v19  ;;  %v1390_v44 = vunpack.c.1.s8 %v422_v56  ;;  %v2354_v29 = vcvt.s32.f32 %v1330_v5 }
 0x2dd   : > { %4519 = vmatmul.bf16.gmra.mxu1 %v7022_v48  ;;  %v1386_v48 = vunpack.c.0.s8 %v422_v56  ;;  %v2902_v7 = vpack.c.bf16 %v2294_v36, %v2290_v8  ;;  %v1450_v41 = vunpack.c.0.s8 %v438_v30  ;;  %v1454_v34 = vunpack.c.1.s8 %v438_v30 }
 0x2de   : > { %4542 = vmatmul.bf16.gmra.mxu2 %v7023_v11  ;;  %4605 = vmatpush.bf16.msra.mxu1 %v2778_v28  ;;  %v2998_v9 = vpack.c.bf16 %v2486_v40, %v2482_v60  ;;  %v1334_v11 = vunpack.c.3.s8 %v406_v23  ;;  %v2414_v33 = vcvt.s32.f32 %v1390_v44  ;;  %v2282_v18 = vcvt.s32.f32 %v1258_v51  ;;  %v418_v60 = vld [vmem:[%s5509_s21 + $0x758] sm:$0xff] }
 0x2df   : > { %4565 = vmatmul.bf16.gmra.mxu3 %v7024_v35  ;;  %v2410_v39 = vcvt.s32.f32 %v1386_v48  ;;  %v1262_v35 = vunpack.c.1.s8 %v390_v1  ;;  %4667 = vmatpush.bf16.msrb.mxu0 %v2902_v7  ;;  %v1322_v15 = vunpack.c.0.s8 %v406_v23  ;;  %v2474_v62 = vcvt.s32.f32 %v1450_v41  ;;  %v386_v40 = vld [vmem:[%s5509_s21 + $0x658] sm:$0xff] }
 0x2e0   : > { %4713 = vmatpush.bf16.msrb.mxu2 %v2966_v31  ;;  %4736 = vmatpush.bf16.msrb.mxu3 %v2998_v9  ;;  %v2358_v0 = vcvt.s32.f32 %v1334_v11  ;;  %v1326_v1 = vunpack.c.1.s8 %v406_v23  ;;  %v434_v31 = vld [vmem:[%s5509_s21 + $0x7d8] sm:$0xff]  ;;  %v1378_v23 = vunpack.c.2.s8 %v418_v60  ;;  %v1382_v44 = vunpack.c.3.s8 %v418_v60 }
 0x2e1   : > { %v6727_v57 = vpop.f32.mrf.mxu2  ;;  %v4228_v32 = vpop.f32.mrf.mxu0  ;;  %v2962_v14 = vpack.c.bf16 %v2414_v33, %v2410_v39  ;;  %v2346_v30 = vcvt.s32.f32 %v1322_v15  ;;  %v1250_v7 = vunpack.c.2.s8 %v386_v40  ;;  %v1254_v9 = vunpack.c.3.s8 %v386_v40  ;;  %v402_v51 = vld [vmem:[%s5509_s21 + $0x6d8] sm:$0xff] }
 0x2e2   : > { %v6729_v3 = vpop.f32.mrf.mxu3  ;;  %v4251_v47 = vpop.f32.mrf.mxu1  ;;  %v2286_v32 = vcvt.s32.f32 %v1262_v35  ;;  %v2934_v52 = vpack.c.bf16 %v2358_v0, %v2354_v29  ;;  %v2350_v36 = vcvt.s32.f32 %v1326_v1  ;;  %v1442_v5 = vunpack.c.2.s8 %v434_v31 }
 0x2e3   : > { %v2478_v47 = vcvt.s32.f32 %v1454_v34  ;;  %v1446_v11 = vunpack.c.3.s8 %v434_v31  ;;  %v2406_v39 = vcvt.s32.f32 %v1382_v44  ;;  %v2274_v33 = vcvt.s32.f32 %v1250_v7 }
 0x2e4   : > { %4714 = vmatpush.bf16.msrb.mxu2 %v2962_v14  ;;  %v2898_v38 = vpack.c.bf16 %v2286_v32, %v2282_v18  ;;  %4690 = vmatpush.bf16.msrb.mxu1 %v2934_v52  ;;  %v2930_v48 = vpack.c.bf16 %v2350_v36, %v2346_v30  ;;  %v2278_v35 = vcvt.s32.f32 %v1254_v9  ;;  %v2466_v29 = vcvt.s32.f32 %v1442_v5 }
 0x2e5   : > { %v2994_v8 = vpack.c.bf16 %v2478_v47, %v2474_v62  ;;  %v2470_v0 = vcvt.s32.f32 %v1446_v11  ;;  %v1314_v41 = vunpack.c.2.s8 %v402_v51  ;;  %v1318_v18 = vunpack.c.3.s8 %v402_v51 }
 0x2e6   : > { %4668 = vmatpush.bf16.msrb.mxu0 %v2898_v38  ;;  %v1374_v32 = vunpack.c.1.s8 %v418_v60  ;;  %v2894_v52 = vpack.c.bf16 %v2278_v35, %v2274_v33  ;;  %v1242_v36 = vunpack.c.0.s8 %v386_v40  ;;  %v1306_v9 = vunpack.c.0.s8 %v402_v51  ;;  %v414_v35 = vld [vmem:[%s5509_s21 + $0x738] sm:$0xff] }
 0x2e7   : > { %4737 = vmatpush.bf16.msrb.mxu3 %v2994_v8  ;;  %v2990_v62 = vpack.c.bf16 %v2470_v0, %v2466_v29  ;;  %v2338_v47 = vcvt.s32.f32 %v1314_v41  ;;  %v2342_v1 = vcvt.s32.f32 %v1318_v18  ;;  %v4227_v8 = vadd.f32 %v6714_v20, %v6665_v25  ;;  %v382_v29 = vld [vmem:[%s5509_s21 + $0x638] sm:$0xff] }
 0x2e8   : > { %4691 = vmatpush.bf16.msrb.mxu1 %v2930_v48  ;;  %v1434_v48 = vunpack.c.0.s8 %v434_v31  ;;  %v1310_v5 = vunpack.c.1.s8 %v402_v51  ;;  %v2266_v20 = vcvt.s32.f32 %v1242_v36  ;;  %v430_v0 = vld [vmem:[%s5509_s21 + $0x7b8] sm:$0xff] }
 0x2e9   : > { %v4274_v56 = vpop.f32.mrf.mxu2  ;;  %v6732_v2 = vpop.f32.mrf.mxu0  ;;  %v2926_v38 = vpack.c.bf16 %v2342_v1, %v2338_v47  ;;  %v4250_v11 = vadd.f32 %v6718_v61, %v4227_v8  ;;  %v1362_v61 = vunpack.c.2.s8 %v414_v35  ;;  %v1238_v47 = vunpack.c.3.s8 %v382_v29 }
 0x2ea   : > { %v4297_v28 = vpop.f32.mrf.mxu3  ;;  %v6734_v19 = vpop.f32.mrf.mxu1  ;;  %4669 = vmatpush.bf16.msrb.mxu0 %v2894_v52  ;;  %v1234_v52 = vunpack.c.2.s8 %v382_v29  ;;  %v1426_v1 = vunpack.c.2.s8 %v430_v0 }
 0x2eb   : > { %v2398_v28 = vcvt.s32.f32 %v1374_v32  ;;  %4738 = vmatpush.bf16.msrb.mxu3 %v2990_v62  ;;  %v4273_v41 = vadd.f32 %v6727_v57, %v4250_v11  ;;  %v2386_v62 = vcvt.s32.f32 %v1362_v61  ;;  %v1358_v11 = vunpack.c.1.s8 %v414_v35  ;;  %v6781_v61 = vld [vmem:[%s5509_s21 + $0x718] sm:$0xff] }
 0x2ec   : > { %4501 = vmatmul.bf16.gmra.mxu0 %v5697_v26  ;;  %v2402_v26 = vcvt.s32.f32 %v1378_v23  ;;  %4692 = vmatpush.bf16.msrb.mxu1 %v2926_v38  ;;  %v1438_v23 = vunpack.c.1.s8 %v434_v31  ;;  %v2334_v31 = vcvt.s32.f32 %v1310_v5  ;;  %v2258_v57 = vcvt.s32.f32 %v1234_v52 }
 0x2ed   : > { %4524 = vmatmul.bf16.gmra.mxu1 %v5699_v37  ;;  %v1370_v37 = vunpack.c.0.s8 %v418_v60  ;;  %v1246_v60 = vunpack.c.1.s8 %v386_v40  ;;  %v2450_v8 = vcvt.s32.f32 %v1426_v1 }
 0x2ee   : > { %4547 = vmatmul.bf16.gmra.mxu2 %v7001_v58  ;;  %v2958_v58 = vpack.c.bf16 %v2406_v39, %v2402_v26  ;;  %v2458_v39 = vcvt.s32.f32 %v1434_v48  ;;  %v2462_v33 = vcvt.s32.f32 %v1438_v23 }
 0x2ef   : > { %4570 = vmatmul.bf16.gmra.mxu3 %v6979_v12  ;;  %v2394_v15 = vcvt.s32.f32 %v1370_v37  ;;  %v2270_v40 = vcvt.s32.f32 %v1246_v60  ;;  %v2330_v37 = vcvt.s32.f32 %v1306_v9  ;;  %v1354_v60 = vunpack.c.0.s8 %v414_v35 }
 0x2f0   : > { %4715 = vmatpush.bf16.msrb.mxu2 %v2958_v58  ;;  %v398_v58 = vld [vmem:[%s5509_s21 + $0x6b8] sm:$0xff]  ;;  %v2986_v18 = vpack.c.bf16 %v2462_v33, %v2458_v39 }
 0x2f1   : > { %v6744_v34 = vpop.f32.mrf.mxu2  ;;  %v6746_v14 = vpop.f32.mrf.mxu0  ;;  %v2954_v30 = vpack.c.bf16 %v2398_v28, %v2394_v15  ;;  %v2890_v51 = vpack.c.bf16 %v2270_v40, %v2266_v20  ;;  %v2922_v32 = vpack.c.bf16 %v2334_v31, %v2330_v37  ;;  %v1366_v15 = vunpack.c.3.s8 %v414_v35 }
 0x2f2   : > { %v6748_v56 = vpop.f32.mrf.mxu3  ;;  %v6750_v12 = vpop.f32.mrf.mxu1  ;;  %v1430_v28 = vunpack.c.3.s8 %v430_v0  ;;  %v1298_v38 = vunpack.c.2.s8 %v398_v58  ;;  %4739 = vmatpush.bf16.msrb.mxu3 %v2986_v18  ;;  %v2378_v37 = vcvt.s32.f32 %v1354_v60  ;;  %v2382_v31 = vcvt.s32.f32 %v1358_v11 }
 0x2f3   : > { %4670 = vmatpush.bf16.msrb.mxu0 %v2890_v51  ;;  %4693 = vmatpush.bf16.msrb.mxu1 %v2922_v32  ;;  %v1226_v51 = vunpack.c.0.s8 %v382_v29  ;;  %v4296_v18 = vadd.f32 %v6729_v3, %v4273_v41  ;;  %v1230_v35 = vunpack.c.1.s8 %v382_v29  ;;  %v1418_v32 = vunpack.c.0.s8 %v430_v0 }
 0x2f4   : > { %4716 = vmatpush.bf16.msrb.mxu2 %v2954_v30  ;;  %v1302_v30 = vunpack.c.3.s8 %v398_v58  ;;  %v2454_v36 = vcvt.s32.f32 %v1430_v28  ;;  %v2322_v9 = vcvt.s32.f32 %v1298_v38  ;;  %v2946_v52 = vpack.c.bf16 %v2382_v31, %v2378_v37 }
 0x2f5   : > { %v1290_v1 = vunpack.c.0.s8 %v398_v58  ;;  %v2254_v28 = vcvt.s32.f32 %v1230_v35  ;;  %v1346_v38 = vunpack.c.2.s8 %v6781_v61  ;;  %v1350_v29 = vunpack.c.3.s8 %v6781_v61 }
 0x2f6   : > { %v2326_v5 = vcvt.s32.f32 %v1302_v30  ;;  %v2982_v39 = vpack.c.bf16 %v2454_v36, %v2450_v8  ;;  %v426_v30 = vld [vmem:[%s5509_s21 + $0x798] sm:$0xff] }
 0x2f7   : > { %v2314_v41 = vcvt.s32.f32 %v1290_v1  ;;  %v2370_v60 = vcvt.s32.f32 %v1346_v38  ;;  %v2374_v11 = vcvt.s32.f32 %v1350_v29  ;;  %v4270_v1 = vadd.f32 %v6712_v24, %v6709_v53 }
 0x2f8   : > { %v2918_v33 = vpack.c.bf16 %v2326_v5, %v2322_v9  ;;  %4740 = vmatpush.bf16.msrb.mxu3 %v2982_v39  ;;  %v1410_v39 = vunpack.c.2.s8 %v426_v30  ;;  %v1402_v24 = vunpack.c.0.s8 %v426_v30 }
 0x2f9   : > { %v6754_v44 = vpop.f32.mrf.mxu2  ;;  %v6756_v7 = vpop.f32.mrf.mxu0 }
 0x2fa   : > { %v6759_v26 = vpop.f32.mrf.mxu3  ;;  %v6761_v25 = vpop.f32.mrf.mxu1  ;;  %4694 = vmatpush.bf16.msrb.mxu1 %v2918_v33 }
 0x2fc   : > { %4583 = vmatmul.bf16.vlgmr.msra.gmra.mxu0 %v6980_v22  ;;  %v2390_v22 = vcvt.s32.f32 %v1366_v15  ;;  %v6785_v15 = vld [vmem:[%s5509_s21 + $0x618] sm:$0xff] }
 0x2fd   : > { %4606 = vmatmul.bf16.vlgmr.msra.gmra.mxu1 %v6981_v63  ;;  %v2262_v63 = vcvt.s32.f32 %v1238_v47  ;;  %v1422_v47 = vunpack.c.1.s8 %v430_v0  ;;  %v1222_v0 = vunpack.c.3.s8 %v6785_v15  ;;  %v1210_v53 = vunpack.c.0.s8 %v6785_v15 }
 0x2fe   : > { %4629 = vmatmul.bf16.vlgmr.msra.gmra.mxu2 %v7002_v6  ;;  %v2950_v23 = vpack.c.bf16 %v2390_v22, %v2386_v62  ;;  %v2250_v62 = vcvt.s32.f32 %v1226_v51  ;;  %v2442_v22 = vcvt.s32.f32 %v1418_v32  ;;  %v2942_v32 = vpack.c.bf16 %v2374_v11, %v2370_v60 }
 0x2ff   : > { %4652 = vmatmul.bf16.vlgmr.msra.gmra.mxu3 %v7003_v43  ;;  %v2886_v40 = vpack.c.bf16 %v2262_v63, %v2258_v57  ;;  %v1294_v57 = vunpack.c.1.s8 %v398_v58  ;;  %v2446_v3 = vcvt.s32.f32 %v1422_v47  ;;  %v1218_v63 = vunpack.c.2.s8 %v6785_v15 }
 0x300   : > { %4717 = vmatpush.bf16.msrb.mxu2 %v2950_v23  ;;  %v2882_v8 = vpack.c.bf16 %v2254_v28, %v2250_v62  ;;  %v394_v23 = vld [vmem:[%s5509_s21 + $0x698] sm:$0xff]  ;;  %v2246_v35 = vcvt.s32.f32 %v1222_v0  ;;  %v2434_v62 = vcvt.s32.f32 %v1410_v39  ;;  %v2234_v0 = vcvt.s32.f32 %v1210_v53 }
 0x301   : > { %v6772_v48 = vpop.f32.mrf.mxu2  ;;  %v6774_v6 = vpop.f32.mrf.mxu0  ;;  %4671 = vmatpush.bf16.msrb.mxu0 %v2886_v40  ;;  %v2318_v36 = vcvt.s32.f32 %v1294_v57  ;;  %v2978_v58 = vpack.c.bf16 %v2446_v3, %v2442_v22  ;;  %v2242_v40 = vcvt.s32.f32 %v1218_v63  ;;  %v1282_v47 = vunpack.c.2.s8 %v394_v23 }
 0x302   : > { %v6776_v43 = vpop.f32.mrf.mxu3  ;;  %v6778_v20 = vpop.f32.mrf.mxu1  ;;  %v1286_v57 = vunpack.c.3.s8 %v394_v23  ;;  %v1338_v3 = vunpack.c.0.s8 %v6781_v61  ;;  %v1274_v39 = vunpack.c.0.s8 %v394_v23 }
 0x303   : > { %v2914_v51 = vpack.c.bf16 %v2318_v36, %v2314_v41  ;;  %4741 = vmatpush.bf16.msrb.mxu3 %v2978_v58  ;;  %v2878_v22 = vpack.c.bf16 %v2246_v35, %v2242_v40  ;;  %v2306_v38 = vcvt.s32.f32 %v1282_v47  ;;  %v1342_v41 = vunpack.c.1.s8 %v6781_v61 }
 0x304   : > { %4718 = vmatpush.bf16.msrb.mxu2 %v2946_v52  ;;  %v1414_v52 = vunpack.c.3.s8 %v426_v30  ;;  %v2310_v29 = vcvt.s32.f32 %v1286_v57  ;;  %v1406_v36 = vunpack.c.1.s8 %v426_v30  ;;  %v2426_v58 = vcvt.s32.f32 %v1402_v24 }
 0x305   : > { %4672 = vmatpush.bf16.msrb.mxu0 %v2882_v8  ;;  %4695 = vmatpush.bf16.msrb.mxu1 %v2914_v51  ;;  %v2366_v8 = vcvt.s32.f32 %v1342_v41  ;;  %v4293_v35 = vadd.f32 %v6716_v16, %v4270_v1 }
 0x306   : > { %v2910_v60 = vpack.c.bf16 %v2310_v29, %v2306_v38  ;;  %v2430_v40 = vcvt.s32.f32 %v1406_v36 }
 0x308   : > { %4719 = vmatpush.bf16.msrb.mxu2 %v2942_v32  ;;  %v2970_v30 = vpack.c.bf16 %v2430_v40, %v2426_v58  ;;  %v2298_v32 = vcvt.s32.f32 %v1274_v39 }
 0x309   : > { %v6793_v9 = vpop.f32.mrf.mxu2  ;;  %v4318_v5 = vpop.f32.mrf.mxu0  ;;  %4673 = vmatpush.bf16.msrb.mxu0 %v2878_v22  ;;  %4696 = vmatpush.bf16.msrb.mxu1 %v2910_v60  ;;  %v4311_v22 = vadd.f32 %v6746_v14, %v6693_v55 }
 0x30a   : > { %v6795_v33 = vpop.f32.mrf.mxu3  ;;  %v4319_v37 = vadd.f32 %v4318_v5, %v4296_v18  ;;  %v4341_v31 = vpop.f32.mrf.mxu1  ;;  %v2438_v18 = vcvt.s32.f32 %v1414_v52 }
 0x30c   : > { %v4342_v28 = vadd.f32 %v4341_v31, %v4319_v37  ;;  %4588 = vmatmul.bf16.gmra.mxu0 %v6984_v21  ;;  %v1214_v21 = vunpack.c.1.s8 %v6785_v15  ;;  %v2974_v63 = vpack.c.bf16 %v2438_v18, %v2434_v62  ;;  %v1278_v37 = vunpack.c.1.s8 %v394_v23 }
 0x30d   : > { %4611 = vmatmul.bf16.gmra.mxu1 %v6985_v17  ;;  %v2362_v17 = vcvt.s32.f32 %v1338_v3  ;;  %v4309_v62 = vadd.f32 %v6732_v2, %v6678_v4  ;;  %v4314_v23 = vadd.f32 %v6756_v7, %v6707_v49  ;;  %v4334_v18 = vadd.f32 %v6750_v12, %v4311_v22 }
 0x30e   : > { %4634 = vmatmul.bf16.gmra.mxu2 %v7004_v42  ;;  %v2238_v5 = vcvt.s32.f32 %v1214_v21  ;;  %4742 = vmatpush.bf16.msrb.mxu3 %v2974_v63  ;;  %v2302_v52 = vcvt.s32.f32 %v1278_v37  ;;  %v7027_v37 = vld [vmem:[#allocation35_spill] sm:$0xff] }
 0x30f   : > { %4657 = vmatmul.bf16.gmra.mxu3 %v7005_v50  ;;  %v2938_v42 = vpack.c.bf16 %v2366_v8, %v2362_v17  ;;  %v4332_v1 = vadd.f32 %v6734_v19, %v4309_v62  ;;  %v4337_v4 = vadd.f32 %v6761_v25, %v4314_v23 }
 0x310   : > { %v2874_v50 = vpack.c.bf16 %v2238_v5, %v2234_v0  ;;  %v2906_v57 = vpack.c.bf16 %v2302_v52, %v2298_v32 }
 0x311   : > { %v4364_v61 = vpop.f32.mrf.mxu2  ;;  %v4320_v11 = vpop.f32.mrf.mxu0  ;;  %4720 = vmatpush.bf16.msrb.mxu2 %v2938_v42  ;;  %v4355_v14 = vadd.f32 %v6744_v34, %v4332_v1  ;;  %v4360_v3 = vadd.f32 %v6772_v48, %v4337_v4  ;;  %v7026_v48 = vld [vmem:[#allocation34_spill] sm:$0xff]  ;;  %v7032_v4 = vld [vmem:[#allocation40_spill] sm:$0xff] }
 0x312   : > { %v4365_v31 = vadd.f32 %v4364_v61, %v4342_v28  ;;  %v4387_v15 = vpop.f32.mrf.mxu3  ;;  %v4343_v51 = vpop.f32.mrf.mxu1  ;;  %4674 = vmatpush.bf16.msrb.mxu0 %v2874_v50  ;;  %v4316_v28 = vadd.f32 %v6774_v6, %v4293_v35  ;;  %4743 = vmatpush.bf16.msrb.mxu3 %v2970_v30  ;;  %v4357_v6 = vadd.f32 %v6754_v44, %v4334_v18  ;;  %v7030_v1 = vld [vmem:[#allocation38_spill] sm:$0xff]  ;;  %v7031_v18 = vld [vmem:[#allocation39_spill] sm:$0xff] }
 0x313   : > { %4697 = vmatpush.bf16.msrb.mxu1 %v2906_v57  ;;  %v4378_v25 = vadd.f32 %v6748_v56, %v4355_v14  ;;  %v4383_v29 = vadd.f32 %v6776_v43, %v4360_v3 }
 0x314   : > { %v4388_v47 = vadd.f32 %v4387_v15, %v4365_v31  ;;  %v4339_v2 = vadd.f32 %v6778_v20, %v4316_v28  ;;  %v7025_v20 = vld [vmem:[#allocation33_spill] sm:$0xff]  ;;  %v4380_v34 = vadd.f32 %v6759_v26, %v4357_v6  ;;  %v7028_v31 = vld [vmem:[#allocation36_spill] sm:$0xff] }
 0x315   : > { %v7029_v15 = vld [vmem:[#allocation37_spill] sm:$0xff] }
 0x316   : > { %v4761_v16 = vadd.f32 1.0, %v4388_v47  ;;  %v4362_v41 = vadd.f32 %v6793_v9, %v4339_v2  ;;  %v7033_v2 = vld [vmem:[#allocation41_spill] sm:$0xff] }
 0x318   : > { %5247 = vrcp.f32 %v4761_v16  ;;  %v4385_v44 = vadd.f32 %v6795_v33, %v4362_v41 }
 0x319   : > { %v4366_v38 = vpop.f32.mrf.mxu2  ;;  %v4400_v55 = vpop.f32.mrf.mxu0 }
 0x31a   : > { %v4389_v49 = vpop.f32.mrf.mxu3  ;;  %v4423_v7 = vpop.f32.mrf.mxu1 }
 0x31b   : > { %v4424_v19 = vadd.f32 %v4423_v7, %v4400_v55 }
 0x31c   : > { %4593 = vmatmul.bf16.gmra.mxu0 %v7006_v46 }
 0x31d   : > { %4616 = vmatmul.bf16.gmra.mxu1 %v7007_v10 }
 0x31e   : > { %v5248_v12 = vpop.eup %5247  ;;  %4639 = vmatmul.bf16.gmra.mxu2 %v7025_v20 }
 0x31f   : > { %v4769_v53 = vperm.slane %v5248_v12, 0  ;;  %4662 = vmatmul.bf16.gmra.mxu3 %v7026_v48 }
 0x321   : > { %v4773_v9 = vmul.f32 %v4769_v53, %v4378_v25  ;;  %v4777_v46 = vmul.f32 %v4769_v53, %v4380_v34  ;;  %v4781_v10 = vmul.f32 %v4769_v53, %v4383_v29  ;;  %v4785_v21 = vmul.f32 %v4769_v53, %v4385_v44  ;;  %v4446_v56 = vpop.f32.mrf.mxu2  ;;  %v4402_v24 = vpop.f32.mrf.mxu0 }
 0x322   : > { %v4447_v63 = vadd.f32 %v4446_v56, %v4424_v19  ;;  %v4469_v17 = vpop.f32.mrf.mxu3  ;;  %v4425_v26 = vpop.f32.mrf.mxu1 }
 0x323   : > { %v4789_v8 = vmax.f32 %v4773_v9, 0.0  ;;  %v4793_v43 = vmax.f32 %v4777_v46, 0.0  ;;  %v4797_v36 = vmax.f32 %v4781_v10, 0.0  ;;  %v4801_v33 = vmax.f32 %v4785_v21, 0.0 }
 0x324   : > { %v4470_v60 = vadd.f32 %v4469_v17, %v4447_v63  ;;  %v4426_v0 = vadd.f32 %v4425_v26, %v4402_v24 }
 0x325   : > { %4805 = vst [vmem:[%s6229_s20 + $0x10] sm:$0xff] %v4789_v8 }
 0x326   : > { %4809 = vst [vmem:[%s6229_s20 + $0x30] sm:$0xff] %v4793_v43 }
 0x327   : > { %4813 = vst [vmem:[%s6229_s20 + $0x50] sm:$0xff] %v4797_v36 }
 0x328   : > { %4817 = vst [vmem:[%s6229_s20 + $0x70] sm:$0xff] %v4801_v33 }
 0x329   : > { %v4448_v5 = vpop.f32.mrf.mxu2  ;;  %v4405_v58 = vpop.f32.mrf.mxu0 }
 0x32a   : > { %v4449_v61 = vadd.f32 %v4448_v5, %v4426_v0  ;;  %v4471_v11 = vpop.f32.mrf.mxu3  ;;  %v4428_v42 = vpop.f32.mrf.mxu1 }
 0x32b   : > { %v4429_v40 = vadd.f32 %v4428_v42, %v4405_v58 }
 0x32c   : > { %v4472_v39 = vadd.f32 %v4471_v11, %v4449_v61  ;;  %4675 = vmatmul.bf16.vlgmr.msrb.gmra.mxu0 %v5810_v13 }
 0x32d   : > { %4698 = vmatmul.bf16.vlgmr.msrb.gmra.mxu1 %v7027_v37 }
 0x32e   : > { %4721 = vmatmul.bf16.vlgmr.msrb.gmra.mxu2 %v7028_v31 }
 0x32f   : > { %4744 = vmatmul.bf16.vlgmr.msrb.gmra.mxu3 %v7029_v15 }
 0x331   : > { %v4451_v51 = vpop.f32.mrf.mxu2  ;;  %v4407_v50 = vpop.f32.mrf.mxu0 }
 0x332   : > { %v4452_v35 = vadd.f32 %v4451_v51, %v4429_v40  ;;  %v4474_v30 = vpop.f32.mrf.mxu3  ;;  %v4430_v32 = vpop.f32.mrf.mxu1 }
 0x333   : > { %v4431_v52 = vadd.f32 %v4430_v32, %v4407_v50 }
 0x334   : > { %v4475_v62 = vadd.f32 %v4474_v30, %v4452_v35 }
 0x339   : > { %v4453_v47 = vpop.f32.mrf.mxu2  ;;  %v4410_v22 = vpop.f32.mrf.mxu0 }
 0x33a   : > { %v4454_v23 = vadd.f32 %v4453_v47, %v4431_v52  ;;  %v4476_v28 = vpop.f32.mrf.mxu3  ;;  %v4433_v57 = vpop.f32.mrf.mxu1 }
 0x33b   : > { %v4434_v16 = vadd.f32 %v4433_v57, %v4410_v22 }
 0x33c   : > { %v4477_v13 = vadd.f32 %v4476_v28, %v4454_v23  ;;  %4680 = vmatmul.bf16.gmra.mxu0 %v7030_v1 }
 0x33d   : > { %4703 = vmatmul.bf16.gmra.mxu1 %v7031_v18 }
 0x33e   : > { %4726 = vmatmul.bf16.gmra.mxu2 %v7032_v4 }
 0x33f   : > { %4749 = vmatmul.bf16.gmra.mxu3 %v7033_v2 }
 0x341   : > { %v4456_v38 = vpop.f32.mrf.mxu2  ;;  %v4412_v55 = vpop.f32.mrf.mxu0 }
 0x342   : > { %v4457_v14 = vadd.f32 %v4456_v38, %v4434_v16  ;;  %v4479_v49 = vpop.f32.mrf.mxu3  ;;  %v4435_v7 = vpop.f32.mrf.mxu1 }
 0x344   : > { %v4480_v6 = vadd.f32 %v4479_v49, %v4457_v14 }
 0x349   : > { %v4458_v3 = vpop.f32.mrf.mxu2  ;;  %v4492_v41 = vpop.f32.mrf.mxu0 }
 0x34a   : > { %v4481_v19 = vpop.f32.mrf.mxu3  ;;  %v4493_v12 = vadd.f32 %v4492_v41, %v4470_v60  ;;  %v4515_v25 = vpop.f32.mrf.mxu1 }
 0x34c   : > { %v4516_v20 = vadd.f32 %v4515_v25, %v4493_v12  ;;  %4685 = vmatmul.bf16.gmra.mxu0 %v5905_v45 }
 0x34d   : > { %4708 = vmatmul.bf16.gmra.mxu1 %v5907_v59 }
 0x34e   : > { %4731 = vmatmul.bf16.gmra.mxu2 %v5909_v27 }
 0x34f   : > { %4754 = vmatmul.bf16.gmra.mxu3 %v5911_v54 }
 0x351   : > { %v4538_v34 = vpop.f32.mrf.mxu2  ;;  %v4494_v29 = vpop.f32.mrf.mxu0 }
 0x352   : > { %v4539_v44 = vadd.f32 %v4538_v34, %v4516_v20  ;;  %v4561_v53 = vpop.f32.mrf.mxu3  ;;  %v4495_v48 = vadd.f32 %v4494_v29, %v4472_v39  ;;  %v4517_v9 = vpop.f32.mrf.mxu1 }
 0x354   : > { %v4562_v46 = vadd.f32 %v4561_v53, %v4539_v44  ;;  %v4518_v10 = vadd.f32 %v4517_v9, %v4495_v48 }
 0x359   : > { %v4540_v21 = vpop.f32.mrf.mxu2  ;;  %v4497_v56 = vpop.f32.mrf.mxu0 }
 0x35a   : > { %v4541_v24 = vadd.f32 %v4540_v21, %v4518_v10  ;;  %v4563_v63 = vpop.f32.mrf.mxu3  ;;  %v4498_v17 = vadd.f32 %v4497_v56, %v4475_v62  ;;  %v4520_v45 = vpop.f32.mrf.mxu1 }
 0x35c   : > { %v4564_v26 = vadd.f32 %v4563_v63, %v4541_v24  ;;  %v4521_v59 = vadd.f32 %v4520_v45, %v4498_v17 }
 0x361   : > { %v4543_v8 = vpop.f32.mrf.mxu2  ;;  %v4499_v27 = vpop.f32.mrf.mxu0 }
 0x362   : > { %v4544_v43 = vadd.f32 %v4543_v8, %v4521_v59  ;;  %v4566_v54 = vpop.f32.mrf.mxu3  ;;  %v4500_v36 = vadd.f32 %v4499_v27, %v4477_v13  ;;  %v4522_v33 = vpop.f32.mrf.mxu1 }
 0x364   : > { %v4567_v60 = vadd.f32 %v4566_v54, %v4544_v43  ;;  %v4523_v0 = vadd.f32 %v4522_v33, %v4500_v36 }
 0x369   : > { %v4545_v5 = vpop.f32.mrf.mxu2  ;;  %v4502_v58 = vpop.f32.mrf.mxu0 }
 0x36a   : > { %v4546_v61 = vadd.f32 %v4545_v5, %v4523_v0  ;;  %v4568_v11 = vpop.f32.mrf.mxu3  ;;  %v4503_v42 = vadd.f32 %v4502_v58, %v4480_v6  ;;  %v4525_v40 = vpop.f32.mrf.mxu1 }
 0x36c   : > { %v4569_v39 = vadd.f32 %v4568_v11, %v4546_v61  ;;  %v4526_v37 = vadd.f32 %v4525_v40, %v4503_v42 }
 0x371   : > { %v4548_v31 = vpop.f32.mrf.mxu2  ;;  %v4504_v15 = vpop.f32.mrf.mxu0 }
 0x372   : > { %v4549_v51 = vadd.f32 %v4548_v31, %v4526_v37  ;;  %v4571_v50 = vpop.f32.mrf.mxu3  ;;  %v4527_v35 = vpop.f32.mrf.mxu1 }
 0x374   : > { %v4572_v30 = vadd.f32 %v4571_v50, %v4549_v51 }
 0x379   : > { %v4550_v32 = vpop.f32.mrf.mxu2  ;;  %v4584_v52 = vpop.f32.mrf.mxu0 }
 0x37a   : > { %v4573_v62 = vpop.f32.mrf.mxu3  ;;  %v4585_v47 = vadd.f32 %v4584_v52, %v4562_v46  ;;  %v4607_v22 = vpop.f32.mrf.mxu1 }
 0x37c   : > { %v4608_v23 = vadd.f32 %v4607_v22, %v4585_v47 }
 0x381   : > { %v4630_v28 = vpop.f32.mrf.mxu2  ;;  %v4586_v57 = vpop.f32.mrf.mxu0 }
 0x382   : > { %v4631_v16 = vadd.f32 %v4630_v28, %v4608_v23  ;;  %v4653_v13 = vpop.f32.mrf.mxu3  ;;  %v4587_v1 = vadd.f32 %v4586_v57, %v4564_v26  ;;  %v4609_v18 = vpop.f32.mrf.mxu1 }
 0x384   : > { %v4654_v4 = vadd.f32 %v4653_v13, %v4631_v16  ;;  %v4610_v2 = vadd.f32 %v4609_v18, %v4587_v1 }
 0x389   : > { %v4632_v38 = vpop.f32.mrf.mxu2  ;;  %v4589_v55 = vpop.f32.mrf.mxu0 }
 0x38a   : > { %v4633_v14 = vadd.f32 %v4632_v38, %v4610_v2  ;;  %v4655_v49 = vpop.f32.mrf.mxu3  ;;  %v4590_v7 = vadd.f32 %v4589_v55, %v4567_v60  ;;  %v4612_v6 = vpop.f32.mrf.mxu1 }
 0x38c   : > { %v4656_v3 = vadd.f32 %v4655_v49, %v4633_v14  ;;  %v4613_v41 = vadd.f32 %v4612_v6, %v4590_v7 }
 0x391   : > { %v4635_v19 = vpop.f32.mrf.mxu2  ;;  %v4591_v12 = vpop.f32.mrf.mxu0 }
 0x392   : > { %v4636_v25 = vadd.f32 %v4635_v19, %v4613_v41  ;;  %v4658_v20 = vpop.f32.mrf.mxu3  ;;  %v4592_v34 = vadd.f32 %v4591_v12, %v4569_v39  ;;  %v4614_v29 = vpop.f32.mrf.mxu1 }
 0x394   : > { %v4659_v44 = vadd.f32 %v4658_v20, %v4636_v25  ;;  %v4615_v53 = vadd.f32 %v4614_v29, %v4592_v34 }
 0x399   : > { %v4637_v48 = vpop.f32.mrf.mxu2  ;;  %v4594_v9 = vpop.f32.mrf.mxu0 }
 0x39a   : > { %v4660_v46 = vpop.f32.mrf.mxu3  ;;  %v4617_v10 = vpop.f32.mrf.mxu1  ;;  %v4595_v5 = vadd.f32 %v4594_v9, %v4572_v30  ;;  %v4638_v32 = vadd.f32 %v4637_v48, %v4615_v53 }
 0x39c   : > { %v4618_v40 = vadd.f32 %v4617_v10, %v4595_v5  ;;  %v4661_v30 = vadd.f32 %v4660_v46, %v4638_v32 }
 0x3a1   : > { %v4640_v21 = vpop.f32.mrf.mxu2  ;;  %v4596_v56 = vpop.f32.mrf.mxu0 }
 0x3a2   : > { %v4663_v24 = vpop.f32.mrf.mxu3  ;;  %v4619_v63 = vpop.f32.mrf.mxu1  ;;  %v4641_v39 = vadd.f32 %v4640_v21, %v4618_v40 }
 0x3a4   : > { %v4664_v15 = vadd.f32 %v4663_v24, %v4641_v39 }
 0x3a9   : > { %v4642_v17 = vpop.f32.mrf.mxu2  ;;  %v4676_v45 = vpop.f32.mrf.mxu0 }
 0x3aa   : > { %v4665_v26 = vpop.f32.mrf.mxu3  ;;  %v4699_v59 = vpop.f32.mrf.mxu1  ;;  %v4677_v57 = vadd.f32 %v4676_v45, %v4654_v4 }
 0x3ac   : > { %v4700_v38 = vadd.f32 %v4699_v59, %v4677_v57 }
 0x3b1   : > { %v4722_v8 = vpop.f32.mrf.mxu2  ;;  %v4678_v27 = vpop.f32.mrf.mxu0 }
 0x3b2   : > { %v4745_v43 = vpop.f32.mrf.mxu3  ;;  %v4701_v54 = vpop.f32.mrf.mxu1  ;;  %v4679_v13 = vadd.f32 %v4678_v27, %v4656_v3  ;;  %v4723_v6 = vadd.f32 %v4722_v8, %v4700_v38 }
 0x3b4   : > { %v4702_v55 = vadd.f32 %v4701_v54, %v4679_v13  ;;  %v4746_v20 = vadd.f32 %v4745_v43, %v4723_v6 }
 0x3b9   : > { %v4724_v36 = vpop.f32.mrf.mxu2  ;;  %v4681_v33 = vpop.f32.mrf.mxu0 }
 0x3ba   : > { %v4747_v60 = vpop.f32.mrf.mxu3  ;;  %v4704_v0 = vpop.f32.mrf.mxu1  ;;  %v4682_v1 = vadd.f32 %v4681_v33, %v4659_v44  ;;  %v4725_v19 = vadd.f32 %v4724_v36, %v4702_v55 }
 0x3bc   : > { %v4705_v14 = vadd.f32 %v4704_v0, %v4682_v1  ;;  %v4748_v34 = vadd.f32 %v4747_v60, %v4725_v19 }
 0x3c1   : > { %v4727_v58 = vpop.f32.mrf.mxu2  ;;  %v4683_v61 = vpop.f32.mrf.mxu0 }
 0x3c2   : > { %v4750_v11 = vpop.f32.mrf.mxu3  ;;  %v4706_v42 = vpop.f32.mrf.mxu1  ;;  %v4684_v18 = vadd.f32 %v4683_v61, %v4661_v30  ;;  %v4728_v12 = vadd.f32 %v4727_v58, %v4705_v14 }
 0x3c4   : > { %v4707_v49 = vadd.f32 %v4706_v42, %v4684_v18  ;;  %v4751_v3 = vadd.f32 %v4750_v11, %v4728_v12 }
 0x3c9   : > { %v4729_v37 = vpop.f32.mrf.mxu2  ;;  %v4686_v31 = vpop.f32.mrf.mxu0 }
 0x3ca   : > { %v4752_v51 = vpop.f32.mrf.mxu3  ;;  %v4709_v50 = vpop.f32.mrf.mxu1  ;;  %v4687_v35 = vadd.f32 %v4686_v31, %v4664_v15  ;;  %v4730_v25 = vadd.f32 %v4729_v37, %v4707_v49 }
 0x3cc   : > { %v4710_v52 = vadd.f32 %v4709_v50, %v4687_v35  ;;  %v4753_v29 = vadd.f32 %v4752_v51, %v4730_v25 }
 0x3d1   : > { %v4732_v62 = vpop.f32.mrf.mxu2  ;;  %v4688_v47 = vpop.f32.mrf.mxu0 }
 0x3d2   : > { %v4733_v22 = vadd.f32 %v4732_v62, %v4710_v52  ;;  %v4755_v23 = vpop.f32.mrf.mxu3  ;;  %v4711_v28 = vpop.f32.mrf.mxu1 }
 0x3d4   : > { %v4756_v16 = vadd.f32 %v4755_v23, %v4733_v22 }
 0x3d6   : > { %v4762_v2 = vadd.f32 1.0, %v4756_v16 }
 0x3d8   : > { %5249 = vrcp.f32 %v4762_v2 }
 0x3d9   : > { %v4734_v7 = vpop.f32.mrf.mxu2 }
 0x3da   : > { %v4757_v41 = vpop.f32.mrf.mxu3 }
 0x3de   : > { %v5250_v4 = vpop.eup %5249 }
 0x3df   : > { %v4770_v44 = vperm.slane %v5250_v4, 0 }
 0x3e1   : > { %v4774_v53 = vmul.f32 %v4770_v44, %v4746_v20  ;;  %v4778_v48 = vmul.f32 %v4770_v44, %v4748_v34  ;;  %v4782_v9 = vmul.f32 %v4770_v44, %v4751_v3  ;;  %v4786_v46 = vmul.f32 %v4770_v44, %v4753_v29 }
 0x3e3   : > { %v4790_v10 = vmax.f32 %v4774_v53, 0.0  ;;  %v4794_v21 = vmax.f32 %v4778_v48, 0.0  ;;  %v4798_v56 = vmax.f32 %v4782_v9, 0.0  ;;  %v4802_v24 = vmax.f32 %v4786_v46, 0.0 }
 0x3e5   : > { %4806 = vst [vmem:[%s6229_s20 + $0x18] sm:$0xff] %v4790_v10 }
 0x3e6   : > { %4810 = vst [vmem:[%s6229_s20 + $0x38] sm:$0xff] %v4794_v21 }
 0x3e7   : > { %4814 = vst [vmem:[%s6229_s20 + $0x58] sm:$0xff] %v4798_v56 }
 0x3e8   : > { %4818 = vst [vmem:[%s6229_s20 + $0x78] sm:$0xff] %v4802_v24 }
 0x3e9   : > { %5338 = shalt.err (!%p5335_p10)
}
 0x3ea   : > { %s5389_s6 = smov 512   ;;  %s5390_s7 = smov 2048  }
 0x3eb   : > { %s5391_s14 = smov 32  }
 0x3ec   : > { %5184 = dma.vmem_to_hbm [thread:$0]  (%p5473_p5), %s4833_s13, 2048, %s4835_s22, %s4820_s24, %s5389_s6, %s5390_s7, %s5391_s14  }
 0x3ed PF: > { %p5201_p11 = scmp.ge.s32.totalorder %s5381_s12, 2  ;;  %s4849_s21 = sand.u32 1, %s5369_s9  }
 0x3ee   : > { %s4850_s15 = scalar_lea.sflag [#allocation4], %s4849_s21 }
 0x3ef   : > { %p5195_p12 = pnand %p5201_p11, %p5442_p6 }
 0x3f1   : > { %p5196_p13 = pneg %p5195_p12 }
 0x3f3   : > { %5364 = dma.done.wait (%p5196_p13), %s4850_s15, 2048  }
 0x3f4   : > { %5366 = vsyncadd (%p5196_p13), %s4850_s15, 4294965248  ;;  %p16_p0 = scmp.ge.s32.totalorder %s5459_s23, 6   ;;  %s7034_s9 = smov %s5373_s10 }
 0x3f5   : > { %s7035_s10 = smov %s5377_s11  ;;  %s7036_s11 = smov %s5469_s28 }
 0x3f6   : > { %s7037_s12 = smov %s5459_s23  ;;  %18 = sbr.rel (!%p16_p0) target bundleno = 6 (0x6), region = 78 }
 0x3fb   :  { %4856 = vsyncpa [#allocation3], 1 }
 0x3fc   :  { %4858 = vsyncpa [#allocation3 + $0x1], 1 }
 0x3fd   :  { %4859 = vsyncpa [#allocation6], 1 }
 0x3fe   :  { %4861 = vsyncpa [#allocation6 + $0x1], 1 }
 0x3ff   :  { %4862 = vsyncpa [#allocation4], 1 }
 0x400   :  { %4864 = vsyncpa [#allocation4 + $0x1], 1 }

</bundles_post_ra>
